<compile_context>
chip_gen: v5e
topology: v5e:2x2
jax: 0.10.0
libtpu: 0.0.40
codegen_flags: <defaults>
</compile_context>

<pallas_src>
import jax
import jax.numpy as jnp
from jax.experimental import pallas as pl
from jax.experimental.pallas import tpu as pltpu

# ----------------------- small, self-consistent configuration ---------------
B = 2                                   # batch
IMG_C = 1                               # image channels
IMG_HW = 32                             # image height / width
PATCH = 8                               # SimplePatchifier patch size
N_PATCH = (IMG_HW // PATCH) ** 2        # num_patches = 16
IN_FEATURES = IMG_C * PATCH * PATCH     # 64
OUT_FEATURE = 32                        # token channel dim D
NUM_BLOCKS = 2                          # num_ViGBlocks
K_EDGES = 4                             # num_edges (k of top-k)
HIDDEN = 64                             # predictor hidden layer
N_CLASSES = 10
BN_EPS = 1e-5
LANES = 128                             # padded lane width for all weights
BN_ROWS = B * N_PATCH                   # fused token-slab rows = 32
NEG = -1e30                             # python float (never captured const)
PE_DIMS = [IN_FEATURES, OUT_FEATURE // 2, OUT_FEATURE // 4, OUT_FEATURE // 8,
           OUT_FEATURE // 4, OUT_FEATURE // 2, OUT_FEATURE]

assert B & (B - 1) == 0, "batch-id bit trick needs power-of-two B"
assert K_EDGES <= N_PATCH


# ------------------------- static parameter-slab layout ---------------------
def _mat_layout():
  layout, off = {}, 0

  def add(name, rows):
    nonlocal off
    layout[name] = (off, rows)
    off += rows

  add('pe0', IN_FEATURES)
  for i in range(1, 6):
    add(f'pe{i}', LANES)
  add('pose', BN_ROWS)
  for bi in range(NUM_BLOCKS):
    add(f'b{bi}_in1_w1', LANES)
    add(f'b{bi}_in1_w2', LANES)
    add(f'b{bi}_fc', 2 * LANES)
    add(f'b{bi}_out1_w1', LANES)
    add(f'b{bi}_out1_w2', LANES)
    add(f'b{bi}_in2_w1', LANES)
    add(f'b{bi}_in2_w2', LANES)
    add(f'b{bi}_out2_w1', LANES)
    add(f'b{bi}_out2_w2', LANES)
  add('w1', N_PATCH * LANES)
  add('w2', LANES)
  return layout, off


def _vec_layout():
  layout, off = {}, 0

  def add(name):
    nonlocal off
    layout[name] = off
    off += 1

  for i in range(6):
    add(f'pe{i}_b'); add(f'pe{i}_g'); add(f'pe{i}_be')
  for bi in range(NUM_BLOCKS):
    for nm in ('in1_b1', 'in1_b2', 'fc_b', 'out1_b1', 'out1_b2',
               'in2_b1', 'in2_b2', 'out2_b1', 'out2_b2'):
      add(f'b{bi}_{nm}')
  for nm in ('p_b1', 'p_g1', 'p_be1', 'p_b2'):
    add(nm)
  return layout, ((off + 7) // 8) * 8


MAT_OFF, MAT_ROWS = _mat_layout()
VEC_OFF, VEC_ROWS = _vec_layout()
assert MAT_ROWS % 8 == 0


# ----------------------------- in-kernel helpers ----------------------------
def _gelu(x):
  """Exact-form GELU: 0.5*x*(1+erf(x/sqrt(2))); erf via A&S 7.1.26."""
  z = x * 0.7071067811865476
  az = jnp.abs(z)
  t = 1.0 / (1.0 + 0.3275911 * az)
  poly = t * (0.254829592 + t * (-0.284496736 + t * (1.421413741
              + t * (-1.453152027 + t * 1.061405429))))
  erf_abs = 1.0 - poly * jnp.exp(-(az * az))
  erf = jnp.where(z < 0.0, -erf_abs, erf_abs)
  return 0.5 * x * (1.0 + erf)


def _bn(y, g, be):
  """BatchNorm1d forward with batch statistics (train mode), biased variance."""
  mu = jnp.mean(y, axis=0, keepdims=True)
  var = jnp.mean((y - mu) * (y - mu), axis=0, keepdims=True)
  return (y - mu) * jax.lax.rsqrt(var + BN_EPS) * g + be


# ------------------------------- the mega kernel -----------------------------
def _forward_kernel(patches_ref, mats_ref, vecs_ref, feat_ref, logits_ref):
  def mat(name):
    off, rows = MAT_OFF[name]
    return mats_ref[pl.ds(off, rows), :]

  def vec(name):
    return vecs_ref[pl.ds(VEC_OFF[name], 1), :]

  def lin(xv, wname, bname):
    return jnp.dot(xv, mat(wname), preferred_element_type=jnp.float32) + vec(bname)

  # ---- patch_embedding: 6 x (Linear + BN [+ GELU]); no GELU after layer 5 ---
  x = patches_ref[...]                                  # (B*N, 64)
  for i in range(6):
    y = lin(x, f'pe{i}', f'pe{i}_b')
    y = _bn(y, vec(f'pe{i}_g'), vec(f'pe{i}_be'))
    x = _gelu(y) if i < 5 else y                        # (B*N, 128) padded
  x = x + mat('pose')                                   # pose pre-tiled at init

  # ---- masks for per-batch top-k on the fused (patch-major) token slab ------
  r = jax.lax.broadcasted_iota(jnp.int32, (BN_ROWS, BN_ROWS), 0)
  c = jax.lax.broadcasted_iota(jnp.int32, (BN_ROWS, BN_ROWS), 1)
  same_batch = (r & (B - 1)) == (c & (B - 1))           # row order = n*B + b
  col_f = c.astype(jnp.float32)

  # ---- ViG blocks ------------------------------------------------------------
  for bi in range(NUM_BLOCKS):
    shortcut = x
    # similarity of the block INPUT; cross-batch entries masked out.
    sim = jax.lax.dot_general(x, x, (((1,), (1,)), ((), ())),
                              preferred_element_type=jnp.float32)
    s = jnp.where(same_batch, sim, NEG)

    # in_layer1 (TwoLayerNN): Linear -> GELU -> Linear
    h = _gelu(lin(x, f'b{bi}_in1_w1', f'b{bi}_in1_b1'))
    x1 = lin(h, f'b{bi}_in1_w2', f'b{bi}_in1_b2')       # (B*N, 128)

    # top-k: K serial masked argmax passes, then ONE stacked one-hot gather dot
    hits = []
    for _ in range(K_EDGES):
      m = jnp.max(s, axis=-1, keepdims=True)                    # row max
      cand = jnp.where(s == m, col_f, float(BN_ROWS))
      sel = jnp.min(cand, axis=-1, keepdims=True)               # argmax index
      hit = col_f == sel                                        # one-hot row
      hits.append(hit.astype(jnp.float32))
      s = jnp.where(hit, NEG, s)                                # mask chosen
    hit_all = jnp.concatenate(hits, axis=0)                     # (K*BN, BN)
    gath = jnp.dot(hit_all, x1, preferred_element_type=jnp.float32)
    agg = gath[0:BN_ROWS]
    for kk in range(1, K_EDGES):
      agg = jnp.maximum(agg, gath[kk * BN_ROWS:(kk + 1) * BN_ROWS])
    agg = agg - x1

    # multi_head_fc: Conv1d(2C->C,1) on interleaved stack == [x1|agg] @ Wfc + b
    xa = jnp.concatenate([x1, agg], axis=-1)                    # (B*N, 256)
    y = (jnp.dot(xa, mat(f'b{bi}_fc'), preferred_element_type=jnp.float32)
         + vec(f'b{bi}_fc_b'))

    # out_layer1 applied to gelu(y), plus residual
    h = _gelu(lin(_gelu(y), f'b{bi}_out1_w1', f'b{bi}_out1_b1'))
    x = lin(h, f'b{bi}_out1_w2', f'b{bi}_out1_b2') + shortcut

    # FFN branch: out_layer2(gelu(in_layer2(x))) + x
    h = _gelu(lin(x, f'b{bi}_in2_w1', f'b{bi}_in2_b1'))
    h = lin(h, f'b{bi}_in2_w2', f'b{bi}_in2_b2')
    h = _gelu(lin(_gelu(h), f'b{bi}_out2_w1', f'b{bi}_out2_b1'))
    x = lin(h, f'b{bi}_out2_w2', f'b{bi}_out2_b2') + x

  feat_ref[...] = x[:, 0:OUT_FEATURE]                   # (B*N, D) features out

  # ---- predictor: Linear -> BN -> GELU -> Linear -----------------------------
  # (B, N*D) @ W1 as 16 accumulating (B,128)@(128,128) dots on contiguous
  # 2-row slices (patch-major row order makes each slice static & contiguous).
  w1_off, _ = MAT_OFF['w1']
  h = None
  for n in range(N_PATCH):
    xb = x[n * B:(n + 1) * B, :]                                     # (B, 128)
    wn = mats_ref[pl.ds(w1_off + n * LANES, LANES), :]               # (128,128)
    t = jnp.dot(xb, wn, preferred_element_type=jnp.float32)
    h = t if h is None else h + t
  h = h + vec('p_b1')                                   # (B, 128) valid :HIDDEN
  h = _gelu(_bn(h, vec('p_g1'), vec('p_be1')))
  logits = jnp.dot(h, mat('w2'), preferred_element_type=jnp.float32) + vec('p_b2')
  logits_ref[...] = logits[:, 0:N_CLASSES]


# ------------------------------- model forward -------------------------------
def classifier_forward(params, img):
  # SimplePatchifier: NCHW -> (N*B, C*P*P) in (patch-major, batch-minor) order.
  b, c, hh, ww = img.shape
  hp, wp = hh // PATCH, ww // PATCH
  n = hp * wp
  patches = img.reshape(b, c, hp, PATCH, wp, PATCH)
  patches = patches.transpose(0, 2, 4, 1, 3, 5).reshape(b, n, c * PATCH * PATCH)
  patches_nb = patches.transpose(1, 0, 2).reshape(n * b, c * PATCH * PATCH)

  vmem_spec = pl.BlockSpec(memory_space=pltpu.MemorySpace.VMEM)
  feat_nb, logits = pl.pallas_call(
      _forward_kernel,
      out_shape=(jax.ShapeDtypeStruct((n * b, OUT_FEATURE), jnp.float32),
                 jax.ShapeDtypeStruct((b, N_CLASSES), jnp.float32)),
      in_specs=[vmem_spec, vmem_spec, vmem_spec],
      out_specs=(vmem_spec, vmem_spec),
  )(patches_nb, params['mats'], params['vecs'])

  features = feat_nb.reshape(n, b, OUT_FEATURE).transpose(1, 0, 2)  # (B, N, D)
  return features, logits


# ------------------------------ parameter init --------------------------------
def init_params(key):
  d = OUT_FEATURE
  keys = iter(jax.random.split(key, 256))

  def lin_p(din, dout):
    w = 0.1 * jax.random.normal(next(keys), (dout, din), jnp.float32)
    bb = 0.02 * jax.random.normal(next(keys), (dout,), jnp.float32)
    return w.T, bb                               # (din, dout) for x @ w

  def bn_p(dim):
    g = 1.0 + 0.05 * jax.random.normal(next(keys), (dim,), jnp.float32)
    be = 0.02 * jax.random.normal(next(keys), (dim,), jnp.float32)
    return g, be

  mats = jnp.zeros((MAT_ROWS, LANES), jnp.float32)
  vecs = jnp.zeros((VEC_ROWS, LANES), jnp.float32)

  def put_mat(name, w):
    nonlocal mats
    off, rows = MAT_OFF[name]
    assert w.shape[0] <= rows and w.shape[1] <= LANES
    mats = mats.at[off:off + w.shape[0], :w.shape[1]].set(w)

  def put_vec(name, v):
    nonlocal vecs
    vecs = vecs.at[VEC_OFF[name], :v.shape[0]].set(v)

  # patch embedding (weights zero-padded to 128 lanes -> exact padded math)
  for i in range(6):
    w, bb = lin_p(PE_DIMS[i], PE_DIMS[i + 1])
    g, be = bn_p(PE_DIMS[i + 1])
    put_mat(f'pe{i}', w)
    put_vec(f'pe{i}_b', bb); put_vec(f'pe{i}_g', g); put_vec(f'pe{i}_be', be)

  # pose embedding (torch.rand), pre-tiled to (B*N, D) in (n, b) row order
  pose = jax.random.uniform(next(keys), (N_PATCH, d), jnp.float32)
  put_mat('pose', jnp.repeat(pose, B, axis=0))

  # ViG blocks
  for bi in range(NUM_BLOCKS):
    w, bb = lin_p(d, d); put_mat(f'b{bi}_in1_w1', w); put_vec(f'b{bi}_in1_b1', bb)
    w, bb = lin_p(d, d); put_mat(f'b{bi}_in1_w2', w); put_vec(f'b{bi}_in1_b2', bb)
    # Conv1d(2d -> d, kernel 1): weight (d, 2d); conv on interleaved
    # stack([x, agg], -1) == x @ Wa + agg @ Wb + b.  Stack Wa/Wb into one slab.
    wc = 0.1 * jax.random.normal(next(keys), (d, 2 * d), jnp.float32)
    bc = 0.02 * jax.random.normal(next(keys), (d,), jnp.float32)
    fc_slab = jnp.zeros((2 * LANES, LANES), jnp.float32)
    fc_slab = fc_slab.at[0:d, 0:d].set(wc[:, 0::2].T)          # acts on x1
    fc_slab = fc_slab.at[LANES:LANES + d, 0:d].set(wc[:, 1::2].T)  # acts on agg
    put_mat(f'b{bi}_fc', fc_slab); put_vec(f'b{bi}_fc_b', bc)
    w, bb = lin_p(d, d); put_mat(f'b{bi}_out1_w1', w); put_vec(f'b{bi}_out1_b1', bb)
    w, bb = lin_p(d, d); put_mat(f'b{bi}_out1_w2', w); put_vec(f'b{bi}_out1_b2', bb)
    w, bb = lin_p(d, 4 * d); put_mat(f'b{bi}_in2_w1', w); put_vec(f'b{bi}_in2_b1', bb)
    w, bb = lin_p(4 * d, d); put_mat(f'b{bi}_in2_w2', w); put_vec(f'b{bi}_in2_b2', bb)
    w, bb = lin_p(d, 4 * d); put_mat(f'b{bi}_out2_w1', w); put_vec(f'b{bi}_out2_b1', bb)
    w, bb = lin_p(4 * d, d); put_mat(f'b{bi}_out2_w2', w); put_vec(f'b{bi}_out2_b2', bb)

  # predictor
  w1, b1 = lin_p(d * N_PATCH, HIDDEN)           # (512, 64)
  g1, be1 = bn_p(HIDDEN)
  w2, b2 = lin_p(HIDDEN, N_CLASSES)             # (64, 10)
  w1_3 = w1.reshape(N_PATCH, d, HIDDEN)
  w1_pad = jnp.zeros((N_PATCH, LANES, LANES), jnp.float32)
  w1_pad = w1_pad.at[:, :d, :HIDDEN].set(w1_3).reshape(N_PATCH * LANES, LANES)
  put_mat('w1', w1_pad)
  put_mat('w2', w2)
  put_vec('p_b1', b1); put_vec('p_g1', g1); put_vec('p_be1', be1)
  put_vec('p_b2', b2)

  return {'mats': mats, 'vecs': vecs}


# ------------------------------------ main ------------------------------------
if __name__ == "__main__":
  root = jax.random.PRNGKey(0)
  pkey, xkey = jax.random.split(root)
  params = init_params(pkey)
  x = jax.random.normal(xkey, (B, IMG_C, IMG_HW, IMG_HW), jnp.float32)

  fwd = jax.jit(classifier_forward)
  features, logits = fwd(params, x)
  jax.block_until_ready((features, logits))

  assert features.shape == (B, N_PATCH, OUT_FEATURE)
  assert logits.shape == (B, N_CLASSES)
  print("KERNEL_OK")
</pallas_src>

<mosaic_0001>
module attributes {stable_mosaic.version = 11 : i64} {
  func.func @_forward_kernel(%arg0: memref<32x64xf32, #tpu.memory_space<vmem>>, %arg1: memref<5472x128xf32, #tpu.memory_space<vmem>>, %arg2: memref<40x128xf32, #tpu.memory_space<vmem>>, %arg3: memref<32x32xf32, #tpu.memory_space<vmem>>, %arg4: memref<2x10xf32, #tpu.memory_space<vmem>>) attributes {dimension_semantics = [], scalar_prefetch = 0 : i64, scratch_operands = 0 : i64, tpu.core_type = #tpu.core_type<tc>} {
    %c0 = arith.constant 0 : index
    %c0_0 = arith.constant 0 : index
    %0 = vector.load %arg0[%c0, %c0_0] : memref<32x64xf32, #tpu.memory_space<vmem>>, vector<32x64xf32>
    %c0_1 = arith.constant 0 : index
    %c0_2 = arith.constant 0 : index
    %1 = vector.load %arg1[%c0_1, %c0_2] : memref<5472x128xf32, #tpu.memory_space<vmem>>, vector<64x128xf32>
    %cst = arith.constant dense<0.000000e+00> : vector<32x128xf32>
    %2 = tpu.matmul %0, %1, %cst {dimension_numbers = #tpu.dot_dimension_numbers<[1], [0], [0], [1], [0, 0, 1, 1], [], []>} : vector<32x64xf32>, vector<64x128xf32>, vector<32x128xf32> -> vector<32x128xf32>
    %c0_3 = arith.constant 0 : index
    %c0_4 = arith.constant 0 : index
    %3 = vector.load %arg2[%c0_3, %c0_4] : memref<40x128xf32, #tpu.memory_space<vmem>>, vector<1x128xf32>
    %4 = vector.broadcast %3 : vector<1x128xf32> to vector<32x128xf32>
    %5 = arith.addf %2, %4 : vector<32x128xf32>
    %c1 = arith.constant 1 : index
    %c0_5 = arith.constant 0 : index
    %6 = vector.load %arg2[%c1, %c0_5] : memref<40x128xf32, #tpu.memory_space<vmem>>, vector<1x128xf32>
    %c2 = arith.constant 2 : index
    %c0_6 = arith.constant 0 : index
    %7 = vector.load %arg2[%c2, %c0_6] : memref<40x128xf32, #tpu.memory_space<vmem>>, vector<1x128xf32>
    %cst_7 = arith.constant dense<0.000000e+00> : vector<128xf32>
    %8 = vector.multi_reduction <add>, %5, %cst_7 [0] : vector<32x128xf32> to vector<128xf32>
    %9 = vector.shape_cast %8 : vector<128xf32> to vector<1x128xf32>
    %cst_8 = arith.constant 3.200000e+01 : f32
    %10 = vector.broadcast %cst_8 : f32 to vector<1x128xf32>
    %11 = arith.divf %9, %10 : vector<1x128xf32>
    %12 = vector.broadcast %11 : vector<1x128xf32> to vector<32x128xf32>
    %13 = arith.subf %5, %12 : vector<32x128xf32>
    %14 = vector.broadcast %11 : vector<1x128xf32> to vector<32x128xf32>
    %15 = arith.subf %5, %14 : vector<32x128xf32>
    %16 = arith.mulf %13, %15 : vector<32x128xf32>
    %cst_9 = arith.constant dense<0.000000e+00> : vector<128xf32>
    %17 = vector.multi_reduction <add>, %16, %cst_9 [0] : vector<32x128xf32> to vector<128xf32>
    %18 = vector.shape_cast %17 : vector<128xf32> to vector<1x128xf32>
    %cst_10 = arith.constant 3.200000e+01 : f32
    %19 = vector.broadcast %cst_10 : f32 to vector<1x128xf32>
    %20 = arith.divf %18, %19 : vector<1x128xf32>
    %21 = vector.broadcast %11 : vector<1x128xf32> to vector<32x128xf32>
    %22 = arith.subf %5, %21 : vector<32x128xf32>
    %cst_11 = arith.constant 9.99999974E-6 : f32
    %23 = vector.broadcast %cst_11 : f32 to vector<1x128xf32>
    %24 = arith.addf %20, %23 : vector<1x128xf32>
    %25 = math.rsqrt %24 : vector<1x128xf32>
    %26 = vector.broadcast %25 : vector<1x128xf32> to vector<32x128xf32>
    %27 = arith.mulf %22, %26 : vector<32x128xf32>
    %28 = vector.broadcast %6 : vector<1x128xf32> to vector<32x128xf32>
    %29 = arith.mulf %27, %28 : vector<32x128xf32>
    %30 = vector.broadcast %7 : vector<1x128xf32> to vector<32x128xf32>
    %31 = arith.addf %29, %30 : vector<32x128xf32>
    %cst_12 = arith.constant 0.707106769 : f32
    %32 = vector.broadcast %cst_12 : f32 to vector<32x128xf32>
    %33 = arith.mulf %31, %32 : vector<32x128xf32>
    %34 = math.absf %33 : vector<32x128xf32>
    %cst_13 = arith.constant 0.327591091 : f32
    %35 = vector.broadcast %cst_13 : f32 to vector<32x128xf32>
    %36 = arith.mulf %35, %34 : vector<32x128xf32>
    %cst_14 = arith.constant 1.000000e+00 : f32
    %37 = vector.broadcast %cst_14 : f32 to vector<32x128xf32>
    %38 = arith.addf %37, %36 : vector<32x128xf32>
    %cst_15 = arith.constant 1.000000e+00 : f32
    %39 = vector.broadcast %cst_15 : f32 to vector<32x128xf32>
    %40 = arith.divf %39, %38 : vector<32x128xf32>
    %cst_16 = arith.constant 1.06140542 : f32
    %41 = vector.broadcast %cst_16 : f32 to vector<32x128xf32>
    %42 = arith.mulf %40, %41 : vector<32x128xf32>
    %cst_17 = arith.constant -1.45315206 : f32
    %43 = vector.broadcast %cst_17 : f32 to vector<32x128xf32>
    %44 = arith.addf %43, %42 : vector<32x128xf32>
    %45 = arith.mulf %40, %44 : vector<32x128xf32>
    %cst_18 = arith.constant 1.42141378 : f32
    %46 = vector.broadcast %cst_18 : f32 to vector<32x128xf32>
    %47 = arith.addf %46, %45 : vector<32x128xf32>
    %48 = arith.mulf %40, %47 : vector<32x128xf32>
    %cst_19 = arith.constant -0.284496725 : f32
    %49 = vector.broadcast %cst_19 : f32 to vector<32x128xf32>
    %50 = arith.addf %49, %48 : vector<32x128xf32>
    %51 = arith.mulf %40, %50 : vector<32x128xf32>
    %cst_20 = arith.constant 0.254829586 : f32
    %52 = vector.broadcast %cst_20 : f32 to vector<32x128xf32>
    %53 = arith.addf %52, %51 : vector<32x128xf32>
    %54 = arith.mulf %40, %53 : vector<32x128xf32>
    %55 = arith.mulf %34, %34 : vector<32x128xf32>
    %cst_21 = arith.constant 0.000000e+00 : f32
    %56 = vector.broadcast %cst_21 : f32 to vector<32x128xf32>
    %57 = arith.subf %56, %55 : vector<32x128xf32>
    %58 = math.exp %57 : vector<32x128xf32>
    %59 = arith.mulf %54, %58 : vector<32x128xf32>
    %cst_22 = arith.constant 1.000000e+00 : f32
    %60 = vector.broadcast %cst_22 : f32 to vector<32x128xf32>
    %61 = arith.subf %60, %59 : vector<32x128xf32>
    %cst_23 = arith.constant 0.000000e+00 : f32
    %62 = vector.broadcast %cst_23 : f32 to vector<32x128xf32>
    %63 = arith.cmpf olt, %33, %62 : vector<32x128xf32>
    %cst_24 = arith.constant 0.000000e+00 : f32
    %64 = vector.broadcast %cst_24 : f32 to vector<32x128xf32>
    %65 = arith.subf %64, %61 : vector<32x128xf32>
    %66 = arith.select %63, %65, %61 : vector<32x128xi1>, vector<32x128xf32>
    %cst_25 = arith.constant 5.000000e-01 : f32
    %67 = vector.broadcast %cst_25 : f32 to vector<32x128xf32>
    %68 = arith.mulf %67, %31 : vector<32x128xf32>
    %cst_26 = arith.constant 1.000000e+00 : f32
    %69 = vector.broadcast %cst_26 : f32 to vector<32x128xf32>
    %70 = arith.addf %69, %66 : vector<32x128xf32>
    %71 = arith.mulf %68, %70 : vector<32x128xf32>
    %c64 = arith.constant 64 : index
    %c0_27 = arith.constant 0 : index
    %72 = vector.load %arg1[%c64, %c0_27] : memref<5472x128xf32, #tpu.memory_space<vmem>>, vector<128x128xf32>
    %cst_28 = arith.constant dense<0.000000e+00> : vector<32x128xf32>
    %73 = tpu.matmul %71, %72, %cst_28 {dimension_numbers = #tpu.dot_dimension_numbers<[1], [0], [0], [1], [0, 0, 1, 1], [], []>} : vector<32x128xf32>, vector<128x128xf32>, vector<32x128xf32> -> vector<32x128xf32>
    %c3 = arith.constant 3 : index
    %c0_29 = arith.constant 0 : index
    %74 = vector.load %arg2[%c3, %c0_29] : memref<40x128xf32, #tpu.memory_space<vmem>>, vector<1x128xf32>
    %75 = vector.broadcast %74 : vector<1x128xf32> to vector<32x128xf32>
    %76 = arith.addf %73, %75 : vector<32x128xf32>
    %c4 = arith.constant 4 : index
    %c0_30 = arith.constant 0 : index
    %77 = vector.load %arg2[%c4, %c0_30] : memref<40x128xf32, #tpu.memory_space<vmem>>, vector<1x128xf32>
    %c5 = arith.constant 5 : index
    %c0_31 = arith.constant 0 : index
    %78 = vector.load %arg2[%c5, %c0_31] : memref<40x128xf32, #tpu.memory_space<vmem>>, vector<1x128xf32>
    %cst_32 = arith.constant dense<0.000000e+00> : vector<128xf32>
    %79 = vector.multi_reduction <add>, %76, %cst_32 [0] : vector<32x128xf32> to vector<128xf32>
    %80 = vector.shape_cast %79 : vector<128xf32> to vector<1x128xf32>
    %cst_33 = arith.constant 3.200000e+01 : f32
    %81 = vector.broadcast %cst_33 : f32 to vector<1x128xf32>
    %82 = arith.divf %80, %81 : vector<1x128xf32>
    %83 = vector.broadcast %82 : vector<1x128xf32> to vector<32x128xf32>
    %84 = arith.subf %76, %83 : vector<32x128xf32>
    %85 = vector.broadcast %82 : vector<1x128xf32> to vector<32x128xf32>
    %86 = arith.subf %76, %85 : vector<32x128xf32>
    %87 = arith.mulf %84, %86 : vector<32x128xf32>
    %cst_34 = arith.constant dense<0.000000e+00> : vector<128xf32>
    %88 = vector.multi_reduction <add>, %87, %cst_34 [0] : vector<32x128xf32> to vector<128xf32>
    %89 = vector.shape_cast %88 : vector<128xf32> to vector<1x128xf32>
    %cst_35 = arith.constant 3.200000e+01 : f32
    %90 = vector.broadcast %cst_35 : f32 to vector<1x128xf32>
    %91 = arith.divf %89, %90 : vector<1x128xf32>
    %92 = vector.broadcast %82 : vector<1x128xf32> to vector<32x128xf32>
    %93 = arith.subf %76, %92 : vector<32x128xf32>
    %cst_36 = arith.constant 9.99999974E-6 : f32
    %94 = vector.broadcast %cst_36 : f32 to vector<1x128xf32>
    %95 = arith.addf %91, %94 : vector<1x128xf32>
    %96 = math.rsqrt %95 : vector<1x128xf32>
    %97 = vector.broadcast %96 : vector<1x128xf32> to vector<32x128xf32>
    %98 = arith.mulf %93, %97 : vector<32x128xf32>
    %99 = vector.broadcast %77 : vector<1x128xf32> to vector<32x128xf32>
    %100 = arith.mulf %98, %99 : vector<32x128xf32>
    %101 = vector.broadcast %78 : vector<1x128xf32> to vector<32x128xf32>
    %102 = arith.addf %100, %101 : vector<32x128xf32>
    %cst_37 = arith.constant 0.707106769 : f32
    %103 = vector.broadcast %cst_37 : f32 to vector<32x128xf32>
    %104 = arith.mulf %102, %103 : vector<32x128xf32>
    %105 = math.absf %104 : vector<32x128xf32>
    %cst_38 = arith.constant 0.327591091 : f32
    %106 = vector.broadcast %cst_38 : f32 to vector<32x128xf32>
    %107 = arith.mulf %106, %105 : vector<32x128xf32>
    %cst_39 = arith.constant 1.000000e+00 : f32
    %108 = vector.broadcast %cst_39 : f32 to vector<32x128xf32>
    %109 = arith.addf %108, %107 : vector<32x128xf32>
    %cst_40 = arith.constant 1.000000e+00 : f32
    %110 = vector.broadcast %cst_40 : f32 to vector<32x128xf32>
    %111 = arith.divf %110, %109 : vector<32x128xf32>
    %cst_41 = arith.constant 1.06140542 : f32
    %112 = vector.broadcast %cst_41 : f32 to vector<32x128xf32>
    %113 = arith.mulf %111, %112 : vector<32x128xf32>
    %cst_42 = arith.constant -1.45315206 : f32
    %114 = vector.broadcast %cst_42 : f32 to vector<32x128xf32>
    %115 = arith.addf %114, %113 : vector<32x128xf32>
    %116 = arith.mulf %111, %115 : vector<32x128xf32>
    %cst_43 = arith.constant 1.42141378 : f32
    %117 = vector.broadcast %cst_43 : f32 to vector<32x128xf32>
    %118 = arith.addf %117, %116 : vector<32x128xf32>
    %119 = arith.mulf %111, %118 : vector<32x128xf32>
    %cst_44 = arith.constant -0.284496725 : f32
    %120 = vector.broadcast %cst_44 : f32 to vector<32x128xf32>
    %121 = arith.addf %120, %119 : vector<32x128xf32>
    %122 = arith.mulf %111, %121 : vector<32x128xf32>
    %cst_45 = arith.constant 0.254829586 : f32
    %123 = vector.broadcast %cst_45 : f32 to vector<32x128xf32>
    %124 = arith.addf %123, %122 : vector<32x128xf32>
    %125 = arith.mulf %111, %124 : vector<32x128xf32>
    %126 = arith.mulf %105, %105 : vector<32x128xf32>
    %cst_46 = arith.constant 0.000000e+00 : f32
    %127 = vector.broadcast %cst_46 : f32 to vector<32x128xf32>
    %128 = arith.subf %127, %126 : vector<32x128xf32>
    %129 = math.exp %128 : vector<32x128xf32>
    %130 = arith.mulf %125, %129 : vector<32x128xf32>
    %cst_47 = arith.constant 1.000000e+00 : f32
    %131 = vector.broadcast %cst_47 : f32 to vector<32x128xf32>
    %132 = arith.subf %131, %130 : vector<32x128xf32>
    %cst_48 = arith.constant 0.000000e+00 : f32
    %133 = vector.broadcast %cst_48 : f32 to vector<32x128xf32>
    %134 = arith.cmpf olt, %104, %133 : vector<32x128xf32>
    %cst_49 = arith.constant 0.000000e+00 : f32
    %135 = vector.broadcast %cst_49 : f32 to vector<32x128xf32>
    %136 = arith.subf %135, %132 : vector<32x128xf32>
    %137 = arith.select %134, %136, %132 : vector<32x128xi1>, vector<32x128xf32>
    %cst_50 = arith.constant 5.000000e-01 : f32
    %138 = vector.broadcast %cst_50 : f32 to vector<32x128xf32>
    %139 = arith.mulf %138, %102 : vector<32x128xf32>
    %cst_51 = arith.constant 1.000000e+00 : f32
    %140 = vector.broadcast %cst_51 : f32 to vector<32x128xf32>
    %141 = arith.addf %140, %137 : vector<32x128xf32>
    %142 = arith.mulf %139, %141 : vector<32x128xf32>
    %c192 = arith.constant 192 : index
    %c0_52 = arith.constant 0 : index
    %143 = vector.load %arg1[%c192, %c0_52] : memref<5472x128xf32, #tpu.memory_space<vmem>>, vector<128x128xf32>
    %cst_53 = arith.constant dense<0.000000e+00> : vector<32x128xf32>
    %144 = tpu.matmul %142, %143, %cst_53 {dimension_numbers = #tpu.dot_dimension_numbers<[1], [0], [0], [1], [0, 0, 1, 1], [], []>} : vector<32x128xf32>, vector<128x128xf32>, vector<32x128xf32> -> vector<32x128xf32>
    %c6 = arith.constant 6 : index
    %c0_54 = arith.constant 0 : index
    %145 = vector.load %arg2[%c6, %c0_54] : memref<40x128xf32, #tpu.memory_space<vmem>>, vector<1x128xf32>
    %146 = vector.broadcast %145 : vector<1x128xf32> to vector<32x128xf32>
    %147 = arith.addf %144, %146 : vector<32x128xf32>
    %c7 = arith.constant 7 : index
    %c0_55 = arith.constant 0 : index
    %148 = vector.load %arg2[%c7, %c0_55] : memref<40x128xf32, #tpu.memory_space<vmem>>, vector<1x128xf32>
    %c8 = arith.constant 8 : index
    %c0_56 = arith.constant 0 : index
    %149 = vector.load %arg2[%c8, %c0_56] : memref<40x128xf32, #tpu.memory_space<vmem>>, vector<1x128xf32>
    %cst_57 = arith.constant dense<0.000000e+00> : vector<128xf32>
    %150 = vector.multi_reduction <add>, %147, %cst_57 [0] : vector<32x128xf32> to vector<128xf32>
    %151 = vector.shape_cast %150 : vector<128xf32> to vector<1x128xf32>
    %cst_58 = arith.constant 3.200000e+01 : f32
    %152 = vector.broadcast %cst_58 : f32 to vector<1x128xf32>
    %153 = arith.divf %151, %152 : vector<1x128xf32>
    %154 = vector.broadcast %153 : vector<1x128xf32> to vector<32x128xf32>
    %155 = arith.subf %147, %154 : vector<32x128xf32>
    %156 = vector.broadcast %153 : vector<1x128xf32> to vector<32x128xf32>
    %157 = arith.subf %147, %156 : vector<32x128xf32>
    %158 = arith.mulf %155, %157 : vector<32x128xf32>
    %cst_59 = arith.constant dense<0.000000e+00> : vector<128xf32>
    %159 = vector.multi_reduction <add>, %158, %cst_59 [0] : vector<32x128xf32> to vector<128xf32>
    %160 = vector.shape_cast %159 : vector<128xf32> to vector<1x128xf32>
    %cst_60 = arith.constant 3.200000e+01 : f32
    %161 = vector.broadcast %cst_60 : f32 to vector<1x128xf32>
    %162 = arith.divf %160, %161 : vector<1x128xf32>
    %163 = vector.broadcast %153 : vector<1x128xf32> to vector<32x128xf32>
    %164 = arith.subf %147, %163 : vector<32x128xf32>
    %cst_61 = arith.constant 9.99999974E-6 : f32
    %165 = vector.broadcast %cst_61 : f32 to vector<1x128xf32>
    %166 = arith.addf %162, %165 : vector<1x128xf32>
    %167 = math.rsqrt %166 : vector<1x128xf32>
    %168 = vector.broadcast %167 : vector<1x128xf32> to vector<32x128xf32>
    %169 = arith.mulf %164, %168 : vector<32x128xf32>
    %170 = vector.broadcast %148 : vector<1x128xf32> to vector<32x128xf32>
    %171 = arith.mulf %169, %170 : vector<32x128xf32>
    %172 = vector.broadcast %149 : vector<1x128xf32> to vector<32x128xf32>
    %173 = arith.addf %171, %172 : vector<32x128xf32>
    %cst_62 = arith.constant 0.707106769 : f32
    %174 = vector.broadcast %cst_62 : f32 to vector<32x128xf32>
    %175 = arith.mulf %173, %174 : vector<32x128xf32>
    %176 = math.absf %175 : vector<32x128xf32>
    %cst_63 = arith.constant 0.327591091 : f32
    %177 = vector.broadcast %cst_63 : f32 to vector<32x128xf32>
    %178 = arith.mulf %177, %176 : vector<32x128xf32>
    %cst_64 = arith.constant 1.000000e+00 : f32
    %179 = vector.broadcast %cst_64 : f32 to vector<32x128xf32>
    %180 = arith.addf %179, %178 : vector<32x128xf32>
    %cst_65 = arith.constant 1.000000e+00 : f32
    %181 = vector.broadcast %cst_65 : f32 to vector<32x128xf32>
    %182 = arith.divf %181, %180 : vector<32x128xf32>
    %cst_66 = arith.constant 1.06140542 : f32
    %183 = vector.broadcast %cst_66 : f32 to vector<32x128xf32>
    %184 = arith.mulf %182, %183 : vector<32x128xf32>
    %cst_67 = arith.constant -1.45315206 : f32
    %185 = vector.broadcast %cst_67 : f32 to vector<32x128xf32>
    %186 = arith.addf %185, %184 : vector<32x128xf32>
    %187 = arith.mulf %182, %186 : vector<32x128xf32>
    %cst_68 = arith.constant 1.42141378 : f32
    %188 = vector.broadcast %cst_68 : f32 to vector<32x128xf32>
    %189 = arith.addf %188, %187 : vector<32x128xf32>
    %190 = arith.mulf %182, %189 : vector<32x128xf32>
    %cst_69 = arith.constant -0.284496725 : f32
    %191 = vector.broadcast %cst_69 : f32 to vector<32x128xf32>
    %192 = arith.addf %191, %190 : vector<32x128xf32>
    %193 = arith.mulf %182, %192 : vector<32x128xf32>
    %cst_70 = arith.constant 0.254829586 : f32
    %194 = vector.broadcast %cst_70 : f32 to vector<32x128xf32>
    %195 = arith.addf %194, %193 : vector<32x128xf32>
    %196 = arith.mulf %182, %195 : vector<32x128xf32>
    %197 = arith.mulf %176, %176 : vector<32x128xf32>
    %cst_71 = arith.constant 0.000000e+00 : f32
    %198 = vector.broadcast %cst_71 : f32 to vector<32x128xf32>
    %199 = arith.subf %198, %197 : vector<32x128xf32>
    %200 = math.exp %199 : vector<32x128xf32>
    %201 = arith.mulf %196, %200 : vector<32x128xf32>
    %cst_72 = arith.constant 1.000000e+00 : f32
    %202 = vector.broadcast %cst_72 : f32 to vector<32x128xf32>
    %203 = arith.subf %202, %201 : vector<32x128xf32>
    %cst_73 = arith.constant 0.000000e+00 : f32
    %204 = vector.broadcast %cst_73 : f32 to vector<32x128xf32>
    %205 = arith.cmpf olt, %175, %204 : vector<32x128xf32>
    %cst_74 = arith.constant 0.000000e+00 : f32
    %206 = vector.broadcast %cst_74 : f32 to vector<32x128xf32>
    %207 = arith.subf %206, %203 : vector<32x128xf32>
    %208 = arith.select %205, %207, %203 : vector<32x128xi1>, vector<32x128xf32>
    %cst_75 = arith.constant 5.000000e-01 : f32
    %209 = vector.broadcast %cst_75 : f32 to vector<32x128xf32>
    %210 = arith.mulf %209, %173 : vector<32x128xf32>
    %cst_76 = arith.constant 1.000000e+00 : f32
    %211 = vector.broadcast %cst_76 : f32 to vector<32x128xf32>
    %212 = arith.addf %211, %208 : vector<32x128xf32>
    %213 = arith.mulf %210, %212 : vector<32x128xf32>
    %c320 = arith.constant 320 : index
    %c0_77 = arith.constant 0 : index
    %214 = vector.load %arg1[%c320, %c0_77] : memref<5472x128xf32, #tpu.memory_space<vmem>>, vector<128x128xf32>
    %cst_78 = arith.constant dense<0.000000e+00> : vector<32x128xf32>
    %215 = tpu.matmul %213, %214, %cst_78 {dimension_numbers = #tpu.dot_dimension_numbers<[1], [0], [0], [1], [0, 0, 1, 1], [], []>} : vector<32x128xf32>, vector<128x128xf32>, vector<32x128xf32> -> vector<32x128xf32>
    %c9 = arith.constant 9 : index
    %c0_79 = arith.constant 0 : index
    %216 = vector.load %arg2[%c9, %c0_79] : memref<40x128xf32, #tpu.memory_space<vmem>>, vector<1x128xf32>
    %217 = vector.broadcast %216 : vector<1x128xf32> to vector<32x128xf32>
    %218 = arith.addf %215, %217 : vector<32x128xf32>
    %c10 = arith.constant 10 : index
    %c0_80 = arith.constant 0 : index
    %219 = vector.load %arg2[%c10, %c0_80] : memref<40x128xf32, #tpu.memory_space<vmem>>, vector<1x128xf32>
    %c11 = arith.constant 11 : index
    %c0_81 = arith.constant 0 : index
    %220 = vector.load %arg2[%c11, %c0_81] : memref<40x128xf32, #tpu.memory_space<vmem>>, vector<1x128xf32>
    %cst_82 = arith.constant dense<0.000000e+00> : vector<128xf32>
    %221 = vector.multi_reduction <add>, %218, %cst_82 [0] : vector<32x128xf32> to vector<128xf32>
    %222 = vector.shape_cast %221 : vector<128xf32> to vector<1x128xf32>
    %cst_83 = arith.constant 3.200000e+01 : f32
    %223 = vector.broadcast %cst_83 : f32 to vector<1x128xf32>
    %224 = arith.divf %222, %223 : vector<1x128xf32>
    %225 = vector.broadcast %224 : vector<1x128xf32> to vector<32x128xf32>
    %226 = arith.subf %218, %225 : vector<32x128xf32>
    %227 = vector.broadcast %224 : vector<1x128xf32> to vector<32x128xf32>
    %228 = arith.subf %218, %227 : vector<32x128xf32>
    %229 = arith.mulf %226, %228 : vector<32x128xf32>
    %cst_84 = arith.constant dense<0.000000e+00> : vector<128xf32>
    %230 = vector.multi_reduction <add>, %229, %cst_84 [0] : vector<32x128xf32> to vector<128xf32>
    %231 = vector.shape_cast %230 : vector<128xf32> to vector<1x128xf32>
    %cst_85 = arith.constant 3.200000e+01 : f32
    %232 = vector.broadcast %cst_85 : f32 to vector<1x128xf32>
    %233 = arith.divf %231, %232 : vector<1x128xf32>
    %234 = vector.broadcast %224 : vector<1x128xf32> to vector<32x128xf32>
    %235 = arith.subf %218, %234 : vector<32x128xf32>
    %cst_86 = arith.constant 9.99999974E-6 : f32
    %236 = vector.broadcast %cst_86 : f32 to vector<1x128xf32>
    %237 = arith.addf %233, %236 : vector<1x128xf32>
    %238 = math.rsqrt %237 : vector<1x128xf32>
    %239 = vector.broadcast %238 : vector<1x128xf32> to vector<32x128xf32>
    %240 = arith.mulf %235, %239 : vector<32x128xf32>
    %241 = vector.broadcast %219 : vector<1x128xf32> to vector<32x128xf32>
    %242 = arith.mulf %240, %241 : vector<32x128xf32>
    %243 = vector.broadcast %220 : vector<1x128xf32> to vector<32x128xf32>
    %244 = arith.addf %242, %243 : vector<32x128xf32>
    %cst_87 = arith.constant 0.707106769 : f32
    %245 = vector.broadcast %cst_87 : f32 to vector<32x128xf32>
    %246 = arith.mulf %244, %245 : vector<32x128xf32>
    %247 = math.absf %246 : vector<32x128xf32>
    %cst_88 = arith.constant 0.327591091 : f32
    %248 = vector.broadcast %cst_88 : f32 to vector<32x128xf32>
    %249 = arith.mulf %248, %247 : vector<32x128xf32>
    %cst_89 = arith.constant 1.000000e+00 : f32
    %250 = vector.broadcast %cst_89 : f32 to vector<32x128xf32>
    %251 = arith.addf %250, %249 : vector<32x128xf32>
    %cst_90 = arith.constant 1.000000e+00 : f32
    %252 = vector.broadcast %cst_90 : f32 to vector<32x128xf32>
    %253 = arith.divf %252, %251 : vector<32x128xf32>
    %cst_91 = arith.constant 1.06140542 : f32
    %254 = vector.broadcast %cst_91 : f32 to vector<32x128xf32>
    %255 = arith.mulf %253, %254 : vector<32x128xf32>
    %cst_92 = arith.constant -1.45315206 : f32
    %256 = vector.broadcast %cst_92 : f32 to vector<32x128xf32>
    %257 = arith.addf %256, %255 : vector<32x128xf32>
    %258 = arith.mulf %253, %257 : vector<32x128xf32>
    %cst_93 = arith.constant 1.42141378 : f32
    %259 = vector.broadcast %cst_93 : f32 to vector<32x128xf32>
    %260 = arith.addf %259, %258 : vector<32x128xf32>
    %261 = arith.mulf %253, %260 : vector<32x128xf32>
    %cst_94 = arith.constant -0.284496725 : f32
    %262 = vector.broadcast %cst_94 : f32 to vector<32x128xf32>
    %263 = arith.addf %262, %261 : vector<32x128xf32>
    %264 = arith.mulf %253, %263 : vector<32x128xf32>
    %cst_95 = arith.constant 0.254829586 : f32
    %265 = vector.broadcast %cst_95 : f32 to vector<32x128xf32>
    %266 = arith.addf %265, %264 : vector<32x128xf32>
    %267 = arith.mulf %253, %266 : vector<32x128xf32>
    %268 = arith.mulf %247, %247 : vector<32x128xf32>
    %cst_96 = arith.constant 0.000000e+00 : f32
    %269 = vector.broadcast %cst_96 : f32 to vector<32x128xf32>
    %270 = arith.subf %269, %268 : vector<32x128xf32>
    %271 = math.exp %270 : vector<32x128xf32>
    %272 = arith.mulf %267, %271 : vector<32x128xf32>
    %cst_97 = arith.constant 1.000000e+00 : f32
    %273 = vector.broadcast %cst_97 : f32 to vector<32x128xf32>
    %274 = arith.subf %273, %272 : vector<32x128xf32>
    %cst_98 = arith.constant 0.000000e+00 : f32
    %275 = vector.broadcast %cst_98 : f32 to vector<32x128xf32>
    %276 = arith.cmpf olt, %246, %275 : vector<32x128xf32>
    %cst_99 = arith.constant 0.000000e+00 : f32
    %277 = vector.broadcast %cst_99 : f32 to vector<32x128xf32>
    %278 = arith.subf %277, %274 : vector<32x128xf32>
    %279 = arith.select %276, %278, %274 : vector<32x128xi1>, vector<32x128xf32>
    %cst_100 = arith.constant 5.000000e-01 : f32
    %280 = vector.broadcast %cst_100 : f32 to vector<32x128xf32>
    %281 = arith.mulf %280, %244 : vector<32x128xf32>
    %cst_101 = arith.constant 1.000000e+00 : f32
    %282 = vector.broadcast %cst_101 : f32 to vector<32x128xf32>
    %283 = arith.addf %282, %279 : vector<32x128xf32>
    %284 = arith.mulf %281, %283 : vector<32x128xf32>
    %c448 = arith.constant 448 : index
    %c0_102 = arith.constant 0 : index
    %285 = vector.load %arg1[%c448, %c0_102] : memref<5472x128xf32, #tpu.memory_space<vmem>>, vector<128x128xf32>
    %cst_103 = arith.constant dense<0.000000e+00> : vector<32x128xf32>
    %286 = tpu.matmul %284, %285, %cst_103 {dimension_numbers = #tpu.dot_dimension_numbers<[1], [0], [0], [1], [0, 0, 1, 1], [], []>} : vector<32x128xf32>, vector<128x128xf32>, vector<32x128xf32> -> vector<32x128xf32>
    %c12 = arith.constant 12 : index
    %c0_104 = arith.constant 0 : index
    %287 = vector.load %arg2[%c12, %c0_104] : memref<40x128xf32, #tpu.memory_space<vmem>>, vector<1x128xf32>
    %288 = vector.broadcast %287 : vector<1x128xf32> to vector<32x128xf32>
    %289 = arith.addf %286, %288 : vector<32x128xf32>
    %c13 = arith.constant 13 : index
    %c0_105 = arith.constant 0 : index
    %290 = vector.load %arg2[%c13, %c0_105] : memref<40x128xf32, #tpu.memory_space<vmem>>, vector<1x128xf32>
    %c14 = arith.constant 14 : index
    %c0_106 = arith.constant 0 : index
    %291 = vector.load %arg2[%c14, %c0_106] : memref<40x128xf32, #tpu.memory_space<vmem>>, vector<1x128xf32>
    %cst_107 = arith.constant dense<0.000000e+00> : vector<128xf32>
    %292 = vector.multi_reduction <add>, %289, %cst_107 [0] : vector<32x128xf32> to vector<128xf32>
    %293 = vector.shape_cast %292 : vector<128xf32> to vector<1x128xf32>
    %cst_108 = arith.constant 3.200000e+01 : f32
    %294 = vector.broadcast %cst_108 : f32 to vector<1x128xf32>
    %295 = arith.divf %293, %294 : vector<1x128xf32>
    %296 = vector.broadcast %295 : vector<1x128xf32> to vector<32x128xf32>
    %297 = arith.subf %289, %296 : vector<32x128xf32>
    %298 = vector.broadcast %295 : vector<1x128xf32> to vector<32x128xf32>
    %299 = arith.subf %289, %298 : vector<32x128xf32>
    %300 = arith.mulf %297, %299 : vector<32x128xf32>
    %cst_109 = arith.constant dense<0.000000e+00> : vector<128xf32>
    %301 = vector.multi_reduction <add>, %300, %cst_109 [0] : vector<32x128xf32> to vector<128xf32>
    %302 = vector.shape_cast %301 : vector<128xf32> to vector<1x128xf32>
    %cst_110 = arith.constant 3.200000e+01 : f32
    %303 = vector.broadcast %cst_110 : f32 to vector<1x128xf32>
    %304 = arith.divf %302, %303 : vector<1x128xf32>
    %305 = vector.broadcast %295 : vector<1x128xf32> to vector<32x128xf32>
    %306 = arith.subf %289, %305 : vector<32x128xf32>
    %cst_111 = arith.constant 9.99999974E-6 : f32
    %307 = vector.broadcast %cst_111 : f32 to vector<1x128xf32>
    %308 = arith.addf %304, %307 : vector<1x128xf32>
    %309 = math.rsqrt %308 : vector<1x128xf32>
    %310 = vector.broadcast %309 : vector<1x128xf32> to vector<32x128xf32>
    %311 = arith.mulf %306, %310 : vector<32x128xf32>
    %312 = vector.broadcast %290 : vector<1x128xf32> to vector<32x128xf32>
    %313 = arith.mulf %311, %312 : vector<32x128xf32>
    %314 = vector.broadcast %291 : vector<1x128xf32> to vector<32x128xf32>
    %315 = arith.addf %313, %314 : vector<32x128xf32>
    %cst_112 = arith.constant 0.707106769 : f32
    %316 = vector.broadcast %cst_112 : f32 to vector<32x128xf32>
    %317 = arith.mulf %315, %316 : vector<32x128xf32>
    %318 = math.absf %317 : vector<32x128xf32>
    %cst_113 = arith.constant 0.327591091 : f32
    %319 = vector.broadcast %cst_113 : f32 to vector<32x128xf32>
    %320 = arith.mulf %319, %318 : vector<32x128xf32>
    %cst_114 = arith.constant 1.000000e+00 : f32
    %321 = vector.broadcast %cst_114 : f32 to vector<32x128xf32>
    %322 = arith.addf %321, %320 : vector<32x128xf32>
    %cst_115 = arith.constant 1.000000e+00 : f32
    %323 = vector.broadcast %cst_115 : f32 to vector<32x128xf32>
    %324 = arith.divf %323, %322 : vector<32x128xf32>
    %cst_116 = arith.constant 1.06140542 : f32
    %325 = vector.broadcast %cst_116 : f32 to vector<32x128xf32>
    %326 = arith.mulf %324, %325 : vector<32x128xf32>
    %cst_117 = arith.constant -1.45315206 : f32
    %327 = vector.broadcast %cst_117 : f32 to vector<32x128xf32>
    %328 = arith.addf %327, %326 : vector<32x128xf32>
    %329 = arith.mulf %324, %328 : vector<32x128xf32>
    %cst_118 = arith.constant 1.42141378 : f32
    %330 = vector.broadcast %cst_118 : f32 to vector<32x128xf32>
    %331 = arith.addf %330, %329 : vector<32x128xf32>
    %332 = arith.mulf %324, %331 : vector<32x128xf32>
    %cst_119 = arith.constant -0.284496725 : f32
    %333 = vector.broadcast %cst_119 : f32 to vector<32x128xf32>
    %334 = arith.addf %333, %332 : vector<32x128xf32>
    %335 = arith.mulf %324, %334 : vector<32x128xf32>
    %cst_120 = arith.constant 0.254829586 : f32
    %336 = vector.broadcast %cst_120 : f32 to vector<32x128xf32>
    %337 = arith.addf %336, %335 : vector<32x128xf32>
    %338 = arith.mulf %324, %337 : vector<32x128xf32>
    %339 = arith.mulf %318, %318 : vector<32x128xf32>
    %cst_121 = arith.constant 0.000000e+00 : f32
    %340 = vector.broadcast %cst_121 : f32 to vector<32x128xf32>
    %341 = arith.subf %340, %339 : vector<32x128xf32>
    %342 = math.exp %341 : vector<32x128xf32>
    %343 = arith.mulf %338, %342 : vector<32x128xf32>
    %cst_122 = arith.constant 1.000000e+00 : f32
    %344 = vector.broadcast %cst_122 : f32 to vector<32x128xf32>
    %345 = arith.subf %344, %343 : vector<32x128xf32>
    %cst_123 = arith.constant 0.000000e+00 : f32
    %346 = vector.broadcast %cst_123 : f32 to vector<32x128xf32>
    %347 = arith.cmpf olt, %317, %346 : vector<32x128xf32>
    %cst_124 = arith.constant 0.000000e+00 : f32
    %348 = vector.broadcast %cst_124 : f32 to vector<32x128xf32>
    %349 = arith.subf %348, %345 : vector<32x128xf32>
    %350 = arith.select %347, %349, %345 : vector<32x128xi1>, vector<32x128xf32>
    %cst_125 = arith.constant 5.000000e-01 : f32
    %351 = vector.broadcast %cst_125 : f32 to vector<32x128xf32>
    %352 = arith.mulf %351, %315 : vector<32x128xf32>
    %cst_126 = arith.constant 1.000000e+00 : f32
    %353 = vector.broadcast %cst_126 : f32 to vector<32x128xf32>
    %354 = arith.addf %353, %350 : vector<32x128xf32>
    %355 = arith.mulf %352, %354 : vector<32x128xf32>
    %c576 = arith.constant 576 : index
    %c0_127 = arith.constant 0 : index
    %356 = vector.load %arg1[%c576, %c0_127] : memref<5472x128xf32, #tpu.memory_space<vmem>>, vector<128x128xf32>
    %cst_128 = arith.constant dense<0.000000e+00> : vector<32x128xf32>
    %357 = tpu.matmul %355, %356, %cst_128 {dimension_numbers = #tpu.dot_dimension_numbers<[1], [0], [0], [1], [0, 0, 1, 1], [], []>} : vector<32x128xf32>, vector<128x128xf32>, vector<32x128xf32> -> vector<32x128xf32>
    %c15 = arith.constant 15 : index
    %c0_129 = arith.constant 0 : index
    %358 = vector.load %arg2[%c15, %c0_129] : memref<40x128xf32, #tpu.memory_space<vmem>>, vector<1x128xf32>
    %359 = vector.broadcast %358 : vector<1x128xf32> to vector<32x128xf32>
    %360 = arith.addf %357, %359 : vector<32x128xf32>
    %c16 = arith.constant 16 : index
    %c0_130 = arith.constant 0 : index
    %361 = vector.load %arg2[%c16, %c0_130] : memref<40x128xf32, #tpu.memory_space<vmem>>, vector<1x128xf32>
    %c17 = arith.constant 17 : index
    %c0_131 = arith.constant 0 : index
    %362 = vector.load %arg2[%c17, %c0_131] : memref<40x128xf32, #tpu.memory_space<vmem>>, vector<1x128xf32>
    %cst_132 = arith.constant dense<0.000000e+00> : vector<128xf32>
    %363 = vector.multi_reduction <add>, %360, %cst_132 [0] : vector<32x128xf32> to vector<128xf32>
    %364 = vector.shape_cast %363 : vector<128xf32> to vector<1x128xf32>
    %cst_133 = arith.constant 3.200000e+01 : f32
    %365 = vector.broadcast %cst_133 : f32 to vector<1x128xf32>
    %366 = arith.divf %364, %365 : vector<1x128xf32>
    %367 = vector.broadcast %366 : vector<1x128xf32> to vector<32x128xf32>
    %368 = arith.subf %360, %367 : vector<32x128xf32>
    %369 = vector.broadcast %366 : vector<1x128xf32> to vector<32x128xf32>
    %370 = arith.subf %360, %369 : vector<32x128xf32>
    %371 = arith.mulf %368, %370 : vector<32x128xf32>
    %cst_134 = arith.constant dense<0.000000e+00> : vector<128xf32>
    %372 = vector.multi_reduction <add>, %371, %cst_134 [0] : vector<32x128xf32> to vector<128xf32>
    %373 = vector.shape_cast %372 : vector<128xf32> to vector<1x128xf32>
    %cst_135 = arith.constant 3.200000e+01 : f32
    %374 = vector.broadcast %cst_135 : f32 to vector<1x128xf32>
    %375 = arith.divf %373, %374 : vector<1x128xf32>
    %376 = vector.broadcast %366 : vector<1x128xf32> to vector<32x128xf32>
    %377 = arith.subf %360, %376 : vector<32x128xf32>
    %cst_136 = arith.constant 9.99999974E-6 : f32
    %378 = vector.broadcast %cst_136 : f32 to vector<1x128xf32>
    %379 = arith.addf %375, %378 : vector<1x128xf32>
    %380 = math.rsqrt %379 : vector<1x128xf32>
    %381 = vector.broadcast %380 : vector<1x128xf32> to vector<32x128xf32>
    %382 = arith.mulf %377, %381 : vector<32x128xf32>
    %383 = vector.broadcast %361 : vector<1x128xf32> to vector<32x128xf32>
    %384 = arith.mulf %382, %383 : vector<32x128xf32>
    %385 = vector.broadcast %362 : vector<1x128xf32> to vector<32x128xf32>
    %386 = arith.addf %384, %385 : vector<32x128xf32>
    %c704 = arith.constant 704 : index
    %c0_137 = arith.constant 0 : index
    %387 = vector.load %arg1[%c704, %c0_137] : memref<5472x128xf32, #tpu.memory_space<vmem>>, vector<32x128xf32>
    %388 = arith.addf %386, %387 : vector<32x128xf32>
    %389 = tpu.iota {dimensions = array<i32: 0>} : vector<32x32xi32>
    %390 = tpu.iota {dimensions = array<i32: 1>} : vector<32x32xi32>
    %c1_i32 = arith.constant 1 : i32
    %391 = vector.broadcast %c1_i32 : i32 to vector<32x32xi32>
    %392 = arith.andi %389, %391 : vector<32x32xi32>
    %c1_i32_138 = arith.constant 1 : i32
    %393 = vector.broadcast %c1_i32_138 : i32 to vector<32x32xi32>
    %394 = arith.andi %390, %393 : vector<32x32xi32>
    %395 = arith.cmpi eq, %392, %394 : vector<32x32xi32>
    %396 = arith.sitofp %390 : vector<32x32xi32> to vector<32x32xf32>
    %cst_139 = arith.constant dense<0.000000e+00> : vector<32x32xf32>
    %397 = tpu.matmul %388, %388, %cst_139 {dimension_numbers = #tpu.dot_dimension_numbers<[1], [1], [0], [0], [0, 0, 1, 0], [], []>} : vector<32x128xf32>, vector<32x128xf32>, vector<32x32xf32> -> vector<32x32xf32>
    %cst_140 = arith.constant -1.000000e+30 : f32
    %398 = vector.broadcast %cst_140 : f32 to vector<32x32xf32>
    %399 = arith.select %395, %397, %398 : vector<32x32xi1>, vector<32x32xf32>
    %c736 = arith.constant 736 : index
    %c0_141 = arith.constant 0 : index
    %400 = vector.load %arg1[%c736, %c0_141] : memref<5472x128xf32, #tpu.memory_space<vmem>>, vector<128x128xf32>
    %cst_142 = arith.constant dense<0.000000e+00> : vector<32x128xf32>
    %401 = tpu.matmul %388, %400, %cst_142 {dimension_numbers = #tpu.dot_dimension_numbers<[1], [0], [0], [1], [0, 0, 1, 1], [], []>} : vector<32x128xf32>, vector<128x128xf32>, vector<32x128xf32> -> vector<32x128xf32>
    %c18 = arith.constant 18 : index
    %c0_143 = arith.constant 0 : index
    %402 = vector.load %arg2[%c18, %c0_143] : memref<40x128xf32, #tpu.memory_space<vmem>>, vector<1x128xf32>
    %403 = vector.broadcast %402 : vector<1x128xf32> to vector<32x128xf32>
    %404 = arith.addf %401, %403 : vector<32x128xf32>
    %cst_144 = arith.constant 0.707106769 : f32
    %405 = vector.broadcast %cst_144 : f32 to vector<32x128xf32>
    %406 = arith.mulf %404, %405 : vector<32x128xf32>
    %407 = math.absf %406 : vector<32x128xf32>
    %cst_145 = arith.constant 0.327591091 : f32
    %408 = vector.broadcast %cst_145 : f32 to vector<32x128xf32>
    %409 = arith.mulf %408, %407 : vector<32x128xf32>
    %cst_146 = arith.constant 1.000000e+00 : f32
    %410 = vector.broadcast %cst_146 : f32 to vector<32x128xf32>
    %411 = arith.addf %410, %409 : vector<32x128xf32>
    %cst_147 = arith.constant 1.000000e+00 : f32
    %412 = vector.broadcast %cst_147 : f32 to vector<32x128xf32>
    %413 = arith.divf %412, %411 : vector<32x128xf32>
    %cst_148 = arith.constant 1.06140542 : f32
    %414 = vector.broadcast %cst_148 : f32 to vector<32x128xf32>
    %415 = arith.mulf %413, %414 : vector<32x128xf32>
    %cst_149 = arith.constant -1.45315206 : f32
    %416 = vector.broadcast %cst_149 : f32 to vector<32x128xf32>
    %417 = arith.addf %416, %415 : vector<32x128xf32>
    %418 = arith.mulf %413, %417 : vector<32x128xf32>
    %cst_150 = arith.constant 1.42141378 : f32
    %419 = vector.broadcast %cst_150 : f32 to vector<32x128xf32>
    %420 = arith.addf %419, %418 : vector<32x128xf32>
    %421 = arith.mulf %413, %420 : vector<32x128xf32>
    %cst_151 = arith.constant -0.284496725 : f32
    %422 = vector.broadcast %cst_151 : f32 to vector<32x128xf32>
    %423 = arith.addf %422, %421 : vector<32x128xf32>
    %424 = arith.mulf %413, %423 : vector<32x128xf32>
    %cst_152 = arith.constant 0.254829586 : f32
    %425 = vector.broadcast %cst_152 : f32 to vector<32x128xf32>
    %426 = arith.addf %425, %424 : vector<32x128xf32>
    %427 = arith.mulf %413, %426 : vector<32x128xf32>
    %428 = arith.mulf %407, %407 : vector<32x128xf32>
    %cst_153 = arith.constant 0.000000e+00 : f32
    %429 = vector.broadcast %cst_153 : f32 to vector<32x128xf32>
    %430 = arith.subf %429, %428 : vector<32x128xf32>
    %431 = math.exp %430 : vector<32x128xf32>
    %432 = arith.mulf %427, %431 : vector<32x128xf32>
    %cst_154 = arith.constant 1.000000e+00 : f32
    %433 = vector.broadcast %cst_154 : f32 to vector<32x128xf32>
    %434 = arith.subf %433, %432 : vector<32x128xf32>
    %cst_155 = arith.constant 0.000000e+00 : f32
    %435 = vector.broadcast %cst_155 : f32 to vector<32x128xf32>
    %436 = arith.cmpf olt, %406, %435 : vector<32x128xf32>
    %cst_156 = arith.constant 0.000000e+00 : f32
    %437 = vector.broadcast %cst_156 : f32 to vector<32x128xf32>
    %438 = arith.subf %437, %434 : vector<32x128xf32>
    %439 = arith.select %436, %438, %434 : vector<32x128xi1>, vector<32x128xf32>
    %cst_157 = arith.constant 5.000000e-01 : f32
    %440 = vector.broadcast %cst_157 : f32 to vector<32x128xf32>
    %441 = arith.mulf %440, %404 : vector<32x128xf32>
    %cst_158 = arith.constant 1.000000e+00 : f32
    %442 = vector.broadcast %cst_158 : f32 to vector<32x128xf32>
    %443 = arith.addf %442, %439 : vector<32x128xf32>
    %444 = arith.mulf %441, %443 : vector<32x128xf32>
    %c864 = arith.constant 864 : index
    %c0_159 = arith.constant 0 : index
    %445 = vector.load %arg1[%c864, %c0_159] : memref<5472x128xf32, #tpu.memory_space<vmem>>, vector<128x128xf32>
    %cst_160 = arith.constant dense<0.000000e+00> : vector<32x128xf32>
    %446 = tpu.matmul %444, %445, %cst_160 {dimension_numbers = #tpu.dot_dimension_numbers<[1], [0], [0], [1], [0, 0, 1, 1], [], []>} : vector<32x128xf32>, vector<128x128xf32>, vector<32x128xf32> -> vector<32x128xf32>
    %c19 = arith.constant 19 : index
    %c0_161 = arith.constant 0 : index
    %447 = vector.load %arg2[%c19, %c0_161] : memref<40x128xf32, #tpu.memory_space<vmem>>, vector<1x128xf32>
    %448 = vector.broadcast %447 : vector<1x128xf32> to vector<32x128xf32>
    %449 = arith.addf %446, %448 : vector<32x128xf32>
    %cst_162 = arith.constant dense<0xFF800000> : vector<32xf32>
    %450 = vector.multi_reduction <maximumf>, %399, %cst_162 [1] : vector<32x32xf32> to vector<32xf32>
    %451 = vector.shape_cast %450 : vector<32xf32> to vector<32x1xf32>
    %452 = vector.broadcast %451 : vector<32x1xf32> to vector<32x32xf32>
    %453 = arith.cmpf oeq, %399, %452 : vector<32x32xf32>
    %cst_163 = arith.constant 3.200000e+01 : f32
    %454 = vector.broadcast %cst_163 : f32 to vector<32x32xf32>
    %455 = arith.select %453, %396, %454 : vector<32x32xi1>, vector<32x32xf32>
    %cst_164 = arith.constant dense<0x7F800000> : vector<32xf32>
    %456 = vector.multi_reduction <minimumf>, %455, %cst_164 [1] : vector<32x32xf32> to vector<32xf32>
    %457 = vector.shape_cast %456 : vector<32xf32> to vector<32x1xf32>
    %458 = vector.broadcast %457 : vector<32x1xf32> to vector<32x32xf32>
    %459 = arith.cmpf oeq, %396, %458 : vector<32x32xf32>
    %460 = arith.extui %459 : vector<32x32xi1> to vector<32x32xi32>
    %461 = arith.sitofp %460 : vector<32x32xi32> to vector<32x32xf32>
    %cst_165 = arith.constant -1.000000e+30 : f32
    %462 = vector.broadcast %cst_165 : f32 to vector<32x32xf32>
    %463 = arith.select %459, %462, %399 : vector<32x32xi1>, vector<32x32xf32>
    %cst_166 = arith.constant dense<0xFF800000> : vector<32xf32>
    %464 = vector.multi_reduction <maximumf>, %463, %cst_166 [1] : vector<32x32xf32> to vector<32xf32>
    %465 = vector.shape_cast %464 : vector<32xf32> to vector<32x1xf32>
    %466 = vector.broadcast %465 : vector<32x1xf32> to vector<32x32xf32>
    %467 = arith.cmpf oeq, %463, %466 : vector<32x32xf32>
    %cst_167 = arith.constant 3.200000e+01 : f32
    %468 = vector.broadcast %cst_167 : f32 to vector<32x32xf32>
    %469 = arith.select %467, %396, %468 : vector<32x32xi1>, vector<32x32xf32>
    %cst_168 = arith.constant dense<0x7F800000> : vector<32xf32>
    %470 = vector.multi_reduction <minimumf>, %469, %cst_168 [1] : vector<32x32xf32> to vector<32xf32>
    %471 = vector.shape_cast %470 : vector<32xf32> to vector<32x1xf32>
    %472 = vector.broadcast %471 : vector<32x1xf32> to vector<32x32xf32>
    %473 = arith.cmpf oeq, %396, %472 : vector<32x32xf32>
    %474 = arith.extui %473 : vector<32x32xi1> to vector<32x32xi32>
    %475 = arith.sitofp %474 : vector<32x32xi32> to vector<32x32xf32>
    %cst_169 = arith.constant -1.000000e+30 : f32
    %476 = vector.broadcast %cst_169 : f32 to vector<32x32xf32>
    %477 = arith.select %473, %476, %463 : vector<32x32xi1>, vector<32x32xf32>
    %cst_170 = arith.constant dense<0xFF800000> : vector<32xf32>
    %478 = vector.multi_reduction <maximumf>, %477, %cst_170 [1] : vector<32x32xf32> to vector<32xf32>
    %479 = vector.shape_cast %478 : vector<32xf32> to vector<32x1xf32>
    %480 = vector.broadcast %479 : vector<32x1xf32> to vector<32x32xf32>
    %481 = arith.cmpf oeq, %477, %480 : vector<32x32xf32>
    %cst_171 = arith.constant 3.200000e+01 : f32
    %482 = vector.broadcast %cst_171 : f32 to vector<32x32xf32>
    %483 = arith.select %481, %396, %482 : vector<32x32xi1>, vector<32x32xf32>
    %cst_172 = arith.constant dense<0x7F800000> : vector<32xf32>
    %484 = vector.multi_reduction <minimumf>, %483, %cst_172 [1] : vector<32x32xf32> to vector<32xf32>
    %485 = vector.shape_cast %484 : vector<32xf32> to vector<32x1xf32>
    %486 = vector.broadcast %485 : vector<32x1xf32> to vector<32x32xf32>
    %487 = arith.cmpf oeq, %396, %486 : vector<32x32xf32>
    %488 = arith.extui %487 : vector<32x32xi1> to vector<32x32xi32>
    %489 = arith.sitofp %488 : vector<32x32xi32> to vector<32x32xf32>
    %cst_173 = arith.constant -1.000000e+30 : f32
    %490 = vector.broadcast %cst_173 : f32 to vector<32x32xf32>
    %491 = arith.select %487, %490, %477 : vector<32x32xi1>, vector<32x32xf32>
    %cst_174 = arith.constant dense<0xFF800000> : vector<32xf32>
    %492 = vector.multi_reduction <maximumf>, %491, %cst_174 [1] : vector<32x32xf32> to vector<32xf32>
    %493 = vector.shape_cast %492 : vector<32xf32> to vector<32x1xf32>
    %494 = vector.broadcast %493 : vector<32x1xf32> to vector<32x32xf32>
    %495 = arith.cmpf oeq, %491, %494 : vector<32x32xf32>
    %cst_175 = arith.constant 3.200000e+01 : f32
    %496 = vector.broadcast %cst_175 : f32 to vector<32x32xf32>
    %497 = arith.select %495, %396, %496 : vector<32x32xi1>, vector<32x32xf32>
    %cst_176 = arith.constant dense<0x7F800000> : vector<32xf32>
    %498 = vector.multi_reduction <minimumf>, %497, %cst_176 [1] : vector<32x32xf32> to vector<32xf32>
    %499 = vector.shape_cast %498 : vector<32xf32> to vector<32x1xf32>
    %500 = vector.broadcast %499 : vector<32x1xf32> to vector<32x32xf32>
    %501 = arith.cmpf oeq, %396, %500 : vector<32x32xf32>
    %502 = arith.extui %501 : vector<32x32xi1> to vector<32x32xi32>
    %503 = arith.sitofp %502 : vector<32x32xi32> to vector<32x32xf32>
    %504 = tpu.concatenate %461, %475, %489, %503 in 0 : vector<32x32xf32>, vector<32x32xf32>, vector<32x32xf32>, vector<32x32xf32> -> vector<128x32xf32>
    %cst_177 = arith.constant dense<0.000000e+00> : vector<128x128xf32>
    %505 = tpu.matmul %504, %449, %cst_177 {dimension_numbers = #tpu.dot_dimension_numbers<[1], [0], [0], [1], [0, 0, 1, 1], [], []>} : vector<128x32xf32>, vector<32x128xf32>, vector<128x128xf32> -> vector<128x128xf32>
    %506 = vector.extract_strided_slice %505 {offsets = [0, 0], sizes = [32, 128], strides = [1, 1]} : vector<128x128xf32> to vector<32x128xf32>
    %507 = vector.extract_strided_slice %505 {offsets = [32, 0], sizes = [32, 128], strides = [1, 1]} : vector<128x128xf32> to vector<32x128xf32>
    %508 = arith.maximumf %506, %507 : vector<32x128xf32>
    %509 = vector.extract_strided_slice %505 {offsets = [64, 0], sizes = [32, 128], strides = [1, 1]} : vector<128x128xf32> to vector<32x128xf32>
    %510 = arith.maximumf %508, %509 : vector<32x128xf32>
    %511 = vector.extract_strided_slice %505 {offsets = [96, 0], sizes = [32, 128], strides = [1, 1]} : vector<128x128xf32> to vector<32x128xf32>
    %512 = arith.maximumf %510, %511 : vector<32x128xf32>
    %513 = arith.subf %512, %449 : vector<32x128xf32>
    %514 = tpu.concatenate %449, %513 in 1 : vector<32x128xf32>, vector<32x128xf32> -> vector<32x256xf32>
    %c992 = arith.constant 992 : index
    %c0_178 = arith.constant 0 : index
    %515 = vector.load %arg1[%c992, %c0_178] : memref<5472x128xf32, #tpu.memory_space<vmem>>, vector<256x128xf32>
    %cst_179 = arith.constant dense<0.000000e+00> : vector<32x128xf32>
    %516 = tpu.matmul %514, %515, %cst_179 {dimension_numbers = #tpu.dot_dimension_numbers<[1], [0], [0], [1], [0, 0, 1, 1], [], []>} : vector<32x256xf32>, vector<256x128xf32>, vector<32x128xf32> -> vector<32x128xf32>
    %c20 = arith.constant 20 : index
    %c0_180 = arith.constant 0 : index
    %517 = vector.load %arg2[%c20, %c0_180] : memref<40x128xf32, #tpu.memory_space<vmem>>, vector<1x128xf32>
    %518 = vector.broadcast %517 : vector<1x128xf32> to vector<32x128xf32>
    %519 = arith.addf %516, %518 : vector<32x128xf32>
    %cst_181 = arith.constant 0.707106769 : f32
    %520 = vector.broadcast %cst_181 : f32 to vector<32x128xf32>
    %521 = arith.mulf %519, %520 : vector<32x128xf32>
    %522 = math.absf %521 : vector<32x128xf32>
    %cst_182 = arith.constant 0.327591091 : f32
    %523 = vector.broadcast %cst_182 : f32 to vector<32x128xf32>
    %524 = arith.mulf %523, %522 : vector<32x128xf32>
    %cst_183 = arith.constant 1.000000e+00 : f32
    %525 = vector.broadcast %cst_183 : f32 to vector<32x128xf32>
    %526 = arith.addf %525, %524 : vector<32x128xf32>
    %cst_184 = arith.constant 1.000000e+00 : f32
    %527 = vector.broadcast %cst_184 : f32 to vector<32x128xf32>
    %528 = arith.divf %527, %526 : vector<32x128xf32>
    %cst_185 = arith.constant 1.06140542 : f32
    %529 = vector.broadcast %cst_185 : f32 to vector<32x128xf32>
    %530 = arith.mulf %528, %529 : vector<32x128xf32>
    %cst_186 = arith.constant -1.45315206 : f32
    %531 = vector.broadcast %cst_186 : f32 to vector<32x128xf32>
    %532 = arith.addf %531, %530 : vector<32x128xf32>
    %533 = arith.mulf %528, %532 : vector<32x128xf32>
    %cst_187 = arith.constant 1.42141378 : f32
    %534 = vector.broadcast %cst_187 : f32 to vector<32x128xf32>
    %535 = arith.addf %534, %533 : vector<32x128xf32>
    %536 = arith.mulf %528, %535 : vector<32x128xf32>
    %cst_188 = arith.constant -0.284496725 : f32
    %537 = vector.broadcast %cst_188 : f32 to vector<32x128xf32>
    %538 = arith.addf %537, %536 : vector<32x128xf32>
    %539 = arith.mulf %528, %538 : vector<32x128xf32>
    %cst_189 = arith.constant 0.254829586 : f32
    %540 = vector.broadcast %cst_189 : f32 to vector<32x128xf32>
    %541 = arith.addf %540, %539 : vector<32x128xf32>
    %542 = arith.mulf %528, %541 : vector<32x128xf32>
    %543 = arith.mulf %522, %522 : vector<32x128xf32>
    %cst_190 = arith.constant 0.000000e+00 : f32
    %544 = vector.broadcast %cst_190 : f32 to vector<32x128xf32>
    %545 = arith.subf %544, %543 : vector<32x128xf32>
    %546 = math.exp %545 : vector<32x128xf32>
    %547 = arith.mulf %542, %546 : vector<32x128xf32>
    %cst_191 = arith.constant 1.000000e+00 : f32
    %548 = vector.broadcast %cst_191 : f32 to vector<32x128xf32>
    %549 = arith.subf %548, %547 : vector<32x128xf32>
    %cst_192 = arith.constant 0.000000e+00 : f32
    %550 = vector.broadcast %cst_192 : f32 to vector<32x128xf32>
    %551 = arith.cmpf olt, %521, %550 : vector<32x128xf32>
    %cst_193 = arith.constant 0.000000e+00 : f32
    %552 = vector.broadcast %cst_193 : f32 to vector<32x128xf32>
    %553 = arith.subf %552, %549 : vector<32x128xf32>
    %554 = arith.select %551, %553, %549 : vector<32x128xi1>, vector<32x128xf32>
    %cst_194 = arith.constant 5.000000e-01 : f32
    %555 = vector.broadcast %cst_194 : f32 to vector<32x128xf32>
    %556 = arith.mulf %555, %519 : vector<32x128xf32>
    %cst_195 = arith.constant 1.000000e+00 : f32
    %557 = vector.broadcast %cst_195 : f32 to vector<32x128xf32>
    %558 = arith.addf %557, %554 : vector<32x128xf32>
    %559 = arith.mulf %556, %558 : vector<32x128xf32>
    %c1248 = arith.constant 1248 : index
    %c0_196 = arith.constant 0 : index
    %560 = vector.load %arg1[%c1248, %c0_196] : memref<5472x128xf32, #tpu.memory_space<vmem>>, vector<128x128xf32>
    %cst_197 = arith.constant dense<0.000000e+00> : vector<32x128xf32>
    %561 = tpu.matmul %559, %560, %cst_197 {dimension_numbers = #tpu.dot_dimension_numbers<[1], [0], [0], [1], [0, 0, 1, 1], [], []>} : vector<32x128xf32>, vector<128x128xf32>, vector<32x128xf32> -> vector<32x128xf32>
    %c21 = arith.constant 21 : index
    %c0_198 = arith.constant 0 : index
    %562 = vector.load %arg2[%c21, %c0_198] : memref<40x128xf32, #tpu.memory_space<vmem>>, vector<1x128xf32>
    %563 = vector.broadcast %562 : vector<1x128xf32> to vector<32x128xf32>
    %564 = arith.addf %561, %563 : vector<32x128xf32>
    %cst_199 = arith.constant 0.707106769 : f32
    %565 = vector.broadcast %cst_199 : f32 to vector<32x128xf32>
    %566 = arith.mulf %564, %565 : vector<32x128xf32>
    %567 = math.absf %566 : vector<32x128xf32>
    %cst_200 = arith.constant 0.327591091 : f32
    %568 = vector.broadcast %cst_200 : f32 to vector<32x128xf32>
    %569 = arith.mulf %568, %567 : vector<32x128xf32>
    %cst_201 = arith.constant 1.000000e+00 : f32
    %570 = vector.broadcast %cst_201 : f32 to vector<32x128xf32>
    %571 = arith.addf %570, %569 : vector<32x128xf32>
    %cst_202 = arith.constant 1.000000e+00 : f32
    %572 = vector.broadcast %cst_202 : f32 to vector<32x128xf32>
    %573 = arith.divf %572, %571 : vector<32x128xf32>
    %cst_203 = arith.constant 1.06140542 : f32
    %574 = vector.broadcast %cst_203 : f32 to vector<32x128xf32>
    %575 = arith.mulf %573, %574 : vector<32x128xf32>
    %cst_204 = arith.constant -1.45315206 : f32
    %576 = vector.broadcast %cst_204 : f32 to vector<32x128xf32>
    %577 = arith.addf %576, %575 : vector<32x128xf32>
    %578 = arith.mulf %573, %577 : vector<32x128xf32>
    %cst_205 = arith.constant 1.42141378 : f32
    %579 = vector.broadcast %cst_205 : f32 to vector<32x128xf32>
    %580 = arith.addf %579, %578 : vector<32x128xf32>
    %581 = arith.mulf %573, %580 : vector<32x128xf32>
    %cst_206 = arith.constant -0.284496725 : f32
    %582 = vector.broadcast %cst_206 : f32 to vector<32x128xf32>
    %583 = arith.addf %582, %581 : vector<32x128xf32>
    %584 = arith.mulf %573, %583 : vector<32x128xf32>
    %cst_207 = arith.constant 0.254829586 : f32
    %585 = vector.broadcast %cst_207 : f32 to vector<32x128xf32>
    %586 = arith.addf %585, %584 : vector<32x128xf32>
    %587 = arith.mulf %573, %586 : vector<32x128xf32>
    %588 = arith.mulf %567, %567 : vector<32x128xf32>
    %cst_208 = arith.constant 0.000000e+00 : f32
    %589 = vector.broadcast %cst_208 : f32 to vector<32x128xf32>
    %590 = arith.subf %589, %588 : vector<32x128xf32>
    %591 = math.exp %590 : vector<32x128xf32>
    %592 = arith.mulf %587, %591 : vector<32x128xf32>
    %cst_209 = arith.constant 1.000000e+00 : f32
    %593 = vector.broadcast %cst_209 : f32 to vector<32x128xf32>
    %594 = arith.subf %593, %592 : vector<32x128xf32>
    %cst_210 = arith.constant 0.000000e+00 : f32
    %595 = vector.broadcast %cst_210 : f32 to vector<32x128xf32>
    %596 = arith.cmpf olt, %566, %595 : vector<32x128xf32>
    %cst_211 = arith.constant 0.000000e+00 : f32
    %597 = vector.broadcast %cst_211 : f32 to vector<32x128xf32>
    %598 = arith.subf %597, %594 : vector<32x128xf32>
    %599 = arith.select %596, %598, %594 : vector<32x128xi1>, vector<32x128xf32>
    %cst_212 = arith.constant 5.000000e-01 : f32
    %600 = vector.broadcast %cst_212 : f32 to vector<32x128xf32>
    %601 = arith.mulf %600, %564 : vector<32x128xf32>
    %cst_213 = arith.constant 1.000000e+00 : f32
    %602 = vector.broadcast %cst_213 : f32 to vector<32x128xf32>
    %603 = arith.addf %602, %599 : vector<32x128xf32>
    %604 = arith.mulf %601, %603 : vector<32x128xf32>
    %c1376 = arith.constant 1376 : index
    %c0_214 = arith.constant 0 : index
    %605 = vector.load %arg1[%c1376, %c0_214] : memref<5472x128xf32, #tpu.memory_space<vmem>>, vector<128x128xf32>
    %cst_215 = arith.constant dense<0.000000e+00> : vector<32x128xf32>
    %606 = tpu.matmul %604, %605, %cst_215 {dimension_numbers = #tpu.dot_dimension_numbers<[1], [0], [0], [1], [0, 0, 1, 1], [], []>} : vector<32x128xf32>, vector<128x128xf32>, vector<32x128xf32> -> vector<32x128xf32>
    %c22 = arith.constant 22 : index
    %c0_216 = arith.constant 0 : index
    %607 = vector.load %arg2[%c22, %c0_216] : memref<40x128xf32, #tpu.memory_space<vmem>>, vector<1x128xf32>
    %608 = vector.broadcast %607 : vector<1x128xf32> to vector<32x128xf32>
    %609 = arith.addf %606, %608 : vector<32x128xf32>
    %610 = arith.addf %609, %388 : vector<32x128xf32>
    %c1504 = arith.constant 1504 : index
    %c0_217 = arith.constant 0 : index
    %611 = vector.load %arg1[%c1504, %c0_217] : memref<5472x128xf32, #tpu.memory_space<vmem>>, vector<128x128xf32>
    %cst_218 = arith.constant dense<0.000000e+00> : vector<32x128xf32>
    %612 = tpu.matmul %610, %611, %cst_218 {dimension_numbers = #tpu.dot_dimension_numbers<[1], [0], [0], [1], [0, 0, 1, 1], [], []>} : vector<32x128xf32>, vector<128x128xf32>, vector<32x128xf32> -> vector<32x128xf32>
    %c23 = arith.constant 23 : index
    %c0_219 = arith.constant 0 : index
    %613 = vector.load %arg2[%c23, %c0_219] : memref<40x128xf32, #tpu.memory_space<vmem>>, vector<1x128xf32>
    %614 = vector.broadcast %613 : vector<1x128xf32> to vector<32x128xf32>
    %615 = arith.addf %612, %614 : vector<32x128xf32>
    %cst_220 = arith.constant 0.707106769 : f32
    %616 = vector.broadcast %cst_220 : f32 to vector<32x128xf32>
    %617 = arith.mulf %615, %616 : vector<32x128xf32>
    %618 = math.absf %617 : vector<32x128xf32>
    %cst_221 = arith.constant 0.327591091 : f32
    %619 = vector.broadcast %cst_221 : f32 to vector<32x128xf32>
    %620 = arith.mulf %619, %618 : vector<32x128xf32>
    %cst_222 = arith.constant 1.000000e+00 : f32
    %621 = vector.broadcast %cst_222 : f32 to vector<32x128xf32>
    %622 = arith.addf %621, %620 : vector<32x128xf32>
    %cst_223 = arith.constant 1.000000e+00 : f32
    %623 = vector.broadcast %cst_223 : f32 to vector<32x128xf32>
    %624 = arith.divf %623, %622 : vector<32x128xf32>
    %cst_224 = arith.constant 1.06140542 : f32
    %625 = vector.broadcast %cst_224 : f32 to vector<32x128xf32>
    %626 = arith.mulf %624, %625 : vector<32x128xf32>
    %cst_225 = arith.constant -1.45315206 : f32
    %627 = vector.broadcast %cst_225 : f32 to vector<32x128xf32>
    %628 = arith.addf %627, %626 : vector<32x128xf32>
    %629 = arith.mulf %624, %628 : vector<32x128xf32>
    %cst_226 = arith.constant 1.42141378 : f32
    %630 = vector.broadcast %cst_226 : f32 to vector<32x128xf32>
    %631 = arith.addf %630, %629 : vector<32x128xf32>
    %632 = arith.mulf %624, %631 : vector<32x128xf32>
    %cst_227 = arith.constant -0.284496725 : f32
    %633 = vector.broadcast %cst_227 : f32 to vector<32x128xf32>
    %634 = arith.addf %633, %632 : vector<32x128xf32>
    %635 = arith.mulf %624, %634 : vector<32x128xf32>
    %cst_228 = arith.constant 0.254829586 : f32
    %636 = vector.broadcast %cst_228 : f32 to vector<32x128xf32>
    %637 = arith.addf %636, %635 : vector<32x128xf32>
    %638 = arith.mulf %624, %637 : vector<32x128xf32>
    %639 = arith.mulf %618, %618 : vector<32x128xf32>
    %cst_229 = arith.constant 0.000000e+00 : f32
    %640 = vector.broadcast %cst_229 : f32 to vector<32x128xf32>
    %641 = arith.subf %640, %639 : vector<32x128xf32>
    %642 = math.exp %641 : vector<32x128xf32>
    %643 = arith.mulf %638, %642 : vector<32x128xf32>
    %cst_230 = arith.constant 1.000000e+00 : f32
    %644 = vector.broadcast %cst_230 : f32 to vector<32x128xf32>
    %645 = arith.subf %644, %643 : vector<32x128xf32>
    %cst_231 = arith.constant 0.000000e+00 : f32
    %646 = vector.broadcast %cst_231 : f32 to vector<32x128xf32>
    %647 = arith.cmpf olt, %617, %646 : vector<32x128xf32>
    %cst_232 = arith.constant 0.000000e+00 : f32
    %648 = vector.broadcast %cst_232 : f32 to vector<32x128xf32>
    %649 = arith.subf %648, %645 : vector<32x128xf32>
    %650 = arith.select %647, %649, %645 : vector<32x128xi1>, vector<32x128xf32>
    %cst_233 = arith.constant 5.000000e-01 : f32
    %651 = vector.broadcast %cst_233 : f32 to vector<32x128xf32>
    %652 = arith.mulf %651, %615 : vector<32x128xf32>
    %cst_234 = arith.constant 1.000000e+00 : f32
    %653 = vector.broadcast %cst_234 : f32 to vector<32x128xf32>
    %654 = arith.addf %653, %650 : vector<32x128xf32>
    %655 = arith.mulf %652, %654 : vector<32x128xf32>
    %c1632 = arith.constant 1632 : index
    %c0_235 = arith.constant 0 : index
    %656 = vector.load %arg1[%c1632, %c0_235] : memref<5472x128xf32, #tpu.memory_space<vmem>>, vector<128x128xf32>
    %cst_236 = arith.constant dense<0.000000e+00> : vector<32x128xf32>
    %657 = tpu.matmul %655, %656, %cst_236 {dimension_numbers = #tpu.dot_dimension_numbers<[1], [0], [0], [1], [0, 0, 1, 1], [], []>} : vector<32x128xf32>, vector<128x128xf32>, vector<32x128xf32> -> vector<32x128xf32>
    %c24 = arith.constant 24 : index
    %c0_237 = arith.constant 0 : index
    %658 = vector.load %arg2[%c24, %c0_237] : memref<40x128xf32, #tpu.memory_space<vmem>>, vector<1x128xf32>
    %659 = vector.broadcast %658 : vector<1x128xf32> to vector<32x128xf32>
    %660 = arith.addf %657, %659 : vector<32x128xf32>
    %cst_238 = arith.constant 0.707106769 : f32
    %661 = vector.broadcast %cst_238 : f32 to vector<32x128xf32>
    %662 = arith.mulf %660, %661 : vector<32x128xf32>
    %663 = math.absf %662 : vector<32x128xf32>
    %cst_239 = arith.constant 0.327591091 : f32
    %664 = vector.broadcast %cst_239 : f32 to vector<32x128xf32>
    %665 = arith.mulf %664, %663 : vector<32x128xf32>
    %cst_240 = arith.constant 1.000000e+00 : f32
    %666 = vector.broadcast %cst_240 : f32 to vector<32x128xf32>
    %667 = arith.addf %666, %665 : vector<32x128xf32>
    %cst_241 = arith.constant 1.000000e+00 : f32
    %668 = vector.broadcast %cst_241 : f32 to vector<32x128xf32>
    %669 = arith.divf %668, %667 : vector<32x128xf32>
    %cst_242 = arith.constant 1.06140542 : f32
    %670 = vector.broadcast %cst_242 : f32 to vector<32x128xf32>
    %671 = arith.mulf %669, %670 : vector<32x128xf32>
    %cst_243 = arith.constant -1.45315206 : f32
    %672 = vector.broadcast %cst_243 : f32 to vector<32x128xf32>
    %673 = arith.addf %672, %671 : vector<32x128xf32>
    %674 = arith.mulf %669, %673 : vector<32x128xf32>
    %cst_244 = arith.constant 1.42141378 : f32
    %675 = vector.broadcast %cst_244 : f32 to vector<32x128xf32>
    %676 = arith.addf %675, %674 : vector<32x128xf32>
    %677 = arith.mulf %669, %676 : vector<32x128xf32>
    %cst_245 = arith.constant -0.284496725 : f32
    %678 = vector.broadcast %cst_245 : f32 to vector<32x128xf32>
    %679 = arith.addf %678, %677 : vector<32x128xf32>
    %680 = arith.mulf %669, %679 : vector<32x128xf32>
    %cst_246 = arith.constant 0.254829586 : f32
    %681 = vector.broadcast %cst_246 : f32 to vector<32x128xf32>
    %682 = arith.addf %681, %680 : vector<32x128xf32>
    %683 = arith.mulf %669, %682 : vector<32x128xf32>
    %684 = arith.mulf %663, %663 : vector<32x128xf32>
    %cst_247 = arith.constant 0.000000e+00 : f32
    %685 = vector.broadcast %cst_247 : f32 to vector<32x128xf32>
    %686 = arith.subf %685, %684 : vector<32x128xf32>
    %687 = math.exp %686 : vector<32x128xf32>
    %688 = arith.mulf %683, %687 : vector<32x128xf32>
    %cst_248 = arith.constant 1.000000e+00 : f32
    %689 = vector.broadcast %cst_248 : f32 to vector<32x128xf32>
    %690 = arith.subf %689, %688 : vector<32x128xf32>
    %cst_249 = arith.constant 0.000000e+00 : f32
    %691 = vector.broadcast %cst_249 : f32 to vector<32x128xf32>
    %692 = arith.cmpf olt, %662, %691 : vector<32x128xf32>
    %cst_250 = arith.constant 0.000000e+00 : f32
    %693 = vector.broadcast %cst_250 : f32 to vector<32x128xf32>
    %694 = arith.subf %693, %690 : vector<32x128xf32>
    %695 = arith.select %692, %694, %690 : vector<32x128xi1>, vector<32x128xf32>
    %cst_251 = arith.constant 5.000000e-01 : f32
    %696 = vector.broadcast %cst_251 : f32 to vector<32x128xf32>
    %697 = arith.mulf %696, %660 : vector<32x128xf32>
    %cst_252 = arith.constant 1.000000e+00 : f32
    %698 = vector.broadcast %cst_252 : f32 to vector<32x128xf32>
    %699 = arith.addf %698, %695 : vector<32x128xf32>
    %700 = arith.mulf %697, %699 : vector<32x128xf32>
    %c1760 = arith.constant 1760 : index
    %c0_253 = arith.constant 0 : index
    %701 = vector.load %arg1[%c1760, %c0_253] : memref<5472x128xf32, #tpu.memory_space<vmem>>, vector<128x128xf32>
    %cst_254 = arith.constant dense<0.000000e+00> : vector<32x128xf32>
    %702 = tpu.matmul %700, %701, %cst_254 {dimension_numbers = #tpu.dot_dimension_numbers<[1], [0], [0], [1], [0, 0, 1, 1], [], []>} : vector<32x128xf32>, vector<128x128xf32>, vector<32x128xf32> -> vector<32x128xf32>
    %c25 = arith.constant 25 : index
    %c0_255 = arith.constant 0 : index
    %703 = vector.load %arg2[%c25, %c0_255] : memref<40x128xf32, #tpu.memory_space<vmem>>, vector<1x128xf32>
    %704 = vector.broadcast %703 : vector<1x128xf32> to vector<32x128xf32>
    %705 = arith.addf %702, %704 : vector<32x128xf32>
    %cst_256 = arith.constant 0.707106769 : f32
    %706 = vector.broadcast %cst_256 : f32 to vector<32x128xf32>
    %707 = arith.mulf %705, %706 : vector<32x128xf32>
    %708 = math.absf %707 : vector<32x128xf32>
    %cst_257 = arith.constant 0.327591091 : f32
    %709 = vector.broadcast %cst_257 : f32 to vector<32x128xf32>
    %710 = arith.mulf %709, %708 : vector<32x128xf32>
    %cst_258 = arith.constant 1.000000e+00 : f32
    %711 = vector.broadcast %cst_258 : f32 to vector<32x128xf32>
    %712 = arith.addf %711, %710 : vector<32x128xf32>
    %cst_259 = arith.constant 1.000000e+00 : f32
    %713 = vector.broadcast %cst_259 : f32 to vector<32x128xf32>
    %714 = arith.divf %713, %712 : vector<32x128xf32>
    %cst_260 = arith.constant 1.06140542 : f32
    %715 = vector.broadcast %cst_260 : f32 to vector<32x128xf32>
    %716 = arith.mulf %714, %715 : vector<32x128xf32>
    %cst_261 = arith.constant -1.45315206 : f32
    %717 = vector.broadcast %cst_261 : f32 to vector<32x128xf32>
    %718 = arith.addf %717, %716 : vector<32x128xf32>
    %719 = arith.mulf %714, %718 : vector<32x128xf32>
    %cst_262 = arith.constant 1.42141378 : f32
    %720 = vector.broadcast %cst_262 : f32 to vector<32x128xf32>
    %721 = arith.addf %720, %719 : vector<32x128xf32>
    %722 = arith.mulf %714, %721 : vector<32x128xf32>
    %cst_263 = arith.constant -0.284496725 : f32
    %723 = vector.broadcast %cst_263 : f32 to vector<32x128xf32>
    %724 = arith.addf %723, %722 : vector<32x128xf32>
    %725 = arith.mulf %714, %724 : vector<32x128xf32>
    %cst_264 = arith.constant 0.254829586 : f32
    %726 = vector.broadcast %cst_264 : f32 to vector<32x128xf32>
    %727 = arith.addf %726, %725 : vector<32x128xf32>
    %728 = arith.mulf %714, %727 : vector<32x128xf32>
    %729 = arith.mulf %708, %708 : vector<32x128xf32>
    %cst_265 = arith.constant 0.000000e+00 : f32
    %730 = vector.broadcast %cst_265 : f32 to vector<32x128xf32>
    %731 = arith.subf %730, %729 : vector<32x128xf32>
    %732 = math.exp %731 : vector<32x128xf32>
    %733 = arith.mulf %728, %732 : vector<32x128xf32>
    %cst_266 = arith.constant 1.000000e+00 : f32
    %734 = vector.broadcast %cst_266 : f32 to vector<32x128xf32>
    %735 = arith.subf %734, %733 : vector<32x128xf32>
    %cst_267 = arith.constant 0.000000e+00 : f32
    %736 = vector.broadcast %cst_267 : f32 to vector<32x128xf32>
    %737 = arith.cmpf olt, %707, %736 : vector<32x128xf32>
    %cst_268 = arith.constant 0.000000e+00 : f32
    %738 = vector.broadcast %cst_268 : f32 to vector<32x128xf32>
    %739 = arith.subf %738, %735 : vector<32x128xf32>
    %740 = arith.select %737, %739, %735 : vector<32x128xi1>, vector<32x128xf32>
    %cst_269 = arith.constant 5.000000e-01 : f32
    %741 = vector.broadcast %cst_269 : f32 to vector<32x128xf32>
    %742 = arith.mulf %741, %705 : vector<32x128xf32>
    %cst_270 = arith.constant 1.000000e+00 : f32
    %743 = vector.broadcast %cst_270 : f32 to vector<32x128xf32>
    %744 = arith.addf %743, %740 : vector<32x128xf32>
    %745 = arith.mulf %742, %744 : vector<32x128xf32>
    %c1888 = arith.constant 1888 : index
    %c0_271 = arith.constant 0 : index
    %746 = vector.load %arg1[%c1888, %c0_271] : memref<5472x128xf32, #tpu.memory_space<vmem>>, vector<128x128xf32>
    %cst_272 = arith.constant dense<0.000000e+00> : vector<32x128xf32>
    %747 = tpu.matmul %745, %746, %cst_272 {dimension_numbers = #tpu.dot_dimension_numbers<[1], [0], [0], [1], [0, 0, 1, 1], [], []>} : vector<32x128xf32>, vector<128x128xf32>, vector<32x128xf32> -> vector<32x128xf32>
    %c26 = arith.constant 26 : index
    %c0_273 = arith.constant 0 : index
    %748 = vector.load %arg2[%c26, %c0_273] : memref<40x128xf32, #tpu.memory_space<vmem>>, vector<1x128xf32>
    %749 = vector.broadcast %748 : vector<1x128xf32> to vector<32x128xf32>
    %750 = arith.addf %747, %749 : vector<32x128xf32>
    %751 = arith.addf %750, %610 : vector<32x128xf32>
    %cst_274 = arith.constant dense<0.000000e+00> : vector<32x32xf32>
    %752 = tpu.matmul %751, %751, %cst_274 {dimension_numbers = #tpu.dot_dimension_numbers<[1], [1], [0], [0], [0, 0, 1, 0], [], []>} : vector<32x128xf32>, vector<32x128xf32>, vector<32x32xf32> -> vector<32x32xf32>
    %cst_275 = arith.constant -1.000000e+30 : f32
    %753 = vector.broadcast %cst_275 : f32 to vector<32x32xf32>
    %754 = arith.select %395, %752, %753 : vector<32x32xi1>, vector<32x32xf32>
    %c2016 = arith.constant 2016 : index
    %c0_276 = arith.constant 0 : index
    %755 = vector.load %arg1[%c2016, %c0_276] : memref<5472x128xf32, #tpu.memory_space<vmem>>, vector<128x128xf32>
    %cst_277 = arith.constant dense<0.000000e+00> : vector<32x128xf32>
    %756 = tpu.matmul %751, %755, %cst_277 {dimension_numbers = #tpu.dot_dimension_numbers<[1], [0], [0], [1], [0, 0, 1, 1], [], []>} : vector<32x128xf32>, vector<128x128xf32>, vector<32x128xf32> -> vector<32x128xf32>
    %c27 = arith.constant 27 : index
    %c0_278 = arith.constant 0 : index
    %757 = vector.load %arg2[%c27, %c0_278] : memref<40x128xf32, #tpu.memory_space<vmem>>, vector<1x128xf32>
    %758 = vector.broadcast %757 : vector<1x128xf32> to vector<32x128xf32>
    %759 = arith.addf %756, %758 : vector<32x128xf32>
    %cst_279 = arith.constant 0.707106769 : f32
    %760 = vector.broadcast %cst_279 : f32 to vector<32x128xf32>
    %761 = arith.mulf %759, %760 : vector<32x128xf32>
    %762 = math.absf %761 : vector<32x128xf32>
    %cst_280 = arith.constant 0.327591091 : f32
    %763 = vector.broadcast %cst_280 : f32 to vector<32x128xf32>
    %764 = arith.mulf %763, %762 : vector<32x128xf32>
    %cst_281 = arith.constant 1.000000e+00 : f32
    %765 = vector.broadcast %cst_281 : f32 to vector<32x128xf32>
    %766 = arith.addf %765, %764 : vector<32x128xf32>
    %cst_282 = arith.constant 1.000000e+00 : f32
    %767 = vector.broadcast %cst_282 : f32 to vector<32x128xf32>
    %768 = arith.divf %767, %766 : vector<32x128xf32>
    %cst_283 = arith.constant 1.06140542 : f32
    %769 = vector.broadcast %cst_283 : f32 to vector<32x128xf32>
    %770 = arith.mulf %768, %769 : vector<32x128xf32>
    %cst_284 = arith.constant -1.45315206 : f32
    %771 = vector.broadcast %cst_284 : f32 to vector<32x128xf32>
    %772 = arith.addf %771, %770 : vector<32x128xf32>
    %773 = arith.mulf %768, %772 : vector<32x128xf32>
    %cst_285 = arith.constant 1.42141378 : f32
    %774 = vector.broadcast %cst_285 : f32 to vector<32x128xf32>
    %775 = arith.addf %774, %773 : vector<32x128xf32>
    %776 = arith.mulf %768, %775 : vector<32x128xf32>
    %cst_286 = arith.constant -0.284496725 : f32
    %777 = vector.broadcast %cst_286 : f32 to vector<32x128xf32>
    %778 = arith.addf %777, %776 : vector<32x128xf32>
    %779 = arith.mulf %768, %778 : vector<32x128xf32>
    %cst_287 = arith.constant 0.254829586 : f32
    %780 = vector.broadcast %cst_287 : f32 to vector<32x128xf32>
    %781 = arith.addf %780, %779 : vector<32x128xf32>
    %782 = arith.mulf %768, %781 : vector<32x128xf32>
    %783 = arith.mulf %762, %762 : vector<32x128xf32>
    %cst_288 = arith.constant 0.000000e+00 : f32
    %784 = vector.broadcast %cst_288 : f32 to vector<32x128xf32>
    %785 = arith.subf %784, %783 : vector<32x128xf32>
    %786 = math.exp %785 : vector<32x128xf32>
    %787 = arith.mulf %782, %786 : vector<32x128xf32>
    %cst_289 = arith.constant 1.000000e+00 : f32
    %788 = vector.broadcast %cst_289 : f32 to vector<32x128xf32>
    %789 = arith.subf %788, %787 : vector<32x128xf32>
    %cst_290 = arith.constant 0.000000e+00 : f32
    %790 = vector.broadcast %cst_290 : f32 to vector<32x128xf32>
    %791 = arith.cmpf olt, %761, %790 : vector<32x128xf32>
    %cst_291 = arith.constant 0.000000e+00 : f32
    %792 = vector.broadcast %cst_291 : f32 to vector<32x128xf32>
    %793 = arith.subf %792, %789 : vector<32x128xf32>
    %794 = arith.select %791, %793, %789 : vector<32x128xi1>, vector<32x128xf32>
    %cst_292 = arith.constant 5.000000e-01 : f32
    %795 = vector.broadcast %cst_292 : f32 to vector<32x128xf32>
    %796 = arith.mulf %795, %759 : vector<32x128xf32>
    %cst_293 = arith.constant 1.000000e+00 : f32
    %797 = vector.broadcast %cst_293 : f32 to vector<32x128xf32>
    %798 = arith.addf %797, %794 : vector<32x128xf32>
    %799 = arith.mulf %796, %798 : vector<32x128xf32>
    %c2144 = arith.constant 2144 : index
    %c0_294 = arith.constant 0 : index
    %800 = vector.load %arg1[%c2144, %c0_294] : memref<5472x128xf32, #tpu.memory_space<vmem>>, vector<128x128xf32>
    %cst_295 = arith.constant dense<0.000000e+00> : vector<32x128xf32>
    %801 = tpu.matmul %799, %800, %cst_295 {dimension_numbers = #tpu.dot_dimension_numbers<[1], [0], [0], [1], [0, 0, 1, 1], [], []>} : vector<32x128xf32>, vector<128x128xf32>, vector<32x128xf32> -> vector<32x128xf32>
    %c28 = arith.constant 28 : index
    %c0_296 = arith.constant 0 : index
    %802 = vector.load %arg2[%c28, %c0_296] : memref<40x128xf32, #tpu.memory_space<vmem>>, vector<1x128xf32>
    %803 = vector.broadcast %802 : vector<1x128xf32> to vector<32x128xf32>
    %804 = arith.addf %801, %803 : vector<32x128xf32>
    %cst_297 = arith.constant dense<0xFF800000> : vector<32xf32>
    %805 = vector.multi_reduction <maximumf>, %754, %cst_297 [1] : vector<32x32xf32> to vector<32xf32>
    %806 = vector.shape_cast %805 : vector<32xf32> to vector<32x1xf32>
    %807 = vector.broadcast %806 : vector<32x1xf32> to vector<32x32xf32>
    %808 = arith.cmpf oeq, %754, %807 : vector<32x32xf32>
    %cst_298 = arith.constant 3.200000e+01 : f32
    %809 = vector.broadcast %cst_298 : f32 to vector<32x32xf32>
    %810 = arith.select %808, %396, %809 : vector<32x32xi1>, vector<32x32xf32>
    %cst_299 = arith.constant dense<0x7F800000> : vector<32xf32>
    %811 = vector.multi_reduction <minimumf>, %810, %cst_299 [1] : vector<32x32xf32> to vector<32xf32>
    %812 = vector.shape_cast %811 : vector<32xf32> to vector<32x1xf32>
    %813 = vector.broadcast %812 : vector<32x1xf32> to vector<32x32xf32>
    %814 = arith.cmpf oeq, %396, %813 : vector<32x32xf32>
    %815 = arith.extui %814 : vector<32x32xi1> to vector<32x32xi32>
    %816 = arith.sitofp %815 : vector<32x32xi32> to vector<32x32xf32>
    %cst_300 = arith.constant -1.000000e+30 : f32
    %817 = vector.broadcast %cst_300 : f32 to vector<32x32xf32>
    %818 = arith.select %814, %817, %754 : vector<32x32xi1>, vector<32x32xf32>
    %cst_301 = arith.constant dense<0xFF800000> : vector<32xf32>
    %819 = vector.multi_reduction <maximumf>, %818, %cst_301 [1] : vector<32x32xf32> to vector<32xf32>
    %820 = vector.shape_cast %819 : vector<32xf32> to vector<32x1xf32>
    %821 = vector.broadcast %820 : vector<32x1xf32> to vector<32x32xf32>
    %822 = arith.cmpf oeq, %818, %821 : vector<32x32xf32>
    %cst_302 = arith.constant 3.200000e+01 : f32
    %823 = vector.broadcast %cst_302 : f32 to vector<32x32xf32>
    %824 = arith.select %822, %396, %823 : vector<32x32xi1>, vector<32x32xf32>
    %cst_303 = arith.constant dense<0x7F800000> : vector<32xf32>
    %825 = vector.multi_reduction <minimumf>, %824, %cst_303 [1] : vector<32x32xf32> to vector<32xf32>
    %826 = vector.shape_cast %825 : vector<32xf32> to vector<32x1xf32>
    %827 = vector.broadcast %826 : vector<32x1xf32> to vector<32x32xf32>
    %828 = arith.cmpf oeq, %396, %827 : vector<32x32xf32>
    %829 = arith.extui %828 : vector<32x32xi1> to vector<32x32xi32>
    %830 = arith.sitofp %829 : vector<32x32xi32> to vector<32x32xf32>
    %cst_304 = arith.constant -1.000000e+30 : f32
    %831 = vector.broadcast %cst_304 : f32 to vector<32x32xf32>
    %832 = arith.select %828, %831, %818 : vector<32x32xi1>, vector<32x32xf32>
    %cst_305 = arith.constant dense<0xFF800000> : vector<32xf32>
    %833 = vector.multi_reduction <maximumf>, %832, %cst_305 [1] : vector<32x32xf32> to vector<32xf32>
    %834 = vector.shape_cast %833 : vector<32xf32> to vector<32x1xf32>
    %835 = vector.broadcast %834 : vector<32x1xf32> to vector<32x32xf32>
    %836 = arith.cmpf oeq, %832, %835 : vector<32x32xf32>
    %cst_306 = arith.constant 3.200000e+01 : f32
    %837 = vector.broadcast %cst_306 : f32 to vector<32x32xf32>
    %838 = arith.select %836, %396, %837 : vector<32x32xi1>, vector<32x32xf32>
    %cst_307 = arith.constant dense<0x7F800000> : vector<32xf32>
    %839 = vector.multi_reduction <minimumf>, %838, %cst_307 [1] : vector<32x32xf32> to vector<32xf32>
    %840 = vector.shape_cast %839 : vector<32xf32> to vector<32x1xf32>
    %841 = vector.broadcast %840 : vector<32x1xf32> to vector<32x32xf32>
    %842 = arith.cmpf oeq, %396, %841 : vector<32x32xf32>
    %843 = arith.extui %842 : vector<32x32xi1> to vector<32x32xi32>
    %844 = arith.sitofp %843 : vector<32x32xi32> to vector<32x32xf32>
    %cst_308 = arith.constant -1.000000e+30 : f32
    %845 = vector.broadcast %cst_308 : f32 to vector<32x32xf32>
    %846 = arith.select %842, %845, %832 : vector<32x32xi1>, vector<32x32xf32>
    %cst_309 = arith.constant dense<0xFF800000> : vector<32xf32>
    %847 = vector.multi_reduction <maximumf>, %846, %cst_309 [1] : vector<32x32xf32> to vector<32xf32>
    %848 = vector.shape_cast %847 : vector<32xf32> to vector<32x1xf32>
    %849 = vector.broadcast %848 : vector<32x1xf32> to vector<32x32xf32>
    %850 = arith.cmpf oeq, %846, %849 : vector<32x32xf32>
    %cst_310 = arith.constant 3.200000e+01 : f32
    %851 = vector.broadcast %cst_310 : f32 to vector<32x32xf32>
    %852 = arith.select %850, %396, %851 : vector<32x32xi1>, vector<32x32xf32>
    %cst_311 = arith.constant dense<0x7F800000> : vector<32xf32>
    %853 = vector.multi_reduction <minimumf>, %852, %cst_311 [1] : vector<32x32xf32> to vector<32xf32>
    %854 = vector.shape_cast %853 : vector<32xf32> to vector<32x1xf32>
    %855 = vector.broadcast %854 : vector<32x1xf32> to vector<32x32xf32>
    %856 = arith.cmpf oeq, %396, %855 : vector<32x32xf32>
    %857 = arith.extui %856 : vector<32x32xi1> to vector<32x32xi32>
    %858 = arith.sitofp %857 : vector<32x32xi32> to vector<32x32xf32>
    %859 = tpu.concatenate %816, %830, %844, %858 in 0 : vector<32x32xf32>, vector<32x32xf32>, vector<32x32xf32>, vector<32x32xf32> -> vector<128x32xf32>
    %cst_312 = arith.constant dense<0.000000e+00> : vector<128x128xf32>
    %860 = tpu.matmul %859, %804, %cst_312 {dimension_numbers = #tpu.dot_dimension_numbers<[1], [0], [0], [1], [0, 0, 1, 1], [], []>} : vector<128x32xf32>, vector<32x128xf32>, vector<128x128xf32> -> vector<128x128xf32>
    %861 = vector.extract_strided_slice %860 {offsets = [0, 0], sizes = [32, 128], strides = [1, 1]} : vector<128x128xf32> to vector<32x128xf32>
    %862 = vector.extract_strided_slice %860 {offsets = [32, 0], sizes = [32, 128], strides = [1, 1]} : vector<128x128xf32> to vector<32x128xf32>
    %863 = arith.maximumf %861, %862 : vector<32x128xf32>
    %864 = vector.extract_strided_slice %860 {offsets = [64, 0], sizes = [32, 128], strides = [1, 1]} : vector<128x128xf32> to vector<32x128xf32>
    %865 = arith.maximumf %863, %864 : vector<32x128xf32>
    %866 = vector.extract_strided_slice %860 {offsets = [96, 0], sizes = [32, 128], strides = [1, 1]} : vector<128x128xf32> to vector<32x128xf32>
    %867 = arith.maximumf %865, %866 : vector<32x128xf32>
    %868 = arith.subf %867, %804 : vector<32x128xf32>
    %869 = tpu.concatenate %804, %868 in 1 : vector<32x128xf32>, vector<32x128xf32> -> vector<32x256xf32>
    %c2272 = arith.constant 2272 : index
    %c0_313 = arith.constant 0 : index
    %870 = vector.load %arg1[%c2272, %c0_313] : memref<5472x128xf32, #tpu.memory_space<vmem>>, vector<256x128xf32>
    %cst_314 = arith.constant dense<0.000000e+00> : vector<32x128xf32>
    %871 = tpu.matmul %869, %870, %cst_314 {dimension_numbers = #tpu.dot_dimension_numbers<[1], [0], [0], [1], [0, 0, 1, 1], [], []>} : vector<32x256xf32>, vector<256x128xf32>, vector<32x128xf32> -> vector<32x128xf32>
    %c29 = arith.constant 29 : index
    %c0_315 = arith.constant 0 : index
    %872 = vector.load %arg2[%c29, %c0_315] : memref<40x128xf32, #tpu.memory_space<vmem>>, vector<1x128xf32>
    %873 = vector.broadcast %872 : vector<1x128xf32> to vector<32x128xf32>
    %874 = arith.addf %871, %873 : vector<32x128xf32>
    %cst_316 = arith.constant 0.707106769 : f32
    %875 = vector.broadcast %cst_316 : f32 to vector<32x128xf32>
    %876 = arith.mulf %874, %875 : vector<32x128xf32>
    %877 = math.absf %876 : vector<32x128xf32>
    %cst_317 = arith.constant 0.327591091 : f32
    %878 = vector.broadcast %cst_317 : f32 to vector<32x128xf32>
    %879 = arith.mulf %878, %877 : vector<32x128xf32>
    %cst_318 = arith.constant 1.000000e+00 : f32
    %880 = vector.broadcast %cst_318 : f32 to vector<32x128xf32>
    %881 = arith.addf %880, %879 : vector<32x128xf32>
    %cst_319 = arith.constant 1.000000e+00 : f32
    %882 = vector.broadcast %cst_319 : f32 to vector<32x128xf32>
    %883 = arith.divf %882, %881 : vector<32x128xf32>
    %cst_320 = arith.constant 1.06140542 : f32
    %884 = vector.broadcast %cst_320 : f32 to vector<32x128xf32>
    %885 = arith.mulf %883, %884 : vector<32x128xf32>
    %cst_321 = arith.constant -1.45315206 : f32
    %886 = vector.broadcast %cst_321 : f32 to vector<32x128xf32>
    %887 = arith.addf %886, %885 : vector<32x128xf32>
    %888 = arith.mulf %883, %887 : vector<32x128xf32>
    %cst_322 = arith.constant 1.42141378 : f32
    %889 = vector.broadcast %cst_322 : f32 to vector<32x128xf32>
    %890 = arith.addf %889, %888 : vector<32x128xf32>
    %891 = arith.mulf %883, %890 : vector<32x128xf32>
    %cst_323 = arith.constant -0.284496725 : f32
    %892 = vector.broadcast %cst_323 : f32 to vector<32x128xf32>
    %893 = arith.addf %892, %891 : vector<32x128xf32>
    %894 = arith.mulf %883, %893 : vector<32x128xf32>
    %cst_324 = arith.constant 0.254829586 : f32
    %895 = vector.broadcast %cst_324 : f32 to vector<32x128xf32>
    %896 = arith.addf %895, %894 : vector<32x128xf32>
    %897 = arith.mulf %883, %896 : vector<32x128xf32>
    %898 = arith.mulf %877, %877 : vector<32x128xf32>
    %cst_325 = arith.constant 0.000000e+00 : f32
    %899 = vector.broadcast %cst_325 : f32 to vector<32x128xf32>
    %900 = arith.subf %899, %898 : vector<32x128xf32>
    %901 = math.exp %900 : vector<32x128xf32>
    %902 = arith.mulf %897, %901 : vector<32x128xf32>
    %cst_326 = arith.constant 1.000000e+00 : f32
    %903 = vector.broadcast %cst_326 : f32 to vector<32x128xf32>
    %904 = arith.subf %903, %902 : vector<32x128xf32>
    %cst_327 = arith.constant 0.000000e+00 : f32
    %905 = vector.broadcast %cst_327 : f32 to vector<32x128xf32>
    %906 = arith.cmpf olt, %876, %905 : vector<32x128xf32>
    %cst_328 = arith.constant 0.000000e+00 : f32
    %907 = vector.broadcast %cst_328 : f32 to vector<32x128xf32>
    %908 = arith.subf %907, %904 : vector<32x128xf32>
    %909 = arith.select %906, %908, %904 : vector<32x128xi1>, vector<32x128xf32>
    %cst_329 = arith.constant 5.000000e-01 : f32
    %910 = vector.broadcast %cst_329 : f32 to vector<32x128xf32>
    %911 = arith.mulf %910, %874 : vector<32x128xf32>
    %cst_330 = arith.constant 1.000000e+00 : f32
    %912 = vector.broadcast %cst_330 : f32 to vector<32x128xf32>
    %913 = arith.addf %912, %909 : vector<32x128xf32>
    %914 = arith.mulf %911, %913 : vector<32x128xf32>
    %c2528 = arith.constant 2528 : index
    %c0_331 = arith.constant 0 : index
    %915 = vector.load %arg1[%c2528, %c0_331] : memref<5472x128xf32, #tpu.memory_space<vmem>>, vector<128x128xf32>
    %cst_332 = arith.constant dense<0.000000e+00> : vector<32x128xf32>
    %916 = tpu.matmul %914, %915, %cst_332 {dimension_numbers = #tpu.dot_dimension_numbers<[1], [0], [0], [1], [0, 0, 1, 1], [], []>} : vector<32x128xf32>, vector<128x128xf32>, vector<32x128xf32> -> vector<32x128xf32>
    %c30 = arith.constant 30 : index
    %c0_333 = arith.constant 0 : index
    %917 = vector.load %arg2[%c30, %c0_333] : memref<40x128xf32, #tpu.memory_space<vmem>>, vector<1x128xf32>
    %918 = vector.broadcast %917 : vector<1x128xf32> to vector<32x128xf32>
    %919 = arith.addf %916, %918 : vector<32x128xf32>
    %cst_334 = arith.constant 0.707106769 : f32
    %920 = vector.broadcast %cst_334 : f32 to vector<32x128xf32>
    %921 = arith.mulf %919, %920 : vector<32x128xf32>
    %922 = math.absf %921 : vector<32x128xf32>
    %cst_335 = arith.constant 0.327591091 : f32
    %923 = vector.broadcast %cst_335 : f32 to vector<32x128xf32>
    %924 = arith.mulf %923, %922 : vector<32x128xf32>
    %cst_336 = arith.constant 1.000000e+00 : f32
    %925 = vector.broadcast %cst_336 : f32 to vector<32x128xf32>
    %926 = arith.addf %925, %924 : vector<32x128xf32>
    %cst_337 = arith.constant 1.000000e+00 : f32
    %927 = vector.broadcast %cst_337 : f32 to vector<32x128xf32>
    %928 = arith.divf %927, %926 : vector<32x128xf32>
    %cst_338 = arith.constant 1.06140542 : f32
    %929 = vector.broadcast %cst_338 : f32 to vector<32x128xf32>
    %930 = arith.mulf %928, %929 : vector<32x128xf32>
    %cst_339 = arith.constant -1.45315206 : f32
    %931 = vector.broadcast %cst_339 : f32 to vector<32x128xf32>
    %932 = arith.addf %931, %930 : vector<32x128xf32>
    %933 = arith.mulf %928, %932 : vector<32x128xf32>
    %cst_340 = arith.constant 1.42141378 : f32
    %934 = vector.broadcast %cst_340 : f32 to vector<32x128xf32>
    %935 = arith.addf %934, %933 : vector<32x128xf32>
    %936 = arith.mulf %928, %935 : vector<32x128xf32>
    %cst_341 = arith.constant -0.284496725 : f32
    %937 = vector.broadcast %cst_341 : f32 to vector<32x128xf32>
    %938 = arith.addf %937, %936 : vector<32x128xf32>
    %939 = arith.mulf %928, %938 : vector<32x128xf32>
    %cst_342 = arith.constant 0.254829586 : f32
    %940 = vector.broadcast %cst_342 : f32 to vector<32x128xf32>
    %941 = arith.addf %940, %939 : vector<32x128xf32>
    %942 = arith.mulf %928, %941 : vector<32x128xf32>
    %943 = arith.mulf %922, %922 : vector<32x128xf32>
    %cst_343 = arith.constant 0.000000e+00 : f32
    %944 = vector.broadcast %cst_343 : f32 to vector<32x128xf32>
    %945 = arith.subf %944, %943 : vector<32x128xf32>
    %946 = math.exp %945 : vector<32x128xf32>
    %947 = arith.mulf %942, %946 : vector<32x128xf32>
    %cst_344 = arith.constant 1.000000e+00 : f32
    %948 = vector.broadcast %cst_344 : f32 to vector<32x128xf32>
    %949 = arith.subf %948, %947 : vector<32x128xf32>
    %cst_345 = arith.constant 0.000000e+00 : f32
    %950 = vector.broadcast %cst_345 : f32 to vector<32x128xf32>
    %951 = arith.cmpf olt, %921, %950 : vector<32x128xf32>
    %cst_346 = arith.constant 0.000000e+00 : f32
    %952 = vector.broadcast %cst_346 : f32 to vector<32x128xf32>
    %953 = arith.subf %952, %949 : vector<32x128xf32>
    %954 = arith.select %951, %953, %949 : vector<32x128xi1>, vector<32x128xf32>
    %cst_347 = arith.constant 5.000000e-01 : f32
    %955 = vector.broadcast %cst_347 : f32 to vector<32x128xf32>
    %956 = arith.mulf %955, %919 : vector<32x128xf32>
    %cst_348 = arith.constant 1.000000e+00 : f32
    %957 = vector.broadcast %cst_348 : f32 to vector<32x128xf32>
    %958 = arith.addf %957, %954 : vector<32x128xf32>
    %959 = arith.mulf %956, %958 : vector<32x128xf32>
    %c2656 = arith.constant 2656 : index
    %c0_349 = arith.constant 0 : index
    %960 = vector.load %arg1[%c2656, %c0_349] : memref<5472x128xf32, #tpu.memory_space<vmem>>, vector<128x128xf32>
    %cst_350 = arith.constant dense<0.000000e+00> : vector<32x128xf32>
    %961 = tpu.matmul %959, %960, %cst_350 {dimension_numbers = #tpu.dot_dimension_numbers<[1], [0], [0], [1], [0, 0, 1, 1], [], []>} : vector<32x128xf32>, vector<128x128xf32>, vector<32x128xf32> -> vector<32x128xf32>
    %c31 = arith.constant 31 : index
    %c0_351 = arith.constant 0 : index
    %962 = vector.load %arg2[%c31, %c0_351] : memref<40x128xf32, #tpu.memory_space<vmem>>, vector<1x128xf32>
    %963 = vector.broadcast %962 : vector<1x128xf32> to vector<32x128xf32>
    %964 = arith.addf %961, %963 : vector<32x128xf32>
    %965 = arith.addf %964, %751 : vector<32x128xf32>
    %c2784 = arith.constant 2784 : index
    %c0_352 = arith.constant 0 : index
    %966 = vector.load %arg1[%c2784, %c0_352] : memref<5472x128xf32, #tpu.memory_space<vmem>>, vector<128x128xf32>
    %cst_353 = arith.constant dense<0.000000e+00> : vector<32x128xf32>
    %967 = tpu.matmul %965, %966, %cst_353 {dimension_numbers = #tpu.dot_dimension_numbers<[1], [0], [0], [1], [0, 0, 1, 1], [], []>} : vector<32x128xf32>, vector<128x128xf32>, vector<32x128xf32> -> vector<32x128xf32>
    %c32 = arith.constant 32 : index
    %c0_354 = arith.constant 0 : index
    %968 = vector.load %arg2[%c32, %c0_354] : memref<40x128xf32, #tpu.memory_space<vmem>>, vector<1x128xf32>
    %969 = vector.broadcast %968 : vector<1x128xf32> to vector<32x128xf32>
    %970 = arith.addf %967, %969 : vector<32x128xf32>
    %cst_355 = arith.constant 0.707106769 : f32
    %971 = vector.broadcast %cst_355 : f32 to vector<32x128xf32>
    %972 = arith.mulf %970, %971 : vector<32x128xf32>
    %973 = math.absf %972 : vector<32x128xf32>
    %cst_356 = arith.constant 0.327591091 : f32
    %974 = vector.broadcast %cst_356 : f32 to vector<32x128xf32>
    %975 = arith.mulf %974, %973 : vector<32x128xf32>
    %cst_357 = arith.constant 1.000000e+00 : f32
    %976 = vector.broadcast %cst_357 : f32 to vector<32x128xf32>
    %977 = arith.addf %976, %975 : vector<32x128xf32>
    %cst_358 = arith.constant 1.000000e+00 : f32
    %978 = vector.broadcast %cst_358 : f32 to vector<32x128xf32>
    %979 = arith.divf %978, %977 : vector<32x128xf32>
    %cst_359 = arith.constant 1.06140542 : f32
    %980 = vector.broadcast %cst_359 : f32 to vector<32x128xf32>
    %981 = arith.mulf %979, %980 : vector<32x128xf32>
    %cst_360 = arith.constant -1.45315206 : f32
    %982 = vector.broadcast %cst_360 : f32 to vector<32x128xf32>
    %983 = arith.addf %982, %981 : vector<32x128xf32>
    %984 = arith.mulf %979, %983 : vector<32x128xf32>
    %cst_361 = arith.constant 1.42141378 : f32
    %985 = vector.broadcast %cst_361 : f32 to vector<32x128xf32>
    %986 = arith.addf %985, %984 : vector<32x128xf32>
    %987 = arith.mulf %979, %986 : vector<32x128xf32>
    %cst_362 = arith.constant -0.284496725 : f32
    %988 = vector.broadcast %cst_362 : f32 to vector<32x128xf32>
    %989 = arith.addf %988, %987 : vector<32x128xf32>
    %990 = arith.mulf %979, %989 : vector<32x128xf32>
    %cst_363 = arith.constant 0.254829586 : f32
    %991 = vector.broadcast %cst_363 : f32 to vector<32x128xf32>
    %992 = arith.addf %991, %990 : vector<32x128xf32>
    %993 = arith.mulf %979, %992 : vector<32x128xf32>
    %994 = arith.mulf %973, %973 : vector<32x128xf32>
    %cst_364 = arith.constant 0.000000e+00 : f32
    %995 = vector.broadcast %cst_364 : f32 to vector<32x128xf32>
    %996 = arith.subf %995, %994 : vector<32x128xf32>
    %997 = math.exp %996 : vector<32x128xf32>
    %998 = arith.mulf %993, %997 : vector<32x128xf32>
    %cst_365 = arith.constant 1.000000e+00 : f32
    %999 = vector.broadcast %cst_365 : f32 to vector<32x128xf32>
    %1000 = arith.subf %999, %998 : vector<32x128xf32>
    %cst_366 = arith.constant 0.000000e+00 : f32
    %1001 = vector.broadcast %cst_366 : f32 to vector<32x128xf32>
    %1002 = arith.cmpf olt, %972, %1001 : vector<32x128xf32>
    %cst_367 = arith.constant 0.000000e+00 : f32
    %1003 = vector.broadcast %cst_367 : f32 to vector<32x128xf32>
    %1004 = arith.subf %1003, %1000 : vector<32x128xf32>
    %1005 = arith.select %1002, %1004, %1000 : vector<32x128xi1>, vector<32x128xf32>
    %cst_368 = arith.constant 5.000000e-01 : f32
    %1006 = vector.broadcast %cst_368 : f32 to vector<32x128xf32>
    %1007 = arith.mulf %1006, %970 : vector<32x128xf32>
    %cst_369 = arith.constant 1.000000e+00 : f32
    %1008 = vector.broadcast %cst_369 : f32 to vector<32x128xf32>
    %1009 = arith.addf %1008, %1005 : vector<32x128xf32>
    %1010 = arith.mulf %1007, %1009 : vector<32x128xf32>
    %c2912 = arith.constant 2912 : index
    %c0_370 = arith.constant 0 : index
    %1011 = vector.load %arg1[%c2912, %c0_370] : memref<5472x128xf32, #tpu.memory_space<vmem>>, vector<128x128xf32>
    %cst_371 = arith.constant dense<0.000000e+00> : vector<32x128xf32>
    %1012 = tpu.matmul %1010, %1011, %cst_371 {dimension_numbers = #tpu.dot_dimension_numbers<[1], [0], [0], [1], [0, 0, 1, 1], [], []>} : vector<32x128xf32>, vector<128x128xf32>, vector<32x128xf32> -> vector<32x128xf32>
    %c33 = arith.constant 33 : index
    %c0_372 = arith.constant 0 : index
    %1013 = vector.load %arg2[%c33, %c0_372] : memref<40x128xf32, #tpu.memory_space<vmem>>, vector<1x128xf32>
    %1014 = vector.broadcast %1013 : vector<1x128xf32> to vector<32x128xf32>
    %1015 = arith.addf %1012, %1014 : vector<32x128xf32>
    %cst_373 = arith.constant 0.707106769 : f32
    %1016 = vector.broadcast %cst_373 : f32 to vector<32x128xf32>
    %1017 = arith.mulf %1015, %1016 : vector<32x128xf32>
    %1018 = math.absf %1017 : vector<32x128xf32>
    %cst_374 = arith.constant 0.327591091 : f32
    %1019 = vector.broadcast %cst_374 : f32 to vector<32x128xf32>
    %1020 = arith.mulf %1019, %1018 : vector<32x128xf32>
    %cst_375 = arith.constant 1.000000e+00 : f32
    %1021 = vector.broadcast %cst_375 : f32 to vector<32x128xf32>
    %1022 = arith.addf %1021, %1020 : vector<32x128xf32>
    %cst_376 = arith.constant 1.000000e+00 : f32
    %1023 = vector.broadcast %cst_376 : f32 to vector<32x128xf32>
    %1024 = arith.divf %1023, %1022 : vector<32x128xf32>
    %cst_377 = arith.constant 1.06140542 : f32
    %1025 = vector.broadcast %cst_377 : f32 to vector<32x128xf32>
    %1026 = arith.mulf %1024, %1025 : vector<32x128xf32>
    %cst_378 = arith.constant -1.45315206 : f32
    %1027 = vector.broadcast %cst_378 : f32 to vector<32x128xf32>
    %1028 = arith.addf %1027, %1026 : vector<32x128xf32>
    %1029 = arith.mulf %1024, %1028 : vector<32x128xf32>
    %cst_379 = arith.constant 1.42141378 : f32
    %1030 = vector.broadcast %cst_379 : f32 to vector<32x128xf32>
    %1031 = arith.addf %1030, %1029 : vector<32x128xf32>
    %1032 = arith.mulf %1024, %1031 : vector<32x128xf32>
    %cst_380 = arith.constant -0.284496725 : f32
    %1033 = vector.broadcast %cst_380 : f32 to vector<32x128xf32>
    %1034 = arith.addf %1033, %1032 : vector<32x128xf32>
    %1035 = arith.mulf %1024, %1034 : vector<32x128xf32>
    %cst_381 = arith.constant 0.254829586 : f32
    %1036 = vector.broadcast %cst_381 : f32 to vector<32x128xf32>
    %1037 = arith.addf %1036, %1035 : vector<32x128xf32>
    %1038 = arith.mulf %1024, %1037 : vector<32x128xf32>
    %1039 = arith.mulf %1018, %1018 : vector<32x128xf32>
    %cst_382 = arith.constant 0.000000e+00 : f32
    %1040 = vector.broadcast %cst_382 : f32 to vector<32x128xf32>
    %1041 = arith.subf %1040, %1039 : vector<32x128xf32>
    %1042 = math.exp %1041 : vector<32x128xf32>
    %1043 = arith.mulf %1038, %1042 : vector<32x128xf32>
    %cst_383 = arith.constant 1.000000e+00 : f32
    %1044 = vector.broadcast %cst_383 : f32 to vector<32x128xf32>
    %1045 = arith.subf %1044, %1043 : vector<32x128xf32>
    %cst_384 = arith.constant 0.000000e+00 : f32
    %1046 = vector.broadcast %cst_384 : f32 to vector<32x128xf32>
    %1047 = arith.cmpf olt, %1017, %1046 : vector<32x128xf32>
    %cst_385 = arith.constant 0.000000e+00 : f32
    %1048 = vector.broadcast %cst_385 : f32 to vector<32x128xf32>
    %1049 = arith.subf %1048, %1045 : vector<32x128xf32>
    %1050 = arith.select %1047, %1049, %1045 : vector<32x128xi1>, vector<32x128xf32>
    %cst_386 = arith.constant 5.000000e-01 : f32
    %1051 = vector.broadcast %cst_386 : f32 to vector<32x128xf32>
    %1052 = arith.mulf %1051, %1015 : vector<32x128xf32>
    %cst_387 = arith.constant 1.000000e+00 : f32
    %1053 = vector.broadcast %cst_387 : f32 to vector<32x128xf32>
    %1054 = arith.addf %1053, %1050 : vector<32x128xf32>
    %1055 = arith.mulf %1052, %1054 : vector<32x128xf32>
    %c3040 = arith.constant 3040 : index
    %c0_388 = arith.constant 0 : index
    %1056 = vector.load %arg1[%c3040, %c0_388] : memref<5472x128xf32, #tpu.memory_space<vmem>>, vector<128x128xf32>
    %cst_389 = arith.constant dense<0.000000e+00> : vector<32x128xf32>
    %1057 = tpu.matmul %1055, %1056, %cst_389 {dimension_numbers = #tpu.dot_dimension_numbers<[1], [0], [0], [1], [0, 0, 1, 1], [], []>} : vector<32x128xf32>, vector<128x128xf32>, vector<32x128xf32> -> vector<32x128xf32>
    %c34 = arith.constant 34 : index
    %c0_390 = arith.constant 0 : index
    %1058 = vector.load %arg2[%c34, %c0_390] : memref<40x128xf32, #tpu.memory_space<vmem>>, vector<1x128xf32>
    %1059 = vector.broadcast %1058 : vector<1x128xf32> to vector<32x128xf32>
    %1060 = arith.addf %1057, %1059 : vector<32x128xf32>
    %cst_391 = arith.constant 0.707106769 : f32
    %1061 = vector.broadcast %cst_391 : f32 to vector<32x128xf32>
    %1062 = arith.mulf %1060, %1061 : vector<32x128xf32>
    %1063 = math.absf %1062 : vector<32x128xf32>
    %cst_392 = arith.constant 0.327591091 : f32
    %1064 = vector.broadcast %cst_392 : f32 to vector<32x128xf32>
    %1065 = arith.mulf %1064, %1063 : vector<32x128xf32>
    %cst_393 = arith.constant 1.000000e+00 : f32
    %1066 = vector.broadcast %cst_393 : f32 to vector<32x128xf32>
    %1067 = arith.addf %1066, %1065 : vector<32x128xf32>
    %cst_394 = arith.constant 1.000000e+00 : f32
    %1068 = vector.broadcast %cst_394 : f32 to vector<32x128xf32>
    %1069 = arith.divf %1068, %1067 : vector<32x128xf32>
    %cst_395 = arith.constant 1.06140542 : f32
    %1070 = vector.broadcast %cst_395 : f32 to vector<32x128xf32>
    %1071 = arith.mulf %1069, %1070 : vector<32x128xf32>
    %cst_396 = arith.constant -1.45315206 : f32
    %1072 = vector.broadcast %cst_396 : f32 to vector<32x128xf32>
    %1073 = arith.addf %1072, %1071 : vector<32x128xf32>
    %1074 = arith.mulf %1069, %1073 : vector<32x128xf32>
    %cst_397 = arith.constant 1.42141378 : f32
    %1075 = vector.broadcast %cst_397 : f32 to vector<32x128xf32>
    %1076 = arith.addf %1075, %1074 : vector<32x128xf32>
    %1077 = arith.mulf %1069, %1076 : vector<32x128xf32>
    %cst_398 = arith.constant -0.284496725 : f32
    %1078 = vector.broadcast %cst_398 : f32 to vector<32x128xf32>
    %1079 = arith.addf %1078, %1077 : vector<32x128xf32>
    %1080 = arith.mulf %1069, %1079 : vector<32x128xf32>
    %cst_399 = arith.constant 0.254829586 : f32
    %1081 = vector.broadcast %cst_399 : f32 to vector<32x128xf32>
    %1082 = arith.addf %1081, %1080 : vector<32x128xf32>
    %1083 = arith.mulf %1069, %1082 : vector<32x128xf32>
    %1084 = arith.mulf %1063, %1063 : vector<32x128xf32>
    %cst_400 = arith.constant 0.000000e+00 : f32
    %1085 = vector.broadcast %cst_400 : f32 to vector<32x128xf32>
    %1086 = arith.subf %1085, %1084 : vector<32x128xf32>
    %1087 = math.exp %1086 : vector<32x128xf32>
    %1088 = arith.mulf %1083, %1087 : vector<32x128xf32>
    %cst_401 = arith.constant 1.000000e+00 : f32
    %1089 = vector.broadcast %cst_401 : f32 to vector<32x128xf32>
    %1090 = arith.subf %1089, %1088 : vector<32x128xf32>
    %cst_402 = arith.constant 0.000000e+00 : f32
    %1091 = vector.broadcast %cst_402 : f32 to vector<32x128xf32>
    %1092 = arith.cmpf olt, %1062, %1091 : vector<32x128xf32>
    %cst_403 = arith.constant 0.000000e+00 : f32
    %1093 = vector.broadcast %cst_403 : f32 to vector<32x128xf32>
    %1094 = arith.subf %1093, %1090 : vector<32x128xf32>
    %1095 = arith.select %1092, %1094, %1090 : vector<32x128xi1>, vector<32x128xf32>
    %cst_404 = arith.constant 5.000000e-01 : f32
    %1096 = vector.broadcast %cst_404 : f32 to vector<32x128xf32>
    %1097 = arith.mulf %1096, %1060 : vector<32x128xf32>
    %cst_405 = arith.constant 1.000000e+00 : f32
    %1098 = vector.broadcast %cst_405 : f32 to vector<32x128xf32>
    %1099 = arith.addf %1098, %1095 : vector<32x128xf32>
    %1100 = arith.mulf %1097, %1099 : vector<32x128xf32>
    %c3168 = arith.constant 3168 : index
    %c0_406 = arith.constant 0 : index
    %1101 = vector.load %arg1[%c3168, %c0_406] : memref<5472x128xf32, #tpu.memory_space<vmem>>, vector<128x128xf32>
    %cst_407 = arith.constant dense<0.000000e+00> : vector<32x128xf32>
    %1102 = tpu.matmul %1100, %1101, %cst_407 {dimension_numbers = #tpu.dot_dimension_numbers<[1], [0], [0], [1], [0, 0, 1, 1], [], []>} : vector<32x128xf32>, vector<128x128xf32>, vector<32x128xf32> -> vector<32x128xf32>
    %c35 = arith.constant 35 : index
    %c0_408 = arith.constant 0 : index
    %1103 = vector.load %arg2[%c35, %c0_408] : memref<40x128xf32, #tpu.memory_space<vmem>>, vector<1x128xf32>
    %1104 = vector.broadcast %1103 : vector<1x128xf32> to vector<32x128xf32>
    %1105 = arith.addf %1102, %1104 : vector<32x128xf32>
    %1106 = arith.addf %1105, %965 : vector<32x128xf32>
    %1107 = vector.extract_strided_slice %1106 {offsets = [0, 0], sizes = [32, 32], strides = [1, 1]} : vector<32x128xf32> to vector<32x32xf32>
    %c0_409 = arith.constant 0 : index
    %c0_410 = arith.constant 0 : index
    %1108 = vector.load %arg3[%c0_409, %c0_410] : memref<32x32xf32, #tpu.memory_space<vmem>>, vector<32x32xf32>
    tpu.vector_store %arg3[%c0_409, %c0_410], %1107 {strides = array<i32>} : memref<32x32xf32, #tpu.memory_space<vmem>>, vector<32x32xf32>,
    %1109 = vector.extract_strided_slice %1106 {offsets = [0, 0], sizes = [2, 128], strides = [1, 1]} : vector<32x128xf32> to vector<2x128xf32>
    %c3296 = arith.constant 3296 : index
    %c0_411 = arith.constant 0 : index
    %1110 = vector.load %arg1[%c3296, %c0_411] : memref<5472x128xf32, #tpu.memory_space<vmem>>, vector<128x128xf32>
    %cst_412 = arith.constant dense<0.000000e+00> : vector<2x128xf32>
    %1111 = tpu.matmul %1109, %1110, %cst_412 {dimension_numbers = #tpu.dot_dimension_numbers<[1], [0], [0], [1], [0, 0, 1, 1], [], []>} : vector<2x128xf32>, vector<128x128xf32>, vector<2x128xf32> -> vector<2x128xf32>
    %1112 = vector.extract_strided_slice %1106 {offsets = [2, 0], sizes = [2, 128], strides = [1, 1]} : vector<32x128xf32> to vector<2x128xf32>
    %c3424 = arith.constant 3424 : index
    %c0_413 = arith.constant 0 : index
    %1113 = vector.load %arg1[%c3424, %c0_413] : memref<5472x128xf32, #tpu.memory_space<vmem>>, vector<128x128xf32>
    %cst_414 = arith.constant dense<0.000000e+00> : vector<2x128xf32>
    %1114 = tpu.matmul %1112, %1113, %cst_414 {dimension_numbers = #tpu.dot_dimension_numbers<[1], [0], [0], [1], [0, 0, 1, 1], [], []>} : vector<2x128xf32>, vector<128x128xf32>, vector<2x128xf32> -> vector<2x128xf32>
    %1115 = arith.addf %1111, %1114 : vector<2x128xf32>
    %1116 = vector.extract_strided_slice %1106 {offsets = [4, 0], sizes = [2, 128], strides = [1, 1]} : vector<32x128xf32> to vector<2x128xf32>
    %c3552 = arith.constant 3552 : index
    %c0_415 = arith.constant 0 : index
    %1117 = vector.load %arg1[%c3552, %c0_415] : memref<5472x128xf32, #tpu.memory_space<vmem>>, vector<128x128xf32>
    %cst_416 = arith.constant dense<0.000000e+00> : vector<2x128xf32>
    %1118 = tpu.matmul %1116, %1117, %cst_416 {dimension_numbers = #tpu.dot_dimension_numbers<[1], [0], [0], [1], [0, 0, 1, 1], [], []>} : vector<2x128xf32>, vector<128x128xf32>, vector<2x128xf32> -> vector<2x128xf32>
    %1119 = arith.addf %1115, %1118 : vector<2x128xf32>
    %1120 = vector.extract_strided_slice %1106 {offsets = [6, 0], sizes = [2, 128], strides = [1, 1]} : vector<32x128xf32> to vector<2x128xf32>
    %c3680 = arith.constant 3680 : index
    %c0_417 = arith.constant 0 : index
    %1121 = vector.load %arg1[%c3680, %c0_417] : memref<5472x128xf32, #tpu.memory_space<vmem>>, vector<128x128xf32>
    %cst_418 = arith.constant dense<0.000000e+00> : vector<2x128xf32>
    %1122 = tpu.matmul %1120, %1121, %cst_418 {dimension_numbers = #tpu.dot_dimension_numbers<[1], [0], [0], [1], [0, 0, 1, 1], [], []>} : vector<2x128xf32>, vector<128x128xf32>, vector<2x128xf32> -> vector<2x128xf32>
    %1123 = arith.addf %1119, %1122 : vector<2x128xf32>
    %1124 = vector.extract_strided_slice %1106 {offsets = [8, 0], sizes = [2, 128], strides = [1, 1]} : vector<32x128xf32> to vector<2x128xf32>
    %c3808 = arith.constant 3808 : index
    %c0_419 = arith.constant 0 : index
    %1125 = vector.load %arg1[%c3808, %c0_419] : memref<5472x128xf32, #tpu.memory_space<vmem>>, vector<128x128xf32>
    %cst_420 = arith.constant dense<0.000000e+00> : vector<2x128xf32>
    %1126 = tpu.matmul %1124, %1125, %cst_420 {dimension_numbers = #tpu.dot_dimension_numbers<[1], [0], [0], [1], [0, 0, 1, 1], [], []>} : vector<2x128xf32>, vector<128x128xf32>, vector<2x128xf32> -> vector<2x128xf32>
    %1127 = arith.addf %1123, %1126 : vector<2x128xf32>
    %1128 = vector.extract_strided_slice %1106 {offsets = [10, 0], sizes = [2, 128], strides = [1, 1]} : vector<32x128xf32> to vector<2x128xf32>
    %c3936 = arith.constant 3936 : index
    %c0_421 = arith.constant 0 : index
    %1129 = vector.load %arg1[%c3936, %c0_421] : memref<5472x128xf32, #tpu.memory_space<vmem>>, vector<128x128xf32>
    %cst_422 = arith.constant dense<0.000000e+00> : vector<2x128xf32>
    %1130 = tpu.matmul %1128, %1129, %cst_422 {dimension_numbers = #tpu.dot_dimension_numbers<[1], [0], [0], [1], [0, 0, 1, 1], [], []>} : vector<2x128xf32>, vector<128x128xf32>, vector<2x128xf32> -> vector<2x128xf32>
    %1131 = arith.addf %1127, %1130 : vector<2x128xf32>
    %1132 = vector.extract_strided_slice %1106 {offsets = [12, 0], sizes = [2, 128], strides = [1, 1]} : vector<32x128xf32> to vector<2x128xf32>
    %c4064 = arith.constant 4064 : index
    %c0_423 = arith.constant 0 : index
    %1133 = vector.load %arg1[%c4064, %c0_423] : memref<5472x128xf32, #tpu.memory_space<vmem>>, vector<128x128xf32>
    %cst_424 = arith.constant dense<0.000000e+00> : vector<2x128xf32>
    %1134 = tpu.matmul %1132, %1133, %cst_424 {dimension_numbers = #tpu.dot_dimension_numbers<[1], [0], [0], [1], [0, 0, 1, 1], [], []>} : vector<2x128xf32>, vector<128x128xf32>, vector<2x128xf32> -> vector<2x128xf32>
    %1135 = arith.addf %1131, %1134 : vector<2x128xf32>
    %1136 = vector.extract_strided_slice %1106 {offsets = [14, 0], sizes = [2, 128], strides = [1, 1]} : vector<32x128xf32> to vector<2x128xf32>
    %c4192 = arith.constant 4192 : index
    %c0_425 = arith.constant 0 : index
    %1137 = vector.load %arg1[%c4192, %c0_425] : memref<5472x128xf32, #tpu.memory_space<vmem>>, vector<128x128xf32>
    %cst_426 = arith.constant dense<0.000000e+00> : vector<2x128xf32>
    %1138 = tpu.matmul %1136, %1137, %cst_426 {dimension_numbers = #tpu.dot_dimension_numbers<[1], [0], [0], [1], [0, 0, 1, 1], [], []>} : vector<2x128xf32>, vector<128x128xf32>, vector<2x128xf32> -> vector<2x128xf32>
    %1139 = arith.addf %1135, %1138 : vector<2x128xf32>
    %1140 = vector.extract_strided_slice %1106 {offsets = [16, 0], sizes = [2, 128], strides = [1, 1]} : vector<32x128xf32> to vector<2x128xf32>
    %c4320 = arith.constant 4320 : index
    %c0_427 = arith.constant 0 : index
    %1141 = vector.load %arg1[%c4320, %c0_427] : memref<5472x128xf32, #tpu.memory_space<vmem>>, vector<128x128xf32>
    %cst_428 = arith.constant dense<0.000000e+00> : vector<2x128xf32>
    %1142 = tpu.matmul %1140, %1141, %cst_428 {dimension_numbers = #tpu.dot_dimension_numbers<[1], [0], [0], [1], [0, 0, 1, 1], [], []>} : vector<2x128xf32>, vector<128x128xf32>, vector<2x128xf32> -> vector<2x128xf32>
    %1143 = arith.addf %1139, %1142 : vector<2x128xf32>
    %1144 = vector.extract_strided_slice %1106 {offsets = [18, 0], sizes = [2, 128], strides = [1, 1]} : vector<32x128xf32> to vector<2x128xf32>
    %c4448 = arith.constant 4448 : index
    %c0_429 = arith.constant 0 : index
    %1145 = vector.load %arg1[%c4448, %c0_429] : memref<5472x128xf32, #tpu.memory_space<vmem>>, vector<128x128xf32>
    %cst_430 = arith.constant dense<0.000000e+00> : vector<2x128xf32>
    %1146 = tpu.matmul %1144, %1145, %cst_430 {dimension_numbers = #tpu.dot_dimension_numbers<[1], [0], [0], [1], [0, 0, 1, 1], [], []>} : vector<2x128xf32>, vector<128x128xf32>, vector<2x128xf32> -> vector<2x128xf32>
    %1147 = arith.addf %1143, %1146 : vector<2x128xf32>
    %1148 = vector.extract_strided_slice %1106 {offsets = [20, 0], sizes = [2, 128], strides = [1, 1]} : vector<32x128xf32> to vector<2x128xf32>
    %c4576 = arith.constant 4576 : index
    %c0_431 = arith.constant 0 : index
    %1149 = vector.load %arg1[%c4576, %c0_431] : memref<5472x128xf32, #tpu.memory_space<vmem>>, vector<128x128xf32>
    %cst_432 = arith.constant dense<0.000000e+00> : vector<2x128xf32>
    %1150 = tpu.matmul %1148, %1149, %cst_432 {dimension_numbers = #tpu.dot_dimension_numbers<[1], [0], [0], [1], [0, 0, 1, 1], [], []>} : vector<2x128xf32>, vector<128x128xf32>, vector<2x128xf32> -> vector<2x128xf32>
    %1151 = arith.addf %1147, %1150 : vector<2x128xf32>
    %1152 = vector.extract_strided_slice %1106 {offsets = [22, 0], sizes = [2, 128], strides = [1, 1]} : vector<32x128xf32> to vector<2x128xf32>
    %c4704 = arith.constant 4704 : index
    %c0_433 = arith.constant 0 : index
    %1153 = vector.load %arg1[%c4704, %c0_433] : memref<5472x128xf32, #tpu.memory_space<vmem>>, vector<128x128xf32>
    %cst_434 = arith.constant dense<0.000000e+00> : vector<2x128xf32>
    %1154 = tpu.matmul %1152, %1153, %cst_434 {dimension_numbers = #tpu.dot_dimension_numbers<[1], [0], [0], [1], [0, 0, 1, 1], [], []>} : vector<2x128xf32>, vector<128x128xf32>, vector<2x128xf32> -> vector<2x128xf32>
    %1155 = arith.addf %1151, %1154 : vector<2x128xf32>
    %1156 = vector.extract_strided_slice %1106 {offsets = [24, 0], sizes = [2, 128], strides = [1, 1]} : vector<32x128xf32> to vector<2x128xf32>
    %c4832 = arith.constant 4832 : index
    %c0_435 = arith.constant 0 : index
    %1157 = vector.load %arg1[%c4832, %c0_435] : memref<5472x128xf32, #tpu.memory_space<vmem>>, vector<128x128xf32>
    %cst_436 = arith.constant dense<0.000000e+00> : vector<2x128xf32>
    %1158 = tpu.matmul %1156, %1157, %cst_436 {dimension_numbers = #tpu.dot_dimension_numbers<[1], [0], [0], [1], [0, 0, 1, 1], [], []>} : vector<2x128xf32>, vector<128x128xf32>, vector<2x128xf32> -> vector<2x128xf32>
    %1159 = arith.addf %1155, %1158 : vector<2x128xf32>
    %1160 = vector.extract_strided_slice %1106 {offsets = [26, 0], sizes = [2, 128], strides = [1, 1]} : vector<32x128xf32> to vector<2x128xf32>
    %c4960 = arith.constant 4960 : index
    %c0_437 = arith.constant 0 : index
    %1161 = vector.load %arg1[%c4960, %c0_437] : memref<5472x128xf32, #tpu.memory_space<vmem>>, vector<128x128xf32>
    %cst_438 = arith.constant dense<0.000000e+00> : vector<2x128xf32>
    %1162 = tpu.matmul %1160, %1161, %cst_438 {dimension_numbers = #tpu.dot_dimension_numbers<[1], [0], [0], [1], [0, 0, 1, 1], [], []>} : vector<2x128xf32>, vector<128x128xf32>, vector<2x128xf32> -> vector<2x128xf32>
    %1163 = arith.addf %1159, %1162 : vector<2x128xf32>
    %1164 = vector.extract_strided_slice %1106 {offsets = [28, 0], sizes = [2, 128], strides = [1, 1]} : vector<32x128xf32> to vector<2x128xf32>
    %c5088 = arith.constant 5088 : index
    %c0_439 = arith.constant 0 : index
    %1165 = vector.load %arg1[%c5088, %c0_439] : memref<5472x128xf32, #tpu.memory_space<vmem>>, vector<128x128xf32>
    %cst_440 = arith.constant dense<0.000000e+00> : vector<2x128xf32>
    %1166 = tpu.matmul %1164, %1165, %cst_440 {dimension_numbers = #tpu.dot_dimension_numbers<[1], [0], [0], [1], [0, 0, 1, 1], [], []>} : vector<2x128xf32>, vector<128x128xf32>, vector<2x128xf32> -> vector<2x128xf32>
    %1167 = arith.addf %1163, %1166 : vector<2x128xf32>
    %1168 = vector.extract_strided_slice %1106 {offsets = [30, 0], sizes = [2, 128], strides = [1, 1]} : vector<32x128xf32> to vector<2x128xf32>
    %c5216 = arith.constant 5216 : index
    %c0_441 = arith.constant 0 : index
    %1169 = vector.load %arg1[%c5216, %c0_441] : memref<5472x128xf32, #tpu.memory_space<vmem>>, vector<128x128xf32>
    %cst_442 = arith.constant dense<0.000000e+00> : vector<2x128xf32>
    %1170 = tpu.matmul %1168, %1169, %cst_442 {dimension_numbers = #tpu.dot_dimension_numbers<[1], [0], [0], [1], [0, 0, 1, 1], [], []>} : vector<2x128xf32>, vector<128x128xf32>, vector<2x128xf32> -> vector<2x128xf32>
    %1171 = arith.addf %1167, %1170 : vector<2x128xf32>
    %c36 = arith.constant 36 : index
    %c0_443 = arith.constant 0 : index
    %1172 = vector.load %arg2[%c36, %c0_443] : memref<40x128xf32, #tpu.memory_space<vmem>>, vector<1x128xf32>
    %1173 = vector.broadcast %1172 : vector<1x128xf32> to vector<2x128xf32>
    %1174 = arith.addf %1171, %1173 : vector<2x128xf32>
    %c37 = arith.constant 37 : index
    %c0_444 = arith.constant 0 : index
    %1175 = vector.load %arg2[%c37, %c0_444] : memref<40x128xf32, #tpu.memory_space<vmem>>, vector<1x128xf32>
    %c38 = arith.constant 38 : index
    %c0_445 = arith.constant 0 : index
    %1176 = vector.load %arg2[%c38, %c0_445] : memref<40x128xf32, #tpu.memory_space<vmem>>, vector<1x128xf32>
    %cst_446 = arith.constant dense<0.000000e+00> : vector<128xf32>
    %1177 = vector.multi_reduction <add>, %1174, %cst_446 [0] : vector<2x128xf32> to vector<128xf32>
    %1178 = vector.shape_cast %1177 : vector<128xf32> to vector<1x128xf32>
    %cst_447 = arith.constant 2.000000e+00 : f32
    %1179 = vector.broadcast %cst_447 : f32 to vector<1x128xf32>
    %1180 = arith.divf %1178, %1179 : vector<1x128xf32>
    %1181 = vector.broadcast %1180 : vector<1x128xf32> to vector<2x128xf32>
    %1182 = arith.subf %1174, %1181 : vector<2x128xf32>
    %1183 = vector.broadcast %1180 : vector<1x128xf32> to vector<2x128xf32>
    %1184 = arith.subf %1174, %1183 : vector<2x128xf32>
    %1185 = arith.mulf %1182, %1184 : vector<2x128xf32>
    %cst_448 = arith.constant dense<0.000000e+00> : vector<128xf32>
    %1186 = vector.multi_reduction <add>, %1185, %cst_448 [0] : vector<2x128xf32> to vector<128xf32>
    %1187 = vector.shape_cast %1186 : vector<128xf32> to vector<1x128xf32>
    %cst_449 = arith.constant 2.000000e+00 : f32
    %1188 = vector.broadcast %cst_449 : f32 to vector<1x128xf32>
    %1189 = arith.divf %1187, %1188 : vector<1x128xf32>
    %1190 = vector.broadcast %1180 : vector<1x128xf32> to vector<2x128xf32>
    %1191 = arith.subf %1174, %1190 : vector<2x128xf32>
    %cst_450 = arith.constant 9.99999974E-6 : f32
    %1192 = vector.broadcast %cst_450 : f32 to vector<1x128xf32>
    %1193 = arith.addf %1189, %1192 : vector<1x128xf32>
    %1194 = math.rsqrt %1193 : vector<1x128xf32>
    %1195 = vector.broadcast %1194 : vector<1x128xf32> to vector<2x128xf32>
    %1196 = arith.mulf %1191, %1195 : vector<2x128xf32>
    %1197 = vector.broadcast %1175 : vector<1x128xf32> to vector<2x128xf32>
    %1198 = arith.mulf %1196, %1197 : vector<2x128xf32>
    %1199 = vector.broadcast %1176 : vector<1x128xf32> to vector<2x128xf32>
    %1200 = arith.addf %1198, %1199 : vector<2x128xf32>
    %cst_451 = arith.constant 0.707106769 : f32
    %1201 = vector.broadcast %cst_451 : f32 to vector<2x128xf32>
    %1202 = arith.mulf %1200, %1201 : vector<2x128xf32>
    %1203 = math.absf %1202 : vector<2x128xf32>
    %cst_452 = arith.constant 0.327591091 : f32
    %1204 = vector.broadcast %cst_452 : f32 to vector<2x128xf32>
    %1205 = arith.mulf %1204, %1203 : vector<2x128xf32>
    %cst_453 = arith.constant 1.000000e+00 : f32
    %1206 = vector.broadcast %cst_453 : f32 to vector<2x128xf32>
    %1207 = arith.addf %1206, %1205 : vector<2x128xf32>
    %cst_454 = arith.constant 1.000000e+00 : f32
    %1208 = vector.broadcast %cst_454 : f32 to vector<2x128xf32>
    %1209 = arith.divf %1208, %1207 : vector<2x128xf32>
    %cst_455 = arith.constant 1.06140542 : f32
    %1210 = vector.broadcast %cst_455 : f32 to vector<2x128xf32>
    %1211 = arith.mulf %1209, %1210 : vector<2x128xf32>
    %cst_456 = arith.constant -1.45315206 : f32
    %1212 = vector.broadcast %cst_456 : f32 to vector<2x128xf32>
    %1213 = arith.addf %1212, %1211 : vector<2x128xf32>
    %1214 = arith.mulf %1209, %1213 : vector<2x128xf32>
    %cst_457 = arith.constant 1.42141378 : f32
    %1215 = vector.broadcast %cst_457 : f32 to vector<2x128xf32>
    %1216 = arith.addf %1215, %1214 : vector<2x128xf32>
    %1217 = arith.mulf %1209, %1216 : vector<2x128xf32>
    %cst_458 = arith.constant -0.284496725 : f32
    %1218 = vector.broadcast %cst_458 : f32 to vector<2x128xf32>
    %1219 = arith.addf %1218, %1217 : vector<2x128xf32>
    %1220 = arith.mulf %1209, %1219 : vector<2x128xf32>
    %cst_459 = arith.constant 0.254829586 : f32
    %1221 = vector.broadcast %cst_459 : f32 to vector<2x128xf32>
    %1222 = arith.addf %1221, %1220 : vector<2x128xf32>
    %1223 = arith.mulf %1209, %1222 : vector<2x128xf32>
    %1224 = arith.mulf %1203, %1203 : vector<2x128xf32>
    %cst_460 = arith.constant 0.000000e+00 : f32
    %1225 = vector.broadcast %cst_460 : f32 to vector<2x128xf32>
    %1226 = arith.subf %1225, %1224 : vector<2x128xf32>
    %1227 = math.exp %1226 : vector<2x128xf32>
    %1228 = arith.mulf %1223, %1227 : vector<2x128xf32>
    %cst_461 = arith.constant 1.000000e+00 : f32
    %1229 = vector.broadcast %cst_461 : f32 to vector<2x128xf32>
    %1230 = arith.subf %1229, %1228 : vector<2x128xf32>
    %cst_462 = arith.constant 0.000000e+00 : f32
    %1231 = vector.broadcast %cst_462 : f32 to vector<2x128xf32>
    %1232 = arith.cmpf olt, %1202, %1231 : vector<2x128xf32>
    %cst_463 = arith.constant 0.000000e+00 : f32
    %1233 = vector.broadcast %cst_463 : f32 to vector<2x128xf32>
    %1234 = arith.subf %1233, %1230 : vector<2x128xf32>
    %1235 = arith.select %1232, %1234, %1230 : vector<2x128xi1>, vector<2x128xf32>
    %cst_464 = arith.constant 5.000000e-01 : f32
    %1236 = vector.broadcast %cst_464 : f32 to vector<2x128xf32>
    %1237 = arith.mulf %1236, %1200 : vector<2x128xf32>
    %cst_465 = arith.constant 1.000000e+00 : f32
    %1238 = vector.broadcast %cst_465 : f32 to vector<2x128xf32>
    %1239 = arith.addf %1238, %1235 : vector<2x128xf32>
    %1240 = arith.mulf %1237, %1239 : vector<2x128xf32>
    %c5344 = arith.constant 5344 : index
    %c0_466 = arith.constant 0 : index
    %1241 = vector.load %arg1[%c5344, %c0_466] : memref<5472x128xf32, #tpu.memory_space<vmem>>, vector<128x128xf32>
    %cst_467 = arith.constant dense<0.000000e+00> : vector<2x128xf32>
    %1242 = tpu.matmul %1240, %1241, %cst_467 {dimension_numbers = #tpu.dot_dimension_numbers<[1], [0], [0], [1], [0, 0, 1, 1], [], []>} : vector<2x128xf32>, vector<128x128xf32>, vector<2x128xf32> -> vector<2x128xf32>
    %c39 = arith.constant 39 : index
    %c0_468 = arith.constant 0 : index
    %1243 = vector.load %arg2[%c39, %c0_468] : memref<40x128xf32, #tpu.memory_space<vmem>>, vector<1x128xf32>
    %1244 = vector.broadcast %1243 : vector<1x128xf32> to vector<2x128xf32>
    %1245 = arith.addf %1242, %1244 : vector<2x128xf32>
    %1246 = vector.extract_strided_slice %1245 {offsets = [0, 0], sizes = [2, 10], strides = [1, 1]} : vector<2x128xf32> to vector<2x10xf32>
    %c0_469 = arith.constant 0 : index
    %c0_470 = arith.constant 0 : index
    %1247 = vector.load %arg4[%c0_469, %c0_470] : memref<2x10xf32, #tpu.memory_space<vmem>>, vector<2x10xf32>
    tpu.vector_store %arg4[%c0_469, %c0_470], %1246 {strides = array<i32>} : memref<2x10xf32, #tpu.memory_space<vmem>>, vector<2x10xf32>,
    return
  }
}

</mosaic_0001>

<bundles_post_ra>
// kernel: classifier_forward.1
= control target key start
LH: loop header
LB: loop body
LE: loop exit
PB: predicated region body
PF: predicated region fallthrough
CT: control target
= control target key end

     0   :  { %10 = vsyncpa [#allocation3], 0  ;;  %s8007_s0 = inlined_call_operand.vmem [shape: f32[32,64], index: 0, kind: input, shape index: {}]   ;;  %s8008_s1 = inlined_call_operand.hbm [shape: f32[5472,128], index: 1, kind: input, shape index: {}]   ;;  %s8009_s2 = inlined_call_operand.hbm [shape: f32[40,128], index: 2, kind: input, shape index: {}]   ;;  %s8010_s3 = inlined_call_operand.vmem [shape: f32[32,32], index: 3, kind: output, shape index: {0}]   ;;  %s8011_s4 = inlined_call_operand.hbm [shape: f32[2,10], index: 4, kind: output, shape index: {1}]  }
   0x1   :  { %11 = vsyncpa [#allocation6], 0 }
   0x2   :  { %12 = vsyncpa [#allocation4], 0  ;;  %s19_s17 = sshll.u32 %s8008_s1, 4  ;;  %s6334_s18 = smov [#allocation2]   ;;  %s20_s17 = int_to_ptr.hbm [resolvable:$true] %s19_s17 }
   0x3   :  { %s21_s19 = sshll.u32 %s6334_s18, 4  ;;  %s32_s22 = sshll.u32 %s8009_s2, 4  ;;  %s22_s19 = int_to_ptr.vmem [resolvable:$true] %s21_s19  ;;  %s33_s22 = int_to_ptr.hbm [resolvable:$true] %s32_s22 }
   0x4   :  { %s6335_s23 = smov 128   ;;  %s6336_s24 = smov 8  }
   0x5   :  { %27 = dma.hbm_to_vmem [thread:$0]  %s20_s17, 87552, %s22_s19, [#allocation3], %s6335_s23, %s6335_s23, %s6336_s24  }
   0x6   :  { %s6337_s25 = smov [#allocation5]  }
   0x7   :  { %s34_s26 = sshll.u32 %s6337_s25, 4  ;;  %s35_s26 = int_to_ptr.vmem [resolvable:$true] %s34_s26 }
   0x8   :  { %40 = dma.hbm_to_vmem [thread:$0]  %s33_s22, 640, %s35_s26, [#allocation6], %s6335_s23, %s6335_s23, %s6336_s24  }
   0x9   :  { %6328 = dma.done.wait [#allocation3], 87552  }
   0xa   :  { %6329 = vsyncadd [#allocation3], 4294879744 }
   0xb   :  { %6330 = dma.done.wait [#allocation6], 640  }
   0xc   :  { %6331 = vsyncadd [#allocation6], 4294966656  ;;  %v60_v0 = vld [vmem:[#allocation2 + $0x38] sm:$0xff]  ;;  %v59_v1 = vld [vmem:[#allocation2 + $0x30] sm:$0xff]  ;;  %vm63_vm0 = vcmask 523264   ;;  %v6338_v14 = vmov 32.0  }
   0xd   :  { %84 = vmatpush.msra.mxu0 %v60_v0  ;;  %v58_v2 = vld [vmem:[#allocation2 + $0x28] sm:$0xff]  ;;  %v57_v3 = vld [vmem:[#allocation2 + $0x20] sm:$0xff]  ;;  %v56_v4 = vld [vmem:[#allocation2 + $0x18] sm:$0xff]  ;;  %5962 = vrcp.f32 %v6338_v14  ;;  %s5833_s17 = sshll.u32 %s8011_s4, 4  ;;  %s5834_s17 = int_to_ptr.hbm [resolvable:$true] %s5833_s17 }
   0xe   :  { %v55_v5 = vld [vmem:[#allocation2 + $0x10] sm:$0xff]  ;;  %v54_v6 = vld [vmem:[#allocation2 + $0x8] sm:$0xff]  ;;  %v53_v7 = vld [vmem:[#allocation2] sm:$0xff] }
   0xf   :  { %85 = vmatpush.msra.mxu0 %v59_v1  ;;  %v49_v8 = vld [vmem:[%s8007_s0] sm:$0xff]  ;;  %v50_v9 = vld [vmem:[%s8007_s0 + $0x8] sm:$0xff]  ;;  %v51_v10 = vld [vmem:[%s8007_s0 + $0x10] sm:$0xff] }
  0x10   :  { %v52_v11 = vld [vmem:[%s8007_s0 + $0x18] sm:$0xff]  ;;  %v5922_v16 = vld [vmem:[#allocation5] ss:$0 sm:$0xff]  ;;  %v341_v52 = vld [vmem:[#allocation2 + $0xb0] sm:$0xff] }
  0x11   :  { %86 = vmatpush.msra.mxu0 %v58_v2  ;;  %v342_v51 = vld [vmem:[#allocation2 + $0xb8] sm:$0xff]  ;;  %v340_v54 = vld [vmem:[#allocation2 + $0xa8] sm:$0xff]  ;;  %v339_v56 = vld [vmem:[#allocation2 + $0xa0] sm:$0xff] }
  0x12   :  { %345 = vmatpush.msra.mxu1 %v342_v51  ;;  %v338_v58 = vld [vmem:[#allocation2 + $0x98] sm:$0xff]  ;;  %v337_v60 = vld [vmem:[#allocation2 + $0x90] sm:$0xff]  ;;  %v336_v62 = vld [vmem:[#allocation2 + $0x88] sm:$0xff] }
  0x13   :  { %87 = vmatpush.msra.mxu0 %v57_v3  ;;  %v5963_v17 = vpop.eup %5962  ;;  %v335_v0 = vld [vmem:[#allocation2 + $0x80] sm:$0xff]  ;;  %v334_v1 = vld [vmem:[#allocation2 + $0x78] sm:$0xff]  ;;  %v333_v2 = vld [vmem:[#allocation2 + $0x70] sm:$0xff] }
  0x14   :  { %v117_v21 = vmul.f32 32.0, %v5963_v17  ;;  %vm121_vm1 = vweird.f32 %v5963_v17  ;;  %346 = vmatpush.msra.mxu1 %v341_v52  ;;  %v332_v3 = vld [vmem:[#allocation2 + $0x68] sm:$0xff] }
  0x15   :  { %88 = vmatpush.msra.mxu0 %v56_v4 }
  0x16   :  { %v118_v26 = vsub.f32 1.0, %v117_v21  ;;  %347 = vmatpush.msra.mxu1 %v340_v54 }
  0x17   :  { %89 = vmatpush.msra.mxu0 %v55_v5  ;;  %v331_v5 = vld [vmem:[#allocation2 + $0x60] sm:$0xff] }
  0x18   :  { %v119_v29 = vmul.f32 %v5963_v17, %v118_v26  ;;  %348 = vmatpush.msra.mxu1 %v339_v56 }
  0x19   :  { %90 = vmatpush.msra.mxu0 %v54_v6 }
  0x1a   :  { %v120_v32 = vadd.f32 %v5963_v17, %v119_v29  ;;  %349 = vmatpush.msra.mxu1 %v338_v58 }
  0x1b   :  { %91 = vmatpush.msra.mxu0 %v53_v7  ;;  %v330_v7 = vld [vmem:[#allocation2 + $0x58] sm:$0xff] }
  0x1c   :  { %5846 = vmatmul.msk.f32.vlgmr.msra.gmra.mxu0 %vm63_vm0, %v49_v8  ;;  %v6385_v35 = vsel %vm121_vm1, %v5963_v17, %v120_v32  ;;  %350 = vmatpush.msra.mxu1 %v337_v60 }
  0x1e   :  { %351 = vmatpush.msra.mxu1 %v336_v62 }
  0x20   :  { %352 = vmatpush.msra.mxu1 %v335_v0 }
  0x22   :  { %353 = vmatpush.msra.mxu1 %v334_v1 }
  0x24   :  { %5847 = vmatmul.msk.f32.gmra.mxu0 %vm63_vm0, %v50_v9  ;;  %354 = vmatpush.msra.mxu1 %v333_v2  ;;  %v329_v9 = vld [vmem:[#allocation2 + $0x50] sm:$0xff] }
  0x26   :  { %355 = vmatpush.msra.mxu1 %v332_v3 }
  0x28   :  { %356 = vmatpush.msra.mxu1 %v331_v5 }
  0x2a   :  { %357 = vmatpush.msra.mxu1 %v330_v7 }
  0x2c   :  { %5848 = vmatmul.msk.f32.gmra.mxu0 %vm63_vm0, %v51_v10  ;;  %358 = vmatpush.msra.mxu1 %v329_v9 }
  0x34   :  { %5849 = vmatmul.msk.f32.gmra.mxu0 %vm63_vm0, %v52_v11  ;;  %v328_v11 = vld [vmem:[#allocation2 + $0x48] sm:$0xff] }
  0x35   :  { %359 = vmatpush.msra.mxu1 %v328_v11 }
  0x99   :  { %v93_v12 = vpop.f32.mrf.mxu0 }
  0x9a   :  { %v94_v19 = vadd.f32 %v5922_v16, %v93_v12 }
  0xa1   :  { %v96_v13 = vpop.f32.mrf.mxu0 }
  0xa2   :  { %v97_v18 = vadd.f32 %v5922_v16, %v96_v13  ;;  %v327_v13 = vld [vmem:[#allocation2 + $0x40] sm:$0xff] }
  0xa3   :  { %360 = vmatpush.msra.mxu1 %v327_v13 }
  0xa4   :  { %v107_v22 = vadd.f32 %v97_v18, %v94_v19 }
  0xa9   :  { %v99_v15 = vpop.f32.mrf.mxu0 }
  0xaa   :  { %v100_v20 = vadd.f32 %v5922_v16, %v99_v15  ;;  %v5923_v15 = vld [vmem:[#allocation5 + $0x1] ss:$0 sm:$0xff] }
  0xac   :  { %v108_v24 = vadd.f32 %v107_v22, %v100_v20 }
  0xb1   :  { %v102_v23 = vpop.f32.mrf.mxu0 }
  0xb2   :  { %v103_v25 = vadd.f32 %v5922_v16, %v102_v23 }
  0xb4   :  { %v109_v27 = vadd.f32 %v108_v24, %v103_v25 }
  0xb6   :  { %v110_v28 = vrot.slane %v109_v27, 4 }
  0xb8   :  { %v111_v30 = vadd.f32 %v110_v28, %v109_v27 }
  0xba   :  { %v112_v31 = vrot.slane %v111_v30, 2 }
  0xbc   :  { %v113_v33 = vadd.f32 %v112_v31, %v111_v30 }
  0xbe   :  { %v114_v34 = vrot.slane %v113_v33, 1 }
  0xc0   :  { %v115_v36 = vadd.f32 %v114_v34, %v113_v33 }
  0xc2   :  { %v123_v37 = vmul.f32 %v6385_v35, %v115_v36 }
  0xc4   :  { %v6388_v38 = vsub.f32 %v94_v19, %v123_v37  ;;  %v6390_v39 = vsub.f32 %v97_v18, %v123_v37  ;;  %v6392_v40 = vsub.f32 %v100_v20, %v123_v37  ;;  %v127_v41 = vsub.f32 %v103_v25, %v123_v37  ;;  %v5924_v19 = vld [vmem:[#allocation5 + $0x2] ss:$0 sm:$0xff] }
  0xc6   :  { %v128_v42 = vmul.f32 %v6388_v38, %v6388_v38  ;;  %v129_v43 = vmul.f32 %v6390_v39, %v6390_v39  ;;  %v130_v44 = vmul.f32 %v6392_v40, %v6392_v40  ;;  %v131_v46 = vmul.f32 %v127_v41, %v127_v41 }
  0xc8   :  { %v132_v45 = vadd.f32 %v129_v43, %v128_v42 }
  0xca   :  { %v133_v47 = vadd.f32 %v132_v45, %v130_v44 }
  0xcc   :  { %v134_v48 = vadd.f32 %v133_v47, %v131_v46 }
  0xce   :  { %v135_v49 = vrot.slane %v134_v48, 4 }
  0xd0   :  { %v136_v50 = vadd.f32 %v135_v49, %v134_v48 }
  0xd2   :  { %v137_v53 = vrot.slane %v136_v50, 2 }
  0xd4   :  { %v138_v55 = vadd.f32 %v137_v53, %v136_v50 }
  0xd6   :  { %v139_v57 = vrot.slane %v138_v55, 1 }
  0xd8   :  { %v140_v59 = vadd.f32 %v139_v57, %v138_v55 }
  0xda   :  { %v141_v61 = vmul.f32 %v140_v59, %v6385_v35 }
  0xdc   :  { %v142_v63 = vadd.f32 1e-05, %v141_v61 }
  0xde   :  { %5964 = vrsqrt.f32 %v142_v63  ;;  %vm149_vm3 = vweird.f32 %v142_v63 }
  0xe4   :  { %v5965_v4 = vpop.eup %5964 }
  0xe5   :  { %v144_v6 = vmul.f32 %v5965_v4, %v142_v63  ;;  %vm150_vm2 = vweird.f32 %v5965_v4 }
  0xe6   :  { %vm151_vm4 = vmor %vm149_vm3, %vm150_vm2 }
  0xe7   :  { %v145_v8 = vmul.f32 %v5965_v4, %v144_v6 }
  0xe9   :  { %v146_v10 = vmul.f32 0.5, %v145_v8 }
  0xeb   :  { %v147_v12 = vsub.f32 1.5, %v146_v10 }
  0xed   :  { %v148_v14 = vmul.f32 %v5965_v4, %v147_v12 }
  0xef   :  { %v152_v16 = vsel %vm151_vm4, %v5965_v4, %v148_v14 }
  0xf0   :  { %v156_v17 = vmul.f32 %v152_v16, %v127_v41  ;;  %v153_v18 = vmul.f32 %v152_v16, %v6388_v38  ;;  %v154_v20 = vmul.f32 %v152_v16, %v6390_v39  ;;  %v155_v21 = vmul.f32 %v152_v16, %v6392_v40 }
  0xf2   :  { %v158_v22 = vmul.f32 %v5923_v15, %v153_v18  ;;  %v159_v23 = vmul.f32 %v5923_v15, %v154_v20  ;;  %v160_v24 = vmul.f32 %v5923_v15, %v155_v21  ;;  %v161_v25 = vmul.f32 %v5923_v15, %v156_v17 }
  0xf4   :  { %v6404_v26 = vadd.f32 %v5924_v19, %v158_v22  ;;  %v6406_v27 = vadd.f32 %v5924_v19, %v159_v23  ;;  %v6408_v28 = vadd.f32 %v5924_v19, %v160_v24  ;;  %v6410_v29 = vadd.f32 %v5924_v19, %v161_v25 }
  0xf6   :  { %v6413_v30 = vmul.f32 0.70710677, %v6404_v26  ;;  %v6416_v31 = vmul.f32 0.70710677, %v6406_v27  ;;  %v6419_v32 = vmul.f32 0.70710677, %v6408_v28 }
  0xf7   :  { %v6422_v33 = vmul.f32 0.70710677, %v6410_v29 }
  0xf8   :  { %v171_v34 = vand.u32 2147483647, %v6413_v30  ;;  %v172_v36 = vand.u32 2147483647, %v6416_v31  ;;  %v173_v37 = vand.u32 2147483647, %v6419_v32 }
  0xf9   :  { %v6428_v38 = vand.u32 2147483647, %v6422_v33 }
  0xfa   :  { %v175_v39 = vmul.f32 0.3275911, %v171_v34  ;;  %v176_v40 = vmul.f32 0.3275911, %v172_v36  ;;  %v177_v41 = vmul.f32 0.3275911, %v173_v37  ;;  %v279_v54 = vmul.f32 %v171_v34, %v171_v34 }
  0xfb   :  { %v178_v44 = vmul.f32 0.3275911, %v6428_v38  ;;  %v6434_v57 = vmul.f32 %v172_v36, %v172_v36  ;;  %v6436_v58 = vmul.f32 %v173_v37, %v173_v37 }
  0xfc   :  { %v179_v42 = vadd.f32 1.0, %v175_v39  ;;  %v180_v43 = vadd.f32 1.0, %v176_v40  ;;  %v181_v45 = vadd.f32 1.0, %v177_v41  ;;  %v283_v24 = vsub.f32 0.0, %v279_v54 }
  0xfd   :  { %v6431_v46 = vadd.f32 1.0, %v178_v44  ;;  %v284_v40 = vsub.f32 0.0, %v6434_v57 }
  0xfe   :  { %5966 = vrcp.f32 %v179_v42  ;;  %v192_v50 = vand.u32 2147483647, %v179_v42  ;;  %v194_v53 = vand.u32 2147483648, %v179_v42  ;;  %v207_v55 = vand.u32 2147483647, %v180_v43 }
  0xff   :  { %5968 = vrcp.f32 %v180_v43  ;;  %vm188_vm5 = vweird.f32 %v179_v42  ;;  %vm203_vm7 = vweird.f32 %v180_v43  ;;  %v209_v61 = vand.u32 2147483648, %v180_v43 }
 0x100   :  { %5970 = vrcp.f32 %v181_v45  ;;  %vm6438_vm8 = vcmp.eq.f32.partialorder %v192_v50, 8.507059e+37  ;;  %v195_v3 = vor.u32 1.1754944e-38, %v194_v53  ;;  %vm6442_vm10 = vcmp.eq.f32.partialorder %v207_v55, 8.507059e+37 }
 0x101   :  { %5972 = vrcp.f32 %v6431_v46  ;;  %vm218_vm11 = vweird.f32 %v181_v45  ;;  %v222_v7 = vand.u32 2147483647, %v181_v45  ;;  %v210_v10 = vor.u32 1.1754944e-38, %v209_v61 }
 0x102   :  { %v224_v11 = vand.u32 2147483648, %v181_v45  ;;  %v237_v18 = vand.u32 2147483647, %v6431_v46  ;;  %v239_v19 = vand.u32 2147483648, %v6431_v46  ;;  %vm233_vm2 = vweird.f32 %v6431_v46 }
 0x103   :  { %vm223_vm1 = vcmp.eq.f32.partialorder %v222_v7, 8.507059e+37  ;;  %v289_v54 = vmul.f32 1.442695, %v284_v40 }
 0x104   :  { %v5967_v47 = vpop.eup %5966  ;;  %v225_v25 = vor.u32 1.1754944e-38, %v224_v11  ;;  %vm238_vm4 = vcmp.eq.f32.partialorder %v237_v18, 8.507059e+37 }
 0x105   :  { %v5969_v48 = vpop.eup %5968  ;;  %v184_v49 = vmul.f32 %v5967_v47, %v179_v42  ;;  %vm189_vm6 = vweird.f32 %v5967_v47  ;;  %v240_v42 = vor.u32 1.1754944e-38, %v239_v19 }
 0x106   :  { %v199_v51 = vmul.f32 %v5969_v48, %v180_v43  ;;  %v5971_v59 = vpop.eup %5970  ;;  %vm204_vm9 = vweird.f32 %v5969_v48  ;;  %vm190_vm12 = vmor %vm188_vm5, %vm189_vm6  ;;  %vm303_vm5 = vcmp.lt.f32.partialorder %v6413_v30, 0.0  ;;  %vm304_vm6 = vcmp.lt.f32.partialorder %v6416_v31, 0.0 }
 0x107   :  { %v185_v52 = vsub.f32 1.0, %v184_v49  ;;  %v214_v0 = vmul.f32 %v5971_v59, %v181_v45  ;;  %v5973_v1 = vpop.eup %5972  ;;  %vm205_vm13 = vmor %vm203_vm7, %vm204_vm9  ;;  %vm219_vm14 = vweird.f32 %v5971_v59  ;;  %v287_v45 = vmul.f32 1.442695, %v283_v24 }
 0x108   :  { %v200_v56 = vsub.f32 1.0, %v199_v51  ;;  %v229_v8 = vmul.f32 %v5973_v1, %v6431_v46  ;;  %vm234_vm15 = vweird.f32 %v5973_v1  ;;  %vm220_vm0 = vmor %vm218_vm11, %vm219_vm14  ;;  %v316_v30 = vmul.f32 0.5, %v6406_v27 }
 0x109   :  { %v186_v60 = vmul.f32 %v5967_v47, %v185_v52  ;;  %v215_v6 = vsub.f32 1.0, %v214_v0  ;;  %vm235_vm3 = vmor %vm233_vm2, %vm234_vm15  ;;  %5974 = vpow2.f32 %v287_v45  ;;  %v282_v0 = vmul.f32 %v6428_v38, %v6428_v38 }
 0x10a   :  { %v201_v63 = vmul.f32 %v5969_v48, %v200_v56  ;;  %v230_v15 = vsub.f32 1.0, %v229_v8  ;;  %v285_v56 = vsub.f32 0.0, %v6436_v58  ;;  %5976 = vpow2.f32 %v289_v54 }
 0x10b   :  { %v187_v2 = vadd.f32 %v5967_v47, %v186_v60  ;;  %v216_v14 = vmul.f32 %v5971_v59, %v215_v6  ;;  %vm305_vm7 = vcmp.lt.f32.partialorder %v6419_v32, 0.0  ;;  %v317_v31 = vmul.f32 0.5, %v6408_v28 }
 0x10c   :  { %v202_v5 = vadd.f32 %v5969_v48, %v201_v63  ;;  %v231_v22 = vmul.f32 %v5973_v1, %v230_v15 }
 0x10d   :  { %v191_v9 = vsel %vm190_vm12, %v5967_v47, %v187_v2  ;;  %v217_v21 = vadd.f32 %v5971_v59, %v216_v14 }
 0x10e   :  { %v196_v12 = vsel %vm6438_vm8, %v195_v3, %v191_v9  ;;  %v206_v13 = vsel %vm205_vm13, %v5969_v48, %v202_v5  ;;  %v232_v37 = vadd.f32 %v5973_v1, %v231_v22  ;;  %v291_v3 = vmul.f32 1.442695, %v285_v56 }
 0x10f   :  { %v243_v16 = vmul.f32 1.0614054, %v196_v12  ;;  %v211_v17 = vsel %vm6442_vm10, %v210_v10, %v206_v13  ;;  %v221_v36 = vsel %vm220_vm0, %v5971_v59, %v217_v21  ;;  %v286_v9 = vsub.f32 0.0, %v282_v0  ;;  %v5975_v10 = vpop.eup %5974 }
 0x110   :  { %v244_v20 = vmul.f32 1.0614054, %v211_v17  ;;  %v226_v41 = vsel %vm223_vm1, %v225_v25, %v221_v36  ;;  %v236_v47 = vsel %vm235_vm3, %v5973_v1, %v232_v37  ;;  %5978 = vpow2.f32 %v291_v3  ;;  %v5977_v15 = vpop.eup %5976 }
 0x111   :  { %v247_v23 = vadd.f32 -1.4531521, %v243_v16  ;;  %v245_v44 = vmul.f32 1.0614054, %v226_v41  ;;  %v241_v49 = vsel %vm238_vm4, %v240_v42, %v236_v47  ;;  %v315_v37 = vmul.f32 0.5, %v6404_v26 }
 0x112   :  { %v248_v34 = vadd.f32 -1.4531521, %v244_v20  ;;  %v246_v52 = vmul.f32 1.0614054, %v241_v49  ;;  %vm306_vm8 = vcmp.lt.f32.partialorder %v6422_v33, 0.0 }
 0x113   :  { %v251_v39 = vmul.f32 %v247_v23, %v196_v12  ;;  %v249_v51 = vadd.f32 -1.4531521, %v245_v44  ;;  %v293_v23 = vmul.f32 1.442695, %v286_v9 }
 0x114   :  { %v252_v43 = vmul.f32 %v248_v34, %v211_v17  ;;  %v250_v57 = vadd.f32 -1.4531521, %v246_v52 }
 0x115   :  { %v255_v48 = vadd.f32 1.4214138, %v251_v39  ;;  %v253_v46 = vmul.f32 %v249_v51, %v226_v41  ;;  %5980 = vpow2.f32 %v293_v23 }
 0x116   :  { %v256_v50 = vadd.f32 1.4214138, %v252_v43  ;;  %v254_v62 = vmul.f32 %v250_v57, %v241_v49  ;;  %v5979_v25 = vpop.eup %5978 }
 0x117   :  { %v259_v53 = vmul.f32 %v255_v48, %v196_v12  ;;  %v257_v61 = vadd.f32 1.4214138, %v253_v46  ;;  %v318_v46 = vmul.f32 0.5, %v6410_v29 }
 0x118   :  { %v260_v55 = vmul.f32 %v256_v50, %v211_v17  ;;  %v258_v4 = vadd.f32 1.4214138, %v254_v62 }
 0x119   :  { %v263_v59 = vadd.f32 -0.28449672, %v259_v53  ;;  %v261_v2 = vmul.f32 %v257_v61, %v226_v41 }
 0x11a   :  { %v264_v60 = vadd.f32 -0.28449672, %v260_v55  ;;  %v262_v8 = vmul.f32 %v258_v4, %v241_v49 }
 0x11b   :  { %v267_v63 = vmul.f32 %v263_v59, %v196_v12  ;;  %v265_v7 = vadd.f32 -0.28449672, %v261_v2  ;;  %v5925_v59 = vld [vmem:[#allocation5 + $0x3] ss:$0 sm:$0xff] }
 0x11c   :  { %v268_v1 = vmul.f32 %v264_v60, %v211_v17  ;;  %v266_v14 = vadd.f32 -0.28449672, %v262_v8 }
 0x11d   :  { %v271_v5 = vadd.f32 0.2548296, %v267_v63  ;;  %v269_v13 = vmul.f32 %v265_v7, %v226_v41 }
 0x11e   :  { %v272_v6 = vadd.f32 0.2548296, %v268_v1  ;;  %v270_v20 = vmul.f32 %v266_v14, %v241_v49 }
 0x11f   :  { %v275_v58 = vmul.f32 %v271_v5, %v196_v12  ;;  %v273_v19 = vadd.f32 0.2548296, %v269_v13 }
 0x120   :  { %v276_v11 = vmul.f32 %v272_v6, %v211_v17  ;;  %v274_v17 = vadd.f32 0.2548296, %v270_v20 }
 0x121   :  { %v295_v16 = vmul.f32 %v5975_v10, %v275_v58  ;;  %v277_v22 = vmul.f32 %v273_v19, %v226_v41  ;;  %v5981_v41 = vpop.eup %5980 }
 0x122   :  { %v296_v18 = vmul.f32 %v5977_v15, %v276_v11  ;;  %v278_v44 = vmul.f32 %v274_v17, %v241_v49 }
 0x123   :  { %v299_v38 = vsub.f32 1.0, %v295_v16  ;;  %v297_v36 = vmul.f32 %v5979_v25, %v277_v22  ;;  %v603_v22 = vld [vmem:[#allocation2 + $0x130] sm:$0xff] }
 0x124   :  { %v300_v21 = vsub.f32 1.0, %v296_v18  ;;  %v298_v45 = vmul.f32 %v5981_v41, %v278_v44  ;;  %v596_v44 = vld [vmem:[#allocation2 + $0xf8] sm:$0xff]  ;;  %v595_v41 = vld [vmem:[#allocation2 + $0xf0] sm:$0xff] }
 0x125   :  { %v307_v24 = vsub.f32 0.0, %v299_v38  ;;  %v301_v43 = vsub.f32 1.0, %v297_v36  ;;  %v600_v36 = vld [vmem:[#allocation2 + $0x118] sm:$0xff] }
 0x126   :  { %v308_v34 = vsub.f32 0.0, %v300_v21  ;;  %v302_v26 = vsub.f32 1.0, %v298_v45  ;;  %v593_v45 = vld [vmem:[#allocation2 + $0xe0] sm:$0xff] }
 0x127   :  { %v311_v12 = vsel %vm303_vm5, %v307_v24, %v299_v38  ;;  %v309_v48 = vsub.f32 0.0, %v301_v43  ;;  %v602_v24 = vld [vmem:[#allocation2 + $0x128] sm:$0xff] }
 0x128   :  { %v319_v39 = vadd.f32 1.0, %v311_v12  ;;  %v312_v42 = vsel %vm304_vm6, %v308_v34, %v300_v21  ;;  %v310_v53 = vsub.f32 0.0, %v302_v26  ;;  %v604_v21 = vld [vmem:[#allocation2 + $0x138] sm:$0xff]  ;;  %v601_v12 = vld [vmem:[#allocation2 + $0x120] sm:$0xff] }
 0x129   :  { %v320_v47 = vadd.f32 1.0, %v312_v42  ;;  %v313_v51 = vsel %vm305_vm7, %v309_v48, %v301_v43  ;;  %607 = vmatpush.msra.mxu2 %v604_v21  ;;  %v597_v43 = vld [vmem:[#allocation2 + $0x100] sm:$0xff] }
 0x12a   :  { %v323_v40 = vmul.f32 %v319_v39, %v315_v37  ;;  %v321_v52 = vadd.f32 1.0, %v313_v51  ;;  %v314_v49 = vsel %vm306_vm8, %v310_v53, %v302_v26  ;;  %v599_v37 = vld [vmem:[#allocation2 + $0x110] sm:$0xff]  ;;  %v590_v53 = vld [vmem:[#allocation2 + $0xc8] sm:$0xff] }
 0x12b   :  { %v324_v50 = vmul.f32 %v320_v47, %v316_v30  ;;  %v322_v55 = vadd.f32 1.0, %v314_v49  ;;  %608 = vmatpush.msra.mxu2 %v603_v22  ;;  %v594_v47 = vld [vmem:[#allocation2 + $0xe8] sm:$0xff]  ;;  %v591_v26 = vld [vmem:[#allocation2 + $0xd0] sm:$0xff] }
 0x12c   :  { %361 = vmatmul.f32.vlgmr.msra.gmra.mxu1 %v323_v40  ;;  %v325_v54 = vmul.f32 %v321_v52, %v317_v31  ;;  %v598_v40 = vld [vmem:[#allocation2 + $0x108] sm:$0xff] }
 0x12d   :  { %v326_v56 = vmul.f32 %v322_v55, %v318_v46  ;;  %609 = vmatpush.msra.mxu2 %v602_v24  ;;  %v5926_v55 = vld [vmem:[#allocation5 + $0x4] ss:$0 sm:$0xff] }
 0x12f   :  { %610 = vmatpush.msra.mxu2 %v601_v12 }
 0x131   :  { %611 = vmatpush.msra.mxu2 %v600_v36 }
 0x133   :  { %612 = vmatpush.msra.mxu2 %v599_v37 }
 0x134   :  { %364 = vmatmul.f32.gmra.mxu1 %v324_v50  ;;  %v592_v50 = vld [vmem:[#allocation2 + $0xd8] sm:$0xff] }
 0x135   :  { %613 = vmatpush.msra.mxu2 %v598_v40 }
 0x137   :  { %614 = vmatpush.msra.mxu2 %v597_v43 }
 0x139   :  { %615 = vmatpush.msra.mxu2 %v596_v44 }
 0x13b   :  { %616 = vmatpush.msra.mxu2 %v595_v41 }
 0x13c   :  { %367 = vmatmul.f32.gmra.mxu1 %v325_v54  ;;  %v589_v54 = vld [vmem:[#allocation2 + $0xc0] sm:$0xff] }
 0x13d   :  { %617 = vmatpush.msra.mxu2 %v594_v47 }
 0x13f   :  { %618 = vmatpush.msra.mxu2 %v593_v45 }
 0x141   :  { %619 = vmatpush.msra.mxu2 %v592_v50 }
 0x143   :  { %620 = vmatpush.msra.mxu2 %v591_v26 }
 0x144   :  { %370 = vmatmul.f32.gmra.mxu1 %v326_v56 }
 0x145   :  { %621 = vmatpush.msra.mxu2 %v590_v53 }
 0x147   :  { %622 = vmatpush.msra.mxu2 %v589_v54 }
 0x1a9   :  { %v362_v27 = vpop.f32.mrf.mxu1 }
 0x1aa   :  { %v363_v61 = vadd.f32 %v5925_v59, %v362_v27 }
 0x1b1   :  { %v365_v57 = vpop.f32.mrf.mxu1 }
 0x1b2   :  { %v366_v60 = vadd.f32 %v5925_v59, %v365_v57  ;;  %v5927_v57 = vld [vmem:[#allocation5 + $0x5] ss:$0 sm:$0xff] }
 0x1b4   :  { %v376_v63 = vadd.f32 %v366_v60, %v363_v61 }
 0x1b9   :  { %v368_v32 = vpop.f32.mrf.mxu1 }
 0x1ba   :  { %v369_v62 = vadd.f32 %v5925_v59, %v368_v32 }
 0x1bc   :  { %v377_v28 = vadd.f32 %v376_v63, %v369_v62 }
 0x1c1   :  { %v371_v0 = vpop.f32.mrf.mxu1 }
 0x1c2   :  { %v372_v1 = vadd.f32 %v5925_v59, %v371_v0 }
 0x1c4   :  { %v378_v2 = vadd.f32 %v377_v28, %v372_v1 }
 0x1c6   :  { %v379_v33 = vrot.slane %v378_v2, 4 }
 0x1c8   :  { %v380_v3 = vadd.f32 %v379_v33, %v378_v2 }
 0x1ca   :  { %v381_v4 = vrot.slane %v380_v3, 2 }
 0x1cc   :  { %v382_v5 = vadd.f32 %v381_v4, %v380_v3 }
 0x1ce   :  { %v383_v6 = vrot.slane %v382_v5, 1 }
 0x1d0   :  { %v384_v29 = vadd.f32 %v383_v6, %v382_v5 }
 0x1d2   :  { %v385_v7 = vmul.f32 %v384_v29, %v6385_v35 }
 0x1d4   :  { %v6471_v8 = vsub.f32 %v363_v61, %v385_v7  ;;  %v6473_v58 = vsub.f32 %v366_v60, %v385_v7  ;;  %v6475_v9 = vsub.f32 %v369_v62, %v385_v7  ;;  %v389_v10 = vsub.f32 %v372_v1, %v385_v7 }
 0x1d6   :  { %v390_v11 = vmul.f32 %v6471_v8, %v6471_v8  ;;  %v391_v13 = vmul.f32 %v6473_v58, %v6473_v58  ;;  %v392_v14 = vmul.f32 %v6475_v9, %v6475_v9  ;;  %v393_v16 = vmul.f32 %v389_v10, %v389_v10 }
 0x1d8   :  { %v394_v15 = vadd.f32 %v391_v13, %v390_v11 }
 0x1da   :  { %v395_v18 = vadd.f32 %v394_v15, %v392_v14 }
 0x1dc   :  { %v396_v19 = vadd.f32 %v395_v18, %v393_v16 }
 0x1de   :  { %v397_v38 = vrot.slane %v396_v19, 4 }
 0x1e0   :  { %v398_v20 = vadd.f32 %v397_v38, %v396_v19 }
 0x1e2   :  { %v399_v23 = vrot.slane %v398_v20, 2 }
 0x1e4   :  { %v400_v25 = vadd.f32 %v399_v23, %v398_v20 }
 0x1e6   :  { %v401_v34 = vrot.slane %v400_v25, 1 }
 0x1e8   :  { %v402_v17 = vadd.f32 %v401_v34, %v400_v25 }
 0x1ea   :  { %v403_v39 = vmul.f32 %v402_v17, %v6385_v35 }
 0x1ec   :  { %v404_v42 = vadd.f32 1e-05, %v403_v39 }
 0x1ee   :  { %5982 = vrsqrt.f32 %v404_v42  ;;  %vm411_vm10 = vweird.f32 %v404_v42 }
 0x1f4   :  { %v5983_v48 = vpop.eup %5982 }
 0x1f5   :  { %v406_v30 = vmul.f32 %v5983_v48, %v404_v42  ;;  %vm412_vm9 = vweird.f32 %v5983_v48 }
 0x1f6   :  { %vm413_vm11 = vmor %vm411_vm10, %vm412_vm9 }
 0x1f7   :  { %v407_v51 = vmul.f32 %v5983_v48, %v406_v30 }
 0x1f9   :  { %v408_v52 = vmul.f32 0.5, %v407_v51 }
 0x1fb   :  { %v409_v31 = vsub.f32 1.5, %v408_v52 }
 0x1fd   :  { %v410_v49 = vmul.f32 %v5983_v48, %v409_v31 }
 0x1ff   :  { %v414_v46 = vsel %vm413_vm11, %v5983_v48, %v410_v49 }
 0x200   :  { %v418_v56 = vmul.f32 %v414_v46, %v389_v10  ;;  %v415_v27 = vmul.f32 %v414_v46, %v6471_v8  ;;  %v416_v32 = vmul.f32 %v414_v46, %v6473_v58  ;;  %v417_v59 = vmul.f32 %v414_v46, %v6475_v9 }
 0x202   :  { %v420_v60 = vmul.f32 %v5926_v55, %v415_v27  ;;  %v421_v61 = vmul.f32 %v5926_v55, %v416_v32  ;;  %v422_v62 = vmul.f32 %v5926_v55, %v417_v59  ;;  %v423_v63 = vmul.f32 %v5926_v55, %v418_v56 }
 0x204   :  { %v6487_v0 = vadd.f32 %v5927_v57, %v420_v60  ;;  %v6489_v28 = vadd.f32 %v5927_v57, %v421_v61  ;;  %v6491_v1 = vadd.f32 %v5927_v57, %v422_v62  ;;  %v6493_v2 = vadd.f32 %v5927_v57, %v423_v63 }
 0x206   :  { %v6496_v33 = vmul.f32 0.70710677, %v6487_v0  ;;  %v6499_v3 = vmul.f32 0.70710677, %v6489_v28  ;;  %v6502_v4 = vmul.f32 0.70710677, %v6491_v1 }
 0x207   :  { %v6505_v5 = vmul.f32 0.70710677, %v6493_v2 }
 0x208   :  { %v433_v6 = vand.u32 2147483647, %v6496_v33  ;;  %v434_v29 = vand.u32 2147483647, %v6499_v3  ;;  %v435_v7 = vand.u32 2147483647, %v6502_v4 }
 0x209   :  { %v6511_v8 = vand.u32 2147483647, %v6505_v5 }
 0x20a   :  { %v437_v58 = vmul.f32 0.3275911, %v433_v6  ;;  %v438_v9 = vmul.f32 0.3275911, %v434_v29  ;;  %v439_v10 = vmul.f32 0.3275911, %v435_v7  ;;  %v541_v24 = vmul.f32 %v433_v6, %v433_v6 }
 0x20b   :  { %v440_v14 = vmul.f32 0.3275911, %v6511_v8  ;;  %v6517_v34 = vmul.f32 %v434_v29, %v434_v29  ;;  %v6519_v36 = vmul.f32 %v435_v7, %v435_v7 }
 0x20c   :  { %v441_v11 = vadd.f32 1.0, %v437_v58  ;;  %v442_v13 = vadd.f32 1.0, %v438_v9  ;;  %v443_v15 = vadd.f32 1.0, %v439_v10  ;;  %v545_v62 = vsub.f32 0.0, %v541_v24 }
 0x20d   :  { %v6514_v16 = vadd.f32 1.0, %v440_v14  ;;  %v546_v9 = vsub.f32 0.0, %v6517_v34 }
 0x20e   :  { %5984 = vrcp.f32 %v441_v11  ;;  %v454_v20 = vand.u32 2147483647, %v441_v11  ;;  %v456_v23 = vand.u32 2147483648, %v441_v11  ;;  %v469_v25 = vand.u32 2147483647, %v442_v13 }
 0x20f   :  { %5986 = vrcp.f32 %v442_v13  ;;  %vm450_vm12 = vweird.f32 %v441_v11  ;;  %vm465_vm14 = vweird.f32 %v442_v13  ;;  %v471_v39 = vand.u32 2147483648, %v442_v13 }
 0x210   :  { %5988 = vrcp.f32 %v443_v15  ;;  %vm6521_vm15 = vcmp.eq.f32.partialorder %v454_v20, 8.507059e+37  ;;  %v457_v47 = vor.u32 1.1754944e-38, %v456_v23  ;;  %vm6525_vm1 = vcmp.eq.f32.partialorder %v469_v25, 8.507059e+37 }
 0x211   :  { %5990 = vrcp.f32 %v6514_v16  ;;  %vm480_vm2 = vweird.f32 %v443_v15  ;;  %v484_v50 = vand.u32 2147483647, %v443_v15  ;;  %v472_v52 = vor.u32 1.1754944e-38, %v471_v39 }
 0x212   :  { %v486_v53 = vand.u32 2147483648, %v443_v15  ;;  %v499_v27 = vand.u32 2147483647, %v6514_v16  ;;  %v501_v57 = vand.u32 2147483648, %v6514_v16  ;;  %vm495_vm9 = vweird.f32 %v6514_v16 }
 0x213   :  { %vm485_vm8 = vcmp.eq.f32.partialorder %v484_v50, 8.507059e+37  ;;  %v551_v24 = vmul.f32 1.442695, %v546_v9 }
 0x214   :  { %v5985_v18 = vpop.eup %5984  ;;  %v487_v63 = vor.u32 1.1754944e-38, %v486_v53  ;;  %vm500_vm11 = vcmp.eq.f32.partialorder %v499_v27, 8.507059e+37 }
 0x215   :  { %v5987_v19 = vpop.eup %5986  ;;  %v446_v38 = vmul.f32 %v5985_v18, %v441_v11  ;;  %vm451_vm13 = vweird.f32 %v5985_v18  ;;  %v502_v11 = vor.u32 1.1754944e-38, %v501_v57 }
 0x216   :  { %v461_v21 = vmul.f32 %v5987_v19, %v442_v13  ;;  %v5989_v17 = vpop.eup %5988  ;;  %vm466_vm0 = vweird.f32 %v5987_v19  ;;  %vm452_vm3 = vmor %vm450_vm12, %vm451_vm13  ;;  %vm565_vm12 = vcmp.lt.f32.partialorder %v6496_v33, 0.0  ;;  %vm566_vm13 = vcmp.lt.f32.partialorder %v6499_v3, 0.0 }
 0x217   :  { %v447_v22 = vsub.f32 1.0, %v446_v38  ;;  %v476_v43 = vmul.f32 %v5989_v17, %v443_v15  ;;  %v5991_v44 = vpop.eup %5990  ;;  %vm467_vm4 = vmor %vm465_vm14, %vm466_vm0  ;;  %vm481_vm5 = vweird.f32 %v5989_v17  ;;  %v549_v15 = vmul.f32 1.442695, %v545_v62 }
 0x218   :  { %v462_v12 = vsub.f32 1.0, %v461_v21  ;;  %v491_v51 = vmul.f32 %v5991_v44, %v6514_v16  ;;  %vm496_vm6 = vweird.f32 %v5991_v44  ;;  %vm482_vm7 = vmor %vm480_vm2, %vm481_vm5  ;;  %v578_v33 = vmul.f32 0.5, %v6489_v28 }
 0x219   :  { %v448_v37 = vmul.f32 %v5985_v18, %v447_v22  ;;  %v477_v30 = vsub.f32 1.0, %v476_v43  ;;  %vm497_vm10 = vmor %vm495_vm9, %vm496_vm6  ;;  %5992 = vpow2.f32 %v549_v15  ;;  %v544_v43 = vmul.f32 %v6511_v8, %v6511_v8 }
 0x21a   :  { %v463_v42 = vmul.f32 %v5987_v19, %v462_v12  ;;  %v492_v55 = vsub.f32 1.0, %v491_v51  ;;  %v547_v12 = vsub.f32 0.0, %v6519_v36  ;;  %5994 = vpow2.f32 %v551_v24 }
 0x21b   :  { %v449_v41 = vadd.f32 %v5985_v18, %v448_v37  ;;  %v478_v49 = vmul.f32 %v5989_v17, %v477_v30  ;;  %vm567_vm14 = vcmp.lt.f32.partialorder %v6502_v4, 0.0  ;;  %v579_v3 = vmul.f32 0.5, %v6491_v1 }
 0x21c   :  { %v464_v45 = vadd.f32 %v5987_v19, %v463_v42  ;;  %v493_v60 = vmul.f32 %v5991_v44, %v492_v55 }
 0x21d   :  { %v453_v26 = vsel %vm452_vm3, %v5985_v18, %v449_v41  ;;  %v479_v59 = vadd.f32 %v5989_v17, %v478_v49 }
 0x21e   :  { %v458_v31 = vsel %vm6521_vm15, %v457_v47, %v453_v26  ;;  %v468_v54 = vsel %vm467_vm4, %v5987_v19, %v464_v45  ;;  %v494_v7 = vadd.f32 %v5991_v44, %v493_v60  ;;  %v553_v47 = vmul.f32 1.442695, %v547_v12 }
 0x21f   :  { %v505_v46 = vmul.f32 1.0614054, %v458_v31  ;;  %v473_v56 = vsel %vm6525_vm1, %v472_v52, %v468_v54  ;;  %v483_v29 = vsel %vm482_vm7, %v5989_v17, %v479_v59  ;;  %v548_v26 = vsub.f32 0.0, %v544_v43  ;;  %v5993_v52 = vpop.eup %5992 }
 0x220   :  { %v506_v32 = vmul.f32 1.0614054, %v473_v56  ;;  %v488_v10 = vsel %vm485_vm8, %v487_v63, %v483_v29  ;;  %v498_v18 = vsel %vm497_vm10, %v5991_v44, %v494_v7  ;;  %5996 = vpow2.f32 %v553_v47  ;;  %v5995_v55 = vpop.eup %5994 }
 0x221   :  { %v509_v61 = vadd.f32 -1.4531521, %v505_v46  ;;  %v507_v14 = vmul.f32 1.0614054, %v488_v10  ;;  %v503_v38 = vsel %vm500_vm11, %v502_v11, %v498_v18  ;;  %v577_v7 = vmul.f32 0.5, %v6487_v0 }
 0x222   :  { %v510_v6 = vadd.f32 -1.4531521, %v506_v32  ;;  %v508_v22 = vmul.f32 1.0614054, %v503_v38  ;;  %vm568_vm15 = vcmp.lt.f32.partialorder %v6505_v5, 0.0 }
 0x223   :  { %v513_v58 = vmul.f32 %v509_v61, %v458_v31  ;;  %v511_v21 = vadd.f32 -1.4531521, %v507_v14  ;;  %v555_v61 = vmul.f32 1.442695, %v548_v26 }
 0x224   :  { %v514_v13 = vmul.f32 %v510_v6, %v473_v56  ;;  %v512_v34 = vadd.f32 -1.4531521, %v508_v22 }
 0x225   :  { %v517_v19 = vadd.f32 1.4214138, %v513_v58  ;;  %v515_v16 = vmul.f32 %v511_v21, %v488_v10  ;;  %5998 = vpow2.f32 %v555_v61 }
 0x226   :  { %v518_v20 = vadd.f32 1.4214138, %v514_v13  ;;  %v516_v40 = vmul.f32 %v512_v34, %v503_v38  ;;  %v5997_v63 = vpop.eup %5996 }
 0x227   :  { %v521_v23 = vmul.f32 %v517_v19, %v458_v31  ;;  %v519_v39 = vadd.f32 1.4214138, %v515_v16  ;;  %v580_v16 = vmul.f32 0.5, %v6493_v2 }
 0x228   :  { %v522_v25 = vmul.f32 %v518_v20, %v473_v56  ;;  %v520_v48 = vadd.f32 1.4214138, %v516_v40 }
 0x229   :  { %v525_v17 = vadd.f32 -0.28449672, %v521_v23  ;;  %v523_v41 = vmul.f32 %v519_v39, %v488_v10 }
 0x22a   :  { %v526_v37 = vadd.f32 -0.28449672, %v522_v25  ;;  %v524_v51 = vmul.f32 %v520_v48, %v503_v38 }
 0x22b   :  { %v529_v42 = vmul.f32 %v525_v17, %v458_v31  ;;  %v527_v50 = vadd.f32 -0.28449672, %v523_v41  ;;  %v5928_v17 = vld [vmem:[#allocation5 + $0x6] ss:$0 sm:$0xff] }
 0x22c   :  { %v530_v44 = vmul.f32 %v526_v37, %v473_v56  ;;  %v528_v49 = vadd.f32 -0.28449672, %v524_v51 }
 0x22d   :  { %v533_v45 = vadd.f32 0.2548296, %v529_v42  ;;  %v531_v54 = vmul.f32 %v527_v50, %v488_v10 }
 0x22e   :  { %v534_v30 = vadd.f32 0.2548296, %v530_v44  ;;  %v532_v32 = vmul.f32 %v528_v49, %v503_v38 }
 0x22f   :  { %v537_v36 = vmul.f32 %v533_v45, %v458_v31  ;;  %v535_v57 = vadd.f32 0.2548296, %v531_v54 }
 0x230   :  { %v538_v53 = vmul.f32 %v534_v30, %v473_v56  ;;  %v536_v56 = vadd.f32 0.2548296, %v532_v32 }
 0x231   :  { %v557_v46 = vmul.f32 %v5993_v52, %v537_v36  ;;  %v539_v60 = vmul.f32 %v535_v57, %v488_v10  ;;  %v5999_v10 = vpop.eup %5998 }
 0x232   :  { %v558_v27 = vmul.f32 %v5995_v55, %v538_v53  ;;  %v540_v14 = vmul.f32 %v536_v56, %v503_v38 }
 0x233   :  { %v561_v8 = vsub.f32 1.0, %v557_v46  ;;  %v559_v29 = vmul.f32 %v5997_v63, %v539_v60  ;;  %v865_v60 = vld [vmem:[#allocation2 + $0x1b0] sm:$0xff] }
 0x234   :  { %v562_v59 = vsub.f32 1.0, %v558_v27  ;;  %v560_v15 = vmul.f32 %v5999_v10, %v540_v14  ;;  %v858_v14 = vld [vmem:[#allocation2 + $0x178] sm:$0xff]  ;;  %v857_v10 = vld [vmem:[#allocation2 + $0x170] sm:$0xff] }
 0x235   :  { %v569_v62 = vsub.f32 0.0, %v561_v8  ;;  %v563_v13 = vsub.f32 1.0, %v559_v29  ;;  %v862_v29 = vld [vmem:[#allocation2 + $0x198] sm:$0xff] }
 0x236   :  { %v570_v6 = vsub.f32 0.0, %v562_v59  ;;  %v564_v0 = vsub.f32 1.0, %v560_v15  ;;  %v855_v15 = vld [vmem:[#allocation2 + $0x160] sm:$0xff] }
 0x237   :  { %v573_v31 = vsel %vm565_vm12, %v569_v62, %v561_v8  ;;  %v571_v19 = vsub.f32 0.0, %v563_v13  ;;  %v864_v62 = vld [vmem:[#allocation2 + $0x1a8] sm:$0xff] }
 0x238   :  { %v581_v58 = vadd.f32 1.0, %v573_v31  ;;  %v574_v11 = vsel %vm566_vm13, %v570_v6, %v562_v59  ;;  %v572_v23 = vsub.f32 0.0, %v564_v0  ;;  %v866_v59 = vld [vmem:[#allocation2 + $0x1b8] sm:$0xff]  ;;  %v863_v31 = vld [vmem:[#allocation2 + $0x1a0] sm:$0xff] }
 0x239   :  { %v582_v18 = vadd.f32 1.0, %v574_v11  ;;  %v575_v21 = vsel %vm567_vm14, %v571_v19, %v563_v13  ;;  %869 = vmatpush.msra.mxu3 %v866_v59  ;;  %v859_v13 = vld [vmem:[#allocation2 + $0x180] sm:$0xff] }
 0x23a   :  { %v585_v9 = vmul.f32 %v581_v58, %v577_v7  ;;  %v583_v22 = vadd.f32 1.0, %v575_v21  ;;  %v576_v38 = vsel %vm568_vm15, %v572_v23, %v564_v0  ;;  %v861_v7 = vld [vmem:[#allocation2 + $0x190] sm:$0xff]  ;;  %v852_v23 = vld [vmem:[#allocation2 + $0x148] sm:$0xff] }
 0x23b   :  { %v586_v20 = vmul.f32 %v582_v18, %v578_v33  ;;  %v584_v25 = vadd.f32 1.0, %v576_v38  ;;  %870 = vmatpush.msra.mxu3 %v865_v60  ;;  %v856_v18 = vld [vmem:[#allocation2 + $0x168] sm:$0xff]  ;;  %v853_v0 = vld [vmem:[#allocation2 + $0x150] sm:$0xff] }
 0x23c   :  { %623 = vmatmul.f32.vlgmr.msra.gmra.mxu2 %v585_v9  ;;  %v587_v24 = vmul.f32 %v583_v22, %v579_v3  ;;  %v860_v9 = vld [vmem:[#allocation2 + $0x188] sm:$0xff] }
 0x23d   :  { %v588_v12 = vmul.f32 %v584_v25, %v580_v16  ;;  %871 = vmatpush.msra.mxu3 %v864_v62  ;;  %v5929_v25 = vld [vmem:[#allocation5 + $0x7] ss:$0 sm:$0xff] }
 0x23f   :  { %872 = vmatpush.msra.mxu3 %v863_v31 }
 0x241   :  { %873 = vmatpush.msra.mxu3 %v862_v29 }
 0x243   :  { %874 = vmatpush.msra.mxu3 %v861_v7 }
 0x244   :  { %626 = vmatmul.f32.gmra.mxu2 %v586_v20  ;;  %v854_v20 = vld [vmem:[#allocation2 + $0x158] sm:$0xff] }
 0x245   :  { %875 = vmatpush.msra.mxu3 %v860_v9 }
 0x247   :  { %876 = vmatpush.msra.mxu3 %v859_v13 }
 0x249   :  { %877 = vmatpush.msra.mxu3 %v858_v14 }
 0x24b   :  { %878 = vmatpush.msra.mxu3 %v857_v10 }
 0x24c   :  { %629 = vmatmul.f32.gmra.mxu2 %v587_v24  ;;  %v851_v24 = vld [vmem:[#allocation2 + $0x140] sm:$0xff] }
 0x24d   :  { %879 = vmatpush.msra.mxu3 %v856_v18 }
 0x24f   :  { %880 = vmatpush.msra.mxu3 %v855_v15 }
 0x251   :  { %881 = vmatpush.msra.mxu3 %v854_v20 }
 0x253   :  { %882 = vmatpush.msra.mxu3 %v853_v0 }
 0x254   :  { %632 = vmatmul.f32.gmra.mxu2 %v588_v12 }
 0x255   :  { %883 = vmatpush.msra.mxu3 %v852_v23 }
 0x257   :  { %884 = vmatpush.msra.mxu3 %v851_v24 }
 0x2bf   :  { %v624_v28 = vpop.f32.mrf.mxu2 }
 0x2c0   :  { %v625_v39 = vadd.f32 %v5928_v17, %v624_v28 }
 0x2c7   :  { %v627_v34 = vpop.f32.mrf.mxu2 }
 0x2c8   :  { %v628_v37 = vadd.f32 %v5928_v17, %v627_v34  ;;  %v5930_v34 = vld [vmem:[#allocation5 + $0x8] ss:$0 sm:$0xff] }
 0x2ca   :  { %v638_v42 = vadd.f32 %v628_v37, %v625_v39 }
 0x2cf   :  { %v630_v4 = vpop.f32.mrf.mxu2 }
 0x2d0   :  { %v631_v40 = vadd.f32 %v5928_v17, %v630_v4 }
 0x2d2   :  { %v639_v1 = vadd.f32 %v638_v42, %v631_v40 }
 0x2d7   :  { %v633_v43 = vpop.f32.mrf.mxu2 }
 0x2d8   :  { %v634_v44 = vadd.f32 %v5928_v17, %v633_v43 }
 0x2da   :  { %v640_v41 = vadd.f32 %v639_v1, %v634_v44 }
 0x2dc   :  { %v641_v5 = vrot.slane %v640_v41, 4 }
 0x2de   :  { %v642_v47 = vadd.f32 %v641_v5, %v640_v41 }
 0x2e0   :  { %v643_v48 = vrot.slane %v642_v47, 2 }
 0x2e2   :  { %v644_v45 = vadd.f32 %v643_v48, %v642_v47 }
 0x2e4   :  { %v645_v30 = vrot.slane %v644_v45, 1 }
 0x2e6   :  { %v646_v2 = vadd.f32 %v645_v30, %v644_v45 }
 0x2e8   :  { %v647_v50 = vmul.f32 %v646_v2, %v6385_v35 }
 0x2ea   :  { %v6554_v51 = vsub.f32 %v625_v39, %v647_v50  ;;  %v6556_v36 = vsub.f32 %v628_v37, %v647_v50  ;;  %v6558_v26 = vsub.f32 %v631_v40, %v647_v50  ;;  %v651_v52 = vsub.f32 %v634_v44, %v647_v50 }
 0x2ec   :  { %v652_v53 = vmul.f32 %v6554_v51, %v6554_v51  ;;  %v653_v54 = vmul.f32 %v6556_v36, %v6556_v36  ;;  %v654_v49 = vmul.f32 %v6558_v26, %v6558_v26  ;;  %v655_v46 = vmul.f32 %v651_v52, %v651_v52 }
 0x2ee   :  { %v656_v55 = vadd.f32 %v653_v54, %v652_v53 }
 0x2f0   :  { %v657_v27 = vadd.f32 %v656_v55, %v654_v49 }
 0x2f2   :  { %v658_v57 = vadd.f32 %v657_v27, %v655_v46 }
 0x2f4   :  { %v659_v8 = vrot.slane %v658_v57, 4 }
 0x2f6   :  { %v660_v32 = vadd.f32 %v659_v8, %v658_v57 }
 0x2f8   :  { %v661_v61 = vrot.slane %v660_v32, 2 }
 0x2fa   :  { %v662_v63 = vadd.f32 %v661_v61, %v660_v32 }
 0x2fc   :  { %v663_v6 = vrot.slane %v662_v63, 1 }
 0x2fe   :  { %v664_v56 = vadd.f32 %v663_v6, %v662_v63 }
 0x300   :  { %v665_v58 = vmul.f32 %v664_v56, %v6385_v35 }
 0x302   :  { %v666_v11 = vadd.f32 1e-05, %v665_v58 }
 0x304   :  { %6000 = vrsqrt.f32 %v666_v11  ;;  %vm673_vm1 = vweird.f32 %v666_v11 }
 0x30a   :  { %v6001_v19 = vpop.eup %6000 }
 0x30b   :  { %v668_v33 = vmul.f32 %v6001_v19, %v666_v11  ;;  %vm674_vm0 = vweird.f32 %v6001_v19 }
 0x30c   :  { %vm675_vm2 = vmor %vm673_vm1, %vm674_vm0 }
 0x30d   :  { %v669_v21 = vmul.f32 %v6001_v19, %v668_v33 }
 0x30f   :  { %v670_v22 = vmul.f32 0.5, %v669_v21 }
 0x311   :  { %v671_v3 = vsub.f32 1.5, %v670_v22 }
 0x313   :  { %v672_v38 = vmul.f32 %v6001_v19, %v671_v3 }
 0x315   :  { %v676_v16 = vsel %vm675_vm2, %v6001_v19, %v672_v38 }
 0x316   :  { %v680_v12 = vmul.f32 %v676_v16, %v651_v52  ;;  %v677_v28 = vmul.f32 %v676_v16, %v6554_v51  ;;  %v678_v4 = vmul.f32 %v676_v16, %v6556_v36  ;;  %v679_v17 = vmul.f32 %v676_v16, %v6558_v26 }
 0x318   :  { %v682_v37 = vmul.f32 %v5929_v25, %v677_v28  ;;  %v683_v39 = vmul.f32 %v5929_v25, %v678_v4  ;;  %v684_v40 = vmul.f32 %v5929_v25, %v679_v17  ;;  %v685_v42 = vmul.f32 %v5929_v25, %v680_v12 }
 0x31a   :  { %v6570_v43 = vadd.f32 %v5930_v34, %v682_v37  ;;  %v6572_v1 = vadd.f32 %v5930_v34, %v683_v39  ;;  %v6574_v44 = vadd.f32 %v5930_v34, %v684_v40  ;;  %v6576_v41 = vadd.f32 %v5930_v34, %v685_v42 }
 0x31c   :  { %v6579_v5 = vmul.f32 0.70710677, %v6570_v43  ;;  %v6582_v47 = vmul.f32 0.70710677, %v6572_v1  ;;  %v6585_v48 = vmul.f32 0.70710677, %v6574_v44 }
 0x31d   :  { %v6588_v45 = vmul.f32 0.70710677, %v6576_v41 }
 0x31e   :  { %v695_v30 = vand.u32 2147483647, %v6579_v5  ;;  %v696_v2 = vand.u32 2147483647, %v6582_v47  ;;  %v697_v50 = vand.u32 2147483647, %v6585_v48 }
 0x31f   :  { %v6594_v51 = vand.u32 2147483647, %v6588_v45 }
 0x320   :  { %v699_v36 = vmul.f32 0.3275911, %v695_v30  ;;  %v700_v26 = vmul.f32 0.3275911, %v696_v2  ;;  %v701_v52 = vmul.f32 0.3275911, %v697_v50  ;;  %v803_v62 = vmul.f32 %v695_v30, %v695_v30 }
 0x321   :  { %v702_v49 = vmul.f32 0.3275911, %v6594_v51  ;;  %v6600_v6 = vmul.f32 %v696_v2, %v696_v2  ;;  %v6602_v29 = vmul.f32 %v697_v50, %v697_v50 }
 0x322   :  { %v703_v53 = vadd.f32 1.0, %v699_v36  ;;  %v704_v54 = vadd.f32 1.0, %v700_v26  ;;  %v705_v55 = vadd.f32 1.0, %v701_v52  ;;  %v807_v40 = vsub.f32 0.0, %v803_v62 }
 0x323   :  { %v6597_v46 = vadd.f32 1.0, %v702_v49  ;;  %v808_v26 = vsub.f32 0.0, %v6600_v6 }
 0x324   :  { %6002 = vrcp.f32 %v703_v53  ;;  %v716_v32 = vand.u32 2147483647, %v703_v53  ;;  %v718_v61 = vand.u32 2147483648, %v703_v53  ;;  %v731_v63 = vand.u32 2147483647, %v704_v54 }
 0x325   :  { %6004 = vrcp.f32 %v704_v54  ;;  %vm712_vm3 = vweird.f32 %v703_v53  ;;  %vm727_vm5 = vweird.f32 %v704_v54  ;;  %v733_v58 = vand.u32 2147483648, %v704_v54 }
 0x326   :  { %6006 = vrcp.f32 %v705_v55  ;;  %vm6604_vm6 = vcmp.eq.f32.partialorder %v716_v32, 8.507059e+37  ;;  %v719_v18 = vor.u32 1.1754944e-38, %v718_v61  ;;  %vm6608_vm8 = vcmp.eq.f32.partialorder %v731_v63, 8.507059e+37 }
 0x327   :  { %6008 = vrcp.f32 %v6597_v46  ;;  %vm742_vm9 = vweird.f32 %v705_v55  ;;  %v746_v20 = vand.u32 2147483647, %v705_v55  ;;  %v734_v22 = vor.u32 1.1754944e-38, %v733_v58 }
 0x328   :  { %v748_v23 = vand.u32 2147483648, %v705_v55  ;;  %v761_v28 = vand.u32 2147483647, %v6597_v46  ;;  %v763_v34 = vand.u32 2147483648, %v6597_v46  ;;  %vm757_vm0 = vweird.f32 %v6597_v46 }
 0x329   :  { %vm747_vm15 = vcmp.eq.f32.partialorder %v746_v20, 8.507059e+37  ;;  %v813_v62 = vmul.f32 1.442695, %v808_v26 }
 0x32a   :  { %v6003_v27 = vpop.eup %6002  ;;  %v749_v42 = vor.u32 1.1754944e-38, %v748_v23  ;;  %vm762_vm2 = vcmp.eq.f32.partialorder %v761_v28, 8.507059e+37 }
 0x32b   :  { %v6005_v57 = vpop.eup %6004  ;;  %v708_v8 = vmul.f32 %v6003_v27, %v703_v53  ;;  %vm713_vm4 = vweird.f32 %v6003_v27  ;;  %v764_v53 = vor.u32 1.1754944e-38, %v763_v34 }
 0x32c   :  { %v723_v59 = vmul.f32 %v6005_v57, %v704_v54  ;;  %v6007_v56 = vpop.eup %6006  ;;  %vm728_vm7 = vweird.f32 %v6005_v57  ;;  %vm714_vm10 = vmor %vm712_vm3, %vm713_vm4  ;;  %vm827_vm3 = vcmp.lt.f32.partialorder %v6579_v5, 0.0  ;;  %vm828_vm4 = vcmp.lt.f32.partialorder %v6582_v47, 0.0 }
 0x32d   :  { %v709_v60 = vsub.f32 1.0, %v708_v8  ;;  %v738_v13 = vmul.f32 %v6007_v56, %v705_v55  ;;  %v6009_v14 = vpop.eup %6008  ;;  %vm729_vm11 = vmor %vm727_vm5, %vm728_vm7  ;;  %vm743_vm12 = vweird.f32 %v6007_v56  ;;  %v811_v55 = vmul.f32 1.442695, %v807_v40 }
 0x32e   :  { %v724_v31 = vsub.f32 1.0, %v723_v59  ;;  %v753_v21 = vmul.f32 %v6009_v14, %v6597_v46  ;;  %vm758_vm13 = vweird.f32 %v6009_v14  ;;  %vm744_vm14 = vmor %vm742_vm9, %vm743_vm12  ;;  %v840_v5 = vmul.f32 0.5, %v6572_v1 }
 0x32f   :  { %v710_v7 = vmul.f32 %v6003_v27, %v709_v60  ;;  %v739_v33 = vsub.f32 1.0, %v738_v13  ;;  %vm759_vm1 = vmor %vm757_vm0, %vm758_vm13  ;;  %6010 = vpow2.f32 %v811_v55  ;;  %v806_v13 = vmul.f32 %v6594_v51, %v6594_v51 }
 0x330   :  { %v725_v11 = vmul.f32 %v6005_v57, %v724_v31  ;;  %v754_v25 = vsub.f32 1.0, %v753_v21  ;;  %v809_v31 = vsub.f32 0.0, %v6602_v29  ;;  %6012 = vpow2.f32 %v813_v62 }
 0x331   :  { %v711_v10 = vadd.f32 %v6003_v27, %v710_v7  ;;  %v740_v38 = vmul.f32 %v6007_v56, %v739_v33  ;;  %vm829_vm5 = vcmp.lt.f32.partialorder %v6585_v48, 0.0  ;;  %v841_v47 = vmul.f32 0.5, %v6574_v44 }
 0x332   :  { %v726_v15 = vadd.f32 %v6005_v57, %v725_v11  ;;  %v755_v37 = vmul.f32 %v6009_v14, %v754_v25 }
 0x333   :  { %v715_v0 = vsel %vm714_vm10, %v6003_v27, %v711_v10  ;;  %v741_v17 = vadd.f32 %v6007_v56, %v740_v38 }
 0x334   :  { %v720_v3 = vsel %vm6604_vm6, %v719_v18, %v715_v0  ;;  %v730_v24 = vsel %vm729_vm11, %v6005_v57, %v726_v15  ;;  %v756_v50 = vadd.f32 %v6009_v14, %v755_v37  ;;  %v815_v18 = vmul.f32 1.442695, %v809_v31 }
 0x335   :  { %v767_v16 = vmul.f32 1.0614054, %v720_v3  ;;  %v735_v12 = vsel %vm6608_vm8, %v734_v22, %v730_v24  ;;  %v745_v2 = vsel %vm744_vm14, %v6007_v56, %v741_v17  ;;  %v810_v0 = vsub.f32 0.0, %v806_v13  ;;  %v6011_v22 = vpop.eup %6010 }
 0x336   :  { %v768_v4 = vmul.f32 1.0614054, %v735_v12  ;;  %v750_v52 = vsel %vm747_vm15, %v749_v42, %v745_v2  ;;  %v760_v27 = vsel %vm759_vm1, %v6009_v14, %v756_v50  ;;  %6014 = vpow2.f32 %v815_v18  ;;  %v6013_v25 = vpop.eup %6012 }
 0x337   :  { %v771_v39 = vadd.f32 -1.4531521, %v767_v16  ;;  %v769_v49 = vmul.f32 1.0614054, %v750_v52  ;;  %v765_v8 = vsel %vm762_vm2, %v764_v53, %v760_v27  ;;  %v839_v50 = vmul.f32 0.5, %v6570_v43 }
 0x338   :  { %v772_v30 = vadd.f32 -1.4531521, %v768_v4  ;;  %v770_v60 = vmul.f32 1.0614054, %v765_v8  ;;  %vm830_vm6 = vcmp.lt.f32.partialorder %v6588_v45, 0.0 }
 0x339   :  { %v775_v36 = vmul.f32 %v771_v39, %v720_v3  ;;  %v773_v59 = vadd.f32 -1.4531521, %v769_v49  ;;  %v817_v39 = vmul.f32 1.442695, %v810_v0 }
 0x33a   :  { %v776_v54 = vmul.f32 %v772_v30, %v735_v12  ;;  %v774_v6 = vadd.f32 -1.4531521, %v770_v60 }
 0x33b   :  { %v779_v57 = vadd.f32 1.4214138, %v775_v36  ;;  %v777_v46 = vmul.f32 %v773_v59, %v750_v52  ;;  %6016 = vpow2.f32 %v817_v39 }
 0x33c   :  { %v780_v32 = vadd.f32 1.4214138, %v776_v54  ;;  %v778_v9 = vmul.f32 %v774_v6, %v765_v8  ;;  %v6015_v42 = vpop.eup %6014 }
 0x33d   :  { %v783_v61 = vmul.f32 %v779_v57, %v720_v3  ;;  %v781_v58 = vadd.f32 1.4214138, %v777_v46  ;;  %v842_v46 = vmul.f32 0.5, %v6576_v41 }
 0x33e   :  { %v784_v63 = vmul.f32 %v780_v32, %v735_v12  ;;  %v782_v19 = vadd.f32 1.4214138, %v778_v9 }
 0x33f   :  { %v787_v56 = vadd.f32 -0.28449672, %v783_v61  ;;  %v785_v10 = vmul.f32 %v781_v58, %v750_v52 }
 0x340   :  { %v788_v7 = vadd.f32 -0.28449672, %v784_v63  ;;  %v786_v21 = vmul.f32 %v782_v19, %v765_v8 }
 0x341   :  { %v791_v11 = vmul.f32 %v787_v56, %v720_v3  ;;  %v789_v20 = vadd.f32 -0.28449672, %v785_v10  ;;  %v5931_v56 = vld [vmem:[#allocation5 + $0x9] ss:$0 sm:$0xff] }
 0x342   :  { %v792_v14 = vmul.f32 %v788_v7, %v735_v12  ;;  %v790_v38 = vadd.f32 -0.28449672, %v786_v21 }
 0x343   :  { %v795_v15 = vadd.f32 0.2548296, %v791_v11  ;;  %v793_v24 = vmul.f32 %v789_v20, %v750_v52 }
 0x344   :  { %v796_v33 = vadd.f32 0.2548296, %v792_v14  ;;  %v794_v4 = vmul.f32 %v790_v38, %v765_v8 }
 0x345   :  { %v799_v29 = vmul.f32 %v795_v15, %v720_v3  ;;  %v797_v34 = vadd.f32 0.2548296, %v793_v24 }
 0x346   :  { %v800_v23 = vmul.f32 %v796_v33, %v735_v12  ;;  %v798_v12 = vadd.f32 0.2548296, %v794_v4 }
 0x347   :  { %v819_v16 = vmul.f32 %v6011_v22, %v799_v29  ;;  %v801_v37 = vmul.f32 %v797_v34, %v750_v52  ;;  %v6017_v52 = vpop.eup %6016 }
 0x348   :  { %v820_v28 = vmul.f32 %v6013_v25, %v800_v23  ;;  %v802_v49 = vmul.f32 %v798_v12, %v765_v8 }
 0x349   :  { %v823_v51 = vsub.f32 1.0, %v819_v16  ;;  %v821_v2 = vmul.f32 %v6015_v42, %v801_v37  ;;  %v1127_v37 = vld [vmem:[#allocation2 + $0x230] sm:$0xff] }
 0x34a   :  { %v824_v17 = vsub.f32 1.0, %v820_v28  ;;  %v822_v55 = vmul.f32 %v6017_v52, %v802_v49  ;;  %v1120_v49 = vld [vmem:[#allocation2 + $0x1f8] sm:$0xff]  ;;  %v1119_v52 = vld [vmem:[#allocation2 + $0x1f0] sm:$0xff] }
 0x34b   :  { %v831_v40 = vsub.f32 0.0, %v823_v51  ;;  %v825_v54 = vsub.f32 1.0, %v821_v2  ;;  %v1124_v2 = vld [vmem:[#allocation2 + $0x218] sm:$0xff] }
 0x34c   :  { %v832_v30 = vsub.f32 0.0, %v824_v17  ;;  %v826_v43 = vsub.f32 1.0, %v822_v55  ;;  %v1117_v55 = vld [vmem:[#allocation2 + $0x1e0] sm:$0xff] }
 0x34d   :  { %v835_v3 = vsel %vm827_vm3, %v831_v40, %v823_v51  ;;  %v833_v57 = vsub.f32 0.0, %v825_v54  ;;  %v1126_v40 = vld [vmem:[#allocation2 + $0x228] sm:$0xff] }
 0x34e   :  { %v843_v36 = vadd.f32 1.0, %v835_v3  ;;  %v836_v53 = vsel %vm828_vm4, %v832_v30, %v824_v17  ;;  %v834_v61 = vsub.f32 0.0, %v826_v43  ;;  %v1128_v17 = vld [vmem:[#allocation2 + $0x238] sm:$0xff]  ;;  %v1125_v3 = vld [vmem:[#allocation2 + $0x220] sm:$0xff] }
 0x34f   :  { %v844_v27 = vadd.f32 1.0, %v836_v53  ;;  %v837_v59 = vsel %vm829_vm5, %v833_v57, %v825_v54  ;;  %1131 = vmatpush.msrb.mxu0 %v1128_v17  ;;  %v1121_v54 = vld [vmem:[#allocation2 + $0x200] sm:$0xff] }
 0x350   :  { %v847_v26 = vmul.f32 %v843_v36, %v839_v50  ;;  %v845_v60 = vadd.f32 1.0, %v837_v59  ;;  %v838_v8 = vsel %vm830_vm6, %v834_v61, %v826_v43  ;;  %v1123_v50 = vld [vmem:[#allocation2 + $0x210] sm:$0xff]  ;;  %v1114_v61 = vld [vmem:[#allocation2 + $0x1c8] sm:$0xff] }
 0x351   :  { %v848_v32 = vmul.f32 %v844_v27, %v840_v5  ;;  %v846_v63 = vadd.f32 1.0, %v838_v8  ;;  %1132 = vmatpush.msrb.mxu0 %v1127_v37  ;;  %v1118_v27 = vld [vmem:[#allocation2 + $0x1e8] sm:$0xff]  ;;  %v1115_v43 = vld [vmem:[#allocation2 + $0x1d0] sm:$0xff] }
 0x352   :  { %885 = vmatmul.f32.vlgmr.msra.gmra.mxu3 %v847_v26  ;;  %v849_v62 = vmul.f32 %v845_v60, %v841_v47  ;;  %v1122_v26 = vld [vmem:[#allocation2 + $0x208] sm:$0xff] }
 0x353   :  { %v850_v31 = vmul.f32 %v846_v63, %v842_v46  ;;  %1133 = vmatpush.msrb.mxu0 %v1126_v40  ;;  %v5932_v63 = vld [vmem:[#allocation5 + $0xa] ss:$0 sm:$0xff] }
 0x355   :  { %1134 = vmatpush.msrb.mxu0 %v1125_v3 }
 0x357   :  { %1135 = vmatpush.msrb.mxu0 %v1124_v2 }
 0x359   :  { %1136 = vmatpush.msrb.mxu0 %v1123_v50 }
 0x35a   :  { %888 = vmatmul.f32.gmra.mxu3 %v848_v32  ;;  %v1116_v32 = vld [vmem:[#allocation2 + $0x1d8] sm:$0xff] }
 0x35b   :  { %1137 = vmatpush.msrb.mxu0 %v1122_v26 }
 0x35d   :  { %1138 = vmatpush.msrb.mxu0 %v1121_v54 }
 0x35f   :  { %1139 = vmatpush.msrb.mxu0 %v1120_v49 }
 0x361   :  { %1140 = vmatpush.msrb.mxu0 %v1119_v52 }
 0x362   :  { %891 = vmatmul.f32.gmra.mxu3 %v849_v62  ;;  %v1113_v62 = vld [vmem:[#allocation2 + $0x1c0] sm:$0xff] }
 0x363   :  { %1141 = vmatpush.msrb.mxu0 %v1118_v27 }
 0x365   :  { %1142 = vmatpush.msrb.mxu0 %v1117_v55 }
 0x367   :  { %1143 = vmatpush.msrb.mxu0 %v1116_v32 }
 0x369   :  { %1144 = vmatpush.msrb.mxu0 %v1115_v43 }
 0x36a   :  { %894 = vmatmul.f32.gmra.mxu3 %v850_v31 }
 0x36b   :  { %1145 = vmatpush.msrb.mxu0 %v1114_v61 }
 0x36d   :  { %1146 = vmatpush.msrb.mxu0 %v1113_v62 }
 0x3d5   :  { %v886_v1 = vpop.f32.mrf.mxu3 }
 0x3d6   :  { %v887_v58 = vadd.f32 %v5931_v56, %v886_v1 }
 0x3dd   :  { %v889_v6 = vpop.f32.mrf.mxu3 }
 0x3de   :  { %v890_v7 = vadd.f32 %v5931_v56, %v889_v6  ;;  %v5933_v6 = vld [vmem:[#allocation5 + $0xb] ss:$0 sm:$0xff] }
 0x3e0   :  { %v900_v11 = vadd.f32 %v890_v7, %v887_v58 }
 0x3e5   :  { %v892_v48 = vpop.f32.mrf.mxu3 }
 0x3e6   :  { %v893_v9 = vadd.f32 %v5931_v56, %v892_v48 }
 0x3e8   :  { %v901_v44 = vadd.f32 %v900_v11, %v893_v9 }
 0x3ed   :  { %v895_v13 = vpop.f32.mrf.mxu3 }
 0x3ee   :  { %v896_v14 = vadd.f32 %v5931_v56, %v895_v13 }
 0x3f0   :  { %v902_v10 = vadd.f32 %v901_v44, %v896_v14 }
 0x3f2   :  { %v903_v45 = vrot.slane %v902_v10, 4 }
 0x3f4   :  { %v904_v18 = vadd.f32 %v903_v45, %v902_v10 }
 0x3f6   :  { %v905_v19 = vrot.slane %v904_v18, 2 }
 0x3f8   :  { %v906_v15 = vadd.f32 %v905_v19, %v904_v18 }
 0x3fa   :  { %v907_v33 = vrot.slane %v906_v15, 1 }
 0x3fc   :  { %v908_v41 = vadd.f32 %v907_v33, %v906_v15 }
 0x3fe   :  { %v909_v20 = vmul.f32 %v908_v41, %v6385_v35 }
 0x400   :  { %v6637_v21 = vsub.f32 %v887_v58, %v909_v20  ;;  %v6639_v29 = vsub.f32 %v890_v7, %v909_v20  ;;  %v6641_v0 = vsub.f32 %v893_v9, %v909_v20  ;;  %v913_v22 = vsub.f32 %v896_v14, %v909_v20 }
 0x402   :  { %v914_v23 = vmul.f32 %v6637_v21, %v6637_v21  ;;  %v915_v24 = vmul.f32 %v6639_v29, %v6639_v29  ;;  %v916_v38 = vmul.f32 %v6641_v0, %v6641_v0  ;;  %v917_v16 = vmul.f32 %v913_v22, %v913_v22 }
 0x404   :  { %v918_v25 = vadd.f32 %v915_v24, %v914_v23 }
 0x406   :  { %v919_v28 = vadd.f32 %v918_v25, %v916_v38 }
 0x408   :  { %v920_v34 = vadd.f32 %v919_v28, %v917_v16 }
 0x40a   :  { %v921_v51 = vrot.slane %v920_v34, 4 }
 0x40c   :  { %v922_v4 = vadd.f32 %v921_v51, %v920_v34 }
 0x40e   :  { %v923_v39 = vrot.slane %v922_v4, 2 }
 0x410   :  { %v924_v42 = vadd.f32 %v923_v39, %v922_v4 }
 0x412   :  { %v925_v30 = vrot.slane %v924_v42, 1 }
 0x414   :  { %v926_v12 = vadd.f32 %v925_v30, %v924_v42 }
 0x416   :  { %v927_v36 = vmul.f32 %v926_v12, %v6385_v35 }
 0x418   :  { %v928_v53 = vadd.f32 1e-05, %v927_v36 }
 0x41a   :  { %6018 = vrsqrt.f32 %v928_v53  ;;  %vm935_vm8 = vweird.f32 %v928_v53 }
 0x420   :  { %v6019_v57 = vpop.eup %6018 }
 0x421   :  { %v930_v5 = vmul.f32 %v6019_v57, %v928_v53  ;;  %vm936_vm7 = vweird.f32 %v6019_v57 }
 0x422   :  { %vm937_vm9 = vmor %vm935_vm8, %vm936_vm7 }
 0x423   :  { %v931_v59 = vmul.f32 %v6019_v57, %v930_v5 }
 0x425   :  { %v932_v60 = vmul.f32 0.5, %v931_v59 }
 0x427   :  { %v933_v47 = vsub.f32 1.5, %v932_v60 }
 0x429   :  { %v934_v8 = vmul.f32 %v6019_v57, %v933_v47 }
 0x42b   :  { %v938_v46 = vsel %vm937_vm9, %v6019_v57, %v934_v8 }
 0x42c   :  { %v942_v31 = vmul.f32 %v938_v46, %v913_v22  ;;  %v939_v1 = vmul.f32 %v938_v46, %v6637_v21  ;;  %v940_v48 = vmul.f32 %v938_v46, %v6639_v29  ;;  %v941_v56 = vmul.f32 %v938_v46, %v6641_v0 }
 0x42e   :  { %v944_v7 = vmul.f32 %v5932_v63, %v939_v1  ;;  %v945_v58 = vmul.f32 %v5932_v63, %v940_v48  ;;  %v946_v9 = vmul.f32 %v5932_v63, %v941_v56  ;;  %v947_v11 = vmul.f32 %v5932_v63, %v942_v31 }
 0x430   :  { %v6653_v13 = vadd.f32 %v5933_v6, %v944_v7  ;;  %v6655_v44 = vadd.f32 %v5933_v6, %v945_v58  ;;  %v6657_v14 = vadd.f32 %v5933_v6, %v946_v9  ;;  %v6659_v10 = vadd.f32 %v5933_v6, %v947_v11 }
 0x432   :  { %v6662_v45 = vmul.f32 0.70710677, %v6653_v13  ;;  %v6665_v18 = vmul.f32 0.70710677, %v6655_v44  ;;  %v6668_v19 = vmul.f32 0.70710677, %v6657_v14 }
 0x433   :  { %v6671_v15 = vmul.f32 0.70710677, %v6659_v10 }
 0x434   :  { %v957_v33 = vand.u32 2147483647, %v6662_v45  ;;  %v958_v41 = vand.u32 2147483647, %v6665_v18  ;;  %v959_v20 = vand.u32 2147483647, %v6668_v19 }
 0x435   :  { %v6677_v21 = vand.u32 2147483647, %v6671_v15 }
 0x436   :  { %v961_v29 = vmul.f32 0.3275911, %v957_v33  ;;  %v962_v0 = vmul.f32 0.3275911, %v958_v41  ;;  %v963_v22 = vmul.f32 0.3275911, %v959_v20  ;;  %v1065_v40 = vmul.f32 %v957_v33, %v957_v33 }
 0x437   :  { %v964_v38 = vmul.f32 0.3275911, %v6677_v21  ;;  %v6683_v30 = vmul.f32 %v958_v41, %v958_v41  ;;  %v6685_v2 = vmul.f32 %v959_v20, %v959_v20 }
 0x438   :  { %v965_v23 = vadd.f32 1.0, %v961_v29  ;;  %v966_v24 = vadd.f32 1.0, %v962_v0  ;;  %v967_v25 = vadd.f32 1.0, %v963_v22  ;;  %v1069_v9 = vsub.f32 0.0, %v1065_v40 }
 0x439   :  { %v6680_v16 = vadd.f32 1.0, %v964_v38  ;;  %v1070_v0 = vsub.f32 0.0, %v6683_v30 }
 0x43a   :  { %6020 = vrcp.f32 %v965_v23  ;;  %v978_v4 = vand.u32 2147483647, %v965_v23  ;;  %v980_v39 = vand.u32 2147483648, %v965_v23  ;;  %v993_v42 = vand.u32 2147483647, %v966_v24 }
 0x43b   :  { %6022 = vrcp.f32 %v966_v24  ;;  %vm974_vm10 = vweird.f32 %v965_v23  ;;  %vm989_vm12 = vweird.f32 %v966_v24  ;;  %v995_v36 = vand.u32 2147483648, %v966_v24 }
 0x43c   :  { %6024 = vrcp.f32 %v967_v25  ;;  %vm6687_vm13 = vcmp.eq.f32.partialorder %v978_v4, 8.507059e+37  ;;  %v981_v27 = vor.u32 1.1754944e-38, %v980_v39  ;;  %vm6691_vm15 = vcmp.eq.f32.partialorder %v993_v42, 8.507059e+37 }
 0x43d   :  { %6026 = vrcp.f32 %v6680_v16  ;;  %vm1004_vm0 = vweird.f32 %v967_v25  ;;  %v1008_v32 = vand.u32 2147483647, %v967_v25  ;;  %v996_v60 = vor.u32 1.1754944e-38, %v995_v36 }
 0x43e   :  { %v1010_v61 = vand.u32 2147483648, %v967_v25  ;;  %v1023_v1 = vand.u32 2147483647, %v6680_v16  ;;  %v1025_v6 = vand.u32 2147483648, %v6680_v16  ;;  %vm1019_vm7 = vweird.f32 %v6680_v16 }
 0x43f   :  { %vm1009_vm6 = vcmp.eq.f32.partialorder %v1008_v32, 8.507059e+37  ;;  %v1075_v40 = vmul.f32 1.442695, %v1070_v0 }
 0x440   :  { %v6021_v28 = vpop.eup %6020  ;;  %v1011_v11 = vor.u32 1.1754944e-38, %v1010_v61  ;;  %vm1024_vm9 = vcmp.eq.f32.partialorder %v1023_v1, 8.507059e+37 }
 0x441   :  { %v6023_v34 = vpop.eup %6022  ;;  %v970_v51 = vmul.f32 %v6021_v28, %v965_v23  ;;  %vm975_vm11 = vweird.f32 %v6021_v28  ;;  %v1026_v23 = vor.u32 1.1754944e-38, %v1025_v6 }
 0x442   :  { %v985_v17 = vmul.f32 %v6023_v34, %v966_v24  ;;  %v6025_v12 = vpop.eup %6024  ;;  %vm990_vm14 = vweird.f32 %v6023_v34  ;;  %vm976_vm1 = vmor %vm974_vm10, %vm975_vm11  ;;  %vm1089_vm10 = vcmp.lt.f32.partialorder %v6662_v45, 0.0  ;;  %vm1090_vm11 = vcmp.lt.f32.partialorder %v6665_v18, 0.0 }
 0x443   :  { %v971_v37 = vsub.f32 1.0, %v970_v51  ;;  %v1000_v54 = vmul.f32 %v6025_v12, %v967_v25  ;;  %v6027_v49 = vpop.eup %6026  ;;  %vm991_vm2 = vmor %vm989_vm12, %vm990_vm14  ;;  %vm1005_vm3 = vweird.f32 %v6025_v12  ;;  %v1073_v25 = vmul.f32 1.442695, %v1069_v9 }
 0x444   :  { %v986_v3 = vsub.f32 1.0, %v985_v17  ;;  %v1015_v59 = vmul.f32 %v6027_v49, %v6680_v16  ;;  %vm1020_vm4 = vweird.f32 %v6027_v49  ;;  %vm1006_vm5 = vmor %vm1004_vm0, %vm1005_vm3  ;;  %v1102_v45 = vmul.f32 0.5, %v6655_v44 }
 0x445   :  { %v972_v50 = vmul.f32 %v6021_v28, %v971_v37  ;;  %v1001_v5 = vsub.f32 1.0, %v1000_v54  ;;  %vm1021_vm8 = vmor %vm1019_vm7, %vm1020_vm4  ;;  %6028 = vpow2.f32 %v1073_v25  ;;  %v1068_v54 = vmul.f32 %v6677_v21, %v6677_v21 }
 0x446   :  { %v987_v53 = vmul.f32 %v6023_v34, %v986_v3  ;;  %v1016_v63 = vsub.f32 1.0, %v1015_v59  ;;  %v1071_v3 = vsub.f32 0.0, %v6685_v2  ;;  %6030 = vpow2.f32 %v1075_v40 }
 0x447   :  { %v973_v52 = vadd.f32 %v6021_v28, %v972_v50  ;;  %v1002_v8 = vmul.f32 %v6025_v12, %v1001_v5  ;;  %vm1091_vm12 = vcmp.lt.f32.partialorder %v6668_v19, 0.0  ;;  %v1103_v18 = vmul.f32 0.5, %v6657_v14 }
 0x448   :  { %v988_v55 = vadd.f32 %v6023_v34, %v987_v53  ;;  %v1017_v7 = vmul.f32 %v6027_v49, %v1016_v63 }
 0x449   :  { %v977_v43 = vsel %vm976_vm1, %v6021_v28, %v973_v52  ;;  %v1003_v56 = vadd.f32 %v6025_v12, %v1002_v8 }
 0x44a   :  { %v982_v47 = vsel %vm6687_vm13, %v981_v27, %v977_v43  ;;  %v992_v62 = vsel %vm991_vm2, %v6023_v34, %v988_v55  ;;  %v1018_v20 = vadd.f32 %v6027_v49, %v1017_v7  ;;  %v1077_v27 = vmul.f32 1.442695, %v1071_v3 }
 0x44b   :  { %v1029_v46 = vmul.f32 1.0614054, %v982_v47  ;;  %v997_v31 = vsel %vm6691_vm15, %v996_v60, %v992_v62  ;;  %v1007_v41 = vsel %vm1006_vm5, %v6025_v12, %v1003_v56  ;;  %v1072_v43 = vsub.f32 0.0, %v1068_v54  ;;  %v6029_v60 = vpop.eup %6028 }
 0x44c   :  { %v1030_v48 = vmul.f32 1.0614054, %v997_v31  ;;  %v1012_v22 = vsel %vm1009_vm6, %v1011_v11, %v1007_v41  ;;  %v1022_v28 = vsel %vm1021_vm8, %v6027_v49, %v1018_v20  ;;  %6032 = vpow2.f32 %v1077_v27  ;;  %v6031_v63 = vpop.eup %6030 }
 0x44d   :  { %v1033_v58 = vadd.f32 -1.4531521, %v1029_v46  ;;  %v1031_v38 = vmul.f32 1.0614054, %v1012_v22  ;;  %v1027_v51 = vsel %vm1024_vm9, %v1026_v23, %v1022_v28  ;;  %v1101_v20 = vmul.f32 0.5, %v6653_v13 }
 0x44e   :  { %v1034_v33 = vadd.f32 -1.4531521, %v1030_v48  ;;  %v1032_v37 = vmul.f32 1.0614054, %v1027_v51  ;;  %vm1092_vm13 = vcmp.lt.f32.partialorder %v6671_v15, 0.0 }
 0x44f   :  { %v1037_v29 = vmul.f32 %v1033_v58, %v982_v47  ;;  %v1035_v17 = vadd.f32 -1.4531521, %v1031_v38  ;;  %v1079_v58 = vmul.f32 1.442695, %v1072_v43 }
 0x450   :  { %v1038_v24 = vmul.f32 %v1034_v33, %v997_v31  ;;  %v1036_v30 = vadd.f32 -1.4531521, %v1032_v37 }
 0x451   :  { %v1041_v34 = vadd.f32 1.4214138, %v1037_v29  ;;  %v1039_v16 = vmul.f32 %v1035_v17, %v1012_v22  ;;  %6034 = vpow2.f32 %v1079_v58 }
 0x452   :  { %v1042_v4 = vadd.f32 1.4214138, %v1038_v24  ;;  %v1040_v26 = vmul.f32 %v1036_v30, %v1027_v51  ;;  %v6033_v11 = vpop.eup %6032 }
 0x453   :  { %v1045_v39 = vmul.f32 %v1041_v34, %v982_v47  ;;  %v1043_v36 = vadd.f32 1.4214138, %v1039_v16  ;;  %v1104_v16 = vmul.f32 0.5, %v6659_v10 }
 0x454   :  { %v1046_v42 = vmul.f32 %v1042_v4, %v997_v31  ;;  %v1044_v57 = vadd.f32 1.4214138, %v1040_v26 }
 0x455   :  { %v1049_v12 = vadd.f32 -0.28449672, %v1045_v39  ;;  %v1047_v52 = vmul.f32 %v1043_v36, %v1012_v22 }
 0x456   :  { %v1050_v50 = vadd.f32 -0.28449672, %v1046_v42  ;;  %v1048_v59 = vmul.f32 %v1044_v57, %v1027_v51 }
 0x457   :  { %v1053_v53 = vmul.f32 %v1049_v12, %v982_v47  ;;  %v1051_v32 = vadd.f32 -0.28449672, %v1047_v52  ;;  %v5934_v12 = vld [vmem:[#allocation5 + $0xc] ss:$0 sm:$0xff] }
 0x458   :  { %v1054_v49 = vmul.f32 %v1050_v50, %v997_v31  ;;  %v1052_v8 = vadd.f32 -0.28449672, %v1048_v59 }
 0x459   :  { %v1057_v55 = vadd.f32 0.2548296, %v1053_v53  ;;  %v1055_v62 = vmul.f32 %v1051_v32, %v1012_v22 }
 0x45a   :  { %v1058_v5 = vadd.f32 0.2548296, %v1054_v49  ;;  %v1056_v48 = vmul.f32 %v1052_v8, %v1027_v51 }
 0x45b   :  { %v1061_v2 = vmul.f32 %v1057_v55, %v982_v47  ;;  %v1059_v6 = vadd.f32 0.2548296, %v1055_v62 }
 0x45c   :  { %v1062_v61 = vmul.f32 %v1058_v5, %v997_v31  ;;  %v1060_v31 = vadd.f32 0.2548296, %v1056_v48 }
 0x45d   :  { %v1081_v46 = vmul.f32 %v6029_v60, %v1061_v2  ;;  %v1063_v7 = vmul.f32 %v1059_v6, %v1012_v22  ;;  %v6035_v22 = vpop.eup %6034 }
 0x45e   :  { %v1082_v1 = vmul.f32 %v6031_v63, %v1062_v61  ;;  %v1064_v38 = vmul.f32 %v1060_v31, %v1027_v51 }
 0x45f   :  { %v1085_v21 = vsub.f32 1.0, %v1081_v46  ;;  %v1083_v41 = vmul.f32 %v6033_v11, %v1063_v7  ;;  %v1389_v7 = vld [vmem:[#allocation2 + $0x2b0] sm:$0xff] }
 0x460   :  { %v1086_v56 = vsub.f32 1.0, %v1082_v1  ;;  %v1084_v25 = vmul.f32 %v6035_v22, %v1064_v38  ;;  %v1382_v38 = vld [vmem:[#allocation2 + $0x278] sm:$0xff]  ;;  %v1381_v22 = vld [vmem:[#allocation2 + $0x270] sm:$0xff] }
 0x461   :  { %v1093_v9 = vsub.f32 0.0, %v1085_v21  ;;  %v1087_v24 = vsub.f32 1.0, %v1083_v41  ;;  %v1386_v41 = vld [vmem:[#allocation2 + $0x298] sm:$0xff] }
 0x462   :  { %v1094_v33 = vsub.f32 0.0, %v1086_v56  ;;  %v1088_v13 = vsub.f32 1.0, %v1084_v25  ;;  %v1379_v25 = vld [vmem:[#allocation2 + $0x260] sm:$0xff] }
 0x463   :  { %v1097_v47 = vsel %vm1089_vm10, %v1093_v9, %v1085_v21  ;;  %v1095_v34 = vsub.f32 0.0, %v1087_v24  ;;  %v1388_v9 = vld [vmem:[#allocation2 + $0x2a8] sm:$0xff] }
 0x464   :  { %v1105_v29 = vadd.f32 1.0, %v1097_v47  ;;  %v1098_v23 = vsel %vm1090_vm11, %v1094_v33, %v1086_v56  ;;  %v1096_v39 = vsub.f32 0.0, %v1088_v13  ;;  %v1390_v56 = vld [vmem:[#allocation2 + $0x2b8] sm:$0xff]  ;;  %v1387_v47 = vld [vmem:[#allocation2 + $0x2a0] sm:$0xff] }
 0x465   :  { %v1106_v28 = vadd.f32 1.0, %v1098_v23  ;;  %v1099_v17 = vsel %vm1091_vm12, %v1095_v34, %v1087_v24  ;;  %1393 = vmatpush.msrb.mxu1 %v1390_v56  ;;  %v1383_v24 = vld [vmem:[#allocation2 + $0x280] sm:$0xff] }
 0x466   :  { %v1109_v0 = vmul.f32 %v1105_v29, %v1101_v20  ;;  %v1107_v37 = vadd.f32 1.0, %v1099_v17  ;;  %v1100_v51 = vsel %vm1092_vm13, %v1096_v39, %v1088_v13  ;;  %v1385_v20 = vld [vmem:[#allocation2 + $0x290] sm:$0xff]  ;;  %v1376_v39 = vld [vmem:[#allocation2 + $0x248] sm:$0xff] }
 0x467   :  { %v1110_v4 = vmul.f32 %v1106_v28, %v1102_v45  ;;  %v1108_v42 = vadd.f32 1.0, %v1100_v51  ;;  %1394 = vmatpush.msrb.mxu1 %v1389_v7  ;;  %v1380_v28 = vld [vmem:[#allocation2 + $0x268] sm:$0xff]  ;;  %v1377_v13 = vld [vmem:[#allocation2 + $0x250] sm:$0xff] }
 0x468   :  { %1147 = vmatmul.f32.vlgmr.msrb.gmra.mxu0 %v1109_v0  ;;  %v1111_v40 = vmul.f32 %v1107_v37, %v1103_v18  ;;  %v1384_v0 = vld [vmem:[#allocation2 + $0x288] sm:$0xff] }
 0x469   :  { %v1112_v3 = vmul.f32 %v1108_v42, %v1104_v16  ;;  %1395 = vmatpush.msrb.mxu1 %v1388_v9  ;;  %v5935_v42 = vld [vmem:[#allocation5 + $0xd] ss:$0 sm:$0xff] }
 0x46b   :  { %1396 = vmatpush.msrb.mxu1 %v1387_v47 }
 0x46d   :  { %1397 = vmatpush.msrb.mxu1 %v1386_v41 }
 0x46f   :  { %1398 = vmatpush.msrb.mxu1 %v1385_v20 }
 0x470   :  { %1150 = vmatmul.f32.gmra.mxu0 %v1110_v4  ;;  %v1378_v4 = vld [vmem:[#allocation2 + $0x258] sm:$0xff] }
 0x471   :  { %1399 = vmatpush.msrb.mxu1 %v1384_v0 }
 0x473   :  { %1400 = vmatpush.msrb.mxu1 %v1383_v24 }
 0x475   :  { %1401 = vmatpush.msrb.mxu1 %v1382_v38 }
 0x477   :  { %1402 = vmatpush.msrb.mxu1 %v1381_v22 }
 0x478   :  { %1153 = vmatmul.f32.gmra.mxu0 %v1111_v40  ;;  %v1375_v40 = vld [vmem:[#allocation2 + $0x240] sm:$0xff] }
 0x479   :  { %1403 = vmatpush.msrb.mxu1 %v1380_v28 }
 0x47b   :  { %1404 = vmatpush.msrb.mxu1 %v1379_v25 }
 0x47d   :  { %1405 = vmatpush.msrb.mxu1 %v1378_v4 }
 0x47f   :  { %1406 = vmatpush.msrb.mxu1 %v1377_v13 }
 0x480   :  { %1156 = vmatmul.f32.gmra.mxu0 %v1112_v3 }
 0x481   :  { %1407 = vmatpush.msrb.mxu1 %v1376_v39 }
 0x483   :  { %1408 = vmatpush.msrb.mxu1 %v1375_v40 }
 0x4e5   :  { %v1148_v44 = vpop.f32.mrf.mxu0 }
 0x4e6   :  { %v1149_v36 = vadd.f32 %v5934_v12, %v1148_v44 }
 0x4ed   :  { %v1151_v30 = vpop.f32.mrf.mxu0 }
 0x4ee   :  { %v1152_v50 = vadd.f32 %v5934_v12, %v1151_v30  ;;  %v5936_v30 = vld [vmem:[#allocation5 + $0xe] ss:$0 sm:$0xff] }
 0x4f0   :  { %v1162_v53 = vadd.f32 %v1152_v50, %v1149_v36 }
 0x4f5   :  { %v1154_v19 = vpop.f32.mrf.mxu0 }
 0x4f6   :  { %v1155_v26 = vadd.f32 %v5934_v12, %v1154_v19 }
 0x4f8   :  { %v1163_v14 = vadd.f32 %v1162_v53, %v1155_v26 }
 0x4fd   :  { %v1157_v54 = vpop.f32.mrf.mxu0 }
 0x4fe   :  { %v1158_v49 = vadd.f32 %v5934_v12, %v1157_v54 }
 0x500   :  { %v1164_v52 = vadd.f32 %v1163_v14, %v1158_v49 }
 0x502   :  { %v1165_v15 = vrot.slane %v1164_v52, 4 }
 0x504   :  { %v1166_v27 = vadd.f32 %v1165_v15, %v1164_v52 }
 0x506   :  { %v1167_v57 = vrot.slane %v1166_v27, 2 }
 0x508   :  { %v1168_v55 = vadd.f32 %v1167_v57, %v1166_v27 }
 0x50a   :  { %v1169_v5 = vrot.slane %v1168_v55, 1 }
 0x50c   :  { %v1170_v10 = vadd.f32 %v1169_v5, %v1168_v55 }
 0x50e   :  { %v1171_v32 = vmul.f32 %v1170_v10, %v6385_v35 }
 0x510   :  { %v6720_v59 = vsub.f32 %v1149_v36, %v1171_v32  ;;  %v6722_v2 = vsub.f32 %v1152_v50, %v1171_v32  ;;  %v6724_v43 = vsub.f32 %v1155_v26, %v1171_v32  ;;  %v1175_v60 = vsub.f32 %v1158_v49, %v1171_v32 }
 0x512   :  { %v1176_v61 = vmul.f32 %v6720_v59, %v6720_v59  ;;  %v1177_v62 = vmul.f32 %v6722_v2, %v6722_v2  ;;  %v1178_v8 = vmul.f32 %v6724_v43, %v6724_v43  ;;  %v1179_v46 = vmul.f32 %v1175_v60, %v1175_v60 }
 0x514   :  { %v1180_v63 = vadd.f32 %v1177_v62, %v1176_v61 }
 0x516   :  { %v1181_v1 = vadd.f32 %v1180_v63, %v1178_v8 }
 0x518   :  { %v1182_v6 = vadd.f32 %v1181_v1, %v1179_v46 }
 0x51a   :  { %v1183_v21 = vrot.slane %v1182_v6, 4 }
 0x51c   :  { %v1184_v48 = vadd.f32 %v1183_v21, %v1182_v6 }
 0x51e   :  { %v1185_v58 = vrot.slane %v1184_v48, 2 }
 0x520   :  { %v1186_v11 = vadd.f32 %v1185_v58, %v1184_v48 }
 0x522   :  { %v1187_v33 = vrot.slane %v1186_v11, 1 }
 0x524   :  { %v1188_v31 = vadd.f32 %v1187_v33, %v1186_v11 }
 0x526   :  { %v1189_v29 = vmul.f32 %v1188_v31, %v6385_v35 }
 0x528   :  { %v1190_v23 = vadd.f32 1e-05, %v1189_v29 }
 0x52a   :  { %6036 = vrsqrt.f32 %v1190_v23  ;;  %vm1197_vm15 = vweird.f32 %v1190_v23 }
 0x530   :  { %v6037_v34 = vpop.eup %6036 }
 0x531   :  { %v1192_v45 = vmul.f32 %v6037_v34, %v1190_v23  ;;  %vm1198_vm14 = vweird.f32 %v6037_v34 }
 0x532   :  { %vm1199_vm0 = vmor %vm1197_vm15, %vm1198_vm14 }
 0x533   :  { %v1193_v17 = vmul.f32 %v6037_v34, %v1192_v45 }
 0x535   :  { %v1194_v37 = vmul.f32 0.5, %v1193_v17 }
 0x537   :  { %v1195_v18 = vsub.f32 1.5, %v1194_v37 }
 0x539   :  { %v1196_v51 = vmul.f32 %v6037_v34, %v1195_v18 }
 0x53b   :  { %v1200_v16 = vsel %vm1199_vm0, %v6037_v34, %v1196_v51 }
 0x53c   :  { %v1204_v3 = vmul.f32 %v1200_v16, %v1175_v60  ;;  %v1201_v44 = vmul.f32 %v1200_v16, %v6720_v59  ;;  %v1202_v19 = vmul.f32 %v1200_v16, %v6722_v2  ;;  %v1203_v12 = vmul.f32 %v1200_v16, %v6724_v43 }
 0x53e   :  { %v1206_v50 = vmul.f32 %v5935_v42, %v1201_v44  ;;  %v1207_v36 = vmul.f32 %v5935_v42, %v1202_v19  ;;  %v1208_v26 = vmul.f32 %v5935_v42, %v1203_v12  ;;  %v1209_v53 = vmul.f32 %v5935_v42, %v1204_v3 }
 0x540   :  { %v6736_v54 = vadd.f32 %v5936_v30, %v1206_v50  ;;  %v6738_v14 = vadd.f32 %v5936_v30, %v1207_v36  ;;  %v6740_v49 = vadd.f32 %v5936_v30, %v1208_v26  ;;  %v6742_v52 = vadd.f32 %v5936_v30, %v1209_v53 }
 0x542   :  { %v6745_v15 = vmul.f32 0.70710677, %v6736_v54  ;;  %v6748_v27 = vmul.f32 0.70710677, %v6738_v14  ;;  %v6751_v57 = vmul.f32 0.70710677, %v6740_v49 }
 0x543   :  { %v6754_v55 = vmul.f32 0.70710677, %v6742_v52 }
 0x544   :  { %v1219_v5 = vand.u32 2147483647, %v6745_v15  ;;  %v1220_v10 = vand.u32 2147483647, %v6748_v27  ;;  %v1221_v32 = vand.u32 2147483647, %v6751_v57 }
 0x545   :  { %v6760_v59 = vand.u32 2147483647, %v6754_v55 }
 0x546   :  { %v1223_v2 = vmul.f32 0.3275911, %v1219_v5  ;;  %v1224_v43 = vmul.f32 0.3275911, %v1220_v10  ;;  %v1225_v60 = vmul.f32 0.3275911, %v1221_v32  ;;  %v1327_v9 = vmul.f32 %v1219_v5, %v1219_v5 }
 0x547   :  { %v1226_v8 = vmul.f32 0.3275911, %v6760_v59  ;;  %v6766_v33 = vmul.f32 %v1220_v10, %v1220_v10  ;;  %v6768_v41 = vmul.f32 %v1221_v32, %v1221_v32 }
 0x548   :  { %v1227_v61 = vadd.f32 1.0, %v1223_v2  ;;  %v1228_v62 = vadd.f32 1.0, %v1224_v43  ;;  %v1229_v63 = vadd.f32 1.0, %v1225_v60  ;;  %v1331_v26 = vsub.f32 0.0, %v1327_v9 }
 0x549   :  { %v6763_v46 = vadd.f32 1.0, %v1226_v8  ;;  %v1332_v43 = vsub.f32 0.0, %v6766_v33 }
 0x54a   :  { %6038 = vrcp.f32 %v1227_v61  ;;  %v1240_v48 = vand.u32 2147483647, %v1227_v61  ;;  %v1242_v58 = vand.u32 2147483648, %v1227_v61  ;;  %v1255_v11 = vand.u32 2147483647, %v1228_v62 }
 0x54b   :  { %6040 = vrcp.f32 %v1228_v62  ;;  %vm1236_vm1 = vweird.f32 %v1227_v61  ;;  %vm1251_vm3 = vweird.f32 %v1228_v62  ;;  %v1257_v29 = vand.u32 2147483648, %v1228_v62 }
 0x54c   :  { %6042 = vrcp.f32 %v1229_v63  ;;  %vm6770_vm4 = vcmp.eq.f32.partialorder %v1240_v48, 8.507059e+37  ;;  %v1243_v28 = vor.u32 1.1754944e-38, %v1242_v58  ;;  %vm6774_vm6 = vcmp.eq.f32.partialorder %v1255_v11, 8.507059e+37 }
 0x54d   :  { %6044 = vrcp.f32 %v6763_v46  ;;  %vm1266_vm7 = vweird.f32 %v1229_v63  ;;  %v1270_v4 = vand.u32 2147483647, %v1229_v63  ;;  %v1258_v37 = vor.u32 1.1754944e-38, %v1257_v29 }
 0x54e   :  { %v1272_v39 = vand.u32 2147483648, %v1229_v63  ;;  %v1285_v44 = vand.u32 2147483647, %v6763_v46  ;;  %v1287_v30 = vand.u32 2147483648, %v6763_v46  ;;  %vm1281_vm14 = vweird.f32 %v6763_v46 }
 0x54f   :  { %vm1271_vm13 = vcmp.eq.f32.partialorder %v1270_v4, 8.507059e+37  ;;  %v1337_v9 = vmul.f32 1.442695, %v1332_v43 }
 0x550   :  { %v6039_v1 = vpop.eup %6038  ;;  %v1273_v53 = vor.u32 1.1754944e-38, %v1272_v39  ;;  %vm1286_vm0 = vcmp.eq.f32.partialorder %v1285_v44, 8.507059e+37 }
 0x551   :  { %v6041_v6 = vpop.eup %6040  ;;  %v1232_v21 = vmul.f32 %v6039_v1, %v1227_v61  ;;  %vm1237_vm2 = vweird.f32 %v6039_v1  ;;  %v1288_v61 = vor.u32 1.1754944e-38, %v1287_v30 }
 0x552   :  { %v1247_v56 = vmul.f32 %v6041_v6, %v1228_v62  ;;  %v6043_v31 = vpop.eup %6042  ;;  %vm1252_vm5 = vweird.f32 %v6041_v6  ;;  %vm1238_vm8 = vmor %vm1236_vm1, %vm1237_vm2  ;;  %vm1351_vm1 = vcmp.lt.f32.partialorder %v6745_v15, 0.0  ;;  %vm1352_vm2 = vcmp.lt.f32.partialorder %v6748_v27, 0.0 }
 0x553   :  { %v1233_v7 = vsub.f32 1.0, %v1232_v21  ;;  %v1262_v24 = vmul.f32 %v6043_v31, %v1229_v63  ;;  %v6045_v38 = vpop.eup %6044  ;;  %vm1253_vm9 = vmor %vm1251_vm3, %vm1252_vm5  ;;  %vm1267_vm10 = vweird.f32 %v6043_v31  ;;  %v1335_v63 = vmul.f32 1.442695, %v1331_v26 }
 0x554   :  { %v1248_v47 = vsub.f32 1.0, %v1247_v56  ;;  %v1277_v17 = vmul.f32 %v6045_v38, %v6763_v46  ;;  %vm1282_vm11 = vweird.f32 %v6045_v38  ;;  %vm1268_vm12 = vmor %vm1266_vm7, %vm1267_vm10  ;;  %v1364_v15 = vmul.f32 0.5, %v6738_v14 }
 0x555   :  { %v1234_v20 = vmul.f32 %v6039_v1, %v1233_v7  ;;  %v1263_v45 = vsub.f32 1.0, %v1262_v24  ;;  %vm1283_vm15 = vmor %vm1281_vm14, %vm1282_vm11  ;;  %6046 = vpow2.f32 %v1335_v63  ;;  %v1330_v24 = vmul.f32 %v6760_v59, %v6760_v59 }
 0x556   :  { %v1249_v23 = vmul.f32 %v6041_v6, %v1248_v47  ;;  %v1278_v42 = vsub.f32 1.0, %v1277_v17  ;;  %v1333_v47 = vsub.f32 0.0, %v6768_v41  ;;  %6048 = vpow2.f32 %v1337_v9 }
 0x557   :  { %v1235_v22 = vadd.f32 %v6039_v1, %v1234_v20  ;;  %v1264_v51 = vmul.f32 %v6043_v31, %v1263_v45  ;;  %vm1353_vm3 = vcmp.lt.f32.partialorder %v6751_v57, 0.0  ;;  %v1365_v27 = vmul.f32 0.5, %v6740_v49 }
 0x558   :  { %v1250_v25 = vadd.f32 %v6041_v6, %v1249_v23  ;;  %v1279_v50 = vmul.f32 %v6045_v38, %v1278_v42 }
 0x559   :  { %v1239_v13 = vsel %vm1238_vm8, %v6039_v1, %v1235_v22  ;;  %v1265_v12 = vadd.f32 %v6043_v31, %v1264_v51 }
 0x55a   :  { %v1244_v18 = vsel %vm6770_vm4, %v1243_v28, %v1239_v13  ;;  %v1254_v40 = vsel %vm1253_vm9, %v6041_v6, %v1250_v25  ;;  %v1280_v32 = vadd.f32 %v6045_v38, %v1279_v50  ;;  %v1339_v28 = vmul.f32 1.442695, %v1333_v47 }
 0x55b   :  { %v1291_v16 = vmul.f32 1.0614054, %v1244_v18  ;;  %v1259_v3 = vsel %vm6774_vm6, %v1258_v37, %v1254_v40  ;;  %v1269_v10 = vsel %vm1268_vm12, %v6043_v31, %v1265_v12  ;;  %v1334_v13 = vsub.f32 0.0, %v1330_v24  ;;  %v6047_v37 = vpop.eup %6046 }
 0x55c   :  { %v1292_v19 = vmul.f32 1.0614054, %v1259_v3  ;;  %v1274_v60 = vsel %vm1271_vm13, %v1273_v53, %v1269_v10  ;;  %v1284_v1 = vsel %vm1283_vm15, %v6045_v38, %v1280_v32  ;;  %6050 = vpow2.f32 %v1339_v28  ;;  %v6049_v42 = vpop.eup %6048 }
 0x55d   :  { %v1295_v36 = vadd.f32 -1.4531521, %v1291_v16  ;;  %v1293_v8 = vmul.f32 1.0614054, %v1274_v60  ;;  %v1289_v21 = vsel %vm1286_vm0, %v1288_v61, %v1284_v1  ;;  %v1363_v32 = vmul.f32 0.5, %v6736_v54 }
 0x55e   :  { %v1296_v5 = vadd.f32 -1.4531521, %v1292_v19  ;;  %v1294_v7 = vmul.f32 1.0614054, %v1289_v21  ;;  %vm1354_vm4 = vcmp.lt.f32.partialorder %v6754_v55, 0.0  ;;  %vm1789_vm9 = vcmask 261120  }
 0x55f   :  { %v1299_v2 = vmul.f32 %v1295_v36, %v1244_v18  ;;  %v1297_v56 = vadd.f32 -1.4531521, %v1293_v8  ;;  %v1341_v36 = vmul.f32 1.442695, %v1334_v13  ;;  %v1548_v13 = vld [vmem:[#allocation2 + $0x348] sm:$0xff] }
 0x560   :  { %v1300_v62 = vmul.f32 %v1296_v5, %v1259_v3  ;;  %v1298_v33 = vadd.f32 -1.4531521, %v1294_v7 }
 0x561   :  { %v1303_v6 = vadd.f32 1.4214138, %v1299_v2  ;;  %v1301_v46 = vmul.f32 %v1297_v56, %v1274_v60  ;;  %6052 = vpow2.f32 %v1341_v36 }
 0x562   :  { %v1304_v48 = vadd.f32 1.4214138, %v1300_v62  ;;  %v1302_v0 = vmul.f32 %v1298_v33, %v1289_v21  ;;  %v6051_v53 = vpop.eup %6050 }
 0x563   :  { %v1307_v58 = vmul.f32 %v1303_v6, %v1244_v18  ;;  %v1305_v29 = vadd.f32 1.4214138, %v1301_v46  ;;  %v1366_v46 = vmul.f32 0.5, %v6742_v52  ;;  %v1550_v52 = vld [vmem:[#allocation2 + $0x358] sm:$0xff] }
 0x564   :  { %v1308_v11 = vmul.f32 %v1304_v48, %v1259_v3  ;;  %v1306_v34 = vadd.f32 1.4214138, %v1302_v0  ;;  %1553 = vmatpush.msrb.mxu3 %v1550_v52  ;;  %v1478_v52 = vld [vmem:[#allocation2 + $0x2c8] sm:$0xff] }
 0x565   :  { %v1311_v31 = vadd.f32 -0.28449672, %v1307_v58  ;;  %v1309_v22 = vmul.f32 %v1305_v29, %v1274_v60 }
 0x566   :  { %v1312_v20 = vadd.f32 -0.28449672, %v1308_v11  ;;  %v1310_v17 = vmul.f32 %v1306_v34, %v1289_v21 }
 0x567   :  { %v1315_v23 = vmul.f32 %v1311_v31, %v1244_v18  ;;  %v1313_v4 = vadd.f32 -0.28449672, %v1309_v22  ;;  %v5937_v31 = vld [vmem:[#allocation5 + $0xf] ss:$0 sm:$0xff] }
 0x568   :  { %v1316_v38 = vmul.f32 %v1312_v20, %v1259_v3  ;;  %v1314_v51 = vadd.f32 -0.28449672, %v1310_v17  ;;  %v1549_v17 = vld [vmem:[#allocation2 + $0x350] sm:$0xff] }
 0x569   :  { %v1319_v25 = vadd.f32 0.2548296, %v1315_v23  ;;  %v1317_v40 = vmul.f32 %v1313_v4, %v1274_v60  ;;  %1554 = vmatpush.msrb.mxu3 %v1549_v17  ;;  %v6829_v17 = vld [vmem:[#allocation5 + $0x12] ss:$0 sm:$0xff] }
 0x56a   :  { %v1320_v45 = vadd.f32 0.2548296, %v1316_v38  ;;  %v1318_v19 = vmul.f32 %v1314_v51, %v1289_v21  ;;  %v1547_v51 = vld [vmem:[#allocation2 + $0x340] sm:$0xff] }
 0x56b   :  { %v1323_v41 = vmul.f32 %v1319_v25, %v1244_v18  ;;  %v1321_v30 = vadd.f32 0.2548296, %v1317_v40  ;;  %1555 = vmatpush.msrb.mxu3 %v1548_v13  ;;  %v1757_v13 = vld [vmem:[#allocation2 + $0x3d8] sm:$0xff] }
 0x56c   :  { %v1324_v39 = vmul.f32 %v1320_v45, %v1259_v3  ;;  %v1322_v3 = vadd.f32 0.2548296, %v1318_v19  ;;  %1760 = vmatpush.msra.mxu0 %v1757_v13 }
 0x56d   :  { %v1343_v16 = vmul.f32 %v6047_v37, %v1323_v41  ;;  %v1325_v50 = vmul.f32 %v1321_v30, %v1274_v60  ;;  %v6053_v60 = vpop.eup %6052  ;;  %1556 = vmatpush.msrb.mxu3 %v1547_v51  ;;  %v1546_v30 = vld [vmem:[#allocation2 + $0x338] sm:$0xff] }
 0x56e   :  { %v1344_v44 = vmul.f32 %v6049_v42, %v1324_v39  ;;  %v1326_v8 = vmul.f32 %v1322_v3, %v1289_v21 }
 0x56f   :  { %v1347_v59 = vsub.f32 1.0, %v1343_v16  ;;  %v1345_v10 = vmul.f32 %v6051_v53, %v1325_v50  ;;  %1557 = vmatpush.msrb.mxu3 %v1546_v30 }
 0x570   :  { %v1348_v12 = vsub.f32 1.0, %v1344_v44  ;;  %v1346_v63 = vmul.f32 %v6053_v60, %v1326_v8  ;;  %v1538_v8 = vld [vmem:[#allocation2 + $0x2f8] sm:$0xff] }
 0x571   :  { %v1355_v26 = vsub.f32 0.0, %v1347_v59  ;;  %v1349_v62 = vsub.f32 1.0, %v1345_v10  ;;  %v1542_v10 = vld [vmem:[#allocation2 + $0x318] sm:$0xff] }
 0x572   :  { %v1356_v5 = vsub.f32 0.0, %v1348_v12  ;;  %v1350_v54 = vsub.f32 1.0, %v1346_v63  ;;  %v1536_v63 = vld [vmem:[#allocation2 + $0x2e8] sm:$0xff] }
 0x573   :  { %v1359_v18 = vsel %vm1351_vm1, %v1355_v26, %v1347_v59  ;;  %v1357_v6 = vsub.f32 0.0, %v1349_v62  ;;  %v1544_v26 = vld [vmem:[#allocation2 + $0x328] sm:$0xff] }
 0x574   :  { %v1367_v2 = vadd.f32 1.0, %v1359_v18  ;;  %v1360_v61 = vsel %vm1352_vm2, %v1356_v5, %v1348_v12  ;;  %v1358_v58 = vsub.f32 0.0, %v1350_v54  ;;  %v1545_v12 = vld [vmem:[#allocation2 + $0x330] sm:$0xff]  ;;  %v1543_v18 = vld [vmem:[#allocation2 + $0x320] sm:$0xff] }
 0x575   :  { %v1368_v1 = vadd.f32 1.0, %v1360_v61  ;;  %v1361_v56 = vsel %vm1353_vm3, %v1357_v6, %v1349_v62  ;;  %1558 = vmatpush.msrb.mxu3 %v1545_v12  ;;  %v1539_v61 = vld [vmem:[#allocation2 + $0x300] sm:$0xff] }
 0x576   :  { %v1371_v43 = vmul.f32 %v1367_v2, %v1363_v32  ;;  %v1369_v7 = vadd.f32 1.0, %v1361_v56  ;;  %v1362_v21 = vsel %vm1354_vm4, %v1358_v58, %v1350_v54  ;;  %v1541_v32 = vld [vmem:[#allocation2 + $0x310] sm:$0xff] }
 0x577   :  { %v1372_v48 = vmul.f32 %v1368_v1, %v1364_v15  ;;  %v1370_v11 = vadd.f32 1.0, %v1362_v21  ;;  %1559 = vmatpush.msrb.mxu3 %v1544_v26  ;;  %v1537_v1 = vld [vmem:[#allocation2 + $0x2f0] sm:$0xff] }
 0x578   :  { %1409 = vmatmul.f32.vlgmr.msrb.gmra.mxu1 %v1371_v43  ;;  %v1373_v9 = vmul.f32 %v1369_v7, %v1365_v27  ;;  %v1540_v43 = vld [vmem:[#allocation2 + $0x308] sm:$0xff] }
 0x579   :  { %v1374_v47 = vmul.f32 %v1370_v11, %v1366_v46  ;;  %1560 = vmatpush.msrb.mxu3 %v1543_v18  ;;  %v5938_v11 = vld [vmem:[#allocation5 + $0x10] ss:$0 sm:$0xff] }
 0x57b   :  { %1561 = vmatpush.msrb.mxu3 %v1542_v10 }
 0x57d   :  { %1562 = vmatpush.msrb.mxu3 %v1541_v32 }
 0x57f   :  { %1563 = vmatpush.msrb.mxu3 %v1540_v43 }
 0x580   :  { %1412 = vmatmul.f32.gmra.mxu1 %v1372_v48  ;;  %v1535_v48 = vld [vmem:[#allocation2 + $0x2e0] sm:$0xff] }
 0x581   :  { %1564 = vmatpush.msrb.mxu3 %v1539_v61  ;;  %v1750_v61 = vld [vmem:[#allocation2 + $0x3a0] sm:$0xff] }
 0x583   :  { %1565 = vmatpush.msrb.mxu3 %v1538_v8 }
 0x585   :  { %1566 = vmatpush.msrb.mxu3 %v1537_v1 }
 0x587   :  { %1567 = vmatpush.msrb.mxu3 %v1536_v63 }
 0x588   :  { %1415 = vmatmul.f32.gmra.mxu1 %v1373_v9 }
 0x589   :  { %1568 = vmatpush.msrb.mxu3 %v1535_v48 }
 0x590   :  { %1418 = vmatmul.f32.gmra.mxu1 %v1374_v47 }
 0x5f5   :  { %v1410_v14 = vpop.f32.mrf.mxu1 }
 0x5f6   :  { %v1411_v29 = vadd.f32 %v5937_v31, %v1410_v14  ;;  %v5939_v14 = vld [vmem:[#allocation5 + $0x11] ss:$0 sm:$0xff] }
 0x5fd   :  { %v1413_v33 = vpop.f32.mrf.mxu1 }
 0x5fe   :  { %v1414_v20 = vadd.f32 %v5937_v31, %v1413_v33 }
 0x600   :  { %v1424_v23 = vadd.f32 %v1414_v20, %v1411_v29 }
 0x605   :  { %v1416_v57 = vpop.f32.mrf.mxu1 }
 0x606   :  { %v1417_v0 = vadd.f32 %v5937_v31, %v1416_v57 }
 0x608   :  { %v1425_v49 = vadd.f32 %v1424_v23, %v1417_v0  ;;  %v1477_v23 = vld [vmem:[#allocation2 + $0x2c0] sm:$0xff] }
 0x60d   :  { %v1419_v24 = vpop.f32.mrf.mxu1 }
 0x60e   :  { %v1420_v38 = vadd.f32 %v5937_v31, %v1419_v24 }
 0x610   :  { %v1426_v22 = vadd.f32 %v1425_v49, %v1420_v38 }
 0x612   :  { %v1427_v55 = vrot.slane %v1426_v22, 4 }
 0x614   :  { %v1428_v28 = vadd.f32 %v1427_v55, %v1426_v22 }
 0x616   :  { %v1429_v34 = vrot.slane %v1428_v28, 2 }
 0x618   :  { %v1430_v25 = vadd.f32 %v1429_v34, %v1428_v28  ;;  %v1479_v34 = vld [vmem:[#allocation2 + $0x2d0] sm:$0xff] }
 0x61a   :  { %v1431_v45 = vrot.slane %v1430_v25, 1 }
 0x61c   :  { %v1432_v4 = vadd.f32 %v1431_v45, %v1430_v25 }
 0x61e   :  { %v1433_v41 = vmul.f32 %v1432_v4, %v6385_v35 }
 0x620   :  { %v1434_v37 = vsub.f32 %v1411_v29, %v1433_v41  ;;  %v6803_v39 = vsub.f32 %v1414_v20, %v1433_v41  ;;  %v1436_v40 = vsub.f32 %v1417_v0, %v1433_v41  ;;  %v1437_v42 = vsub.f32 %v1420_v38, %v1433_v41  ;;  %v1480_v0 = vld [vmem:[#allocation2 + $0x2d8] sm:$0xff] }
 0x622   :  { %v1438_v16 = vmul.f32 %v1434_v37, %v1434_v37  ;;  %v1439_v44 = vmul.f32 %v6803_v39, %v6803_v39  ;;  %v1440_v59 = vmul.f32 %v1436_v40, %v1436_v40  ;;  %v1441_v50 = vmul.f32 %v1437_v42, %v1437_v42 }
 0x624   :  { %v1442_v19 = vadd.f32 %v1439_v44, %v1438_v16 }
 0x626   :  { %v1443_v36 = vadd.f32 %v1442_v19, %v1440_v59  ;;  %v1754_v59 = vld [vmem:[#allocation2 + $0x3c0] sm:$0xff] }
 0x628   :  { %v1444_v53 = vadd.f32 %v1443_v36, %v1441_v50  ;;  %v1753_v50 = vld [vmem:[#allocation2 + $0x3b8] sm:$0xff] }
 0x62a   :  { %v1445_v5 = vrot.slane %v1444_v53, 4 }
 0x62c   :  { %v1446_v3 = vadd.f32 %v1445_v5, %v1444_v53  ;;  %v1752_v5 = vld [vmem:[#allocation2 + $0x3b0] sm:$0xff] }
 0x62e   :  { %v1447_v2 = vrot.slane %v1446_v3, 2 }
 0x630   :  { %v1448_v62 = vadd.f32 %v1447_v2, %v1446_v3  ;;  %v1751_v3 = vld [vmem:[#allocation2 + $0x3a8] sm:$0xff] }
 0x632   :  { %v1449_v60 = vrot.slane %v1448_v62, 1 }
 0x634   :  { %v1450_v6 = vadd.f32 %v1449_v60, %v1448_v62 }
 0x636   :  { %v1451_v15 = vmul.f32 %v1450_v6, %v6385_v35  ;;  %v1749_v6 = vld [vmem:[#allocation2 + $0x398] sm:$0xff] }
 0x638   :  { %v1452_v56 = vadd.f32 1e-05, %v1451_v15 }
 0x63a   :  { %6054 = vrsqrt.f32 %v1452_v56  ;;  %vm1459_vm6 = vweird.f32 %v1452_v56 }
 0x640   :  { %v6055_v54 = vpop.eup %6054 }
 0x641   :  { %v1454_v7 = vmul.f32 %v6055_v54, %v1452_v56  ;;  %vm1460_vm5 = vweird.f32 %v6055_v54 }
 0x642   :  { %vm1461_vm7 = vmor %vm1459_vm6, %vm1460_vm5 }
 0x643   :  { %v1455_v58 = vmul.f32 %v6055_v54, %v1454_v7 }
 0x645   :  { %v1456_v27 = vmul.f32 0.5, %v1455_v58  ;;  %v1748_v58 = vld [vmem:[#allocation2 + $0x390] sm:$0xff] }
 0x647   :  { %v1457_v9 = vsub.f32 1.5, %v1456_v27 }
 0x649   :  { %v1458_v21 = vmul.f32 %v6055_v54, %v1457_v9 }
 0x64b   :  { %v1462_v46 = vsel %vm1461_vm7, %v6055_v54, %v1458_v21 }
 0x64c   :  { %v1466_v47 = vmul.f32 %v1462_v46, %v1437_v42  ;;  %v1463_v35 = vmul.f32 %v1462_v46, %v1434_v37  ;;  %v1465_v33 = vmul.f32 %v1462_v46, %v1436_v40  ;;  %v1464_v29 = vmul.f32 %v1462_v46, %v6803_v39  ;;  %v1756_v40 = vld [vmem:[#allocation2 + $0x3d0] sm:$0xff]  ;;  %v1755_v42 = vld [vmem:[#allocation2 + $0x3c8] sm:$0xff] }
 0x64d   :  { %v1485_v39 = vlaneseq  ;;  %1761 = vmatpush.msra.mxu0 %v1756_v40  ;;  %v1743_v40 = vld [vmem:[#allocation2 + $0x368] sm:$0xff] }
 0x64e   :  { %v1471_v57 = vmul.f32 %v5938_v11, %v1466_v47  ;;  %v1468_v31 = vmul.f32 %v5938_v11, %v1463_v35  ;;  %v1470_v20 = vmul.f32 %v5938_v11, %v1465_v33  ;;  %v1469_v28 = vmul.f32 %v5938_v11, %v1464_v29  ;;  %v1747_v11 = vld [vmem:[#allocation2 + $0x388] sm:$0xff]  ;;  %v1745_v29 = vld [vmem:[#allocation2 + $0x378] sm:$0xff] }
 0x64f   :  { %v6840_v44 = vshrl.u32 %v1485_v39, 7  ;;  %v6842_v30 = vand.u32 127, %v1485_v39  ;;  %1762 = vmatpush.msra.mxu0 %v1755_v42 }
 0x650   :  { %v1476_v24 = vadd.f32 %v5939_v14, %v1471_v57  ;;  %v1473_v49 = vadd.f32 %v5939_v14, %v1468_v31  ;;  %v1475_v55 = vadd.f32 %v5939_v14, %v1470_v20  ;;  %v1474_v45 = vadd.f32 %v5939_v14, %v1469_v28  ;;  %v1746_v57 = vld [vmem:[#allocation2 + $0x380] sm:$0xff] }
 0x651   :  { %1763 = vmatpush.msra.mxu0 %v1754_v59  ;;  %v1492_v53 = vand.u32 1, %v6840_v44  ;;  %v6852_v18 = vand.u32 1, %v6842_v30  ;;  %v1487_v2 = vadd.s32 8, %v6840_v44  ;;  %v1488_v21 = vadd.s32 16, %v6840_v44 }
 0x652   :  { %v6809_v38 = vadd.f32 %v1480_v0, %v1476_v24  ;;  %v6811_v22 = vadd.f32 %v1477_v23, %v1473_v49  ;;  %v6815_v25 = vadd.f32 %v1479_v34, %v1475_v55  ;;  %v6818_v4 = vadd.f32 %v1478_v52, %v1474_v45  ;;  %v1744_v55 = vld [vmem:[#allocation2 + $0x370] sm:$0xff] }
 0x653   :  { %1764 = vmatpush.msra.mxu0 %v1753_v50  ;;  %vm6859_vm8 = vcmp.eq.s32.totalorder %v1492_v53, %v6852_v18  ;;  %v1493_v56 = vand.u32 1, %v1487_v2  ;;  %v1494_v49 = vand.u32 1, %v1488_v21 }
 0x654   :  { %1514 = vmatpush.xpose.msrb.mxu2 %v6809_v38  ;;  %1569 = vmatmul.f32.vlgmr.msrb.gmra.mxu3 %v6811_v22 }
 0x655   :  { %1765 = vmatpush.msra.mxu0 %v1752_v5  ;;  %vm6890_vm10 = vcmp.eq.s32.totalorder %v1493_v56, %v6852_v18  ;;  %vm6920_vm15 = vcmp.eq.s32.totalorder %v1494_v49, %v6852_v18 }
 0x657   :  { %1766 = vmatpush.msra.mxu0 %v1751_v3 }
 0x658   :  { %1515 = vmatpush.xpose.msrb.mxu2 %v6815_v25 }
 0x659   :  { %1767 = vmatpush.msra.mxu0 %v1750_v61 }
 0x65b   :  { %1768 = vmatpush.msra.mxu0 %v1749_v6 }
 0x65c   :  { %1516 = vmatpush.xpose.msrb.mxu2 %v6818_v4  ;;  %1572 = vmatmul.f32.gmra.mxu3 %v6818_v4 }
 0x65d   :  { %1769 = vmatpush.msra.mxu0 %v1748_v58 }
 0x65f   :  { %1770 = vmatpush.msra.mxu0 %v1747_v11 }
 0x660   :  { %1517 = vmatpush.xpose.msrb.mxu2 %v6811_v22 }
 0x661   :  { %1771 = vmatpush.msra.mxu0 %v1746_v57 }
 0x663   :  { %1518 = vmatmul.f32.vlgmr.msrb.gmra.mxu2 %v6811_v22  ;;  %1772 = vmatpush.msra.mxu0 %v1745_v29 }
 0x664   :  { %1575 = vmatmul.f32.gmra.mxu3 %v6815_v25 }
 0x665   :  { %1773 = vmatpush.msra.mxu0 %v1744_v55 }
 0x667   :  { %1774 = vmatpush.msra.mxu0 %v1743_v40 }
 0x66b   :  { %1521 = vmatmul.f32.gmra.mxu2 %v6818_v4 }
 0x66c   :  { %1578 = vmatmul.f32.gmra.mxu3 %v6809_v38 }
 0x673   :  { %1524 = vmatmul.f32.gmra.mxu2 %v6815_v25 }
 0x67b   :  { %1527 = vmatmul.f32.gmra.mxu2 %v6809_v38 }
 0x6d7   :  { %v1570_v41 = vpop.f32.mrf.mxu3 }
 0x6d8   :  { %v6832_v37 = vadd.f32 %v6829_v17, %v1570_v41 }
 0x6da   :  { %v6835_v51 = vmul.f32 0.70710677, %v6832_v37 }
 0x6dc   :  { %v6838_v16 = vand.u32 2147483647, %v6835_v51 }
 0x6de   :  { %v1590_v19 = vmul.f32 0.3275911, %v6838_v16  ;;  %v1694_v39 = vmul.f32 %v6838_v16, %v6838_v16 }
 0x6df   :  { %v1573_v12 = vpop.f32.mrf.mxu3 }
 0x6e0   :  { %v6845_v36 = vadd.f32 1.0, %v1590_v19  ;;  %v6848_v26 = vadd.f32 %v6829_v17, %v1573_v12  ;;  %v1489_v19 = vadd.s32 24, %v6840_v44  ;;  %v1742_v12 = vld [vmem:[#allocation2 + $0x360] sm:$0xff]  ;;  %v1698_v5 = vsub.f32 0.0, %v1694_v39 }
 0x6e1   :  { %1775 = vmatpush.msra.mxu0 %v1742_v12 }
 0x6e2   :  { %6056 = vrcp.f32 %v6845_v36  ;;  %v6856_v10 = vmul.f32 0.70710677, %v6848_v26  ;;  %v1609_v46 = vand.u32 2147483648, %v6845_v36  ;;  %v1607_v33 = vand.u32 2147483647, %v6845_v36 }
 0x6e3   :  { %vm1603_vm12 = vweird.f32 %v6845_v36  ;;  %v1495_v6 = vand.u32 1, %v1489_v19  ;;  %v1702_v11 = vmul.f32 1.442695, %v1698_v5 }
 0x6e4   :  { %v6865_v43 = vand.u32 2147483647, %v6856_v10  ;;  %v1610_v28 = vor.u32 1.1754944e-38, %v1609_v46  ;;  %vm1608_vm14 = vcmp.eq.f32.partialorder %v1607_v33, 8.507059e+37 }
 0x6e5   :  { %vm6941_vm4 = vcmp.eq.s32.totalorder %v1495_v6, %v6852_v18 }
 0x6e6   :  { %v1519_v62 = vpop.f32.mrf.mxu2  ;;  %v1591_v8 = vmul.f32 0.3275911, %v6865_v43 }
 0x6e7   :  { %v6870_v60 = vsel %vm6859_vm8, %v1519_v62, -1e+30  ;;  %v1576_v1 = vpop.f32.mrf.mxu3 }
 0x6e8   :  { %v6057_v63 = vpop.eup %6056  ;;  %v6873_v15 = vadd.f32 %v6829_v17, %v1576_v1  ;;  %v1790_v48 = vsel %vm1789_vm9, %v6870_v60, -inf  ;;  %v6878_v7 = vadd.f32 1.0, %v1591_v8 }
 0x6e9   :  { %v1599_v54 = vmul.f32 %v6057_v63, %v6845_v36  ;;  %1791 = vmax.xlane.f32.xlu0 %v1790_v48  ;;  %vm1604_vm11 = vweird.f32 %v6057_v63 }
 0x6ea   :  { %v6881_v27 = vmul.f32 0.70710677, %v6873_v15  ;;  %6058 = vrcp.f32 %v6878_v7  ;;  %vm1605_vm13 = vmor %vm1603_vm12, %vm1604_vm11  ;;  %v1624_v3 = vand.u32 2147483648, %v6878_v7  ;;  %v1622_v62 = vand.u32 2147483647, %v6878_v7 }
 0x6eb   :  { %v1600_v9 = vsub.f32 1.0, %v1599_v54  ;;  %vm1618_vm1 = vweird.f32 %v6878_v7 }
 0x6ec   :  { %v6887_v47 = vand.u32 2147483647, %v6881_v27  ;;  %vm1623_vm3 = vcmp.eq.f32.partialorder %v1622_v62, 8.507059e+37 }
 0x6ed   :  { %v1601_v35 = vmul.f32 %v6057_v63, %v1600_v9  ;;  %v1625_v9 = vor.u32 1.1754944e-38, %v1624_v3 }
 0x6ee   :  { %v1592_v31 = vmul.f32 0.3275911, %v6887_v47  ;;  %v1522_v20 = vpop.f32.mrf.mxu2  ;;  %v1696_v12 = vmul.f32 %v6887_v47, %v6887_v47 }
 0x6ef   :  { %v1602_v0 = vadd.f32 %v6057_v63, %v1601_v35  ;;  %v6899_v23 = vsel %vm6890_vm10, %v1522_v20, -1e+30  ;;  %v1579_v24 = vpop.f32.mrf.mxu3  ;;  %v1695_v20 = vmul.f32 %v6865_v43, %v6865_v43 }
 0x6f0   :  { %v6901_v34 = vadd.f32 1.0, %v1592_v31  ;;  %v6904_v45 = vadd.f32 %v6829_v17, %v1579_v24  ;;  %v1793_v52 = vsel %vm1789_vm9, %v6899_v23, -inf  ;;  %v6059_v41 = vpop.eup %6058 }
 0x6f1   :  { %v1606_v13 = vsel %vm1605_vm13, %v6057_v63, %v1602_v0  ;;  %1794 = vmax.xlane.f32.xlu0 %v1793_v52  ;;  %v1614_v59 = vmul.f32 %v6059_v41, %v6878_v7  ;;  %vm1619_vm0 = vweird.f32 %v6059_v41 }
 0x6f2   :  { %v6910_v42 = vsel %vm1608_vm14, %v1610_v28, %v1606_v13  ;;  %6060 = vrcp.f32 %v6901_v34  ;;  %v6917_v36 = vmul.f32 0.70710677, %v6904_v45  ;;  %vm1620_vm2 = vmor %vm1618_vm1, %vm1619_vm0  ;;  %v1639_v29 = vand.u32 2147483648, %v6901_v34 }
 0x6f3   :  { %v1658_v17 = vmul.f32 1.0614054, %v6910_v42  ;;  %v1615_v50 = vsub.f32 1.0, %v1614_v59  ;;  %v1637_v0 = vand.u32 2147483647, %v6901_v34  ;;  %vm1633_vm6 = vweird.f32 %v6901_v34 }
 0x6f4   :  { %v6926_v61 = vand.u32 2147483647, %v6917_v36  ;;  %v1699_v13 = vsub.f32 0.0, %v1695_v20  ;;  %v1640_v39 = vor.u32 1.1754944e-38, %v1639_v29  ;;  %vm1718_vm14 = vcmp.lt.f32.partialorder %v6835_v51, 0.0 }
 0x6f5   :  { %v1662_v53 = vadd.f32 -1.4531521, %v1658_v17  ;;  %v1616_v2 = vmul.f32 %v6059_v41, %v1615_v50  ;;  %vm1638_vm11 = vcmp.eq.f32.partialorder %v1637_v0, 8.507059e+37 }
 0x6f6   :  { %v1525_v44 = vpop.f32.mrf.mxu2  ;;  %v1593_v48 = vmul.f32 0.3275911, %v6926_v61  ;;  %v1704_v62 = vmul.f32 1.442695, %v1699_v13 }
 0x6f7   :  { %v1666_v8 = vmul.f32 %v1662_v53, %v6910_v42  ;;  %v6932_v1 = vsel %vm6920_vm15, %v1525_v44, -1e+30  ;;  %v1617_v54 = vadd.f32 %v6059_v41, %v1616_v2 }
 0x6f8   :  { %v6061_v63 = vpop.eup %6060  ;;  %v1796_v56 = vsel %vm1789_vm9, %v6932_v1, -inf  ;;  %v1597_v46 = vadd.f32 1.0, %v1593_v48 }
 0x6f9   :  { %v1670_v58 = vadd.f32 1.4214138, %v1666_v8  ;;  %v1629_v21 = vmul.f32 %v6061_v63, %v6901_v34  ;;  %1797 = vmax.xlane.f32.xlu1 %v1796_v56  ;;  %v1621_v35 = vsel %vm1620_vm2, %v6059_v41, %v1617_v54  ;;  %vm1634_vm5 = vweird.f32 %v6061_v63 }
 0x6fa   :  { %v6945_v31 = vsel %vm1623_vm3, %v1625_v9, %v1621_v35  ;;  %6062 = vrcp.f32 %v1597_v46  ;;  %vm1635_vm7 = vmor %vm1633_vm6, %vm1634_vm5  ;;  %v1700_v54 = vsub.f32 0.0, %v1696_v12  ;;  %vm1648_vm13 = vweird.f32 %v1597_v46 }
 0x6fb   :  { %v1674_v33 = vmul.f32 %v1670_v58, %v6910_v42  ;;  %v1630_v57 = vsub.f32 1.0, %v1629_v21  ;;  %v1659_v55 = vmul.f32 1.0614054, %v6945_v31  ;;  %6064 = vpow2.f32 %v1702_v11 }
 0x6fc   :  { %v1652_v58 = vand.u32 2147483647, %v1597_v46  ;;  %6066 = vpow2.f32 %v1704_v62  ;;  %v1706_v20 = vmul.f32 1.442695, %v1700_v54  ;;  %vm1719_vm2 = vcmp.lt.f32.partialorder %v6856_v10, 0.0 }
 0x6fd   :  { %v1678_v24 = vadd.f32 -0.28449672, %v1674_v33  ;;  %v1631_v49 = vmul.f32 %v6061_v63, %v1630_v57  ;;  %v1663_v43 = vadd.f32 -1.4531521, %v1659_v55  ;;  %vm1720_vm3 = vcmp.lt.f32.partialorder %v6881_v27, 0.0 }
 0x6fe   :  { %v1528_v18 = vpop.f32.mrf.mxu2  ;;  %vm1653_vm1 = vcmp.eq.f32.partialorder %v1652_v58, 8.507059e+37  ;;  %6068 = vpow2.f32 %v1706_v20  ;;  %v1732_v10 = vmul.f32 0.5, %v6873_v15  ;;  %vm1721_vm5 = vcmp.lt.f32.partialorder %v6917_v36, 0.0  ;;  %v2120_v15 = vld [vmem:[#allocation2 + $0x448] sm:$0xff] }
 0x6ff   :  { %v1682_v28 = vmul.f32 %v1678_v24, %v6910_v42  ;;  %v6956_v52 = vsel %vm6941_vm4, %v1528_v18, -1e+30  ;;  %v1632_v41 = vadd.f32 %v6061_v63, %v1631_v49  ;;  %v1667_v17 = vmul.f32 %v1663_v43, %v6945_v31  ;;  %v2116_v36 = vld [vmem:[#allocation2 + $0x428] sm:$0xff] }
 0x700   :  { %v1799_v40 = vsel %vm1789_vm9, %v6956_v52, -inf  ;;  %v6063_v19 = vpop.eup %6062  ;;  %v1730_v18 = vmul.f32 0.5, %v6832_v37 }
 0x701   :  { %v1686_v59 = vadd.f32 0.2548296, %v1682_v28  ;;  %1800 = vmax.xlane.f32.xlu1 %v1799_v40  ;;  %v1636_v34 = vsel %vm1635_vm7, %v6061_v63, %v1632_v41  ;;  %v1644_v5 = vmul.f32 %v6063_v19, %v1597_v46  ;;  %v1671_v3 = vadd.f32 1.4214138, %v1667_v17  ;;  %v6065_v44 = vpop.eup %6064 }
 0x702   :  { %v1641_v50 = vsel %vm1638_vm11, %v1640_v39, %v1636_v34  ;;  %v1654_v63 = vand.u32 2147483648, %v1597_v46  ;;  %vm1649_vm12 = vweird.f32 %v6063_v19  ;;  %v1697_v46 = vmul.f32 %v6926_v61, %v6926_v61  ;;  %v6067_v39 = vpop.eup %6066 }
 0x703   :  { %v1690_v53 = vmul.f32 %v1686_v59, %v6910_v42  ;;  %v1660_v2 = vmul.f32 1.0614054, %v1641_v50  ;;  %v1645_v6 = vsub.f32 1.0, %v1644_v5  ;;  %v1675_v48 = vmul.f32 %v1671_v3, %v6945_v31  ;;  %vm1650_vm0 = vmor %vm1648_vm13, %vm1649_vm12 }
 0x704   :  { %v1655_v29 = vor.u32 1.1754944e-38, %v1654_v63  ;;  %v1701_v12 = vsub.f32 0.0, %v1697_v46  ;;  %v6069_v61 = vpop.eup %6068  ;;  %v6979_v46 = vcvt.s32.f32 %v6842_v30 }
 0x705   :  { %v1710_v8 = vmul.f32 %v6065_v44, %v1690_v53  ;;  %v1664_v56 = vadd.f32 -1.4531521, %v1660_v2  ;;  %v1646_v21 = vmul.f32 %v6063_v19, %v1645_v6  ;;  %v1679_v47 = vadd.f32 -0.28449672, %v1675_v48 }
 0x706   :  { %v1731_v6 = vmul.f32 0.5, %v6848_v26 }
 0x707   :  { %v1714_v9 = vsub.f32 1.0, %v1710_v8  ;;  %v1668_v11 = vmul.f32 %v1664_v56, %v1641_v50  ;;  %v1683_v35 = vmul.f32 %v1679_v47, %v6945_v31  ;;  %v1647_v57 = vadd.f32 %v6063_v19, %v1646_v21 }
 0x709   :  { %v1722_v42 = vsub.f32 0.0, %v1714_v9  ;;  %v1672_v33 = vadd.f32 1.4214138, %v1668_v11  ;;  %v1687_v24 = vadd.f32 0.2548296, %v1683_v35  ;;  %v1651_v55 = vsel %vm1650_vm0, %v6063_v19, %v1647_v57 }
 0x70a   :  { %v1656_v43 = vsel %vm1653_vm1, %v1655_v29, %v1651_v55  ;;  %v1733_v29 = vmul.f32 0.5, %v6904_v45  ;;  %v2119_v55 = vld [vmem:[#allocation2 + $0x440] sm:$0xff] }
 0x70b   :  { %v1726_v0 = vsel %vm1718_vm14, %v1722_v42, %v1714_v9  ;;  %v1676_v49 = vmul.f32 %v1672_v33, %v1641_v50  ;;  %v1691_v41 = vmul.f32 %v1687_v24, %v6945_v31  ;;  %v1661_v51 = vmul.f32 1.0614054, %v1656_v43  ;;  %v2122_v24 = vld [vmem:[#allocation2 + $0x458] sm:$0xff]  ;;  %v2115_v45 = vld [vmem:[#allocation2 + $0x420] sm:$0xff] }
 0x70c   :  { %v1734_v28 = vadd.f32 1.0, %v1726_v0  ;;  %v1708_v31 = vmul.f32 1.442695, %v1701_v12  ;;  %2141 = vmatpush.msra.mxu2 %v2122_v24  ;;  %v2110_v12 = vld [vmem:[#allocation2 + $0x3f8] sm:$0xff] }
 0x70d   :  { %v1680_v13 = vadd.f32 -0.28449672, %v1676_v49  ;;  %v1711_v59 = vmul.f32 %v6067_v39, %v1691_v41  ;;  %v1665_v34 = vadd.f32 -1.4531521, %v1661_v51  ;;  %v2121_v49 = vld [vmem:[#allocation2 + $0x450] sm:$0xff]  ;;  %v2114_v51 = vld [vmem:[#allocation2 + $0x418] sm:$0xff] }
 0x70e   :  { %v1738_v40 = vmul.f32 %v1734_v28, %v1730_v18  ;;  %6070 = vpow2.f32 %v1708_v31  ;;  %2142 = vmatpush.msra.mxu2 %v2121_v49  ;;  %v2118_v18 = vld [vmem:[#allocation2 + $0x438] sm:$0xff]  ;;  %v2117_v28 = vld [vmem:[#allocation2 + $0x430] sm:$0xff] }
 0x70f   :  { %v1684_v17 = vmul.f32 %v1680_v13, %v1641_v50  ;;  %v1715_v19 = vsub.f32 1.0, %v1711_v59  ;;  %v1669_v37 = vmul.f32 %v1665_v34, %v1656_v43  ;;  %v2113_v39 = vld [vmem:[#allocation2 + $0x410] sm:$0xff]  ;;  %v2111_v59 = vld [vmem:[#allocation2 + $0x400] sm:$0xff] }
 0x710   :  { %1776 = vmatmul.f32.vlgmr.msra.gmra.mxu0 %v1738_v40  ;;  %2143 = vmatpush.msra.mxu2 %v2120_v15  ;;  %v2112_v40 = vld [vmem:[#allocation2 + $0x408] sm:$0xff] }
 0x711   :  { %v1688_v53 = vadd.f32 0.2548296, %v1684_v17  ;;  %v1723_v5 = vsub.f32 0.0, %v1715_v19  ;;  %v1673_v2 = vadd.f32 1.4214138, %v1669_v37 }
 0x712   :  { %2144 = vmatpush.msra.mxu2 %v2119_v55 }
 0x713   :  { %v1692_v3 = vmul.f32 %v1688_v53, %v1641_v50  ;;  %v1727_v44 = vsel %vm1719_vm2, %v1723_v5, %v1715_v19  ;;  %v1677_v8 = vmul.f32 %v1673_v2, %v1656_v43  ;;  %v2109_v19 = vld [vmem:[#allocation2 + $0x3f0] sm:$0xff]  ;;  %v2108_v5 = vld [vmem:[#allocation2 + $0x3e8] sm:$0xff] }
 0x714   :  { %v1735_v48 = vadd.f32 1.0, %v1727_v44  ;;  %v6071_v42 = vpop.eup %6070  ;;  %2145 = vmatpush.msra.mxu2 %v2118_v18 }
 0x715   :  { %v1712_v62 = vmul.f32 %v6069_v61, %v1692_v3  ;;  %v1681_v54 = vadd.f32 -0.28449672, %v1677_v8  ;;  %v2107_v3 = vld [vmem:[#allocation2 + $0x3e0] sm:$0xff] }
 0x716   :  { %v1739_v63 = vmul.f32 %v1735_v48, %v1731_v6  ;;  %2146 = vmatpush.msra.mxu2 %v2117_v28 }
 0x717   :  { %v1716_v56 = vsub.f32 1.0, %v1712_v62  ;;  %v1685_v9 = vmul.f32 %v1681_v54, %v1656_v43  ;;  %v5941_v62 = vld [vmem:[#allocation5 + $0x13] ss:$0 sm:$0xff] }
 0x718   :  { %1779 = vmatmul.f32.gmra.mxu0 %v1739_v63  ;;  %2147 = vmatpush.msra.mxu2 %v2116_v36 }
 0x719   :  { %v1724_v58 = vsub.f32 0.0, %v1716_v56  ;;  %v1689_v21 = vadd.f32 0.2548296, %v1685_v9 }
 0x71a   :  { %2148 = vmatpush.msra.mxu2 %v2115_v45 }
 0x71b   :  { %v1728_v50 = vsel %vm1720_vm3, %v1724_v58, %v1716_v56  ;;  %v1693_v11 = vmul.f32 %v1689_v21, %v1656_v43  ;;  %v6339_v21 = vmov 0.0  }
 0x71c   :  { %v1736_v47 = vadd.f32 1.0, %v1728_v50  ;;  %2149 = vmatpush.msra.mxu2 %v2114_v51 }
 0x71d   :  { %v1713_v33 = vmul.f32 %v6071_v42, %v1693_v11 }
 0x71e   :  { %v1740_v35 = vmul.f32 %v1736_v47, %v1732_v10  ;;  %2150 = vmatpush.msra.mxu2 %v2113_v39 }
 0x71f   :  { %v1717_v26 = vsub.f32 1.0, %v1713_v33 }
 0x720   :  { %1782 = vmatmul.f32.gmra.mxu0 %v1740_v35  ;;  %2151 = vmatpush.msra.mxu2 %v2112_v40 }
 0x721   :  { %v1725_v57 = vsub.f32 0.0, %v1717_v26 }
 0x722   :  { %2152 = vmatpush.msra.mxu2 %v2111_v59 }
 0x723   :  { %v1729_v20 = vsel %vm1721_vm5, %v1725_v57, %v1717_v26 }
 0x724   :  { %v1737_v0 = vadd.f32 1.0, %v1729_v20  ;;  %2153 = vmatpush.msra.mxu2 %v2110_v12 }
 0x726   :  { %v1741_v27 = vmul.f32 %v1737_v0, %v1733_v29  ;;  %2154 = vmatpush.msra.mxu2 %v2109_v19 }
 0x728   :  { %1785 = vmatmul.f32.gmra.mxu0 %v1741_v27  ;;  %2155 = vmatpush.msra.mxu2 %v2108_v5 }
 0x72a   :  { %2156 = vmatpush.msra.mxu2 %v2107_v3 }
 0x75c   :  { %v1792_v43 = vpop.xlane.xlu0 %1791 }
 0x75d   :  { %vm1802_vm6 = vcmp.eq.f32.partialorder %v6870_v60, %v1792_v43 }
 0x75e   :  { %v1806_v41 = vsel %vm1802_vm6, %v6979_v46, 32.0 }
 0x75f   :  { %v1810_v13 = vsel %vm1789_vm9, %v1806_v41, inf }
 0x760   :  { %1811 = vmin.xlane.f32.xlu2 %v1810_v13 }
 0x764   :  { %v1795_v30 = vpop.xlane.xlu0 %1794 }
 0x765   :  { %vm1803_vm7 = vcmp.eq.f32.partialorder %v6899_v23, %v1795_v30 }
 0x766   :  { %v1807_v17 = vsel %vm1803_vm7, %v6979_v46, 32.0 }
 0x767   :  { %v1813_v34 = vsel %vm1789_vm9, %v1807_v17, inf }
 0x768   :  { %1814 = vmin.xlane.f32.xlu2 %v1813_v34 }
 0x76c   :  { %v1798_v53 = vpop.xlane.xlu1 %1797 }
 0x76d   :  { %vm1804_vm11 = vcmp.eq.f32.partialorder %v6932_v1, %v1798_v53 }
 0x76e   :  { %v1808_v37 = vsel %vm1804_vm11, %v6979_v46, 32.0 }
 0x76f   :  { %v1816_v2 = vsel %vm1789_vm9, %v1808_v37, inf }
 0x770   :  { %1817 = vmin.xlane.f32.xlu0 %v1816_v2 }
 0x774   :  { %v1801_v61 = vpop.xlane.xlu1 %1800 }
 0x775   :  { %vm1805_vm12 = vcmp.eq.f32.partialorder %v6956_v52, %v1801_v61 }
 0x776   :  { %v1809_v31 = vsel %vm1805_vm12, %v6979_v46, 32.0 }
 0x777   :  { %v1819_v44 = vsel %vm1789_vm9, %v1809_v31, inf }
 0x778   :  { %1820 = vmin.xlane.f32.xlu1 %v1819_v44 }
 0x78d   :  { %v1777_v8 = vpop.f32.mrf.mxu0 }
 0x78e   :  { %v6993_v6 = vadd.f32 %v5941_v62, %v1777_v8 }
 0x790   :  { %2157 = vmatmul.f32.vlgmr.msra.gmra.mxu2 %v6993_v6 }
 0x795   :  { %v1780_v48 = vpop.f32.mrf.mxu0 }
 0x796   :  { %v6996_v56 = vadd.f32 %v5941_v62, %v1780_v48 }
 0x798   :  { %2160 = vmatmul.f32.gmra.mxu2 %v6996_v56 }
 0x79d   :  { %v1783_v54 = vpop.f32.mrf.mxu0 }
 0x79e   :  { %v6999_v63 = vadd.f32 %v5941_v62, %v1783_v54 }
 0x7a0   :  { %2163 = vmatmul.f32.gmra.mxu2 %v6999_v63 }
 0x7a5   :  { %v1786_v58 = vpop.f32.mrf.mxu0 }
 0x7a6   :  { %v7002_v9 = vadd.f32 %v5941_v62, %v1786_v58 }
 0x7a8   :  { %2038 = vmatpush.msra.mxu1 %v7002_v9  ;;  %2166 = vmatmul.f32.gmra.mxu2 %v7002_v9 }
 0x7aa   :  { %2039 = vmatpush.msra.mxu1 %v6999_v63 }
 0x7ac   :  { %2040 = vmatpush.msra.mxu1 %v6996_v56 }
 0x7ae   :  { %2041 = vmatpush.msra.mxu1 %v6993_v6 }
 0x7d3   :  { %v1812_v50 = vpop.xlane.xlu2 %1811 }
 0x7d4   :  { %vm1822_vm13 = vcmp.eq.f32.partialorder %v6979_v46, %v1812_v50 }
 0x7d5   :  { %v5850_v10 = vsel %vm1822_vm13, 1.0, %v6339_v21  ;;  %v1834_v47 = vsel %vm1822_vm13, -1e+30, %v6870_v60 }
 0x7d6   :  { %5866 = vmatmul.msk.f32.vlgmr.msra.gmra.mxu1 %vm1789_vm9, %v5850_v10  ;;  %v1838_v11 = vsel %vm1789_vm9, %v1834_v47, -inf }
 0x7d7   :  { %1839 = vmax.xlane.f32.xlu2 %v1838_v11 }
 0x7db   :  { %v1815_v42 = vpop.xlane.xlu2 %1814 }
 0x7dc   :  { %vm1823_vm14 = vcmp.eq.f32.partialorder %v6979_v46, %v1815_v42 }
 0x7dd   :  { %v5851_v35 = vsel %vm1823_vm14, 1.0, %v6339_v21  ;;  %v1835_v33 = vsel %vm1823_vm14, -1e+30, %v6899_v23 }
 0x7de   :  { %5867 = vmatmul.msk.f32.gmra.mxu1 %vm1789_vm9, %v5851_v35  ;;  %v1841_v26 = vsel %vm1789_vm9, %v1835_v33, -inf }
 0x7df   :  { %1842 = vmax.xlane.f32.xlu0 %v1841_v26 }
 0x7e3   :  { %v1818_v57 = vpop.xlane.xlu0 %1817 }
 0x7e4   :  { %vm1824_vm0 = vcmp.eq.f32.partialorder %v6979_v46, %v1818_v57 }
 0x7e5   :  { %v5852_v60 = vsel %vm1824_vm0, 1.0, %v6339_v21  ;;  %v1836_v20 = vsel %vm1824_vm0, -1e+30, %v6932_v1 }
 0x7e6   :  { %5868 = vmatmul.msk.f32.gmra.mxu1 %vm1789_vm9, %v5852_v60  ;;  %v1844_v29 = vsel %vm1789_vm9, %v1836_v20, -inf }
 0x7e7   :  { %1845 = vmax.xlane.f32.xlu1 %v1844_v29 }
 0x7eb   :  { %v1821_v0 = vpop.xlane.xlu1 %1820 }
 0x7ec   :  { %vm1825_vm1 = vcmp.eq.f32.partialorder %v6979_v46, %v1821_v0 }
 0x7ed   :  { %v5853_v23 = vsel %vm1825_vm1, 1.0, %v6339_v21  ;;  %v1837_v27 = vsel %vm1825_vm1, -1e+30, %v6956_v52 }
 0x7ee   :  { %5869 = vmatmul.msk.f32.gmra.mxu1 %vm1789_vm9, %v5853_v23  ;;  %v1847_v24 = vsel %vm1789_vm9, %v1837_v27, -inf }
 0x7ef   :  { %1848 = vmax.xlane.f32.xlu2 %v1847_v24 }
 0x84a   :  { %v1840_v49 = vpop.xlane.xlu2 %1839 }
 0x84b   :  { %vm1850_vm2 = vcmp.eq.f32.partialorder %v1834_v47, %v1840_v49 }
 0x84c   :  { %v1854_v1 = vsel %vm1850_vm2, %v6979_v46, 32.0 }
 0x84d   :  { %v1858_v15 = vsel %vm1789_vm9, %v1854_v1, inf }
 0x84e   :  { %1859 = vmin.xlane.f32.xlu0 %v1858_v15 }
 0x852   :  { %v1843_v55 = vpop.xlane.xlu0 %1842 }
 0x853   :  { %vm1851_vm3 = vcmp.eq.f32.partialorder %v1835_v33, %v1843_v55 }
 0x854   :  { %v1855_v18 = vsel %vm1851_vm3, %v6979_v46, 32.0 }
 0x855   :  { %v1861_v28 = vsel %vm1789_vm9, %v1855_v18, inf }
 0x856   :  { %1862 = vmin.xlane.f32.xlu1 %v1861_v28 }
 0x85a   :  { %v1846_v52 = vpop.xlane.xlu1 %1845 }
 0x85b   :  { %vm1852_vm5 = vcmp.eq.f32.partialorder %v1836_v20, %v1846_v52 }
 0x85c   :  { %v1856_v36 = vsel %vm1852_vm5, %v6979_v46, 32.0 }
 0x85d   :  { %v1864_v43 = vsel %vm1789_vm9, %v1856_v36, inf }
 0x85e   :  { %1865 = vmin.xlane.f32.xlu2 %v1864_v43 }
 0x862   :  { %v1849_v45 = vpop.xlane.xlu2 %1848 }
 0x863   :  { %vm1853_vm6 = vcmp.eq.f32.partialorder %v1837_v27, %v1849_v45 }
 0x864   :  { %v1857_v41 = vsel %vm1853_vm6, %v6979_v46, 32.0 }
 0x865   :  { %v1867_v13 = vsel %vm1789_vm9, %v1857_v41, inf }
 0x866   :  { %1868 = vmin.xlane.f32.xlu0 %v1867_v13 }
 0x8c1   :  { %v1860_v51 = vpop.xlane.xlu0 %1859 }
 0x8c2   :  { %vm1870_vm7 = vcmp.eq.f32.partialorder %v6979_v46, %v1860_v51 }
 0x8c3   :  { %v5854_v39 = vsel %vm1870_vm7, 1.0, %v6339_v21  ;;  %v1882_v40 = vsel %vm1870_vm7, -1e+30, %v1834_v47 }
 0x8c4   :  { %5870 = vmatmul.msk.f32.gmra.mxu1 %vm1789_vm9, %v5854_v39  ;;  %v1886_v30 = vsel %vm1789_vm9, %v1882_v40, -inf }
 0x8c5   :  { %1887 = vmax.xlane.f32.xlu1 %v1886_v30 }
 0x8c9   :  { %v1863_v59 = vpop.xlane.xlu1 %1862 }
 0x8ca   :  { %vm1871_vm11 = vcmp.eq.f32.partialorder %v6979_v46, %v1863_v59 }
 0x8cb   :  { %v5855_v17 = vsel %vm1871_vm11, 1.0, %v6339_v21  ;;  %v1883_v34 = vsel %vm1871_vm11, -1e+30, %v1835_v33 }
 0x8cc   :  { %5871 = vmatmul.msk.f32.gmra.mxu1 %vm1789_vm9, %v5855_v17  ;;  %v1889_v12 = vsel %vm1789_vm9, %v1883_v34, -inf }
 0x8cd   :  { %1890 = vmax.xlane.f32.xlu2 %v1889_v12  ;;  %v2137_v12 = vld [vmem:[#allocation2 + $0x4d0] sm:$0xff] }
 0x8d1   :  { %v1866_v19 = vpop.xlane.xlu2 %1865 }
 0x8d2   :  { %vm1872_vm12 = vcmp.eq.f32.partialorder %v6979_v46, %v1866_v19  ;;  %v2136_v19 = vld [vmem:[#allocation2 + $0x4c8] sm:$0xff] }
 0x8d3   :  { %v5856_v53 = vsel %vm1872_vm12, 1.0, %v6339_v21  ;;  %v1884_v37 = vsel %vm1872_vm12, -1e+30, %v1836_v20 }
 0x8d4   :  { %5872 = vmatmul.msk.f32.gmra.mxu1 %vm1789_vm9, %v5856_v53  ;;  %v1892_v5 = vsel %vm1789_vm9, %v1884_v37, -inf  ;;  %v2135_v53 = vld [vmem:[#allocation2 + $0x4c0] sm:$0xff] }
 0x8d5   :  { %1893 = vmax.xlane.f32.xlu0 %v1892_v5  ;;  %v2134_v5 = vld [vmem:[#allocation2 + $0x4b8] sm:$0xff] }
 0x8d9   :  { %v1869_v3 = vpop.xlane.xlu0 %1868 }
 0x8da   :  { %vm1873_vm13 = vcmp.eq.f32.partialorder %v6979_v46, %v1869_v3 }
 0x8db   :  { %v5857_v2 = vsel %vm1873_vm13, 1.0, %v6339_v21  ;;  %v1885_v61 = vsel %vm1873_vm13, -1e+30, %v1837_v27 }
 0x8dc   :  { %5873 = vmatmul.msk.f32.gmra.mxu1 %vm1789_vm9, %v5857_v2  ;;  %v1895_v31 = vsel %vm1789_vm9, %v1885_v61, -inf  ;;  %v2133_v2 = vld [vmem:[#allocation2 + $0x4b0] sm:$0xff] }
 0x8dd   :  { %1896 = vmax.xlane.f32.xlu1 %v1895_v31  ;;  %v2131_v31 = vld [vmem:[#allocation2 + $0x4a0] sm:$0xff] }
 0x938   :  { %v1888_v44 = vpop.xlane.xlu1 %1887 }
 0x939   :  { %vm1898_vm14 = vcmp.eq.f32.partialorder %v1882_v40, %v1888_v44 }
 0x93a   :  { %v1902_v62 = vsel %vm1898_vm14, %v6979_v46, 32.0 }
 0x93b   :  { %v1906_v8 = vsel %vm1789_vm9, %v1902_v62, inf  ;;  %v2130_v62 = vld [vmem:[#allocation2 + $0x498] sm:$0xff] }
 0x93c   :  { %1907 = vmin.xlane.f32.xlu2 %v1906_v8 }
 0x940   :  { %v1891_v48 = vpop.xlane.xlu2 %1890 }
 0x941   :  { %vm1899_vm0 = vcmp.eq.f32.partialorder %v1883_v34, %v1891_v48  ;;  %v2129_v48 = vld [vmem:[#allocation2 + $0x490] sm:$0xff] }
 0x942   :  { %v1903_v54 = vsel %vm1899_vm0, %v6979_v46, 32.0 }
 0x943   :  { %v1909_v58 = vsel %vm1789_vm9, %v1903_v54, inf  ;;  %v2128_v54 = vld [vmem:[#allocation2 + $0x488] sm:$0xff] }
 0x944   :  { %1910 = vmin.xlane.f32.xlu0 %v1909_v58  ;;  %v2043_v58 = vpop.f32.mrf.mxu1 }
 0x948   :  { %v1894_v50 = vpop.xlane.xlu0 %1893 }
 0x949   :  { %vm1900_vm1 = vcmp.eq.f32.partialorder %v1884_v37, %v1894_v50  ;;  %v2127_v50 = vld [vmem:[#allocation2 + $0x480] sm:$0xff] }
 0x94a   :  { %v1904_v10 = vsel %vm1900_vm1, %v6979_v46, 32.0 }
 0x94b   :  { %v1912_v47 = vsel %vm1789_vm9, %v1904_v10, inf }
 0x94c   :  { %1913 = vmin.xlane.f32.xlu1 %v1912_v47  ;;  %v2126_v47 = vld [vmem:[#allocation2 + $0x478] sm:$0xff] }
 0x950   :  { %v1897_v11 = vpop.xlane.xlu1 %1896 }
 0x951   :  { %vm1901_vm2 = vcmp.eq.f32.partialorder %v1885_v61, %v1897_v11 }
 0x952   :  { %v1905_v42 = vsel %vm1901_vm2, %v6979_v46, 32.0 }
 0x953   :  { %v1915_v35 = vsel %vm1789_vm9, %v1905_v42, inf  ;;  %v2046_v42 = vpop.f32.mrf.mxu1 }
 0x954   :  { %1916 = vmin.xlane.f32.xlu2 %v1915_v35 }
 0x9af   :  { %v1908_v33 = vpop.xlane.xlu2 %1907 }
 0x9b0   :  { %vm1918_vm3 = vcmp.eq.f32.partialorder %v6979_v46, %v1908_v33 }
 0x9b1   :  { %v5858_v26 = vsel %vm1918_vm3, 1.0, %v6339_v21  ;;  %v1930_v57 = vsel %vm1918_vm3, -1e+30, %v1882_v40 }
 0x9b2   :  { %5874 = vmatmul.msk.f32.gmra.mxu1 %vm1789_vm9, %v5858_v26  ;;  %v1934_v60 = vsel %vm1789_vm9, %v1930_v57, -inf  ;;  %v2049_v26 = vpop.f32.mrf.mxu1 }
 0x9b3   :  { %1935 = vmax.xlane.f32.xlu0 %v1934_v60 }
 0x9b7   :  { %v1911_v20 = vpop.xlane.xlu0 %1910 }
 0x9b8   :  { %vm1919_vm5 = vcmp.eq.f32.partialorder %v6979_v46, %v1911_v20 }
 0x9b9   :  { %v5859_v29 = vsel %vm1919_vm5, 1.0, %v6339_v21  ;;  %v1931_v0 = vsel %vm1919_vm5, -1e+30, %v1883_v34  ;;  %v2138_v34 = vld [vmem:[#allocation2 + $0x4d8] sm:$0xff] }
 0x9ba   :  { %5875 = vmatmul.msk.f32.gmra.mxu1 %vm1789_vm9, %v5859_v29  ;;  %v1937_v23 = vsel %vm1789_vm9, %v1931_v0, -inf  ;;  %2170 = vmatpush.msra.mxu3 %v2138_v34 }
 0x9bb   :  { %1938 = vmax.xlane.f32.xlu1 %v1937_v23 }
 0x9bc   :  { %2171 = vmatpush.msra.mxu3 %v2137_v12 }
 0x9be   :  { %2172 = vmatpush.msra.mxu3 %v2136_v19 }
 0x9bf   :  { %v1914_v27 = vpop.xlane.xlu1 %1913 }
 0x9c0   :  { %vm1920_vm6 = vcmp.eq.f32.partialorder %v6979_v46, %v1914_v27  ;;  %2173 = vmatpush.msra.mxu3 %v2135_v53  ;;  %v2125_v27 = vld [vmem:[#allocation2 + $0x470] sm:$0xff] }
 0x9c1   :  { %v5860_v24 = vsel %vm1920_vm6, 1.0, %v6339_v21  ;;  %v1932_v49 = vsel %vm1920_vm6, -1e+30, %v1884_v37 }
 0x9c2   :  { %5876 = vmatmul.msk.f32.gmra.mxu1 %vm1789_vm9, %v5860_v24  ;;  %v1940_v1 = vsel %vm1789_vm9, %v1932_v49, -inf  ;;  %2174 = vmatpush.msra.mxu3 %v2134_v5  ;;  %v2124_v24 = vld [vmem:[#allocation2 + $0x468] sm:$0xff]  ;;  %v2158_v5 = vpop.f32.mrf.mxu2 }
 0x9c3   :  { %1941 = vmax.xlane.f32.xlu2 %v1940_v1  ;;  %v2123_v1 = vld [vmem:[#allocation2 + $0x460] sm:$0xff] }
 0x9c4   :  { %2175 = vmatpush.msra.mxu3 %v2133_v2 }
 0x9c7   :  { %v1917_v15 = vpop.xlane.xlu2 %1916 }
 0x9c8   :  { %vm1921_vm7 = vcmp.eq.f32.partialorder %v6979_v46, %v1917_v15 }
 0x9c9   :  { %v5861_v55 = vsel %vm1921_vm7, 1.0, %v6339_v21  ;;  %v1933_v18 = vsel %vm1921_vm7, -1e+30, %v1885_v61  ;;  %v2132_v61 = vld [vmem:[#allocation2 + $0x4a8] sm:$0xff] }
 0x9ca   :  { %5877 = vmatmul.msk.f32.gmra.mxu1 %vm1789_vm9, %v5861_v55  ;;  %v1943_v28 = vsel %vm1789_vm9, %v1933_v18, -inf  ;;  %2176 = vmatpush.msra.mxu3 %v2132_v61  ;;  %v2161_v61 = vpop.f32.mrf.mxu2 }
 0x9cb   :  { %1944 = vmax.xlane.f32.xlu0 %v1943_v28 }
 0x9cc   :  { %2177 = vmatpush.msra.mxu3 %v2131_v31  ;;  %v2374_v31 = vld [vmem:[#allocation2 + $0x558] sm:$0xff] }
 0x9cd   :  { %2377 = vmatpush.msrb.mxu0 %v2374_v31 }
 0x9ce   :  { %2178 = vmatpush.msra.mxu3 %v2130_v62  ;;  %v2373_v62 = vld [vmem:[#allocation2 + $0x550] sm:$0xff] }
 0x9cf   :  { %2378 = vmatpush.msrb.mxu0 %v2373_v62 }
 0x9d0   :  { %2179 = vmatpush.msra.mxu3 %v2129_v48 }
 0x9d2   :  { %2180 = vmatpush.msra.mxu3 %v2128_v54 }
 0x9d4   :  { %2181 = vmatpush.msra.mxu3 %v2127_v50 }
 0x9d6   :  { %2182 = vmatpush.msra.mxu3 %v2126_v47 }
 0x9d8   :  { %2183 = vmatpush.msra.mxu3 %v2125_v27 }
 0x9da   :  { %2184 = vmatpush.msra.mxu3 %v2124_v24 }
 0x9dc   :  { %2185 = vmatpush.msra.mxu3 %v2123_v1 }
 0xa26   :  { %v1936_v52 = vpop.xlane.xlu0 %1935 }
 0xa27   :  { %vm1946_vm11 = vcmp.eq.f32.partialorder %v1930_v57, %v1936_v52  ;;  %v2052_v57 = vpop.f32.mrf.mxu1 }
 0xa28   :  { %v1950_v36 = vsel %vm1946_vm11, %v6979_v46, 32.0 }
 0xa29   :  { %v1954_v43 = vsel %vm1789_vm9, %v1950_v36, inf }
 0xa2a   :  { %1955 = vmin.xlane.f32.xlu1 %v1954_v43 }
 0xa2e   :  { %v1939_v45 = vpop.xlane.xlu1 %1938 }
 0xa2f   :  { %vm1947_vm12 = vcmp.eq.f32.partialorder %v1931_v0, %v1939_v45  ;;  %v2055_v60 = vpop.f32.mrf.mxu1 }
 0xa30   :  { %v1951_v41 = vsel %vm1947_vm12, %v6979_v46, 32.0 }
 0xa31   :  { %v1957_v13 = vsel %vm1789_vm9, %v1951_v41, inf }
 0xa32   :  { %1958 = vmin.xlane.f32.xlu2 %v1957_v13 }
 0xa36   :  { %v1942_v51 = vpop.xlane.xlu2 %1941 }
 0xa37   :  { %vm1948_vm13 = vcmp.eq.f32.partialorder %v1932_v49, %v1942_v51  ;;  %v2058_v20 = vpop.f32.mrf.mxu1 }
 0xa38   :  { %v1952_v39 = vsel %vm1948_vm13, %v6979_v46, 32.0  ;;  %v2092_v45 = vmax.f32 %v2046_v42, %v2058_v20  ;;  %v2164_v42 = vpop.f32.mrf.mxu2 }
 0xa39   :  { %v1960_v40 = vsel %vm1789_vm9, %v1952_v39, inf }
 0xa3a   :  { %1961 = vmin.xlane.f32.xlu0 %v1960_v40 }
 0xa3e   :  { %v1945_v30 = vpop.xlane.xlu0 %1944 }
 0xa3f   :  { %vm1949_vm14 = vcmp.eq.f32.partialorder %v1933_v18, %v1945_v30  ;;  %v2061_v29 = vpop.f32.mrf.mxu1  ;;  %v2091_v18 = vmax.f32 %v2043_v58, %v2055_v60  ;;  %v2367_v60 = vld [vmem:[#allocation2 + $0x520] sm:$0xff] }
 0xa40   :  { %v1953_v59 = vsel %vm1949_vm14, %v6979_v46, 32.0  ;;  %v2093_v40 = vmax.f32 %v2049_v26, %v2061_v29  ;;  %v2368_v26 = vld [vmem:[#allocation2 + $0x528] sm:$0xff] }
 0xa41   :  { %v1963_v17 = vsel %vm1789_vm9, %v1953_v59, inf }
 0xa42   :  { %1964 = vmin.xlane.f32.xlu1 %v1963_v17 }
 0xa47   :  { %v2064_v0 = vpop.f32.mrf.mxu1 }
 0xa48   :  { %v2094_v12 = vmax.f32 %v2052_v57, %v2064_v0 }
 0xa4f   :  { %v2067_v23 = vpop.f32.mrf.mxu1 }
 0xa50   :  { %v2095_v28 = vmax.f32 %v2091_v18, %v2067_v23  ;;  %v2366_v23 = vld [vmem:[#allocation2 + $0x518] sm:$0xff]  ;;  %v2167_v18 = vpop.f32.mrf.mxu2 }
 0xa57   :  { %v2070_v49 = vpop.f32.mrf.mxu1 }
 0xa58   :  { %v2096_v41 = vmax.f32 %v2092_v45, %v2070_v49 }
 0xa5f   :  { %v2073_v15 = vpop.f32.mrf.mxu1 }
 0xa60   :  { %v2097_v30 = vmax.f32 %v2093_v40, %v2073_v15  ;;  %v2365_v15 = vld [vmem:[#allocation2 + $0x510] sm:$0xff]  ;;  %v2362_v40 = vld [vmem:[#allocation2 + $0x4f8] sm:$0xff] }
 0xa67   :  { %v2076_v55 = vpop.f32.mrf.mxu1 }
 0xa68   :  { %v2098_v19 = vmax.f32 %v2094_v12, %v2076_v55 }
 0xa9d   :  { %v1956_v37 = vpop.xlane.xlu1 %1955 }
 0xa9e   :  { %vm1966_vm0 = vcmp.eq.f32.partialorder %v6979_v46, %v1956_v37 }
 0xa9f   :  { %v5862_v3 = vsel %vm1966_vm0, 1.0, %v6339_v21 }
 0xaa0   :  { %5878 = vmatmul.msk.f32.gmra.mxu1 %vm1789_vm9, %v5862_v3  ;;  %v5942_v3 = vld [vmem:[#allocation5 + $0x14] ss:$0 sm:$0xff] }
 0xaa1   :  { %v2159_v2 = vadd.f32 %v5942_v3, %v2158_v5  ;;  %v2162_v54 = vadd.f32 %v5942_v3, %v2161_v61  ;;  %v2165_v20 = vadd.f32 %v5942_v3, %v2164_v42  ;;  %v2360_v5 = vld [vmem:[#allocation2 + $0x4e8] sm:$0xff] }
 0xaa5   :  { %v1959_v44 = vpop.xlane.xlu2 %1958 }
 0xaa6   :  { %vm1967_vm1 = vcmp.eq.f32.partialorder %v6979_v46, %v1959_v44 }
 0xaa7   :  { %v5863_v8 = vsel %vm1967_vm1, 1.0, %v6339_v21 }
 0xaa8   :  { %5879 = vmatmul.msk.f32.gmra.mxu1 %vm1789_vm9, %v5863_v8  ;;  %v2372_v8 = vld [vmem:[#allocation2 + $0x548] sm:$0xff] }
 0xaa9   :  { %2379 = vmatpush.msrb.mxu0 %v2372_v8 }
 0xaad   :  { %v1962_v10 = vpop.xlane.xlu0 %1961 }
 0xaae   :  { %vm1968_vm2 = vcmp.eq.f32.partialorder %v6979_v46, %v1962_v10  ;;  %v2370_v10 = vld [vmem:[#allocation2 + $0x538] sm:$0xff] }
 0xaaf   :  { %v5864_v11 = vsel %vm1968_vm2, 1.0, %v6339_v21 }
 0xab0   :  { %5880 = vmatmul.msk.f32.gmra.mxu1 %vm1789_vm9, %v5864_v11 }
 0xab5   :  { %v1965_v35 = vpop.xlane.xlu1 %1964 }
 0xab6   :  { %vm1969_vm3 = vcmp.eq.f32.partialorder %v6979_v46, %v1965_v35  ;;  %v2369_v35 = vld [vmem:[#allocation2 + $0x530] sm:$0xff] }
 0xab7   :  { %v5865_v33 = vsel %vm1969_vm3, 1.0, %v6339_v21 }
 0xab8   :  { %5881 = vmatmul.msk.f32.gmra.mxu1 %vm1789_vm9, %v5865_v33 }
 0xb1d   :  { %v2079_v52 = vpop.f32.mrf.mxu1 }
 0xb1e   :  { %v2099_v36 = vmax.f32 %v2095_v28, %v2079_v52  ;;  %v2364_v52 = vld [vmem:[#allocation2 + $0x508] sm:$0xff] }
 0xb20   :  { %v2103_v43 = vsub.f32 %v2099_v36, %v6993_v6 }
 0xb22   :  { %2186 = vmatmul.f32.vlgmr.msra.gmra.mxu3 %v2103_v43 }
 0xb25   :  { %v2082_v13 = vpop.f32.mrf.mxu1 }
 0xb26   :  { %v2100_v51 = vmax.f32 %v2096_v41, %v2082_v13  ;;  %v2363_v13 = vld [vmem:[#allocation2 + $0x500] sm:$0xff] }
 0xb28   :  { %v2104_v39 = vsub.f32 %v2100_v51, %v6996_v56  ;;  %v2168_v51 = vadd.f32 %v5942_v3, %v2167_v18 }
 0xb2a   :  { %2189 = vmatmul.f32.gmra.mxu3 %v2104_v39 }
 0xb2d   :  { %v2085_v59 = vpop.f32.mrf.mxu1 }
 0xb2e   :  { %v2101_v17 = vmax.f32 %v2097_v30, %v2085_v59 }
 0xb30   :  { %v2105_v34 = vsub.f32 %v2101_v17, %v6999_v63  ;;  %v2361_v17 = vld [vmem:[#allocation2 + $0x4f0] sm:$0xff] }
 0xb32   :  { %2192 = vmatmul.f32.gmra.mxu3 %v2105_v34 }
 0xb35   :  { %v2088_v53 = vpop.f32.mrf.mxu1 }
 0xb36   :  { %v2102_v37 = vmax.f32 %v2098_v19, %v2088_v53 }
 0xb38   :  { %v2106_v6 = vsub.f32 %v2102_v37, %v7002_v9  ;;  %v2371_v9 = vld [vmem:[#allocation2 + $0x540] sm:$0xff] }
 0xb39   :  { %2380 = vmatpush.msrb.mxu0 %v2371_v9 }
 0xb3a   :  { %2195 = vmatmul.f32.gmra.mxu3 %v2106_v6 }
 0xb3b   :  { %2381 = vmatpush.msrb.mxu0 %v2370_v10 }
 0xb3d   :  { %2382 = vmatpush.msrb.mxu0 %v2369_v35 }
 0xb3f   :  { %2383 = vmatpush.msrb.mxu0 %v2368_v26 }
 0xb41   :  { %2384 = vmatpush.msrb.mxu0 %v2367_v60 }
 0xb43   :  { %2385 = vmatpush.msrb.mxu0 %v2366_v23 }
 0xb45   :  { %2386 = vmatpush.msrb.mxu0 %v2365_v15 }
 0xb47   :  { %2387 = vmatpush.msrb.mxu0 %v2364_v52 }
 0xb49   :  { %2388 = vmatpush.msrb.mxu0 %v2363_v13 }
 0xb4b   :  { %2389 = vmatpush.msrb.mxu0 %v2362_v40 }
 0xb4d   :  { %2390 = vmatpush.msrb.mxu0 %v2361_v17 }
 0xb4f   :  { %2391 = vmatpush.msrb.mxu0 %v2360_v5 }
 0xba5   :  { %v2187_v56 = vpop.f32.mrf.mxu3 }
 0xba6   :  { %v7101_v44 = vadd.f32 %v2187_v56, %v2159_v2  ;;  %v2359_v56 = vld [vmem:[#allocation2 + $0x4e0] sm:$0xff] }
 0xba7   :  { %2392 = vmatpush.msrb.mxu0 %v2359_v56 }
 0xba8   :  { %v7104_v63 = vmul.f32 0.70710677, %v7101_v44 }
 0xbaa   :  { %v2203_v48 = vand.u32 2147483647, %v7104_v63 }
 0xbac   :  { %v2207_v58 = vmul.f32 0.3275911, %v2203_v48  ;;  %v2311_v6 = vmul.f32 %v2203_v48, %v2203_v48 }
 0xbad   :  { %v2190_v50 = vpop.f32.mrf.mxu3 }
 0xbae   :  { %v2211_v47 = vadd.f32 1.0, %v2207_v58  ;;  %v7107_v11 = vadd.f32 %v2190_v50, %v2162_v54  ;;  %v2315_v9 = vsub.f32 0.0, %v2311_v6 }
 0xbb0   :  { %6072 = vrcp.f32 %v2211_v47  ;;  %v7110_v33 = vmul.f32 0.70710677, %v7107_v11  ;;  %v2226_v36 = vand.u32 2147483648, %v2211_v47  ;;  %v2224_v41 = vand.u32 2147483647, %v2211_v47 }
 0xbb1   :  { %vm2220_vm6 = vweird.f32 %v2211_v47 }
 0xbb2   :  { %v7113_v57 = vand.u32 2147483647, %v7110_v33  ;;  %v2227_v34 = vor.u32 1.1754944e-38, %v2226_v36  ;;  %vm2225_vm11 = vcmp.eq.f32.partialorder %v2224_v41, 8.507059e+37 }
 0xbb4   :  { %v2208_v29 = vmul.f32 0.3275911, %v7113_v57  ;;  %v2312_v18 = vmul.f32 %v7113_v57, %v7113_v57 }
 0xbb5   :  { %v2193_v0 = vpop.f32.mrf.mxu3 }
 0xbb6   :  { %v6073_v27 = vpop.eup %6072  ;;  %v7116_v24 = vadd.f32 %v2193_v0, %v2165_v20  ;;  %v7118_v1 = vadd.f32 1.0, %v2208_v29  ;;  %v2319_v29 = vmul.f32 1.442695, %v2315_v9 }
 0xbb7   :  { %v2216_v49 = vmul.f32 %v6073_v27, %v2211_v47  ;;  %vm2221_vm5 = vweird.f32 %v6073_v27 }
 0xbb8   :  { %v7121_v55 = vmul.f32 0.70710677, %v7116_v24  ;;  %6074 = vrcp.f32 %v7118_v1  ;;  %vm2222_vm7 = vmor %vm2220_vm6, %vm2221_vm5  ;;  %v2241_v54 = vand.u32 2147483648, %v7118_v1  ;;  %v2239_v50 = vand.u32 2147483647, %v7118_v1 }
 0xbb9   :  { %v2217_v28 = vsub.f32 1.0, %v2216_v49  ;;  %vm2235_vm13 = vweird.f32 %v7118_v1 }
 0xbba   :  { %v7125_v43 = vand.u32 2147483647, %v7121_v55  ;;  %v2242_v60 = vor.u32 1.1754944e-38, %v2241_v54  ;;  %vm2240_vm0 = vcmp.eq.f32.partialorder %v2239_v50, 8.507059e+37 }
 0xbbb   :  { %v2218_v45 = vmul.f32 %v6073_v27, %v2217_v28 }
 0xbbc   :  { %v2209_v39 = vmul.f32 0.3275911, %v7125_v43 }
 0xbbd   :  { %v2219_v30 = vadd.f32 %v6073_v27, %v2218_v45  ;;  %v2196_v59 = vpop.f32.mrf.mxu3 }
 0xbbe   :  { %v2213_v12 = vadd.f32 1.0, %v2209_v39  ;;  %v7128_v19 = vadd.f32 %v2196_v59, %v2168_v51  ;;  %v6075_v53 = vpop.eup %6074  ;;  %v2316_v39 = vsub.f32 0.0, %v2312_v18 }
 0xbbf   :  { %v2223_v37 = vsel %vm2222_vm7, %v6073_v27, %v2219_v30  ;;  %v2231_v2 = vmul.f32 %v6075_v53, %v7118_v1  ;;  %vm2236_vm12 = vweird.f32 %v6075_v53 }
 0xbc0   :  { %v2228_v3 = vsel %vm2225_vm11, %v2227_v34, %v2223_v37  ;;  %6076 = vrcp.f32 %v2213_v12  ;;  %v7132_v62 = vmul.f32 0.70710677, %v7128_v19  ;;  %vm2237_vm14 = vmor %vm2235_vm13, %vm2236_vm12  ;;  %v2256_v28 = vand.u32 2147483648, %v2213_v12 }
 0xbc1   :  { %v2275_v61 = vmul.f32 1.0614054, %v2228_v3  ;;  %v2232_v31 = vsub.f32 1.0, %v2231_v2  ;;  %v2254_v1 = vand.u32 2147483647, %v2213_v12  ;;  %vm2250_vm2 = vweird.f32 %v2213_v12 }
 0xbc2   :  { %v7136_v48 = vand.u32 2147483647, %v7132_v62  ;;  %v2257_v40 = vor.u32 1.1754944e-38, %v2256_v28  ;;  %v2313_v34 = vmul.f32 %v7125_v43, %v7125_v43  ;;  %vm2335_vm11 = vcmp.lt.f32.partialorder %v7104_v63, 0.0 }
 0xbc3   :  { %v2279_v8 = vadd.f32 -1.4531521, %v2275_v61  ;;  %v2233_v58 = vmul.f32 %v6075_v53, %v2232_v31  ;;  %vm2255_vm5 = vcmp.eq.f32.partialorder %v2254_v1, 8.507059e+37  ;;  %v2347_v28 = vmul.f32 0.5, %v7101_v44 }
 0xbc4   :  { %v2210_v42 = vmul.f32 0.3275911, %v7136_v48  ;;  %v2317_v54 = vsub.f32 0.0, %v2313_v34 }
 0xbc5   :  { %v2283_v10 = vmul.f32 %v2279_v8, %v2228_v3  ;;  %v2234_v35 = vadd.f32 %v6075_v53, %v2233_v58 }
 0xbc6   :  { %v6077_v47 = vpop.eup %6076  ;;  %v2214_v0 = vadd.f32 1.0, %v2210_v42 }
 0xbc7   :  { %v2287_v26 = vadd.f32 1.4214138, %v2283_v10  ;;  %v2246_v20 = vmul.f32 %v6077_v47, %v2213_v12  ;;  %v2238_v23 = vsel %vm2237_vm14, %v6075_v53, %v2234_v35  ;;  %vm2251_vm1 = vweird.f32 %v6077_v47 }
 0xbc8   :  { %v2243_v15 = vsel %vm2240_vm0, %v2242_v60, %v2238_v23  ;;  %6078 = vrcp.f32 %v2214_v0  ;;  %vm2252_vm3 = vmor %vm2250_vm2, %vm2251_vm1  ;;  %v2321_v12 = vmul.f32 1.442695, %v2316_v39  ;;  %v2271_v58 = vand.u32 2147483648, %v2214_v0 }
 0xbc9   :  { %v2291_v27 = vmul.f32 %v2287_v26, %v2228_v3  ;;  %v2247_v49 = vsub.f32 1.0, %v2246_v20  ;;  %v2276_v45 = vmul.f32 1.0614054, %v2243_v15  ;;  %6080 = vpow2.f32 %v2319_v29 }
 0xbca   :  { %v2269_v50 = vand.u32 2147483647, %v2214_v0  ;;  %6082 = vpow2.f32 %v2321_v12  ;;  %vm2265_vm7 = vweird.f32 %v2214_v0  ;;  %v2323_v20 = vmul.f32 1.442695, %v2317_v54 }
 0xbcb   :  { %v2295_v52 = vadd.f32 -0.28449672, %v2291_v27  ;;  %v2248_v36 = vmul.f32 %v6077_v47, %v2247_v49  ;;  %v2280_v13 = vadd.f32 -1.4531521, %v2276_v45  ;;  %v2272_v29 = vor.u32 1.1754944e-38, %v2271_v58 }
 0xbcc   :  { %vm2270_vm13 = vcmp.eq.f32.partialorder %v2269_v50, 8.507059e+37  ;;  %6084 = vpow2.f32 %v2323_v20  ;;  %vm2336_vm14 = vcmp.lt.f32.partialorder %v7110_v33, 0.0  ;;  %vm2337_vm0 = vcmp.lt.f32.partialorder %v7121_v55, 0.0  ;;  %v7156_v20 = vld [vmem:[#allocation5 + $0x15] ss:$0 sm:$0xff] }
 0xbcd   :  { %v2299_v41 = vmul.f32 %v2295_v52, %v2228_v3  ;;  %v2249_v51 = vadd.f32 %v6077_v47, %v2248_v36  ;;  %v2284_v59 = vmul.f32 %v2280_v13, %v2243_v15  ;;  %v2349_v33 = vmul.f32 0.5, %v7116_v24  ;;  %v2581_v24 = vld [vmem:[#allocation2 + $0x5d8] sm:$0xff] }
 0xbce   :  { %v6079_v57 = vpop.eup %6078  ;;  %vm2338_vm1 = vcmp.lt.f32.partialorder %v7132_v62, 0.0  ;;  %2584 = vmatpush.msrb.mxu2 %v2581_v24  ;;  %v2579_v62 = vld [vmem:[#allocation2 + $0x5c8] sm:$0xff] }
 0xbcf   :  { %v2303_v30 = vadd.f32 0.2548296, %v2299_v41  ;;  %v2253_v17 = vsel %vm2252_vm3, %v6077_v47, %v2249_v51  ;;  %v2261_v6 = vmul.f32 %v6079_v57, %v2214_v0  ;;  %v2288_v5 = vadd.f32 1.4214138, %v2284_v59  ;;  %v6081_v61 = vpop.eup %6080 }
 0xbd0   :  { %v2258_v53 = vsel %vm2255_vm5, %v2257_v40, %v2253_v17  ;;  %vm2266_vm6 = vweird.f32 %v6079_v57  ;;  %v2314_v0 = vmul.f32 %v7136_v48, %v7136_v48  ;;  %v6083_v63 = vpop.eup %6082 }
 0xbd1   :  { %v2307_v37 = vmul.f32 %v2303_v30, %v2228_v3  ;;  %v2277_v2 = vmul.f32 1.0614054, %v2258_v53  ;;  %v2262_v31 = vsub.f32 1.0, %v2261_v6  ;;  %v2292_v8 = vmul.f32 %v2288_v5, %v2243_v15  ;;  %vm2267_vm12 = vmor %vm2265_vm7, %vm2266_vm6 }
 0xbd2   :  { %v2318_v30 = vsub.f32 0.0, %v2314_v0  ;;  %v6085_v6 = vpop.eup %6084 }
 0xbd3   :  { %v2327_v56 = vmul.f32 %v6081_v61, %v2307_v37  ;;  %v2281_v9 = vadd.f32 -1.4531521, %v2277_v2  ;;  %v2263_v47 = vmul.f32 %v6079_v57, %v2262_v31  ;;  %v2296_v42 = vadd.f32 -0.28449672, %v2292_v8 }
 0xbd4   :  { %v2325_v48 = vmul.f32 1.442695, %v2318_v30  ;;  %v2348_v61 = vmul.f32 0.5, %v7107_v11 }
 0xbd5   :  { %v2331_v10 = vsub.f32 1.0, %v2327_v56  ;;  %v2285_v35 = vmul.f32 %v2281_v9, %v2258_v53  ;;  %v2300_v3 = vmul.f32 %v2296_v42, %v2243_v15  ;;  %v2264_v60 = vadd.f32 %v6079_v57, %v2263_v47 }
 0xbd6   :  { %6086 = vpow2.f32 %v2325_v48 }
 0xbd7   :  { %v2339_v43 = vsub.f32 0.0, %v2331_v10  ;;  %v2289_v26 = vadd.f32 1.4214138, %v2285_v35  ;;  %v2304_v27 = vadd.f32 0.2548296, %v2300_v3  ;;  %v2268_v18 = vsel %vm2267_vm12, %v6079_v57, %v2264_v60 }
 0xbd8   :  { %v2273_v52 = vsel %vm2270_vm13, %v2272_v29, %v2268_v18 }
 0xbd9   :  { %v2343_v23 = vsel %vm2335_vm11, %v2339_v43, %v2331_v10  ;;  %v2293_v49 = vmul.f32 %v2289_v26, %v2258_v53  ;;  %v2308_v36 = vmul.f32 %v2304_v27, %v2243_v15  ;;  %v2278_v41 = vmul.f32 1.0614054, %v2273_v52  ;;  %v2580_v27 = vld [vmem:[#allocation2 + $0x5d0] sm:$0xff] }
 0xbda   :  { %v2351_v1 = vadd.f32 1.0, %v2343_v23  ;;  %v2350_v26 = vmul.f32 0.5, %v7128_v19  ;;  %2585 = vmatpush.msrb.mxu2 %v2580_v27  ;;  %v2578_v19 = vld [vmem:[#allocation2 + $0x5c0] sm:$0xff] }
 0xbdb   :  { %v2297_v45 = vadd.f32 -0.28449672, %v2293_v49  ;;  %v2328_v51 = vmul.f32 %v6083_v63, %v2308_v36  ;;  %v2282_v40 = vadd.f32 -1.4531521, %v2278_v41  ;;  %v2576_v36 = vld [vmem:[#allocation2 + $0x5b0] sm:$0xff]  ;;  %v2575_v41 = vld [vmem:[#allocation2 + $0x5a8] sm:$0xff] }
 0xbdc   :  { %v2355_v13 = vmul.f32 %v2351_v1, %v2347_v28  ;;  %v6087_v47 = vpop.eup %6086  ;;  %2586 = vmatpush.msrb.mxu2 %v2579_v62  ;;  %v2577_v1 = vld [vmem:[#allocation2 + $0x5b8] sm:$0xff] }
 0xbdd   :  { %v2301_v39 = vmul.f32 %v2297_v45, %v2258_v53  ;;  %v2332_v59 = vsub.f32 1.0, %v2328_v51  ;;  %v2286_v57 = vmul.f32 %v2282_v40, %v2273_v52 }
 0xbde   :  { %2393 = vmatmul.f32.vlgmr.msrb.gmra.mxu0 %v2355_v13  ;;  %2587 = vmatpush.msrb.mxu2 %v2578_v19  ;;  %v2574_v13 = vld [vmem:[#allocation2 + $0x5a0] sm:$0xff] }
 0xbdf   :  { %v2305_v17 = vadd.f32 0.2548296, %v2301_v39  ;;  %v2340_v44 = vsub.f32 0.0, %v2332_v59  ;;  %v2290_v37 = vadd.f32 1.4214138, %v2286_v57  ;;  %v2573_v39 = vld [vmem:[#allocation2 + $0x598] sm:$0xff] }
 0xbe0   :  { %2588 = vmatpush.msrb.mxu2 %v2577_v1  ;;  %v2572_v57 = vld [vmem:[#allocation2 + $0x590] sm:$0xff] }
 0xbe1   :  { %v2309_v34 = vmul.f32 %v2305_v17, %v2258_v53  ;;  %v2344_v15 = vsel %vm2336_vm14, %v2340_v44, %v2332_v59  ;;  %v2294_v2 = vmul.f32 %v2290_v37, %v2273_v52 }
 0xbe2   :  { %v2352_v12 = vadd.f32 1.0, %v2344_v15  ;;  %2589 = vmatpush.msrb.mxu2 %v2576_v36 }
 0xbe3   :  { %v2329_v5 = vmul.f32 %v6085_v6, %v2309_v34  ;;  %v2298_v31 = vadd.f32 -0.28449672, %v2294_v2  ;;  %v2571_v6 = vld [vmem:[#allocation2 + $0x588] sm:$0xff] }
 0xbe4   :  { %v2356_v8 = vmul.f32 %v2352_v12, %v2348_v61  ;;  %2590 = vmatpush.msrb.mxu2 %v2575_v41  ;;  %v2570_v61 = vld [vmem:[#allocation2 + $0x580] sm:$0xff] }
 0xbe5   :  { %v2333_v56 = vsub.f32 1.0, %v2329_v5  ;;  %v2302_v54 = vmul.f32 %v2298_v31, %v2273_v52 }
 0xbe6   :  { %2396 = vmatmul.f32.gmra.mxu0 %v2356_v8  ;;  %2591 = vmatpush.msrb.mxu2 %v2574_v13  ;;  %v2568_v8 = vld [vmem:[#allocation2 + $0x570] sm:$0xff] }
 0xbe7   :  { %v2341_v9 = vsub.f32 0.0, %v2333_v56  ;;  %v2306_v58 = vadd.f32 0.2548296, %v2302_v54 }
 0xbe8   :  { %2592 = vmatpush.msrb.mxu2 %v2573_v39 }
 0xbe9   :  { %v2345_v53 = vsel %vm2337_vm0, %v2341_v9, %v2333_v56  ;;  %v2310_v10 = vmul.f32 %v2306_v58, %v2273_v52  ;;  %v2569_v56 = vld [vmem:[#allocation2 + $0x578] sm:$0xff] }
 0xbea   :  { %v2353_v50 = vadd.f32 1.0, %v2345_v53  ;;  %2593 = vmatpush.msrb.mxu2 %v2572_v57 }
 0xbeb   :  { %v2330_v35 = vmul.f32 %v6087_v47, %v2310_v10 }
 0xbec   :  { %v2357_v42 = vmul.f32 %v2353_v50, %v2349_v33  ;;  %2594 = vmatpush.msrb.mxu2 %v2571_v6  ;;  %v2567_v50 = vld [vmem:[#allocation2 + $0x568] sm:$0xff] }
 0xbed   :  { %v2334_v11 = vsub.f32 1.0, %v2330_v35 }
 0xbee   :  { %2399 = vmatmul.f32.gmra.mxu0 %v2357_v42  ;;  %2595 = vmatpush.msrb.mxu2 %v2570_v61 }
 0xbef   :  { %v2342_v43 = vsub.f32 0.0, %v2334_v11 }
 0xbf0   :  { %2596 = vmatpush.msrb.mxu2 %v2569_v56 }
 0xbf1   :  { %v2346_v3 = vsel %vm2338_vm1, %v2342_v43, %v2334_v11  ;;  %v2566_v43 = vld [vmem:[#allocation2 + $0x560] sm:$0xff] }
 0xbf2   :  { %v2354_v60 = vadd.f32 1.0, %v2346_v3  ;;  %2597 = vmatpush.msrb.mxu2 %v2568_v8 }
 0xbf4   :  { %v2358_v55 = vmul.f32 %v2354_v60, %v2350_v26  ;;  %2598 = vmatpush.msrb.mxu2 %v2567_v50 }
 0xbf6   :  { %2402 = vmatmul.f32.gmra.mxu0 %v2358_v55  ;;  %2599 = vmatpush.msrb.mxu2 %v2566_v43 }
 0xc5b   :  { %v2394_v29 = vpop.f32.mrf.mxu0 }
 0xc5c   :  { %v7159_v23 = vadd.f32 %v7156_v20, %v2394_v29 }
 0xc5e   :  { %v7162_v49 = vmul.f32 0.70710677, %v7159_v23 }
 0xc60   :  { %v2410_v18 = vand.u32 2147483647, %v7162_v49 }
 0xc62   :  { %v2414_v28 = vmul.f32 0.3275911, %v2410_v18  ;;  %v2518_v54 = vmul.f32 %v2410_v18, %v2410_v18 }
 0xc63   :  { %v2397_v52 = vpop.f32.mrf.mxu0 }
 0xc64   :  { %v2418_v0 = vadd.f32 1.0, %v2414_v28  ;;  %v7166_v45 = vadd.f32 %v7156_v20, %v2397_v52  ;;  %v2522_v3 = vsub.f32 0.0, %v2518_v54 }
 0xc66   :  { %6088 = vrcp.f32 %v2418_v0  ;;  %v7169_v63 = vmul.f32 0.70710677, %v7166_v45  ;;  %v2433_v48 = vand.u32 2147483648, %v2418_v0  ;;  %v2431_v2 = vand.u32 2147483647, %v2418_v0 }
 0xc67   :  { %vm2427_vm3 = vweird.f32 %v2418_v0 }
 0xc68   :  { %v7172_v51 = vand.u32 2147483647, %v7169_v63  ;;  %v2434_v9 = vor.u32 1.1754944e-38, %v2433_v48  ;;  %vm2432_vm6 = vcmp.eq.f32.partialorder %v2431_v2, 8.507059e+37 }
 0xc6a   :  { %v2415_v59 = vmul.f32 0.3275911, %v7172_v51 }
 0xc6b   :  { %v2400_v17 = vpop.f32.mrf.mxu0 }
 0xc6c   :  { %v6089_v40 = vpop.eup %6088  ;;  %v7176_v44 = vadd.f32 %v7156_v20, %v2400_v17  ;;  %v2419_v37 = vadd.f32 1.0, %v2415_v59  ;;  %v2519_v17 = vmul.f32 %v7172_v51, %v7172_v51 }
 0xc6d   :  { %v2423_v30 = vmul.f32 %v6089_v40, %v2418_v0  ;;  %vm2428_vm2 = vweird.f32 %v6089_v40 }
 0xc6e   :  { %v7179_v15 = vmul.f32 0.70710677, %v7176_v44  ;;  %6090 = vrcp.f32 %v2419_v37  ;;  %vm2429_vm5 = vmor %vm2427_vm3, %vm2428_vm2  ;;  %v2448_v18 = vand.u32 2147483648, %v2419_v37  ;;  %v2446_v1 = vand.u32 2147483647, %v2419_v37 }
 0xc6f   :  { %v2424_v34 = vsub.f32 1.0, %v2423_v30  ;;  %vm2442_vm11 = vweird.f32 %v2419_v37  ;;  %v2523_v8 = vsub.f32 0.0, %v2519_v17  ;;  %v2632_v17 = vld [vmem:[#allocation2 + $0x658] sm:$0xff] }
 0xc70   :  { %v7182_v12 = vand.u32 2147483647, %v7179_v15  ;;  %v2449_v39 = vor.u32 1.1754944e-38, %v2448_v18  ;;  %vm2447_vm13 = vcmp.eq.f32.partialorder %v2446_v1, 8.507059e+37  ;;  %2635 = vmatpush.msrb.mxu3 %v2632_v17  ;;  %v2621_v17 = vld [vmem:[#allocation2 + $0x600] sm:$0xff] }
 0xc71   :  { %v2425_v5 = vmul.f32 %v6089_v40, %v2424_v34 }
 0xc72   :  { %v2416_v53 = vmul.f32 0.3275911, %v7182_v12  ;;  %v2520_v51 = vmul.f32 %v7182_v12, %v7182_v12  ;;  %v2554_v12 = vmul.f32 0.5, %v7159_v23 }
 0xc73   :  { %v2426_v31 = vadd.f32 %v6089_v40, %v2425_v5  ;;  %v2403_v33 = vpop.f32.mrf.mxu0 }
 0xc74   :  { %v2420_v47 = vadd.f32 1.0, %v2416_v53  ;;  %v7186_v42 = vadd.f32 %v7156_v20, %v2403_v33  ;;  %v6091_v35 = vpop.eup %6090  ;;  %v2526_v20 = vmul.f32 1.442695, %v2522_v3  ;;  %v2528_v3 = vmul.f32 1.442695, %v2523_v8  ;;  %v2629_v8 = vld [vmem:[#allocation2 + $0x640] sm:$0xff] }
 0xc75   :  { %v2430_v58 = vsel %vm2429_vm5, %v6089_v40, %v2426_v31  ;;  %v2438_v26 = vmul.f32 %v6091_v35, %v2419_v37  ;;  %vm2443_vm7 = vweird.f32 %v6091_v35  ;;  %vm2542_vm5 = vcmp.lt.f32.partialorder %v7162_v49, 0.0 }
 0xc76   :  { %v2435_v10 = vsel %vm2432_vm6, %v2434_v9, %v2430_v58  ;;  %6092 = vrcp.f32 %v2420_v47  ;;  %v7189_v55 = vmul.f32 0.70710677, %v7186_v42  ;;  %vm2444_vm12 = vmor %vm2442_vm11, %vm2443_vm7  ;;  %v2463_v57 = vand.u32 2147483648, %v2420_v47 }
 0xc77   :  { %v2482_v11 = vmul.f32 1.0614054, %v2435_v10  ;;  %v2439_v29 = vsub.f32 1.0, %v2438_v26  ;;  %6094 = vpow2.f32 %v2526_v20  ;;  %v2461_v37 = vand.u32 2147483647, %v2420_v47 }
 0xc78   :  { %v7192_v27 = vand.u32 2147483647, %v7189_v55  ;;  %vm2457_vm0 = vweird.f32 %v2420_v47  ;;  %v2464_v9 = vor.u32 1.1754944e-38, %v2463_v57  ;;  %v2631_v57 = vld [vmem:[#allocation2 + $0x650] sm:$0xff] }
 0xc79   :  { %v2486_v60 = vadd.f32 -1.4531521, %v2482_v11  ;;  %v2440_v62 = vmul.f32 %v6091_v35, %v2439_v29  ;;  %vm2462_vm2 = vcmp.eq.f32.partialorder %v2461_v37, 8.507059e+37  ;;  %2636 = vmatpush.msrb.mxu3 %v2631_v57 }
 0xc7a   :  { %v2417_v28 = vmul.f32 0.3275911, %v7192_v27  ;;  %v2521_v23 = vmul.f32 %v7192_v27, %v7192_v27 }
 0xc7b   :  { %v2490_v24 = vmul.f32 %v2486_v60, %v2435_v10  ;;  %v2441_v52 = vadd.f32 %v6091_v35, %v2440_v62 }
 0xc7c   :  { %v6093_v0 = vpop.eup %6092  ;;  %v7195_v13 = vadd.f32 1.0, %v2417_v28 }
 0xc7d   :  { %v2494_v19 = vadd.f32 1.4214138, %v2490_v24  ;;  %v2453_v41 = vmul.f32 %v6093_v0, %v2420_v47  ;;  %v2445_v40 = vsel %vm2444_vm12, %v6091_v35, %v2441_v52  ;;  %vm2458_vm14 = vweird.f32 %v6093_v0  ;;  %v6095_v31 = vpop.eup %6094 }
 0xc7e   :  { %6096 = vrcp.f32 %v7195_v13  ;;  %v2450_v34 = vsel %vm2447_vm13, %v2449_v39, %v2445_v40  ;;  %vm2459_vm1 = vmor %vm2457_vm0, %vm2458_vm14  ;;  %v2478_v29 = vand.u32 2147483648, %v7195_v13  ;;  %v2476_v18 = vand.u32 2147483647, %v7195_v13 }
 0xc7f   :  { %v2498_v36 = vmul.f32 %v2494_v19, %v2435_v10  ;;  %v2454_v59 = vsub.f32 1.0, %v2453_v41  ;;  %v2483_v5 = vmul.f32 1.0614054, %v2450_v34  ;;  %6098 = vpow2.f32 %v2528_v3 }
 0xc80   :  { %vm2472_vm6 = vweird.f32 %v7195_v13  ;;  %vm2477_vm11 = vcmp.eq.f32.partialorder %v2476_v18, 8.507059e+37  ;;  %vm2543_vm12 = vcmp.lt.f32.partialorder %v7169_v63, 0.0  ;;  %v2625_v18 = vld [vmem:[#allocation2 + $0x620] sm:$0xff]  ;;  %vm2544_vm13 = vcmp.lt.f32.partialorder %v7179_v15, 0.0 }
 0xc81   :  { %v2502_v30 = vadd.f32 -0.28449672, %v2498_v36  ;;  %v2455_v48 = vmul.f32 %v6093_v0, %v2454_v59  ;;  %v2487_v61 = vadd.f32 -1.4531521, %v2483_v5  ;;  %v2479_v36 = vor.u32 1.1754944e-38, %v2478_v29  ;;  %v2630_v5 = vld [vmem:[#allocation2 + $0x648] sm:$0xff] }
 0xc82   :  { %2637 = vmatpush.msrb.mxu3 %v2630_v5  ;;  %vm2545_vm14 = vcmp.lt.f32.partialorder %v7189_v55, 0.0  ;;  %v2617_v5 = vld [vmem:[#allocation2 + $0x5e0] sm:$0xff] }
 0xc83   :  { %v2506_v6 = vmul.f32 %v2502_v30, %v2435_v10  ;;  %v2456_v56 = vadd.f32 %v6093_v0, %v2455_v48  ;;  %v2491_v58 = vmul.f32 %v2487_v61, %v2450_v34 }
 0xc84   :  { %v6097_v54 = vpop.eup %6096  ;;  %2638 = vmatpush.msrb.mxu3 %v2629_v8 }
 0xc85   :  { %v2510_v2 = vadd.f32 0.2548296, %v2506_v6  ;;  %v2460_v33 = vsel %vm2459_vm1, %v6093_v0, %v2456_v56  ;;  %v2468_v50 = vmul.f32 %v6097_v54, %v7195_v13  ;;  %v2495_v43 = vadd.f32 1.4214138, %v2491_v58  ;;  %v6099_v56 = vpop.eup %6098  ;;  %v2628_v58 = vld [vmem:[#allocation2 + $0x638] sm:$0xff] }
 0xc86   :  { %v2465_v35 = vsel %vm2462_vm2, %v2464_v9, %v2460_v33  ;;  %vm2473_vm3 = vweird.f32 %v6097_v54  ;;  %v2525_v9 = vsub.f32 0.0, %v2521_v23  ;;  %2639 = vmatpush.msrb.mxu3 %v2628_v58  ;;  %v2620_v23 = vld [vmem:[#allocation2 + $0x5f8] sm:$0xff] }
 0xc87   :  { %v2514_v53 = vmul.f32 %v2510_v2, %v2435_v10  ;;  %v2484_v47 = vmul.f32 1.0614054, %v2465_v35  ;;  %v2469_v26 = vsub.f32 1.0, %v2468_v50  ;;  %v2499_v24 = vmul.f32 %v2495_v43, %v2450_v34  ;;  %vm2474_vm7 = vmor %vm2472_vm6, %vm2473_vm3 }
 0xc88   :  { %v2524_v10 = vsub.f32 0.0, %v2520_v51  ;;  %v2532_v43 = vmul.f32 1.442695, %v2525_v9 }
 0xc89   :  { %v2534_v11 = vmul.f32 %v6095_v31, %v2514_v53  ;;  %v2488_v20 = vadd.f32 -1.4531521, %v2484_v47  ;;  %v2470_v62 = vmul.f32 %v6097_v54, %v2469_v26  ;;  %v2503_v28 = vadd.f32 -0.28449672, %v2499_v24 }
 0xc8a   :  { %v2530_v30 = vmul.f32 1.442695, %v2524_v10 }
 0xc8b   :  { %v2538_v60 = vsub.f32 1.0, %v2534_v11  ;;  %v2492_v1 = vmul.f32 %v2488_v20, %v2465_v35  ;;  %v2471_v0 = vadd.f32 %v6097_v54, %v2470_v62  ;;  %v2507_v41 = vmul.f32 %v2503_v28, %v2450_v34  ;;  %v2627_v11 = vld [vmem:[#allocation2 + $0x630] sm:$0xff] }
 0xc8c   :  { %6100 = vpow2.f32 %v2530_v30  ;;  %2640 = vmatpush.msrb.mxu3 %v2627_v11  ;;  %v2555_v20 = vmul.f32 0.5, %v7166_v45  ;;  %v2556_v45 = vmul.f32 0.5, %v7176_v44  ;;  %v2557_v44 = vmul.f32 0.5, %v7186_v42  ;;  %v2838_v11 = vld [vmem:[#allocation2 + $0x6d0] sm:$0xff] }
 0xc8d   :  { %v2546_v19 = vsub.f32 0.0, %v2538_v60  ;;  %v2496_v39 = vadd.f32 1.4214138, %v2492_v1  ;;  %v2475_v59 = vsel %vm2474_vm7, %v6097_v54, %v2471_v0  ;;  %v2511_v37 = vadd.f32 0.2548296, %v2507_v41  ;;  %v2623_v0 = vld [vmem:[#allocation2 + $0x610] sm:$0xff] }
 0xc8e   :  { %v2480_v6 = vsel %vm2477_vm11, %v2479_v36, %v2475_v59  ;;  %6102 = vpow2.f32 %v2532_v43  ;;  %v2837_v43 = vld [vmem:[#allocation2 + $0x6c8] sm:$0xff] }
 0xc8f   :  { %v2550_v52 = vsel %vm2542_vm5, %v2546_v19, %v2538_v60  ;;  %v2500_v49 = vmul.f32 %v2496_v39, %v2465_v35  ;;  %v2485_v48 = vmul.f32 1.0614054, %v2480_v6  ;;  %v2515_v2 = vmul.f32 %v2511_v37, %v2450_v34  ;;  %v2626_v60 = vld [vmem:[#allocation2 + $0x628] sm:$0xff] }
 0xc90   :  { %v2558_v40 = vadd.f32 1.0, %v2550_v52  ;;  %2641 = vmatpush.msrb.mxu3 %v2626_v60  ;;  %v2622_v39 = vld [vmem:[#allocation2 + $0x608] sm:$0xff]  ;;  %v2834_v60 = vld [vmem:[#allocation2 + $0x6b0] sm:$0xff] }
 0xc91   :  { %v2504_v61 = vadd.f32 -0.28449672, %v2500_v49  ;;  %v2489_v31 = vadd.f32 -1.4531521, %v2485_v48  ;;  %v2535_v54 = vmul.f32 %v6099_v56, %v2515_v2  ;;  %v2618_v48 = vld [vmem:[#allocation2 + $0x5e8] sm:$0xff] }
 0xc92   :  { %v2562_v13 = vmul.f32 %v2558_v40, %v2554_v12  ;;  %v6101_v3 = vpop.eup %6100  ;;  %2642 = vmatpush.msrb.mxu3 %v2625_v18  ;;  %v5944_v2 = vld [vmem:[#allocation5 + $0x16] ss:$0 sm:$0xff]  ;;  %v2831_v18 = vld [vmem:[#allocation2 + $0x698] sm:$0xff] }
 0xc93   :  { %v2508_v53 = vmul.f32 %v2504_v61, %v2465_v35  ;;  %v2493_v27 = vmul.f32 %v2489_v31, %v2480_v6  ;;  %v2539_v33 = vsub.f32 1.0, %v2535_v54 }
 0xc94   :  { %2600 = vmatmul.f32.vlgmr.msrb.gmra.mxu2 %v2562_v13  ;;  %v6103_v40 = vpop.eup %6102  ;;  %v2619_v13 = vld [vmem:[#allocation2 + $0x5f0] sm:$0xff] }
 0xc95   :  { %v2512_v51 = vadd.f32 0.2548296, %v2508_v53  ;;  %v2497_v50 = vadd.f32 1.4214138, %v2493_v27  ;;  %v2547_v34 = vsub.f32 0.0, %v2539_v33 }
 0xc97   :  { %v2516_v47 = vmul.f32 %v2512_v51, %v2465_v35  ;;  %v2501_v26 = vmul.f32 %v2497_v50, %v2480_v6  ;;  %v2551_v29 = vsel %vm2543_vm12, %v2547_v34, %v2539_v33  ;;  %v2624_v35 = vld [vmem:[#allocation2 + $0x618] sm:$0xff]  ;;  %v7232_v33 = vld [vmem:[#allocation5 + $0x17] ss:$0 sm:$0xff] }
 0xc98   :  { %v2559_v10 = vadd.f32 1.0, %v2551_v29  ;;  %2643 = vmatpush.msrb.mxu3 %v2624_v35  ;;  %v2839_v51 = vld [vmem:[#allocation2 + $0x6d8] sm:$0xff]  ;;  %v2830_v35 = vld [vmem:[#allocation2 + $0x690] sm:$0xff] }
 0xc99   :  { %v2536_v24 = vmul.f32 %v6101_v3, %v2516_v47  ;;  %v2505_v62 = vadd.f32 -0.28449672, %v2501_v26  ;;  %2842 = vmatpush.msra.mxu0 %v2839_v51  ;;  %v2835_v3 = vld [vmem:[#allocation2 + $0x6b8] sm:$0xff] }
 0xc9a   :  { %v2563_v12 = vmul.f32 %v2559_v10, %v2555_v20  ;;  %2644 = vmatpush.msrb.mxu3 %v2623_v0  ;;  %v2832_v10 = vld [vmem:[#allocation2 + $0x6a0] sm:$0xff] }
 0xc9b   :  { %v2540_v19 = vsub.f32 1.0, %v2536_v24  ;;  %v2509_v28 = vmul.f32 %v2505_v62, %v2480_v6  ;;  %2843 = vmatpush.msra.mxu0 %v2838_v11  ;;  %v2833_v24 = vld [vmem:[#allocation2 + $0x6a8] sm:$0xff] }
 0xc9c   :  { %2603 = vmatmul.f32.gmra.mxu2 %v2563_v12  ;;  %2645 = vmatpush.msrb.mxu3 %v2622_v39 }
 0xc9d   :  { %v2548_v1 = vsub.f32 0.0, %v2540_v19  ;;  %v2513_v63 = vadd.f32 0.2548296, %v2509_v28  ;;  %2844 = vmatpush.msra.mxu0 %v2837_v43 }
 0xc9e   :  { %2646 = vmatpush.msrb.mxu3 %v2621_v17 }
 0xc9f   :  { %v2552_v52 = vsel %vm2544_vm13, %v2548_v1, %v2540_v19  ;;  %v2517_v41 = vmul.f32 %v2513_v63, %v2480_v6 }
 0xca0   :  { %v2560_v36 = vadd.f32 1.0, %v2552_v52  ;;  %2647 = vmatpush.msrb.mxu3 %v2620_v23  ;;  %v2829_v52 = vld [vmem:[#allocation2 + $0x688] sm:$0xff]  ;;  %v2826_v23 = vld [vmem:[#allocation2 + $0x670] sm:$0xff] }
 0xca1   :  { %v2537_v59 = vmul.f32 %v6103_v40, %v2517_v41 }
 0xca2   :  { %v2564_v30 = vmul.f32 %v2560_v36, %v2556_v45  ;;  %2648 = vmatpush.msrb.mxu3 %v2619_v13 }
 0xca3   :  { %v2541_v57 = vsub.f32 1.0, %v2537_v59  ;;  %v2827_v59 = vld [vmem:[#allocation2 + $0x678] sm:$0xff] }
 0xca4   :  { %2606 = vmatmul.f32.gmra.mxu2 %v2564_v30  ;;  %2649 = vmatpush.msrb.mxu3 %v2618_v48  ;;  %v2828_v30 = vld [vmem:[#allocation2 + $0x680] sm:$0xff] }
 0xca5   :  { %v2549_v15 = vsub.f32 0.0, %v2541_v57 }
 0xca6   :  { %2650 = vmatpush.msrb.mxu3 %v2617_v5 }
 0xca7   :  { %v2553_v37 = vsel %vm2545_vm14, %v2549_v15, %v2541_v57 }
 0xca8   :  { %v2561_v49 = vadd.f32 1.0, %v2553_v37 }
 0xcaa   :  { %v2565_v6 = vmul.f32 %v2561_v49, %v2557_v44  ;;  %v2825_v49 = vld [vmem:[#allocation2 + $0x668] sm:$0xff] }
 0xcac   :  { %2609 = vmatmul.f32.gmra.mxu2 %v2565_v6 }
 0xd17   :  { %v2601_v61 = vpop.f32.mrf.mxu2 }
 0xd18   :  { %v2602_v56 = vadd.f32 %v5944_v2, %v2601_v61  ;;  %v2824_v61 = vld [vmem:[#allocation2 + $0x660] sm:$0xff] }
 0xd1a   :  { %v7217_v31 = vadd.f32 %v2602_v56, %v6811_v22 }
 0xd1c   :  { %2651 = vmatmul.f32.vlgmr.msrb.gmra.mxu3 %v7217_v31 }
 0xd1f   :  { %v2604_v55 = vpop.f32.mrf.mxu2 }
 0xd20   :  { %v2605_v8 = vadd.f32 %v5944_v2, %v2604_v55 }
 0xd22   :  { %v7221_v42 = vadd.f32 %v2605_v8, %v6818_v4 }
 0xd24   :  { %2654 = vmatmul.f32.gmra.mxu3 %v7221_v42 }
 0xd27   :  { %v2607_v9 = vpop.f32.mrf.mxu2 }
 0xd28   :  { %v2608_v54 = vadd.f32 %v5944_v2, %v2607_v9 }
 0xd2a   :  { %v7225_v53 = vadd.f32 %v2608_v54, %v6815_v25 }
 0xd2c   :  { %2657 = vmatmul.f32.gmra.mxu3 %v7225_v53 }
 0xd2f   :  { %v2610_v27 = vpop.f32.mrf.mxu2 }
 0xd30   :  { %v2611_v58 = vadd.f32 %v5944_v2, %v2610_v27 }
 0xd32   :  { %v7229_v22 = vadd.f32 %v2611_v58, %v6809_v38  ;;  %v2836_v38 = vld [vmem:[#allocation2 + $0x6c0] sm:$0xff] }
 0xd33   :  { %2845 = vmatpush.msra.mxu0 %v2836_v38 }
 0xd34   :  { %2660 = vmatmul.f32.gmra.mxu3 %v7229_v22 }
 0xd35   :  { %2846 = vmatpush.msra.mxu0 %v2835_v3 }
 0xd37   :  { %2847 = vmatpush.msra.mxu0 %v2834_v60 }
 0xd39   :  { %2848 = vmatpush.msra.mxu0 %v2833_v24 }
 0xd3b   :  { %2849 = vmatpush.msra.mxu0 %v2832_v10 }
 0xd3d   :  { %2850 = vmatpush.msra.mxu0 %v2831_v18 }
 0xd3f   :  { %2851 = vmatpush.msra.mxu0 %v2830_v35 }
 0xd41   :  { %2852 = vmatpush.msra.mxu0 %v2829_v52 }
 0xd43   :  { %2853 = vmatpush.msra.mxu0 %v2828_v30 }
 0xd45   :  { %2854 = vmatpush.msra.mxu0 %v2827_v59 }
 0xd47   :  { %2855 = vmatpush.msra.mxu0 %v2826_v23 }
 0xd49   :  { %2856 = vmatpush.msra.mxu0 %v2825_v49 }
 0xd4b   :  { %2857 = vmatpush.msra.mxu0 %v2824_v61 }
 0xd9f   :  { %v2652_v4 = vpop.f32.mrf.mxu3 }
 0xda0   :  { %v7235_v50 = vadd.f32 %v7232_v33, %v2652_v4 }
 0xda2   :  { %v7238_v25 = vmul.f32 0.70710677, %v7235_v50 }
 0xda4   :  { %v2668_v34 = vand.u32 2147483647, %v7238_v25 }
 0xda6   :  { %v2672_v47 = vmul.f32 0.3275911, %v2668_v34  ;;  %v2776_v13 = vmul.f32 %v2668_v34, %v2668_v34 }
 0xda7   :  { %v2655_v29 = vpop.f32.mrf.mxu3 }
 0xda8   :  { %v2676_v26 = vadd.f32 1.0, %v2672_v47  ;;  %v7242_v20 = vadd.f32 %v7232_v33, %v2655_v29  ;;  %v2780_v27 = vsub.f32 0.0, %v2776_v13 }
 0xdaa   :  { %6104 = vrcp.f32 %v2676_v26  ;;  %v7245_v62 = vmul.f32 0.70710677, %v7242_v20  ;;  %v2691_v45 = vand.u32 2147483648, %v2676_v26  ;;  %v2689_v40 = vand.u32 2147483647, %v2676_v26 }
 0xdab   :  { %vm2685_vm1 = vweird.f32 %v2676_v26  ;;  %v2784_v47 = vmul.f32 1.442695, %v2780_v27 }
 0xdac   :  { %v7248_v12 = vand.u32 2147483647, %v7245_v62  ;;  %v2692_v15 = vor.u32 1.1754944e-38, %v2691_v45  ;;  %vm2690_vm3 = vcmp.eq.f32.partialorder %v2689_v40, 8.507059e+37 }
 0xdae   :  { %v2673_v1 = vmul.f32 0.3275911, %v7248_v12 }
 0xdaf   :  { %v2658_v0 = vpop.f32.mrf.mxu3 }
 0xdb0   :  { %v6105_v19 = vpop.eup %6104  ;;  %v2677_v36 = vadd.f32 1.0, %v2673_v1  ;;  %v7252_v41 = vadd.f32 %v7232_v33, %v2658_v0 }
 0xdb1   :  { %v2681_v28 = vmul.f32 %v6105_v19, %v2676_v26  ;;  %vm2686_vm0 = vweird.f32 %v6105_v19 }
 0xdb2   :  { %6106 = vrcp.f32 %v2677_v36  ;;  %v7255_v57 = vmul.f32 0.70710677, %v7252_v41  ;;  %vm2687_vm2 = vmor %vm2685_vm1, %vm2686_vm0  ;;  %v2704_v11 = vand.u32 2147483647, %v2677_v36  ;;  %v2706_v43 = vand.u32 2147483648, %v2677_v36 }
 0xdb3   :  { %v2682_v63 = vsub.f32 1.0, %v2681_v28  ;;  %vm2700_vm6 = vweird.f32 %v2677_v36  ;;  %vm2800_vm1 = vcmp.lt.f32.partialorder %v7238_v25, 0.0 }
 0xdb4   :  { %v7258_v44 = vand.u32 2147483647, %v7255_v57  ;;  %v2707_v29 = vor.u32 1.1754944e-38, %v2706_v43  ;;  %vm2705_vm11 = vcmp.eq.f32.partialorder %v2704_v11, 8.507059e+37 }
 0xdb5   :  { %v2683_v39 = vmul.f32 %v6105_v19, %v2682_v63  ;;  %v2777_v63 = vmul.f32 %v7248_v12, %v7248_v12 }
 0xdb6   :  { %v2674_v5 = vmul.f32 0.3275911, %v7258_v44 }
 0xdb7   :  { %v2684_v17 = vadd.f32 %v6105_v19, %v2683_v39  ;;  %v2661_v2 = vpop.f32.mrf.mxu3 }
 0xdb8   :  { %v6107_v56 = vpop.eup %6106  ;;  %v7262_v55 = vadd.f32 %v7232_v33, %v2661_v2  ;;  %v2678_v54 = vadd.f32 1.0, %v2674_v5 }
 0xdb9   :  { %v2688_v37 = vsel %vm2687_vm2, %v6105_v19, %v2684_v17  ;;  %v2696_v9 = vmul.f32 %v6107_v56, %v2677_v36  ;;  %vm2701_vm5 = vweird.f32 %v6107_v56  ;;  %v2781_v17 = vsub.f32 0.0, %v2777_v63 }
 0xdba   :  { %v2693_v6 = vsel %vm2690_vm3, %v2692_v15, %v2688_v37  ;;  %v7265_v58 = vmul.f32 0.70710677, %v7262_v55  ;;  %6108 = vrcp.f32 %v2678_v54  ;;  %vm2702_vm7 = vmor %vm2700_vm6, %vm2701_vm5  ;;  %v2721_v36 = vand.u32 2147483648, %v2678_v54 }
 0xdbb   :  { %v2740_v48 = vmul.f32 1.0614054, %v2693_v6  ;;  %v2697_v51 = vsub.f32 1.0, %v2696_v9  ;;  %6110 = vpow2.f32 %v2784_v47  ;;  %v2719_v40 = vand.u32 2147483647, %v2678_v54 }
 0xdbc   :  { %v7268_v33 = vand.u32 2147483647, %v7265_v58  ;;  %vm2715_vm13 = vweird.f32 %v2678_v54 }
 0xdbd   :  { %v2744_v8 = vadd.f32 -1.4531521, %v2740_v48  ;;  %v2698_v38 = vmul.f32 %v6107_v56, %v2697_v51  ;;  %v2722_v48 = vor.u32 1.1754944e-38, %v2721_v36  ;;  %vm2720_vm0 = vcmp.eq.f32.partialorder %v2719_v40, 8.507059e+37 }
 0xdbe   :  { %v2675_v26 = vmul.f32 0.3275911, %v7268_v33  ;;  %v2779_v63 = vmul.f32 %v7268_v33, %v7268_v33 }
 0xdbf   :  { %v2748_v4 = vmul.f32 %v2744_v8, %v2693_v6  ;;  %v2699_v60 = vadd.f32 %v6107_v56, %v2698_v38  ;;  %v2778_v8 = vmul.f32 %v7258_v44, %v7258_v44 }
 0xdc0   :  { %v6109_v24 = vpop.eup %6108  ;;  %v2679_v18 = vadd.f32 1.0, %v2675_v26 }
 0xdc1   :  { %v2752_v34 = vadd.f32 1.4214138, %v2748_v4  ;;  %v2703_v19 = vsel %vm2702_vm7, %v6107_v56, %v2699_v60  ;;  %v2711_v28 = vmul.f32 %v6109_v24, %v2678_v54  ;;  %vm2716_vm12 = vweird.f32 %v6109_v24  ;;  %v6111_v23 = vpop.eup %6110 }
 0xdc2   :  { %v2708_v35 = vsel %vm2705_vm11, %v2707_v29, %v2703_v19  ;;  %6112 = vrcp.f32 %v2679_v18  ;;  %vm2717_vm14 = vmor %vm2715_vm13, %vm2716_vm12  ;;  %v2786_v56 = vmul.f32 1.442695, %v2781_v17  ;;  %v2734_v11 = vand.u32 2147483647, %v2679_v18 }
 0xdc3   :  { %v2756_v3 = vmul.f32 %v2752_v34, %v2693_v6  ;;  %v2712_v0 = vsub.f32 1.0, %v2711_v28  ;;  %v2741_v52 = vmul.f32 1.0614054, %v2708_v35  ;;  %v2736_v43 = vand.u32 2147483648, %v2679_v18 }
 0xdc4   :  { %6114 = vpow2.f32 %v2786_v56  ;;  %v2782_v26 = vsub.f32 0.0, %v2778_v8  ;;  %vm2730_vm3 = vweird.f32 %v2679_v18  ;;  %vm2735_vm6 = vcmp.eq.f32.partialorder %v2734_v11, 8.507059e+37 }
 0xdc5   :  { %v2760_v10 = vadd.f32 -0.28449672, %v2756_v3  ;;  %v2713_v39 = vmul.f32 %v6109_v24, %v2712_v0  ;;  %v2745_v30 = vadd.f32 -1.4531521, %v2741_v52  ;;  %vm2801_vm7 = vcmp.lt.f32.partialorder %v7245_v62, 0.0 }
 0xdc6   :  { %vm2802_vm11 = vcmp.lt.f32.partialorder %v7255_v57, 0.0  ;;  %vm2803_vm12 = vcmp.lt.f32.partialorder %v7265_v58, 0.0  ;;  %v7285_v57 = vld [vmem:[#allocation5 + $0x18] ss:$0 sm:$0xff]  ;;  %v3044_v58 = vld [vmem:[#allocation2 + $0x748] sm:$0xff] }
 0xdc7   :  { %v2764_v1 = vmul.f32 %v2760_v10, %v2693_v6  ;;  %v2749_v15 = vmul.f32 %v2745_v30, %v2708_v35  ;;  %v2714_v37 = vadd.f32 %v6109_v24, %v2713_v39 }
 0xdc8   :  { %v6113_v49 = vpop.eup %6112 }
 0xdc9   :  { %v2768_v45 = vadd.f32 0.2548296, %v2764_v1  ;;  %v2726_v12 = vmul.f32 %v6113_v49, %v2679_v18  ;;  %v2753_v5 = vadd.f32 1.4214138, %v2749_v15  ;;  %v2718_v2 = vsel %vm2717_vm14, %v6109_v24, %v2714_v37 }
 0xdca   :  { %v2723_v9 = vsel %vm2720_vm0, %v2722_v48, %v2718_v2  ;;  %vm2731_vm2 = vweird.f32 %v6113_v49  ;;  %v2737_v24 = vor.u32 1.1754944e-38, %v2736_v43  ;;  %v2788_v1 = vmul.f32 1.442695, %v2782_v26  ;;  %v6115_v36 = vpop.eup %6114 }
 0xdcb   :  { %v2772_v59 = vmul.f32 %v2768_v45, %v2693_v6  ;;  %v2812_v6 = vmul.f32 0.5, %v7235_v50  ;;  %v2727_v27 = vsub.f32 1.0, %v2726_v12  ;;  %v2757_v54 = vmul.f32 %v2753_v5, %v2708_v35  ;;  %vm2732_vm5 = vmor %vm2730_vm3, %vm2731_vm2 }
 0xdcc   :  { %v2742_v4 = vmul.f32 1.0614054, %v2723_v9  ;;  %6116 = vpow2.f32 %v2788_v1  ;;  %v2813_v2 = vmul.f32 0.5, %v7242_v20  ;;  %v3042_v1 = vld [vmem:[#allocation2 + $0x738] sm:$0xff] }
 0xdcd   :  { %v2792_v13 = vmul.f32 %v6111_v23, %v2772_v59  ;;  %v2728_v34 = vmul.f32 %v6113_v49, %v2727_v27  ;;  %v2761_v38 = vadd.f32 -0.28449672, %v2757_v54  ;;  %v2783_v59 = vsub.f32 0.0, %v2779_v63 }
 0xdce   :  { %v2746_v47 = vadd.f32 -1.4531521, %v2742_v4 }
 0xdcf   :  { %v2796_v61 = vsub.f32 1.0, %v2792_v13  ;;  %v2765_v60 = vmul.f32 %v2761_v38, %v2708_v35  ;;  %v2729_v50 = vadd.f32 %v6113_v49, %v2728_v34  ;;  %v2790_v33 = vmul.f32 1.442695, %v2783_v59 }
 0xdd0   :  { %v2750_v29 = vmul.f32 %v2746_v47, %v2723_v9 }
 0xdd1   :  { %v2804_v51 = vsub.f32 0.0, %v2796_v61  ;;  %v2769_v25 = vadd.f32 0.2548296, %v2765_v60  ;;  %v2733_v28 = vsel %vm2732_vm5, %v6113_v49, %v2729_v50  ;;  %6118 = vpow2.f32 %v2790_v33 }
 0xdd2   :  { %v2754_v19 = vadd.f32 1.4214138, %v2750_v29  ;;  %v2738_v0 = vsel %vm2735_vm6, %v2737_v24, %v2733_v28  ;;  %v6117_v5 = vpop.eup %6116  ;;  %v3046_v24 = vld [vmem:[#allocation2 + $0x758] sm:$0xff] }
 0xdd3   :  { %v2808_v3 = vsel %vm2800_vm1, %v2804_v51, %v2796_v61  ;;  %v2773_v52 = vmul.f32 %v2769_v25, %v2708_v35  ;;  %v2743_v18 = vmul.f32 1.0614054, %v2738_v0  ;;  %3049 = vmatpush.msra.mxu2 %v3046_v24 }
 0xdd4   :  { %v2816_v44 = vadd.f32 1.0, %v2808_v3  ;;  %v2758_v45 = vmul.f32 %v2754_v19, %v2723_v9 }
 0xdd5   :  { %v2793_v39 = vmul.f32 %v6115_v36, %v2773_v52  ;;  %v2747_v30 = vadd.f32 -1.4531521, %v2743_v18  ;;  %v3040_v52 = vld [vmem:[#allocation2 + $0x728] sm:$0xff]  ;;  %v3039_v36 = vld [vmem:[#allocation2 + $0x720] sm:$0xff] }
 0xdd6   :  { %v2820_v10 = vmul.f32 %v2816_v44, %v2812_v6  ;;  %v2762_v40 = vadd.f32 -0.28449672, %v2758_v45  ;;  %v2815_v44 = vmul.f32 0.5, %v7262_v55  ;;  %v3043_v55 = vld [vmem:[#allocation2 + $0x740] sm:$0xff] }
 0xdd7   :  { %v2797_v17 = vsub.f32 1.0, %v2793_v39  ;;  %v2751_v15 = vmul.f32 %v2747_v30, %v2738_v0  ;;  %v6119_v43 = vpop.eup %6118 }
 0xdd8   :  { %2858 = vmatmul.f32.vlgmr.msra.gmra.mxu0 %v2820_v10  ;;  %v2766_v23 = vmul.f32 %v2762_v40, %v2723_v9  ;;  %v3045_v10 = vld [vmem:[#allocation2 + $0x750] sm:$0xff]  ;;  %v3038_v40 = vld [vmem:[#allocation2 + $0x718] sm:$0xff] }
 0xdd9   :  { %v2805_v37 = vsub.f32 0.0, %v2797_v17  ;;  %v2755_v13 = vadd.f32 1.4214138, %v2751_v15  ;;  %3050 = vmatpush.msra.mxu2 %v3045_v10 }
 0xdda   :  { %v2770_v49 = vadd.f32 0.2548296, %v2766_v23  ;;  %v3037_v23 = vld [vmem:[#allocation2 + $0x710] sm:$0xff] }
 0xddb   :  { %v2809_v48 = vsel %vm2801_vm7, %v2805_v37, %v2797_v17  ;;  %v2759_v35 = vmul.f32 %v2755_v13, %v2738_v0  ;;  %3051 = vmatpush.msra.mxu2 %v3044_v58 }
 0xddc   :  { %v2774_v12 = vmul.f32 %v2770_v49, %v2723_v9  ;;  %v2817_v61 = vadd.f32 1.0, %v2809_v48  ;;  %v2814_v9 = vmul.f32 0.5, %v7252_v41  ;;  %v3036_v49 = vld [vmem:[#allocation2 + $0x708] sm:$0xff] }
 0xddd   :  { %v2763_v8 = vadd.f32 -0.28449672, %v2759_v35  ;;  %3052 = vmatpush.msra.mxu2 %v3043_v55 }
 0xdde   :  { %v2794_v56 = vmul.f32 %v6117_v5, %v2774_v12  ;;  %v2821_v6 = vmul.f32 %v2817_v61, %v2813_v2  ;;  %v3035_v2 = vld [vmem:[#allocation2 + $0x700] sm:$0xff]  ;;  %v3034_v61 = vld [vmem:[#allocation2 + $0x6f8] sm:$0xff] }
 0xddf   :  { %v2767_v54 = vmul.f32 %v2763_v8, %v2738_v0  ;;  %3053 = vmatpush.msra.mxu2 %v3042_v1  ;;  %v3033_v8 = vld [vmem:[#allocation2 + $0x6f0] sm:$0xff] }
 0xde0   :  { %v2798_v27 = vsub.f32 1.0, %v2794_v56  ;;  %2861 = vmatmul.f32.gmra.mxu0 %v2821_v6 }
 0xde1   :  { %v2771_v51 = vadd.f32 0.2548296, %v2767_v54 }
 0xde2   :  { %v2806_v4 = vsub.f32 0.0, %v2798_v27 }
 0xde3   :  { %v2775_v11 = vmul.f32 %v2771_v51, %v2738_v0  ;;  %v3041_v0 = vld [vmem:[#allocation2 + $0x730] sm:$0xff] }
 0xde4   :  { %v2810_v62 = vsel %vm2802_vm11, %v2806_v4, %v2798_v27  ;;  %3054 = vmatpush.msra.mxu2 %v3041_v0  ;;  %v3032_v4 = vld [vmem:[#allocation2 + $0x6e8] sm:$0xff] }
 0xde5   :  { %v2818_v34 = vadd.f32 1.0, %v2810_v62  ;;  %v2795_v38 = vmul.f32 %v6119_v43, %v2775_v11 }
 0xde6   :  { %3055 = vmatpush.msra.mxu2 %v3040_v52 }
 0xde7   :  { %v2822_v20 = vmul.f32 %v2818_v34, %v2814_v9  ;;  %v2799_v47 = vsub.f32 1.0, %v2795_v38  ;;  %v3031_v9 = vld [vmem:[#allocation2 + $0x6e0] sm:$0xff] }
 0xde8   :  { %3056 = vmatpush.msra.mxu2 %v3039_v36 }
 0xde9   :  { %2864 = vmatmul.f32.gmra.mxu0 %v2822_v20  ;;  %v2807_v3 = vsub.f32 0.0, %v2799_v47 }
 0xdea   :  { %3057 = vmatpush.msra.mxu2 %v3038_v40 }
 0xdeb   :  { %v2811_v26 = vsel %vm2803_vm12, %v2807_v3, %v2799_v47 }
 0xdec   :  { %v2819_v60 = vadd.f32 1.0, %v2811_v26  ;;  %3058 = vmatpush.msra.mxu2 %v3037_v23 }
 0xdee   :  { %v2823_v29 = vmul.f32 %v2819_v60, %v2815_v44  ;;  %3059 = vmatpush.msra.mxu2 %v3036_v49 }
 0xdf0   :  { %3060 = vmatpush.msra.mxu2 %v3035_v2 }
 0xdf1   :  { %2867 = vmatmul.f32.gmra.mxu0 %v2823_v29 }
 0xdf2   :  { %3061 = vmatpush.msra.mxu2 %v3034_v61 }
 0xdf4   :  { %3062 = vmatpush.msra.mxu2 %v3033_v8 }
 0xdf6   :  { %3063 = vmatpush.msra.mxu2 %v3032_v4 }
 0xdf8   :  { %3064 = vmatpush.msra.mxu2 %v3031_v9 }
 0xe55   :  { %v2859_v50 = vpop.f32.mrf.mxu0 }
 0xe56   :  { %v7288_v41 = vadd.f32 %v7285_v57, %v2859_v50 }
 0xe58   :  { %v7291_v25 = vmul.f32 0.70710677, %v7288_v41 }
 0xe5a   :  { %v2875_v19 = vand.u32 2147483647, %v7291_v25 }
 0xe5c   :  { %v2879_v28 = vmul.f32 0.3275911, %v2875_v19  ;;  %v2983_v62 = vmul.f32 %v2875_v19, %v2875_v19 }
 0xe5d   :  { %v2862_v45 = vpop.f32.mrf.mxu0 }
 0xe5e   :  { %v2883_v63 = vadd.f32 1.0, %v2879_v28  ;;  %v7295_v18 = vadd.f32 %v7285_v57, %v2862_v45  ;;  %v2987_v26 = vsub.f32 0.0, %v2983_v62 }
 0xe60   :  { %6120 = vrcp.f32 %v2883_v63  ;;  %v7298_v39 = vmul.f32 0.70710677, %v7295_v18  ;;  %v2896_v13 = vand.u32 2147483647, %v2883_v63  ;;  %v2898_v33 = vand.u32 2147483648, %v2883_v63 }
 0xe61   :  { %vm2892_vm14 = vweird.f32 %v2883_v63  ;;  %v2991_v19 = vmul.f32 1.442695, %v2987_v26 }
 0xe62   :  { %v7301_v17 = vand.u32 2147483647, %v7298_v39  ;;  %v2899_v6 = vor.u32 1.1754944e-38, %v2898_v33  ;;  %vm2897_vm1 = vcmp.eq.f32.partialorder %v2896_v13, 8.507059e+37 }
 0xe64   :  { %v2880_v37 = vmul.f32 0.3275911, %v7301_v17 }
 0xe66   :  { %v6121_v30 = vpop.eup %6120  ;;  %v2865_v48 = vpop.f32.mrf.mxu0  ;;  %v2884_v35 = vadd.f32 1.0, %v2880_v37 }
 0xe67   :  { %v2888_v59 = vmul.f32 %v6121_v30, %v2883_v63  ;;  %vm2893_vm13 = vweird.f32 %v6121_v30  ;;  %v7305_v5 = vadd.f32 %v7285_v57, %v2865_v48 }
 0xe68   :  { %6122 = vrcp.f32 %v2884_v35  ;;  %vm2894_vm0 = vmor %vm2892_vm14, %vm2893_vm13  ;;  %v2913_v28 = vand.u32 2147483648, %v2884_v35  ;;  %v2911_v63 = vand.u32 2147483647, %v2884_v35  ;;  %vm2907_vm3 = vweird.f32 %v2884_v35 }
 0xe69   :  { %v2889_v15 = vsub.f32 1.0, %v2888_v59  ;;  %v7308_v27 = vmul.f32 0.70710677, %v7305_v5  ;;  %vm3007_vm14 = vcmp.lt.f32.partialorder %v7291_v25, 0.0 }
 0xe6a   :  { %v2914_v40 = vor.u32 1.1754944e-38, %v2913_v28  ;;  %vm2912_vm6 = vcmp.eq.f32.partialorder %v2911_v63, 8.507059e+37 }
 0xe6b   :  { %v2890_v12 = vmul.f32 %v6121_v30, %v2889_v15  ;;  %v7311_v11 = vand.u32 2147483647, %v7308_v27 }
 0xe6d   :  { %v2891_v56 = vadd.f32 %v6121_v30, %v2890_v12  ;;  %v2881_v34 = vmul.f32 0.3275911, %v7311_v11 }
 0xe6e   :  { %v2868_v38 = vpop.f32.mrf.mxu0  ;;  %v6123_v20 = vpop.eup %6122 }
 0xe6f   :  { %v2895_v54 = vsel %vm2894_vm0, %v6121_v30, %v2891_v56  ;;  %v7315_v3 = vadd.f32 %v7285_v57, %v2868_v38  ;;  %v2903_v44 = vmul.f32 %v6123_v20, %v2884_v35  ;;  %v2885_v60 = vadd.f32 1.0, %v2881_v34 }
 0xe70   :  { %v2900_v51 = vsel %vm2897_vm1, %v2899_v6, %v2895_v54  ;;  %vm2908_vm2 = vweird.f32 %v6123_v20  ;;  %v2984_v30 = vmul.f32 %v7301_v17, %v7301_v17 }
 0xe71   :  { %v2947_v43 = vmul.f32 1.0614054, %v2900_v51  ;;  %v7318_v50 = vmul.f32 0.70710677, %v7315_v3  ;;  %v2904_v24 = vsub.f32 1.0, %v2903_v44  ;;  %6124 = vrcp.f32 %v2885_v60  ;;  %vm2909_vm5 = vmor %vm2907_vm3, %vm2908_vm2 }
 0xe72   :  { %6126 = vpow2.f32 %v2991_v19  ;;  %v2988_v48 = vsub.f32 0.0, %v2984_v30  ;;  %v2928_v12 = vand.u32 2147483648, %v2885_v60  ;;  %v2926_v35 = vand.u32 2147483647, %v2885_v60 }
 0xe73   :  { %v2951_v47 = vadd.f32 -1.4531521, %v2947_v43  ;;  %v7321_v58 = vand.u32 2147483647, %v7318_v50  ;;  %v2905_v55 = vmul.f32 %v6123_v20, %v2904_v24  ;;  %vm2922_vm11 = vweird.f32 %v2885_v60 }
 0xe74   :  { %v2993_v62 = vmul.f32 1.442695, %v2988_v48  ;;  %v2929_v43 = vor.u32 1.1754944e-38, %v2928_v12  ;;  %vm2927_vm13 = vcmp.eq.f32.partialorder %v2926_v35, 8.507059e+37 }
 0xe75   :  { %v2955_v29 = vmul.f32 %v2951_v47, %v2900_v51  ;;  %v2882_v1 = vmul.f32 0.3275911, %v7321_v58  ;;  %v2906_v0 = vadd.f32 %v6123_v20, %v2905_v55  ;;  %v2985_v47 = vmul.f32 %v7311_v11, %v7311_v11 }
 0xe76   :  { %v2986_v25 = vmul.f32 %v7321_v58, %v7321_v58 }
 0xe77   :  { %v2959_v10 = vadd.f32 1.4214138, %v2955_v29  ;;  %v7324_v45 = vadd.f32 1.0, %v2882_v1  ;;  %v6125_v36 = vpop.eup %6124  ;;  %v2910_v59 = vsel %vm2909_vm5, %v6123_v20, %v2906_v0  ;;  %v2989_v63 = vsub.f32 0.0, %v2985_v47 }
 0xe78   :  { %v2918_v15 = vmul.f32 %v6125_v36, %v2885_v60  ;;  %v2915_v37 = vsel %vm2912_vm6, %v2914_v40, %v2910_v59  ;;  %vm2923_vm7 = vweird.f32 %v6125_v36  ;;  %v6127_v8 = vpop.eup %6126  ;;  %v2990_v35 = vsub.f32 0.0, %v2986_v25  ;;  %v3251_v25 = vld [vmem:[#allocation2 + $0x7c8] sm:$0xff] }
 0xe79   :  { %v2963_v57 = vmul.f32 %v2959_v10, %v2900_v51  ;;  %6128 = vrcp.f32 %v7324_v45  ;;  %v2948_v33 = vmul.f32 1.0614054, %v2915_v37  ;;  %vm2924_vm12 = vmor %vm2922_vm11, %vm2923_vm7  ;;  %v2943_v60 = vand.u32 2147483648, %v7324_v45 }
 0xe7a   :  { %v2919_v13 = vsub.f32 1.0, %v2918_v15  ;;  %v2941_v55 = vand.u32 2147483647, %v7324_v45  ;;  %6130 = vpow2.f32 %v2993_v62  ;;  %vm2937_vm1 = vweird.f32 %v7324_v45 }
 0xe7b   :  { %v2967_v52 = vadd.f32 -0.28449672, %v2963_v57  ;;  %v2952_v56 = vadd.f32 -1.4531521, %v2948_v33  ;;  %v2944_v0 = vor.u32 1.1754944e-38, %v2943_v60  ;;  %vm3008_vm5 = vcmp.lt.f32.partialorder %v7298_v39, 0.0 }
 0xe7c   :  { %v2920_v61 = vmul.f32 %v6125_v36, %v2919_v13  ;;  %vm2942_vm3 = vcmp.eq.f32.partialorder %v2941_v55, 8.507059e+37  ;;  %vm3009_vm6 = vcmp.lt.f32.partialorder %v7308_v27, 0.0  ;;  %vm3010_vm7 = vcmp.lt.f32.partialorder %v7318_v50, 0.0  ;;  %v7345_v27 = vld [vmem:[#allocation5 + $0x19] ss:$0 sm:$0xff] }
 0xe7d   :  { %v2971_v23 = vmul.f32 %v2967_v52, %v2900_v51  ;;  %v2956_v54 = vmul.f32 %v2952_v56, %v2915_v37 }
 0xe7e   :  { %v2921_v4 = vadd.f32 %v6125_v36, %v2920_v61 }
 0xe7f   :  { %v2975_v49 = vadd.f32 0.2548296, %v2971_v23  ;;  %v6129_v6 = vpop.eup %6128  ;;  %v2960_v38 = vadd.f32 1.4214138, %v2956_v54  ;;  %v2997_v54 = vmul.f32 1.442695, %v2990_v35 }
 0xe80   :  { %v2933_v9 = vmul.f32 %v6129_v6, %v7324_v45  ;;  %v2925_v20 = vsel %vm2924_vm12, %v6125_v36, %v2921_v4  ;;  %vm2938_vm0 = vweird.f32 %v6129_v6  ;;  %v6131_v33 = vpop.eup %6130 }
 0xe81   :  { %v2979_v2 = vmul.f32 %v2975_v49, %v2900_v51  ;;  %v3019_v51 = vmul.f32 0.5, %v7288_v41  ;;  %v2930_v44 = vsel %vm2927_vm13, %v2929_v43, %v2925_v20  ;;  %v2964_v24 = vmul.f32 %v2960_v38, %v2915_v37  ;;  %vm2939_vm2 = vmor %vm2937_vm1, %vm2938_vm0 }
 0xe82   :  { %v2934_v26 = vsub.f32 1.0, %v2933_v9  ;;  %v2949_v10 = vmul.f32 1.0614054, %v2930_v44  ;;  %v2995_v49 = vmul.f32 1.442695, %v2989_v63  ;;  %v3022_v63 = vmul.f32 0.5, %v7315_v3 }
 0xe83   :  { %v2999_v17 = vmul.f32 %v6127_v8, %v2979_v2  ;;  %v2968_v57 = vadd.f32 -0.28449672, %v2964_v24 }
 0xe84   :  { %v2935_v19 = vmul.f32 %v6129_v6, %v2934_v26  ;;  %v2953_v41 = vadd.f32 -1.4531521, %v2949_v10  ;;  %6132 = vpow2.f32 %v2995_v49  ;;  %v3248_v49 = vld [vmem:[#allocation2 + $0x7b0] sm:$0xff] }
 0xe85   :  { %v3003_v34 = vsub.f32 1.0, %v2999_v17  ;;  %v2972_v52 = vmul.f32 %v2968_v57, %v2915_v37  ;;  %6134 = vpow2.f32 %v2997_v54 }
 0xe86   :  { %v2936_v11 = vadd.f32 %v6129_v6, %v2935_v19  ;;  %v2957_v36 = vmul.f32 %v2953_v41, %v2930_v44 }
 0xe87   :  { %v3011_v29 = vsub.f32 0.0, %v3003_v34  ;;  %v2976_v59 = vadd.f32 0.2548296, %v2972_v52 }
 0xe88   :  { %v2940_v30 = vsel %vm2939_vm2, %v6129_v6, %v2936_v11  ;;  %v2961_v23 = vadd.f32 1.4214138, %v2957_v36 }
 0xe89   :  { %v3015_v28 = vsel %vm3007_vm14, %v3011_v29, %v3003_v34  ;;  %v2945_v15 = vsel %vm2942_vm3, %v2944_v0, %v2940_v30  ;;  %v2980_v48 = vmul.f32 %v2976_v59, %v2915_v37  ;;  %v3020_v37 = vmul.f32 0.5, %v7295_v18  ;;  %v3252_v30 = vld [vmem:[#allocation2 + $0x7d0] sm:$0xff]  ;;  %v3250_v59 = vld [vmem:[#allocation2 + $0x7c0] sm:$0xff] }
 0xe8a   :  { %v3023_v1 = vadd.f32 1.0, %v3015_v28  ;;  %v2950_v13 = vmul.f32 1.0614054, %v2945_v15  ;;  %v2965_v45 = vmul.f32 %v2961_v23, %v2930_v44  ;;  %v6133_v34 = vpop.eup %6132 }
 0xe8b   :  { %v3000_v2 = vmul.f32 %v6131_v33, %v2980_v48  ;;  %v6135_v39 = vpop.eup %6134 }
 0xe8c   :  { %v3027_v40 = vmul.f32 %v3023_v1, %v3019_v51  ;;  %v2954_v12 = vadd.f32 -1.4531521, %v2950_v13  ;;  %v2969_v61 = vadd.f32 -0.28449672, %v2965_v45  ;;  %v3247_v13 = vld [vmem:[#allocation2 + $0x7a8] sm:$0xff]  ;;  %v3246_v45 = vld [vmem:[#allocation2 + $0x7a0] sm:$0xff] }
 0xe8d   :  { %v3004_v8 = vsub.f32 1.0, %v3000_v2  ;;  %v3245_v2 = vld [vmem:[#allocation2 + $0x798] sm:$0xff] }
 0xe8e   :  { %3065 = vmatmul.f32.vlgmr.msra.gmra.mxu2 %v3027_v40  ;;  %v2958_v56 = vmul.f32 %v2954_v12, %v2945_v15  ;;  %v2973_v6 = vmul.f32 %v2969_v61, %v2930_v44 }
 0xe8f   :  { %v3012_v58 = vsub.f32 0.0, %v3004_v8 }
 0xe90   :  { %v2962_v17 = vadd.f32 1.4214138, %v2958_v56  ;;  %v2977_v4 = vadd.f32 0.2548296, %v2973_v6 }
 0xe91   :  { %v3016_v43 = vsel %vm3008_vm5, %v3012_v58, %v3004_v8  ;;  %v3244_v8 = vld [vmem:[#allocation2 + $0x790] sm:$0xff]  ;;  %v3243_v58 = vld [vmem:[#allocation2 + $0x788] sm:$0xff] }
 0xe92   :  { %v2966_v62 = vmul.f32 %v2962_v17, %v2945_v15  ;;  %v2981_v9 = vmul.f32 %v2977_v4, %v2930_v44  ;;  %v3024_v38 = vadd.f32 1.0, %v3016_v43  ;;  %v3021_v44 = vmul.f32 0.5, %v7305_v5  ;;  %v3253_v5 = vld [vmem:[#allocation2 + $0x7d8] sm:$0xff] }
 0xe93   :  { %3256 = vmatpush.msra.mxu3 %v3253_v5 }
 0xe94   :  { %v2970_v20 = vadd.f32 -0.28449672, %v2966_v62  ;;  %v3001_v51 = vmul.f32 %v6133_v34, %v2981_v9  ;;  %v3028_v47 = vmul.f32 %v3024_v38, %v3020_v37  ;;  %v3242_v37 = vld [vmem:[#allocation2 + $0x780] sm:$0xff]  ;;  %v3241_v38 = vld [vmem:[#allocation2 + $0x778] sm:$0xff] }
 0xe95   :  { %3257 = vmatpush.msra.mxu3 %v3252_v30 }
 0xe96   :  { %v2974_v26 = vmul.f32 %v2970_v20, %v2945_v15  ;;  %v3005_v29 = vsub.f32 1.0, %v3001_v51  ;;  %3068 = vmatmul.f32.gmra.mxu2 %v3028_v47  ;;  %v3240_v47 = vld [vmem:[#allocation2 + $0x770] sm:$0xff] }
 0xe97   :  { %3258 = vmatpush.msra.mxu3 %v3251_v25 }
 0xe98   :  { %v2978_v60 = vadd.f32 0.2548296, %v2974_v26  ;;  %v3013_v24 = vsub.f32 0.0, %v3005_v29 }
 0xe99   :  { %3259 = vmatpush.msra.mxu3 %v3250_v59 }
 0xe9a   :  { %v2982_v10 = vmul.f32 %v2978_v60, %v2945_v15  ;;  %v3017_v19 = vsel %vm3009_vm6, %v3013_v24, %v3005_v29  ;;  %v3249_v15 = vld [vmem:[#allocation2 + $0x7b8] sm:$0xff] }
 0xe9b   :  { %v3025_v55 = vadd.f32 1.0, %v3017_v19  ;;  %3260 = vmatpush.msra.mxu3 %v3249_v15 }
 0xe9c   :  { %v3002_v28 = vmul.f32 %v6135_v39, %v2982_v10  ;;  %v3239_v10 = vld [vmem:[#allocation2 + $0x768] sm:$0xff] }
 0xe9d   :  { %v3029_v18 = vmul.f32 %v3025_v55, %v3021_v44  ;;  %3261 = vmatpush.msra.mxu3 %v3248_v49  ;;  %v3238_v44 = vld [vmem:[#allocation2 + $0x760] sm:$0xff] }
 0xe9e   :  { %v3006_v57 = vsub.f32 1.0, %v3002_v28 }
 0xe9f   :  { %3071 = vmatmul.f32.gmra.mxu2 %v3029_v18  ;;  %3262 = vmatpush.msra.mxu3 %v3247_v13 }
 0xea0   :  { %v3014_v41 = vsub.f32 0.0, %v3006_v57 }
 0xea1   :  { %3263 = vmatpush.msra.mxu3 %v3246_v45 }
 0xea2   :  { %v3018_v1 = vsel %vm3010_vm7, %v3014_v41, %v3006_v57 }
 0xea3   :  { %v3026_v11 = vadd.f32 1.0, %v3018_v1  ;;  %3264 = vmatpush.msra.mxu3 %v3245_v2 }
 0xea5   :  { %v3030_v0 = vmul.f32 %v3026_v11, %v3022_v63  ;;  %3265 = vmatpush.msra.mxu3 %v3244_v8 }
 0xea7   :  { %3074 = vmatmul.f32.gmra.mxu2 %v3030_v0  ;;  %3266 = vmatpush.msra.mxu3 %v3243_v58 }
 0xea9   :  { %3267 = vmatpush.msra.mxu3 %v3242_v37 }
 0xeab   :  { %3268 = vmatpush.msra.mxu3 %v3241_v38 }
 0xead   :  { %3269 = vmatpush.msra.mxu3 %v3240_v47 }
 0xeaf   :  { %3270 = vmatpush.msra.mxu3 %v3239_v10 }
 0xeb1   :  { %3271 = vmatpush.msra.mxu3 %v3238_v44 }
 0xf11   :  { %v3066_v52 = vpop.f32.mrf.mxu2 }
 0xf12   :  { %v7348_v36 = vadd.f32 %v7345_v27, %v3066_v52 }
 0xf14   :  { %v7351_v40 = vmul.f32 0.70710677, %v7348_v36 }
 0xf16   :  { %v3082_v50 = vand.u32 2147483647, %v7351_v40 }
 0xf18   :  { %v3086_v3 = vmul.f32 0.3275911, %v3082_v50  ;;  %v3190_v24 = vmul.f32 %v3082_v50, %v3082_v50 }
 0xf19   :  { %v3069_v33 = vpop.f32.mrf.mxu2 }
 0xf1a   :  { %v3090_v23 = vadd.f32 1.0, %v3086_v3  ;;  %v7355_v48 = vadd.f32 %v7345_v27, %v3069_v33  ;;  %v3194_v41 = vsub.f32 0.0, %v3190_v24 }
 0xf1c   :  { %6136 = vrcp.f32 %v3090_v23  ;;  %v7358_v35 = vmul.f32 0.70710677, %v7355_v48  ;;  %v3105_v17 = vand.u32 2147483648, %v3090_v23  ;;  %v3103_v62 = vand.u32 2147483647, %v3090_v23 }
 0xf1d   :  { %vm3099_vm12 = vweird.f32 %v3090_v23  ;;  %v3198_v50 = vmul.f32 1.442695, %v3194_v41 }
 0xf1e   :  { %v7361_v56 = vand.u32 2147483647, %v7358_v35  ;;  %v3106_v51 = vor.u32 1.1754944e-38, %v3105_v17  ;;  %vm3104_vm14 = vcmp.eq.f32.partialorder %v3103_v62, 8.507059e+37 }
 0xf20   :  { %v3087_v54 = vmul.f32 0.3275911, %v7361_v56 }
 0xf22   :  { %v6137_v12 = vpop.eup %6136  ;;  %v3072_v43 = vpop.f32.mrf.mxu2  ;;  %v3091_v9 = vadd.f32 1.0, %v3087_v54  ;;  %v3191_v54 = vmul.f32 %v7361_v56, %v7361_v56 }
 0xf23   :  { %v3095_v61 = vmul.f32 %v6137_v12, %v3090_v23  ;;  %vm3100_vm11 = vweird.f32 %v6137_v12  ;;  %v7365_v34 = vadd.f32 %v7345_v27, %v3072_v43 }
 0xf24   :  { %vm3101_vm13 = vmor %vm3099_vm12, %vm3100_vm11  ;;  %6138 = vrcp.f32 %v3091_v9  ;;  %v3118_v25 = vand.u32 2147483647, %v3091_v9  ;;  %v3120_v3 = vand.u32 2147483648, %v3091_v9  ;;  %vm3114_vm1 = vweird.f32 %v3091_v9 }
 0xf25   :  { %v3096_v6 = vsub.f32 1.0, %v3095_v61  ;;  %v7368_v29 = vmul.f32 0.70710677, %v7365_v34  ;;  %v3195_v47 = vsub.f32 0.0, %v3191_v54  ;;  %vm3214_vm12 = vcmp.lt.f32.partialorder %v7351_v40, 0.0 }
 0xf26   :  { %v3121_v33 = vor.u32 1.1754944e-38, %v3120_v3  ;;  %vm3119_vm3 = vcmp.eq.f32.partialorder %v3118_v25, 8.507059e+37 }
 0xf27   :  { %v3097_v4 = vmul.f32 %v6137_v12, %v3096_v6  ;;  %v7371_v19 = vand.u32 2147483647, %v7368_v29 }
 0xf29   :  { %v3098_v20 = vadd.f32 %v6137_v12, %v3097_v4  ;;  %v3088_v28 = vmul.f32 0.3275911, %v7371_v19  ;;  %v3192_v41 = vmul.f32 %v7371_v19, %v7371_v19 }
 0xf2a   :  { %v3075_v18 = vpop.f32.mrf.mxu2  ;;  %v6139_v57 = vpop.eup %6138 }
 0xf2b   :  { %v3102_v26 = vsel %vm3101_vm13, %v6137_v12, %v3098_v20  ;;  %v7375_v1 = vadd.f32 %v7345_v27, %v3075_v18  ;;  %v3110_v11 = vmul.f32 %v6139_v57, %v3091_v9  ;;  %v3092_v0 = vadd.f32 1.0, %v3088_v28 }
 0xf2c   :  { %v3107_v60 = vsel %vm3104_vm14, %v3106_v51, %v3102_v26  ;;  %vm3115_vm0 = vweird.f32 %v6139_v57 }
 0xf2d   :  { %v3154_v39 = vmul.f32 1.0614054, %v3107_v60  ;;  %v7378_v52 = vmul.f32 0.70710677, %v7375_v1  ;;  %v3111_v30 = vsub.f32 1.0, %v3110_v11  ;;  %6140 = vrcp.f32 %v3092_v0  ;;  %vm3116_vm2 = vmor %vm3114_vm1, %vm3115_vm0 }
 0xf2e   :  { %6142 = vpow2.f32 %v3198_v50  ;;  %v3135_v43 = vand.u32 2147483648, %v3092_v0  ;;  %v3133_v38 = vand.u32 2147483647, %v3092_v0  ;;  %vm3129_vm6 = vweird.f32 %v3092_v0 }
 0xf2f   :  { %v3158_v55 = vadd.f32 -1.4531521, %v3154_v39  ;;  %v3112_v23 = vmul.f32 %v6139_v57, %v3111_v30  ;;  %v7381_v15 = vand.u32 2147483647, %v7378_v52  ;;  %v3226_v39 = vmul.f32 0.5, %v7348_v36 }
 0xf30   :  { %v3136_v44 = vor.u32 1.1754944e-38, %v3135_v43  ;;  %vm3134_vm11 = vcmp.eq.f32.partialorder %v3133_v38, 8.507059e+37  ;;  %v3334_v38 = vld [vmem:[#allocation2 + $0x840] sm:$0xff] }
 0xf31   :  { %v3162_v63 = vmul.f32 %v3158_v55, %v3107_v60  ;;  %v3089_v49 = vmul.f32 0.3275911, %v7381_v15  ;;  %v3113_v13 = vadd.f32 %v6139_v57, %v3112_v23 }
 0xf33   :  { %v3166_v5 = vadd.f32 1.4214138, %v3162_v63  ;;  %v6141_v45 = vpop.eup %6140  ;;  %v7384_v2 = vadd.f32 1.0, %v3089_v49  ;;  %v3117_v61 = vsel %vm3116_vm2, %v6139_v57, %v3113_v13  ;;  %v3200_v57 = vmul.f32 1.442695, %v3195_v47 }
 0xf34   :  { %v3125_v8 = vmul.f32 %v6141_v45, %v3092_v0  ;;  %v7386_v6 = vsel %vm3119_vm3, %v3121_v33, %v3117_v61  ;;  %v6143_v9 = vpop.eup %6142  ;;  %vm3130_vm5 = vweird.f32 %v6141_v45  ;;  %vm3215_vm2 = vcmp.lt.f32.partialorder %v7358_v35, 0.0  ;;  %v3328_v35 = vld [vmem:[#allocation2 + $0x810] sm:$0xff] }
 0xf35   :  { %v3170_v59 = vmul.f32 %v3166_v5, %v3107_v60  ;;  %6144 = vrcp.f32 %v7384_v2  ;;  %v3155_v4 = vmul.f32 1.0614054, %v7386_v6  ;;  %vm3131_vm7 = vmor %vm3129_vm6, %vm3130_vm5  ;;  %v3148_v30 = vand.u32 2147483647, %v7384_v2 }
 0xf36   :  { %v3126_v58 = vsub.f32 1.0, %v3125_v8  ;;  %v3150_v50 = vand.u32 2147483648, %v7384_v2  ;;  %6146 = vpow2.f32 %v3200_v57  ;;  %vm3144_vm14 = vweird.f32 %v7384_v2 }
 0xf37   :  { %v3174_v27 = vadd.f32 -0.28449672, %v3170_v59  ;;  %v3159_v20 = vadd.f32 -1.4531521, %v3155_v4  ;;  %vm3149_vm1 = vcmp.eq.f32.partialorder %v3148_v30, 8.507059e+37  ;;  %v3335_v4 = vld [vmem:[#allocation2 + $0x848] sm:$0xff] }
 0xf38   :  { %v3127_v37 = vmul.f32 %v6141_v45, %v3126_v58  ;;  %v3151_v33 = vor.u32 1.1754944e-38, %v3150_v50  ;;  %v3193_v58 = vmul.f32 %v7381_v15, %v7381_v15  ;;  %v3332_v15 = vld [vmem:[#allocation2 + $0x830] sm:$0xff]  ;;  %vm3216_vm3 = vcmp.lt.f32.partialorder %v7368_v29, 0.0 }
 0xf39   :  { %v3178_v12 = vmul.f32 %v3174_v27, %v3107_v60  ;;  %v3163_v26 = vmul.f32 %v3159_v20, %v7386_v6  ;;  %v3196_v27 = vsub.f32 0.0, %v3192_v41  ;;  %vm3217_vm5 = vcmp.lt.f32.partialorder %v7378_v52, 0.0 }
 0xf3a   :  { %v3128_v24 = vadd.f32 %v6141_v45, %v3127_v37 }
 0xf3b   :  { %v3182_v17 = vadd.f32 0.2548296, %v3178_v12  ;;  %v6145_v10 = vpop.eup %6144  ;;  %v3167_v55 = vadd.f32 1.4214138, %v3163_v26  ;;  %v3336_v12 = vld [vmem:[#allocation2 + $0x850] sm:$0xff]  ;;  %v3197_v26 = vsub.f32 0.0, %v3193_v58 }
 0xf3c   :  { %v3132_v28 = vsel %vm3131_vm7, %v6141_v45, %v3128_v24  ;;  %vm3145_vm13 = vweird.f32 %v6145_v10  ;;  %v3337_v45 = vld [vmem:[#allocation2 + $0x858] sm:$0xff]  ;;  %v3202_v54 = vmul.f32 1.442695, %v3196_v27  ;;  %v6147_v37 = vpop.eup %6146  ;;  %v3229_v58 = vmul.f32 0.5, %v7375_v1 }
 0xf3d   :  { %v3186_v62 = vmul.f32 %v3182_v17, %v3107_v60  ;;  %v3140_v60 = vmul.f32 %v6145_v10, %v7384_v2  ;;  %v3137_v63 = vsel %vm3134_vm11, %v3136_v44, %v3132_v28  ;;  %v3171_v0 = vmul.f32 %v3167_v55, %v7386_v6  ;;  %vm3146_vm0 = vmor %vm3144_vm14, %vm3145_vm13  ;;  %3340 = vmatpush.msrb.mxu2 %v3337_v45  ;;  %v3333_v24 = vld [vmem:[#allocation2 + $0x838] sm:$0xff]  ;;  %v3331_v28 = vld [vmem:[#allocation2 + $0x828] sm:$0xff] }
 0xf3e   :  { %v3156_v5 = vmul.f32 1.0614054, %v3137_v63  ;;  %6148 = vpow2.f32 %v3202_v54  ;;  %v3204_v55 = vmul.f32 1.442695, %v3197_v26  ;;  %v3326_v45 = vld [vmem:[#allocation2 + $0x800] sm:$0xff] }
 0xf3f   :  { %v3206_v51 = vmul.f32 %v6143_v9, %v3186_v62  ;;  %v3141_v11 = vsub.f32 1.0, %v3140_v60  ;;  %v3175_v59 = vadd.f32 -0.28449672, %v3171_v0  ;;  %3341 = vmatpush.msrb.mxu2 %v3336_v12  ;;  %v3227_v0 = vmul.f32 0.5, %v7355_v48 }
 0xf40   :  { %v3160_v23 = vadd.f32 -1.4531521, %v3156_v5  ;;  %6150 = vpow2.f32 %v3204_v55 }
 0xf41   :  { %v3210_v56 = vsub.f32 1.0, %v3206_v51  ;;  %v3142_v3 = vmul.f32 %v6145_v10, %v3141_v11  ;;  %v3179_v40 = vmul.f32 %v3175_v59, %v7386_v6  ;;  %3342 = vmatpush.msrb.mxu2 %v3335_v4 }
 0xf42   :  { %v3164_v49 = vmul.f32 %v3160_v23, %v3137_v63 }
 0xf43   :  { %v3218_v18 = vsub.f32 0.0, %v3210_v56  ;;  %v3143_v13 = vadd.f32 %v6145_v10, %v3142_v3  ;;  %v3183_v61 = vadd.f32 0.2548296, %v3179_v40  ;;  %3343 = vmatpush.msrb.mxu2 %v3334_v38  ;;  %v3329_v3 = vld [vmem:[#allocation2 + $0x818] sm:$0xff] }
 0xf44   :  { %v3168_v8 = vadd.f32 1.4214138, %v3164_v49  ;;  %v6149_v11 = vpop.eup %6148 }
 0xf45   :  { %v3222_v36 = vsel %vm3214_vm12, %v3218_v18, %v3210_v56  ;;  %v3147_v17 = vsel %vm3146_vm0, %v6145_v10, %v3143_v13  ;;  %v3187_v62 = vmul.f32 %v3183_v61, %v7386_v6  ;;  %3344 = vmatpush.msrb.mxu2 %v3333_v24  ;;  %v3228_v13 = vmul.f32 0.5, %v7365_v34  ;;  %v3324_v34 = vld [vmem:[#allocation2 + $0x7f0] sm:$0xff] }
 0xf46   :  { %v3230_v25 = vadd.f32 1.0, %v3222_v36  ;;  %v3152_v2 = vsel %vm3149_vm1, %v3151_v33, %v3147_v17  ;;  %v3172_v43 = vmul.f32 %v3168_v8, %v3137_v63  ;;  %v3330_v36 = vld [vmem:[#allocation2 + $0x820] sm:$0xff]  ;;  %v6151_v49 = vpop.eup %6150  ;;  %v3325_v8 = vld [vmem:[#allocation2 + $0x7f8] sm:$0xff] }
 0xf47   :  { %v3157_v9 = vmul.f32 1.0614054, %v3152_v2  ;;  %v3207_v20 = vmul.f32 %v6147_v37, %v3187_v62  ;;  %3345 = vmatpush.msrb.mxu2 %v3332_v15  ;;  %v3323_v62 = vld [vmem:[#allocation2 + $0x7e8] sm:$0xff] }
 0xf48   :  { %v3234_v19 = vmul.f32 %v3230_v25, %v3226_v39  ;;  %v3176_v51 = vadd.f32 -0.28449672, %v3172_v43  ;;  %v3322_v43 = vld [vmem:[#allocation2 + $0x7e0] sm:$0xff] }
 0xf49   :  { %v3161_v47 = vadd.f32 -1.4531521, %v3157_v9  ;;  %v3211_v10 = vsub.f32 1.0, %v3207_v20  ;;  %3346 = vmatpush.msrb.mxu2 %v3331_v28  ;;  %v5948_v9 = vld [vmem:[#allocation5 + $0x1a] ss:$0 sm:$0xff]  ;;  %v3541_v28 = vld [vmem:[#allocation2 + $0x8c0] sm:$0xff] }
 0xf4a   :  { %3272 = vmatmul.f32.vlgmr.msra.gmra.mxu3 %v3234_v19  ;;  %v3180_v56 = vmul.f32 %v3176_v51, %v3137_v63  ;;  %v3327_v19 = vld [vmem:[#allocation2 + $0x808] sm:$0xff] }
 0xf4b   :  { %v3165_v39 = vmul.f32 %v3161_v47, %v3152_v2  ;;  %v3219_v44 = vsub.f32 0.0, %v3211_v10  ;;  %3347 = vmatpush.msrb.mxu2 %v3330_v36  ;;  %v3537_v36 = vld [vmem:[#allocation2 + $0x8a0] sm:$0xff] }
 0xf4c   :  { %v3184_v60 = vadd.f32 0.2548296, %v3180_v56 }
 0xf4d   :  { %v3169_v6 = vadd.f32 1.4214138, %v3165_v39  ;;  %v3223_v18 = vsel %vm3215_vm2, %v3219_v44, %v3211_v10  ;;  %3348 = vmatpush.msrb.mxu2 %v3329_v3  ;;  %v3544_v39 = vld [vmem:[#allocation2 + $0x8d8] sm:$0xff]  ;;  %v3543_v44 = vld [vmem:[#allocation2 + $0x8d0] sm:$0xff] }
 0xf4e   :  { %v3188_v57 = vmul.f32 %v3184_v60, %v3137_v63  ;;  %v3231_v5 = vadd.f32 1.0, %v3223_v18  ;;  %3547 = vmatpush.msrb.mxu3 %v3544_v39  ;;  %v3536_v3 = vld [vmem:[#allocation2 + $0x898] sm:$0xff] }
 0xf4f   :  { %v3173_v41 = vmul.f32 %v3169_v6, %v3152_v2  ;;  %3349 = vmatpush.msrb.mxu2 %v3328_v35  ;;  %v3542_v6 = vld [vmem:[#allocation2 + $0x8c8] sm:$0xff]  ;;  %v3535_v35 = vld [vmem:[#allocation2 + $0x890] sm:$0xff] }
 0xf50   :  { %v3208_v30 = vmul.f32 %v6149_v11, %v3188_v57  ;;  %v3235_v25 = vmul.f32 %v3231_v5, %v3227_v0  ;;  %3548 = vmatpush.msrb.mxu3 %v3543_v44  ;;  %v3540_v57 = vld [vmem:[#allocation2 + $0x8b8] sm:$0xff]  ;;  %v3538_v11 = vld [vmem:[#allocation2 + $0x8a8] sm:$0xff] }
 0xf51   :  { %v3177_v50 = vadd.f32 -0.28449672, %v3173_v41  ;;  %3350 = vmatpush.msrb.mxu2 %v3327_v19  ;;  %v3539_v41 = vld [vmem:[#allocation2 + $0x8b0] sm:$0xff] }
 0xf52   :  { %v3212_v59 = vsub.f32 1.0, %v3208_v30  ;;  %3275 = vmatmul.f32.gmra.mxu3 %v3235_v25 }
 0xf53   :  { %v3181_v23 = vmul.f32 %v3177_v50, %v3152_v2  ;;  %3351 = vmatpush.msrb.mxu2 %v3326_v45  ;;  %3549 = vmatpush.msrb.mxu3 %v3542_v6 }
 0xf54   :  { %v3220_v27 = vsub.f32 0.0, %v3212_v59 }
 0xf55   :  { %v3185_v63 = vadd.f32 0.2548296, %v3181_v23  ;;  %3352 = vmatpush.msrb.mxu2 %v3325_v8  ;;  %3550 = vmatpush.msrb.mxu3 %v3541_v28  ;;  %v3532_v8 = vld [vmem:[#allocation2 + $0x878] sm:$0xff] }
 0xf56   :  { %v3224_v48 = vsel %vm3216_vm3, %v3220_v27, %v3212_v59 }
 0xf57   :  { %v3189_v40 = vmul.f32 %v3185_v63, %v3152_v2  ;;  %v3232_v33 = vadd.f32 1.0, %v3224_v48  ;;  %3353 = vmatpush.msrb.mxu2 %v3324_v34  ;;  %3551 = vmatpush.msrb.mxu3 %v3540_v57  ;;  %v3530_v34 = vld [vmem:[#allocation2 + $0x868] sm:$0xff] }
 0xf59   :  { %v3209_v12 = vmul.f32 %v6151_v49, %v3189_v40  ;;  %v3236_v61 = vmul.f32 %v3232_v33, %v3228_v13  ;;  %3354 = vmatpush.msrb.mxu2 %v3323_v62  ;;  %3552 = vmatpush.msrb.mxu3 %v3539_v41  ;;  %v3534_v40 = vld [vmem:[#allocation2 + $0x888] sm:$0xff]  ;;  %v3533_v13 = vld [vmem:[#allocation2 + $0x880] sm:$0xff] }
 0xf5b   :  { %v3213_v17 = vsub.f32 1.0, %v3209_v12  ;;  %3278 = vmatmul.f32.gmra.mxu3 %v3236_v61  ;;  %3355 = vmatpush.msrb.mxu2 %v3322_v43 }
 0xf5c   :  { %3553 = vmatpush.msrb.mxu3 %v3538_v11 }
 0xf5d   :  { %v3221_v54 = vsub.f32 0.0, %v3213_v17 }
 0xf5e   :  { %3554 = vmatpush.msrb.mxu3 %v3537_v36 }
 0xf5f   :  { %v3225_v29 = vsel %vm3217_vm5, %v3221_v54, %v3213_v17  ;;  %v3531_v54 = vld [vmem:[#allocation2 + $0x870] sm:$0xff] }
 0xf60   :  { %v3233_v2 = vadd.f32 1.0, %v3225_v29  ;;  %3555 = vmatpush.msrb.mxu3 %v3536_v3 }
 0xf62   :  { %v3237_v4 = vmul.f32 %v3233_v2, %v3229_v58  ;;  %3556 = vmatpush.msrb.mxu3 %v3535_v35 }
 0xf64   :  { %3281 = vmatmul.f32.gmra.mxu3 %v3237_v4 }
 0xf65   :  { %3557 = vmatpush.msrb.mxu3 %v3534_v40 }
 0xf67   :  { %3558 = vmatpush.msrb.mxu3 %v3533_v13 }
 0xf69   :  { %3559 = vmatpush.msrb.mxu3 %v3532_v8 }
 0xf6b   :  { %3560 = vmatpush.msrb.mxu3 %v3531_v54 }
 0xf6d   :  { %3561 = vmatpush.msrb.mxu3 %v3530_v34 }
 0xfcd   :  { %v3273_v37 = vpop.f32.mrf.mxu3 }
 0xfce   :  { %v3274_v38 = vadd.f32 %v5948_v9, %v3273_v37 }
 0xfd0   :  { %v7413_v20 = vadd.f32 %v3274_v38, %v7217_v31 }
 0xfd2   :  { %3356 = vmatmul.f32.vlgmr.msrb.gmra.mxu2 %v7413_v20 }
 0xfd5   :  { %v3276_v52 = vpop.f32.mrf.mxu3 }
 0xfd6   :  { %v3277_v51 = vadd.f32 %v5948_v9, %v3276_v52 }
 0xfd8   :  { %v7417_v1 = vadd.f32 %v3277_v51, %v7221_v42  ;;  %v7436_v42 = vld [vmem:[#allocation5 + $0x1b] ss:$0 sm:$0xff] }
 0xfda   :  { %3359 = vmatmul.f32.gmra.mxu2 %v7417_v1 }
 0xfde   :  { %v3279_v47 = vpop.f32.mrf.mxu3 }
 0xfdf   :  { %v3280_v26 = vadd.f32 %v5948_v9, %v3279_v47 }
 0xfe1   :  { %v7421_v24 = vadd.f32 %v3280_v26, %v7225_v53 }
 0xfe3   :  { %3362 = vmatmul.f32.gmra.mxu2 %v7421_v24 }
 0xfe7   :  { %v3282_v10 = vpop.f32.mrf.mxu3 }
 0xfe8   :  { %v3283_v56 = vadd.f32 %v5948_v9, %v3282_v10  ;;  %v3529_v9 = vld [vmem:[#allocation2 + $0x860] sm:$0xff] }
 0xfe9   :  { %3562 = vmatpush.msrb.mxu3 %v3529_v9 }
 0xfea   :  { %v7425_v31 = vadd.f32 %v3283_v56, %v7229_v22 }
 0xfec   :  { %3301 = vmatpush.xpose.msrb.mxu0 %v7425_v31  ;;  %3365 = vmatmul.f32.gmra.mxu2 %v7425_v31 }
 0xff0   :  { %3302 = vmatpush.xpose.msrb.mxu0 %v7421_v24 }
 0xff4   :  { %3303 = vmatpush.xpose.msrb.mxu0 %v7417_v1 }
 0xff8   :  { %3304 = vmatpush.xpose.msrb.mxu0 %v7413_v20 }
 0xffb   :  { %3305 = vmatmul.f32.vlgmr.msrb.gmra.mxu0 %v7413_v20 }
0x1003   :  { %3308 = vmatmul.f32.gmra.mxu0 %v7417_v1 }
0x100b   :  { %3311 = vmatmul.f32.gmra.mxu0 %v7421_v24 }
0x1013   :  { %3314 = vmatmul.f32.gmra.mxu0 %v7425_v31 }
0x1055   :  { %v3357_v53 = vpop.f32.mrf.mxu2 }
0x1056   :  { %v7439_v22 = vadd.f32 %v7436_v42, %v3357_v53 }
0x1058   :  { %v7442_v15 = vmul.f32 0.70710677, %v7439_v22 }
0x105a   :  { %v3373_v60 = vand.u32 2147483647, %v7442_v15  ;;  %vm3505_vm2 = vcmp.lt.f32.partialorder %v7442_v15, 0.0 }
0x105c   :  { %v3377_v55 = vmul.f32 0.3275911, %v3373_v60  ;;  %v3481_v58 = vmul.f32 %v3373_v60, %v3373_v60 }
0x105d   :  { %v3360_v0 = vpop.f32.mrf.mxu2 }
0x105e   :  { %v3381_v18 = vadd.f32 1.0, %v3377_v55  ;;  %v7446_v5 = vadd.f32 %v7436_v42, %v3360_v0  ;;  %v3485_v37 = vsub.f32 0.0, %v3481_v58 }
0x1060   :  { %6152 = vrcp.f32 %v3381_v18  ;;  %v7449_v25 = vmul.f32 0.70710677, %v7446_v5  ;;  %v3396_v27 = vand.u32 2147483648, %v3381_v18  ;;  %v3394_v19 = vand.u32 2147483647, %v3381_v18 }
0x1061   :  { %vm3390_vm7 = vweird.f32 %v3381_v18  ;;  %v3489_v44 = vmul.f32 1.442695, %v3485_v37  ;;  %v3518_v7 = vmul.f32 0.5, %v7446_v5 }
0x1062   :  { %v7452_v23 = vand.u32 2147483647, %v7449_v25  ;;  %v3397_v61 = vor.u32 1.1754944e-38, %v3396_v27  ;;  %vm3395_vm12 = vcmp.eq.f32.partialorder %v3394_v19, 8.507059e+37 }
0x1064   :  { %v3378_v48 = vmul.f32 0.3275911, %v7452_v23 }
0x1066   :  { %v6153_v30 = vpop.eup %6152  ;;  %v3363_v49 = vpop.f32.mrf.mxu2  ;;  %v3382_v45 = vadd.f32 1.0, %v3378_v48  ;;  %v3482_v48 = vmul.f32 %v7452_v23, %v7452_v23  ;;  %v3517_v23 = vmul.f32 0.5, %v7439_v22 }
0x1067   :  { %v3386_v50 = vmul.f32 %v6153_v30, %v3381_v18  ;;  %vm3391_vm6 = vweird.f32 %v6153_v30  ;;  %v7456_v12 = vadd.f32 %v7436_v42, %v3363_v49 }
0x1068   :  { %vm3392_vm11 = vmor %vm3390_vm7, %vm3391_vm6  ;;  %6154 = vrcp.f32 %v3382_v45  ;;  %v3411_v57 = vand.u32 2147483648, %v3382_v45  ;;  %vm3405_vm14 = vweird.f32 %v3382_v45  ;;  %v3409_v41 = vand.u32 2147483647, %v3382_v45 }
0x1069   :  { %v3387_v59 = vsub.f32 1.0, %v3386_v50  ;;  %v7459_v2 = vmul.f32 0.70710677, %v7456_v12 }
0x106a   :  { %vm3410_vm1 = vcmp.eq.f32.partialorder %v3409_v41, 8.507059e+37 }
0x106b   :  { %v3388_v63 = vmul.f32 %v6153_v30, %v3387_v59  ;;  %v3375_v62 = vand.u32 2147483647, %v7459_v2 }
0x106d   :  { %v3389_v33 = vadd.f32 %v6153_v30, %v3388_v63  ;;  %v3379_v38 = vmul.f32 0.3275911, %v3375_v62  ;;  %v3412_v63 = vor.u32 1.1754944e-38, %v3411_v57 }
0x106e   :  { %v6155_v51 = vpop.eup %6154 }
0x106f   :  { %v3393_v17 = vsel %vm3392_vm11, %v6153_v30, %v3389_v33  ;;  %v3366_v52 = vpop.f32.mrf.mxu2  ;;  %v3401_v10 = vmul.f32 %v6155_v51, %v3382_v45  ;;  %v3383_v56 = vadd.f32 1.0, %v3379_v38  ;;  %vm3406_vm13 = vweird.f32 %v6155_v51 }
0x1070   :  { %v3398_v29 = vsel %vm3395_vm12, %v3397_v61, %v3393_v17  ;;  %v7463_v26 = vadd.f32 %v7436_v42, %v3366_v52  ;;  %vm7472_vm0 = vmor %vm3405_vm14, %vm3406_vm13 }
0x1071   :  { %v3445_v4 = vmul.f32 1.0614054, %v3398_v29  ;;  %v3402_v60 = vsub.f32 1.0, %v3401_v10  ;;  %6156 = vrcp.f32 %v3383_v56  ;;  %v3426_v45 = vand.u32 2147483648, %v3383_v56 }
0x1072   :  { %v7466_v39 = vmul.f32 0.70710677, %v7463_v26  ;;  %6158 = vpow2.f32 %v3489_v44  ;;  %v3424_v54 = vand.u32 2147483647, %v3383_v56  ;;  %vm3420_vm3 = vweird.f32 %v3383_v56 }
0x1073   :  { %v3449_v43 = vadd.f32 -1.4531521, %v3445_v4  ;;  %v3403_v28 = vmul.f32 %v6155_v51, %v3402_v60  ;;  %v3427_v38 = vor.u32 1.1754944e-38, %v3426_v45 }
0x1074   :  { %v7469_v55 = vand.u32 2147483647, %v7466_v39  ;;  %vm3425_vm6 = vcmp.eq.f32.partialorder %v3424_v54, 8.507059e+37  ;;  %vm3508_vm13 = vcmp.lt.f32.partialorder %v7466_v39, 0.0  ;;  %v3901_v39 = vld [vmem:[#allocation2 + $0x920] sm:$0xff] }
0x1075   :  { %v3453_v47 = vmul.f32 %v3449_v43, %v3398_v29  ;;  %v3404_v11 = vadd.f32 %v6155_v51, %v3403_v28  ;;  %v3483_v43 = vmul.f32 %v3375_v62, %v3375_v62 }
0x1076   :  { %v3380_v42 = vmul.f32 0.3275911, %v7469_v55 }
0x1077   :  { %v3457_v53 = vadd.f32 1.4214138, %v3453_v47  ;;  %v6157_v3 = vpop.eup %6156  ;;  %v3408_v35 = vsel %vm7472_vm0, %v6155_v51, %v3404_v11  ;;  %v3487_v11 = vsub.f32 0.0, %v3483_v43 }
0x1078   :  { %v7476_v30 = vadd.f32 1.0, %v3380_v42  ;;  %v3306_v50 = vpop.f32.mrf.mxu0  ;;  %v3416_v19 = vmul.f32 %v6157_v3, %v3383_v56  ;;  %v7489_v32 = vsel %vm3410_vm1, %v3412_v63, %v3408_v35  ;;  %v6159_v33 = vpop.eup %6158 }
0x1079   :  { %v3461_v6 = vmul.f32 %v3457_v53, %v3398_v29  ;;  %v7480_v59 = vsel %vm6859_vm8, %v3306_v50, -1e+30  ;;  %v3446_v61 = vmul.f32 1.0614054, %v7489_v32  ;;  %vm3421_vm8 = vweird.f32 %v6157_v3 }
0x107a   :  { %6160 = vrcp.f32 %v7476_v30  ;;  %v3417_v49 = vsub.f32 1.0, %v3416_v19  ;;  %v3576_v13 = vsel %vm1789_vm9, %v7480_v59, -inf  ;;  %vm3422_vm5 = vmor %vm3420_vm3, %vm3421_vm8  ;;  %v3439_v14 = vand.u32 2147483647, %v7476_v30 }
0x107b   :  { %v3465_v18 = vadd.f32 -0.28449672, %v3461_v6  ;;  %3577 = vmax.xlane.f32.xlu2 %v3576_v13  ;;  %v3450_v58 = vadd.f32 -1.4531521, %v3446_v61  ;;  %v3441_v28 = vand.u32 2147483648, %v7476_v30  ;;  %vm3435_vm7 = vweird.f32 %v7476_v30 }
0x107c   :  { %v3418_v17 = vmul.f32 %v6157_v3, %v3417_v49  ;;  %vm3440_vm12 = vcmp.eq.f32.partialorder %v3439_v14, 8.507059e+37 }
0x107d   :  { %v3469_v0 = vmul.f32 %v3465_v18, %v3398_v29  ;;  %v3454_v47 = vmul.f32 %v3450_v58, %v7489_v32  ;;  %v3442_v15 = vor.u32 1.1754944e-38, %v3441_v28 }
0x107e   :  { %v3419_v37 = vadd.f32 %v6157_v3, %v3418_v17 }
0x107f   :  { %v3473_v27 = vadd.f32 0.2548296, %v3469_v0  ;;  %v3458_v44 = vadd.f32 1.4214138, %v3454_v47 }
0x1080   :  { %v6161_v4 = vpop.eup %6160  ;;  %v3309_v9 = vpop.f32.mrf.mxu0  ;;  %v3423_v53 = vsel %vm3422_vm5, %v6157_v3, %v3419_v37 }
0x1081   :  { %v3477_v40 = vmul.f32 %v3473_v27, %v3398_v29  ;;  %v3486_v29 = vsub.f32 0.0, %v3482_v48  ;;  %v3431_v52 = vmul.f32 %v6161_v4, %v7476_v30  ;;  %v7497_v51 = vsel %vm6890_vm10, %v3309_v9, -1e+30 }
0x1082   :  { %v3579_v22 = vsel %vm1789_vm9, %v7497_v51, -inf  ;;  %v3428_v60 = vsel %vm3425_vm6, %v3427_v38, %v3423_v53  ;;  %vm3436_vm10 = vweird.f32 %v6161_v4  ;;  %v3462_v41 = vmul.f32 %v3458_v44, %v7489_v32 }
0x1083   :  { %v3497_v8 = vmul.f32 %v6159_v33, %v3477_v40  ;;  %v3491_v56 = vmul.f32 1.442695, %v3486_v29  ;;  %v3432_v62 = vsub.f32 1.0, %v3431_v52  ;;  %3580 = vmax.xlane.f32.xlu0 %v3579_v22  ;;  %v3447_v18 = vmul.f32 1.0614054, %v3428_v60  ;;  %vm3437_vm11 = vmor %vm3435_vm7, %vm3436_vm10 }
0x1084   :  { %v3466_v50 = vadd.f32 -0.28449672, %v3462_v41  ;;  %v3484_v40 = vmul.f32 %v7469_v55, %v7469_v55  ;;  %v3493_v33 = vmul.f32 1.442695, %v3487_v11 }
0x1085   :  { %v3501_v34 = vsub.f32 1.0, %v3497_v8  ;;  %v3433_v42 = vmul.f32 %v6161_v4, %v3432_v62  ;;  %v3451_v0 = vadd.f32 -1.4531521, %v3447_v18  ;;  %6162 = vpow2.f32 %v3491_v56 }
0x1086   :  { %v3470_v19 = vmul.f32 %v3466_v50, %v7489_v32  ;;  %6164 = vpow2.f32 %v3493_v33  ;;  %v3899_v33 = vld [vmem:[#allocation2 + $0x910] sm:$0xff] }
0x1087   :  { %v3509_v10 = vsub.f32 0.0, %v3501_v34  ;;  %v3434_v3 = vadd.f32 %v6161_v4, %v3433_v42  ;;  %v3455_v27 = vmul.f32 %v3451_v0, %v3428_v60 }
0x1088   :  { %v3312_v35 = vpop.f32.mrf.mxu0  ;;  %v3474_v45 = vadd.f32 0.2548296, %v3470_v19 }
0x1089   :  { %v3513_v6 = vsel %vm3505_vm2, %v3509_v10, %v3501_v34  ;;  %v7510_v63 = vsel %vm6920_vm15, %v3312_v35, -1e+30  ;;  %v3438_v48 = vsel %vm3437_vm11, %v6161_v4, %v3434_v3  ;;  %v3459_v49 = vadd.f32 1.4214138, %v3455_v27 }
0x108a   :  { %v3521_v57 = vadd.f32 1.0, %v3513_v6  ;;  %v3582_v30 = vsel %vm1789_vm9, %v7510_v63, -inf  ;;  %v3443_v13 = vsel %vm3440_vm12, %v3442_v15, %v3438_v48  ;;  %v3478_v8 = vmul.f32 %v3474_v45, %v7489_v32  ;;  %v3907_v48 = vld [vmem:[#allocation2 + $0x950] sm:$0xff]  ;;  %v3898_v45 = vld [vmem:[#allocation2 + $0x908] sm:$0xff] }
0x108b   :  { %3583 = vmax.xlane.f32.xlu2 %v3582_v30  ;;  %v3448_v61 = vmul.f32 1.0614054, %v3443_v13  ;;  %v3463_v16 = vmul.f32 %v3459_v49, %v3428_v60  ;;  %v6163_v54 = vpop.eup %6162  ;;  %vm3506_vm15 = vcmp.lt.f32.partialorder %v7449_v25, 0.0  ;;  %v3520_v35 = vmul.f32 0.5, %v7463_v26  ;;  %v3904_v30 = vld [vmem:[#allocation2 + $0x938] sm:$0xff]  ;;  %v3903_v49 = vld [vmem:[#allocation2 + $0x930] sm:$0xff] }
0x108c   :  { %v3525_v36 = vmul.f32 %v3521_v57, %v3517_v23  ;;  %v3488_v23 = vsub.f32 0.0, %v3484_v40  ;;  %v3498_v58 = vmul.f32 %v6163_v54, %v3478_v8  ;;  %v6165_v53 = vpop.eup %6164  ;;  %v3906_v40 = vld [vmem:[#allocation2 + $0x948] sm:$0xff]  ;;  %v3900_v26 = vld [vmem:[#allocation2 + $0x918] sm:$0xff] }
0x108d   :  { %v3452_v17 = vadd.f32 -1.4531521, %v3448_v61  ;;  %v3467_v29 = vadd.f32 -0.28449672, %v3463_v16  ;;  %v3897_v61 = vld [vmem:[#allocation2 + $0x900] sm:$0xff]  ;;  %v3896_v16 = vld [vmem:[#allocation2 + $0x8f8] sm:$0xff] }
0x108e   :  { %3563 = vmatmul.f32.vlgmr.msrb.gmra.mxu3 %v3525_v36  ;;  %v3502_v9 = vsub.f32 1.0, %v3498_v58  ;;  %v3495_v38 = vmul.f32 1.442695, %v3488_v23  ;;  %v3894_v23 = vld [vmem:[#allocation2 + $0x8e8] sm:$0xff]  ;;  %v3893_v58 = vld [vmem:[#allocation2 + $0x8e0] sm:$0xff] }
0x108f   :  { %v3456_v4 = vmul.f32 %v3452_v17, %v3443_v13  ;;  %v3471_v34 = vmul.f32 %v3467_v29, %v3428_v60  ;;  %v3895_v17 = vld [vmem:[#allocation2 + $0x8f0] sm:$0xff] }
0x1090   :  { %v3315_v55 = vpop.f32.mrf.mxu0  ;;  %v3510_v47 = vsub.f32 0.0, %v3502_v9  ;;  %6166 = vpow2.f32 %v3495_v38 }
0x1091   :  { %v7520_v43 = vsel %vm6941_vm4, %v3315_v55, -1e+30  ;;  %v3460_v37 = vadd.f32 1.4214138, %v3456_v4  ;;  %v3475_v32 = vadd.f32 0.2548296, %v3471_v34 }
0x1092   :  { %v3585_v52 = vsel %vm1789_vm9, %v7520_v43, -inf  ;;  %v3514_v56 = vsel %vm3506_vm15, %v3510_v47, %v3502_v9  ;;  %vm3507_vm4 = vcmp.lt.f32.partialorder %v7459_v2, 0.0  ;;  %v3908_v2 = vld [vmem:[#allocation2 + $0x958] sm:$0xff] }
0x1093   :  { %3586 = vmax.xlane.f32.xlu0 %v3585_v52  ;;  %v3464_v10 = vmul.f32 %v3460_v37, %v3443_v13  ;;  %v3479_v22 = vmul.f32 %v3475_v32, %v3428_v60  ;;  %v3522_v44 = vadd.f32 1.0, %v3514_v56  ;;  %v3519_v60 = vmul.f32 0.5, %v7456_v12  ;;  %3927 = vmatpush.msrb.mxu1 %v3908_v2  ;;  %v3905_v12 = vld [vmem:[#allocation2 + $0x940] sm:$0xff] }
0x1095   :  { %v3468_v62 = vadd.f32 -0.28449672, %v3464_v10  ;;  %v3499_v6 = vmul.f32 %v6165_v53, %v3479_v22  ;;  %v3526_v28 = vmul.f32 %v3522_v44, %v3518_v7  ;;  %3928 = vmatpush.msrb.mxu1 %v3907_v48  ;;  %v5950_v10 = vld [vmem:[#allocation5 + $0x1c] ss:$0 sm:$0xff] }
0x1096   :  { %v6167_v11 = vpop.eup %6166 }
0x1097   :  { %v3472_v14 = vmul.f32 %v3468_v62, %v3443_v13  ;;  %v3503_v18 = vsub.f32 1.0, %v3499_v6  ;;  %3566 = vmatmul.f32.gmra.mxu3 %v3526_v28  ;;  %3929 = vmatpush.msrb.mxu1 %v3906_v40 }
0x1099   :  { %v3476_v57 = vadd.f32 0.2548296, %v3472_v14  ;;  %v3511_v42 = vsub.f32 0.0, %v3503_v18  ;;  %3930 = vmatpush.msrb.mxu1 %v3905_v12 }
0x109b   :  { %v3480_v41 = vmul.f32 %v3476_v57, %v3443_v13  ;;  %v3515_v25 = vsel %vm3507_vm4, %v3511_v42, %v3503_v18  ;;  %3931 = vmatpush.msrb.mxu1 %v3904_v30  ;;  %v3902_v13 = vld [vmem:[#allocation2 + $0x928] sm:$0xff] }
0x109c   :  { %v3523_v0 = vadd.f32 1.0, %v3515_v25 }
0x109d   :  { %v3500_v36 = vmul.f32 %v6167_v11, %v3480_v41  ;;  %3932 = vmatpush.msrb.mxu1 %v3903_v49 }
0x109e   :  { %v3527_v50 = vmul.f32 %v3523_v0, %v3519_v60 }
0x109f   :  { %v3504_v5 = vsub.f32 1.0, %v3500_v36  ;;  %3933 = vmatpush.msrb.mxu1 %v3902_v13 }
0x10a0   :  { %3569 = vmatmul.f32.gmra.mxu3 %v3527_v50 }
0x10a1   :  { %v3512_v3 = vsub.f32 0.0, %v3504_v5  ;;  %3934 = vmatpush.msrb.mxu1 %v3901_v39 }
0x10a3   :  { %v3516_v15 = vsel %vm3508_vm13, %v3512_v3, %v3504_v5  ;;  %3935 = vmatpush.msrb.mxu1 %v3900_v26 }
0x10a4   :  { %v3524_v27 = vadd.f32 1.0, %v3516_v15 }
0x10a5   :  { %3936 = vmatpush.msrb.mxu1 %v3899_v33 }
0x10a6   :  { %v3528_v19 = vmul.f32 %v3524_v27, %v3520_v35 }
0x10a7   :  { %3937 = vmatpush.msrb.mxu1 %v3898_v45 }
0x10a8   :  { %3572 = vmatmul.f32.gmra.mxu3 %v3528_v19 }
0x10a9   :  { %3938 = vmatpush.msrb.mxu1 %v3897_v61 }
0x10ab   :  { %3939 = vmatpush.msrb.mxu1 %v3896_v16 }
0x10ad   :  { %3940 = vmatpush.msrb.mxu1 %v3895_v17 }
0x10af   :  { %3941 = vmatpush.msrb.mxu1 %v3894_v23 }
0x10b1   :  { %3942 = vmatpush.msrb.mxu1 %v3893_v58 }
0x10ee   :  { %v3578_v8 = vpop.xlane.xlu2 %3577 }
0x10ef   :  { %vm3588_vm14 = vcmp.eq.f32.partialorder %v7480_v59, %v3578_v8 }
0x10f0   :  { %v3592_v54 = vsel %vm3588_vm14, %v6979_v46, 32.0 }
0x10f1   :  { %v3596_v29 = vsel %vm1789_vm9, %v3592_v54, inf }
0x10f2   :  { %3597 = vmin.xlane.f32.xlu1 %v3596_v29 }
0x10f6   :  { %v3581_v4 = vpop.xlane.xlu0 %3580 }
0x10f7   :  { %vm3589_vm0 = vcmp.eq.f32.partialorder %v7497_v51, %v3581_v4 }
0x10f8   :  { %v3593_v55 = vsel %vm3589_vm0, %v6979_v46, 32.0 }
0x10f9   :  { %v3599_v34 = vsel %vm1789_vm9, %v3593_v55, inf }
0x10fa   :  { %3600 = vmin.xlane.f32.xlu1 %v3599_v34 }
0x10fe   :  { %v3584_v9 = vpop.xlane.xlu2 %3583 }
0x10ff   :  { %vm3590_vm1 = vcmp.eq.f32.partialorder %v7510_v63, %v3584_v9 }
0x1100   :  { %v3594_v37 = vsel %vm3590_vm1, %v6979_v46, 32.0 }
0x1101   :  { %v3602_v38 = vsel %vm1789_vm9, %v3594_v37, inf }
0x1102   :  { %3603 = vmin.xlane.f32.xlu0 %v3602_v38 }
0x1106   :  { %v3587_v52 = vpop.xlane.xlu0 %3586 }
0x1107   :  { %vm3591_vm8 = vcmp.eq.f32.partialorder %v7520_v43, %v3587_v52 }
0x1108   :  { %v3595_v32 = vsel %vm3591_vm8, %v6979_v46, 32.0 }
0x1109   :  { %v3605_v47 = vsel %vm1789_vm9, %v3595_v32, inf }
0x110a   :  { %3606 = vmin.xlane.f32.xlu1 %v3605_v47 }
0x1111   :  { %v3564_v22 = vpop.f32.mrf.mxu3 }
0x1112   :  { %v7542_v53 = vadd.f32 %v5950_v10, %v3564_v22 }
0x1114   :  { %3943 = vmatmul.f32.vlgmr.msrb.gmra.mxu1 %v7542_v53 }
0x111a   :  { %v3567_v56 = vpop.f32.mrf.mxu3 }
0x111b   :  { %v7545_v62 = vadd.f32 %v5950_v10, %v3567_v56 }
0x111d   :  { %3946 = vmatmul.f32.gmra.mxu1 %v7545_v62 }
0x1123   :  { %v3570_v7 = vpop.f32.mrf.mxu3 }
0x1124   :  { %v7548_v44 = vadd.f32 %v5950_v10, %v3570_v7 }
0x1126   :  { %3949 = vmatmul.f32.gmra.mxu1 %v7548_v44 }
0x112b   :  { %v3573_v6 = vpop.f32.mrf.mxu3 }
0x112c   :  { %v7551_v14 = vadd.f32 %v5950_v10, %v3573_v6 }
0x112e   :  { %3824 = vmatpush.msra.mxu0 %v7551_v14  ;;  %3952 = vmatmul.f32.gmra.mxu1 %v7551_v14 }
0x1130   :  { %3825 = vmatpush.msra.mxu0 %v7548_v44 }
0x1132   :  { %3826 = vmatpush.msra.mxu0 %v7545_v62 }
0x1134   :  { %3827 = vmatpush.msra.mxu0 %v7542_v53 }
0x1165   :  { %v3598_v28 = vpop.xlane.xlu1 %3597 }
0x1166   :  { %vm3608_vm2 = vcmp.eq.f32.partialorder %v6979_v46, %v3598_v28 }
0x1167   :  { %v5882_v18 = vsel %vm3608_vm2, 1.0, %v6339_v21  ;;  %v3620_v57 = vsel %vm3608_vm2, -1e+30, %v7480_v59 }
0x1168   :  { %5898 = vmatmul.msk.f32.vlgmr.msra.gmra.mxu0 %vm1789_vm9, %v5882_v18  ;;  %v3624_v42 = vsel %vm1789_vm9, %v3620_v57, -inf }
0x1169   :  { %3625 = vmax.xlane.f32.xlu2 %v3624_v42 }
0x116d   :  { %v3601_v41 = vpop.xlane.xlu1 %3600 }
0x116e   :  { %vm3609_vm3 = vcmp.eq.f32.partialorder %v6979_v46, %v3601_v41 }
0x116f   :  { %v5883_v11 = vsel %vm3609_vm3, 1.0, %v6339_v21  ;;  %v3621_v25 = vsel %vm3609_vm3, -1e+30, %v7497_v51 }
0x1170   :  { %5899 = vmatmul.msk.f32.gmra.mxu0 %vm1789_vm9, %v5883_v11  ;;  %v3627_v60 = vsel %vm1789_vm9, %v3621_v25, -inf }
0x1171   :  { %3628 = vmax.xlane.f32.xlu2 %v3627_v60 }
0x1175   :  { %v3604_v0 = vpop.xlane.xlu0 %3603 }
0x1176   :  { %vm3610_vm5 = vcmp.eq.f32.partialorder %v6979_v46, %v3604_v0 }
0x1177   :  { %v5884_v59 = vsel %vm3610_vm5, 1.0, %v6339_v21  ;;  %v3622_v36 = vsel %vm3610_vm5, -1e+30, %v7510_v63 }
0x1178   :  { %v3630_v50 = vsel %vm1789_vm9, %v3622_v36, -inf  ;;  %5900 = vmatmul.msk.f32.gmra.mxu0 %vm1789_vm9, %v5884_v59 }
0x1179   :  { %3631 = vmax.xlane.f32.xlu1 %v3630_v50 }
0x117d   :  { %v3607_v5 = vpop.xlane.xlu1 %3606 }
0x117e   :  { %vm3611_vm6 = vcmp.eq.f32.partialorder %v6979_v46, %v3607_v5 }
0x117f   :  { %v5885_v51 = vsel %vm3611_vm6, 1.0, %v6339_v21  ;;  %v3623_v3 = vsel %vm3611_vm6, -1e+30, %v7520_v43 }
0x1180   :  { %v3633_v15 = vsel %vm1789_vm9, %v3623_v3, -inf  ;;  %5901 = vmatmul.msk.f32.gmra.mxu0 %vm1789_vm9, %v5885_v51 }
0x1181   :  { %3634 = vmax.xlane.f32.xlu2 %v3633_v15 }
0x11dc   :  { %v3626_v35 = vpop.xlane.xlu2 %3625 }
0x11dd   :  { %vm3636_vm10 = vcmp.eq.f32.partialorder %v3620_v57, %v3626_v35 }
0x11de   :  { %v3640_v63 = vsel %vm3636_vm10, %v6979_v46, 32.0 }
0x11df   :  { %v3644_v27 = vsel %vm1789_vm9, %v3640_v63, inf }
0x11e0   :  { %3645 = vmin.xlane.f32.xlu0 %v3644_v27 }
0x11e4   :  { %v3629_v19 = vpop.xlane.xlu2 %3628 }
0x11e5   :  { %vm3637_vm7 = vcmp.eq.f32.partialorder %v3621_v25, %v3629_v19 }
0x11e6   :  { %v3641_v2 = vsel %vm3637_vm7, %v6979_v46, 32.0 }
0x11e7   :  { %v3647_v48 = vsel %vm1789_vm9, %v3641_v2, inf }
0x11e8   :  { %3648 = vmin.xlane.f32.xlu0 %v3647_v48 }
0x11ec   :  { %v3632_v43 = vpop.xlane.xlu1 %3631 }
0x11ed   :  { %vm3638_vm11 = vcmp.eq.f32.partialorder %v3622_v36, %v3632_v43 }
0x11ee   :  { %v3642_v40 = vsel %vm3638_vm11, %v6979_v46, 32.0 }
0x11ef   :  { %v3650_v12 = vsel %vm1789_vm9, %v3642_v40, inf }
0x11f0   :  { %3651 = vmin.xlane.f32.xlu2 %v3650_v12 }
0x11f4   :  { %v3635_v30 = vpop.xlane.xlu2 %3634 }
0x11f5   :  { %vm3639_vm12 = vcmp.eq.f32.partialorder %v3623_v3, %v3635_v30 }
0x11f6   :  { %v3643_v49 = vsel %vm3639_vm12, %v6979_v46, 32.0 }
0x11f7   :  { %v3653_v13 = vsel %vm1789_vm9, %v3643_v49, inf }
0x11f8   :  { %3654 = vmin.xlane.f32.xlu0 %v3653_v13 }
0x1253   :  { %v3646_v39 = vpop.xlane.xlu0 %3645 }
0x1254   :  { %vm3656_vm15 = vcmp.eq.f32.partialorder %v6979_v46, %v3646_v39 }
0x1255   :  { %v5886_v26 = vsel %vm3656_vm15, 1.0, %v6339_v21  ;;  %v3668_v33 = vsel %vm3656_vm15, -1e+30, %v3620_v57 }
0x1256   :  { %5902 = vmatmul.msk.f32.gmra.mxu0 %vm1789_vm9, %v5886_v26  ;;  %v3672_v45 = vsel %vm1789_vm9, %v3668_v33, -inf }
0x1257   :  { %3673 = vmax.xlane.f32.xlu1 %v3672_v45  ;;  %v3923_v45 = vld [vmem:[#allocation2 + $0x9d0] sm:$0xff] }
0x125b   :  { %v3649_v61 = vpop.xlane.xlu0 %3648 }
0x125c   :  { %vm3657_vm4 = vcmp.eq.f32.partialorder %v6979_v46, %v3649_v61  ;;  %v3922_v61 = vld [vmem:[#allocation2 + $0x9c8] sm:$0xff] }
0x125d   :  { %v5887_v16 = vsel %vm3657_vm4, 1.0, %v6339_v21  ;;  %v3669_v8 = vsel %vm3657_vm4, -1e+30, %v3621_v25 }
0x125e   :  { %5903 = vmatmul.msk.f32.gmra.mxu0 %vm1789_vm9, %v5887_v16  ;;  %v3675_v17 = vsel %vm1789_vm9, %v3669_v8, -inf  ;;  %v3921_v16 = vld [vmem:[#allocation2 + $0x9c0] sm:$0xff] }
0x125f   :  { %3676 = vmax.xlane.f32.xlu1 %v3675_v17  ;;  %v3920_v17 = vld [vmem:[#allocation2 + $0x9b8] sm:$0xff] }
0x1263   :  { %v3652_v54 = vpop.xlane.xlu2 %3651 }
0x1264   :  { %vm3658_vm13 = vcmp.eq.f32.partialorder %v6979_v46, %v3652_v54 }
0x1265   :  { %v5888_v23 = vsel %vm3658_vm13, 1.0, %v6339_v21  ;;  %v3670_v29 = vsel %vm3658_vm13, -1e+30, %v3622_v36 }
0x1266   :  { %v3678_v58 = vsel %vm1789_vm9, %v3670_v29, -inf  ;;  %5904 = vmatmul.msk.f32.gmra.mxu0 %vm1789_vm9, %v5888_v23  ;;  %v3919_v23 = vld [vmem:[#allocation2 + $0x9b0] sm:$0xff] }
0x1267   :  { %3679 = vmax.xlane.f32.xlu0 %v3678_v58  ;;  %v3917_v58 = vld [vmem:[#allocation2 + $0x9a0] sm:$0xff] }
0x126b   :  { %v3655_v4 = vpop.xlane.xlu0 %3654 }
0x126c   :  { %vm3659_vm14 = vcmp.eq.f32.partialorder %v6979_v46, %v3655_v4 }
0x126d   :  { %v5889_v55 = vsel %vm3659_vm14, 1.0, %v6339_v21  ;;  %v3671_v34 = vsel %vm3659_vm14, -1e+30, %v3623_v3 }
0x126e   :  { %v3681_v9 = vsel %vm1789_vm9, %v3671_v34, -inf  ;;  %5905 = vmatmul.msk.f32.gmra.mxu0 %vm1789_vm9, %v5889_v55  ;;  %v3916_v55 = vld [vmem:[#allocation2 + $0x998] sm:$0xff] }
0x126f   :  { %3682 = vmax.xlane.f32.xlu1 %v3681_v9  ;;  %v3915_v9 = vld [vmem:[#allocation2 + $0x990] sm:$0xff] }
0x12ca   :  { %v3674_v37 = vpop.xlane.xlu1 %3673 }
0x12cb   :  { %vm3684_vm0 = vcmp.eq.f32.partialorder %v3668_v33, %v3674_v37  ;;  %v3914_v37 = vld [vmem:[#allocation2 + $0x988] sm:$0xff] }
0x12cc   :  { %v3688_v38 = vsel %vm3684_vm0, %v6979_v46, 32.0 }
0x12cd   :  { %v3692_v52 = vsel %vm1789_vm9, %v3688_v38, inf  ;;  %v3829_v38 = vpop.f32.mrf.mxu0 }
0x12ce   :  { %3693 = vmin.xlane.f32.xlu2 %v3692_v52 }
0x12d2   :  { %v3677_v32 = vpop.xlane.xlu1 %3676 }
0x12d3   :  { %vm3685_vm1 = vcmp.eq.f32.partialorder %v3669_v8, %v3677_v32  ;;  %v3913_v32 = vld [vmem:[#allocation2 + $0x980] sm:$0xff] }
0x12d4   :  { %v3689_v47 = vsel %vm3685_vm1, %v6979_v46, 32.0 }
0x12d5   :  { %v3695_v10 = vsel %vm1789_vm9, %v3689_v47, inf }
0x12d6   :  { %3696 = vmin.xlane.f32.xlu2 %v3695_v10  ;;  %v3912_v10 = vld [vmem:[#allocation2 + $0x978] sm:$0xff] }
0x12da   :  { %v3680_v22 = vpop.xlane.xlu0 %3679 }
0x12db   :  { %vm3686_vm8 = vcmp.eq.f32.partialorder %v3670_v29, %v3680_v22 }
0x12dc   :  { %v3690_v56 = vsel %vm3686_vm8, %v6979_v46, 32.0 }
0x12dd   :  { %v3698_v7 = vsel %vm1789_vm9, %v3690_v56, inf  ;;  %v3832_v56 = vpop.f32.mrf.mxu0 }
0x12de   :  { %3699 = vmin.xlane.f32.xlu1 %v3698_v7 }
0x12e2   :  { %v3683_v6 = vpop.xlane.xlu1 %3682 }
0x12e3   :  { %vm3687_vm2 = vcmp.eq.f32.partialorder %v3671_v34, %v3683_v6 }
0x12e4   :  { %v3691_v28 = vsel %vm3687_vm2, %v6979_v46, 32.0 }
0x12e5   :  { %v3701_v18 = vsel %vm1789_vm9, %v3691_v28, inf  ;;  %v3835_v6 = vpop.f32.mrf.mxu0 }
0x12e6   :  { %3702 = vmin.xlane.f32.xlu2 %v3701_v18 }
0x12ed   :  { %v3838_v28 = vpop.f32.mrf.mxu0 }
0x12f5   :  { %v3841_v18 = vpop.f32.mrf.mxu0 }
0x1341   :  { %v3694_v57 = vpop.xlane.xlu2 %3693 }
0x1342   :  { %vm3704_vm3 = vcmp.eq.f32.partialorder %v6979_v46, %v3694_v57  ;;  %v3844_v57 = vpop.f32.mrf.mxu0 }
0x1343   :  { %v5890_v42 = vsel %vm3704_vm3, 1.0, %v6339_v21  ;;  %v3716_v41 = vsel %vm3704_vm3, -1e+30, %v3668_v33  ;;  %v3924_v33 = vld [vmem:[#allocation2 + $0x9d8] sm:$0xff] }
0x1344   :  { %5906 = vmatmul.msk.f32.gmra.mxu0 %vm1789_vm9, %v5890_v42  ;;  %v3720_v11 = vsel %vm1789_vm9, %v3716_v41, -inf  ;;  %3956 = vmatpush.msra.mxu2 %v3924_v33  ;;  %v5951_v33 = vld [vmem:[#allocation5 + $0x1d] ss:$0 sm:$0xff] }
0x1345   :  { %3721 = vmax.xlane.f32.xlu0 %v3720_v11 }
0x1346   :  { %3957 = vmatpush.msra.mxu2 %v3923_v45  ;;  %v4160_v45 = vld [vmem:[#allocation2 + $0xa58] sm:$0xff] }
0x1347   :  { %4163 = vmatpush.msra.mxu3 %v4160_v45 }
0x1348   :  { %3958 = vmatpush.msra.mxu2 %v3922_v61 }
0x1349   :  { %v3697_v25 = vpop.xlane.xlu2 %3696 }
0x134a   :  { %vm3705_vm5 = vcmp.eq.f32.partialorder %v6979_v46, %v3697_v25  ;;  %3959 = vmatpush.msra.mxu2 %v3921_v16  ;;  %v3847_v42 = vpop.f32.mrf.mxu0  ;;  %v3911_v25 = vld [vmem:[#allocation2 + $0x970] sm:$0xff] }
0x134b   :  { %v5891_v60 = vsel %vm3705_vm5, 1.0, %v6339_v21  ;;  %v3717_v0 = vsel %vm3705_vm5, -1e+30, %v3669_v8 }
0x134c   :  { %5907 = vmatmul.msk.f32.gmra.mxu0 %vm1789_vm9, %v5891_v60  ;;  %v3723_v59 = vsel %vm1789_vm9, %v3717_v0, -inf  ;;  %3960 = vmatpush.msra.mxu2 %v3920_v17  ;;  %v3910_v60 = vld [vmem:[#allocation2 + $0x968] sm:$0xff] }
0x134d   :  { %3724 = vmax.xlane.f32.xlu0 %v3723_v59  ;;  %v4158_v17 = vld [vmem:[#allocation2 + $0xa48] sm:$0xff] }
0x134e   :  { %3961 = vmatpush.msra.mxu2 %v3919_v23 }
0x1351   :  { %v3700_v36 = vpop.xlane.xlu1 %3699 }
0x1352   :  { %vm3706_vm6 = vcmp.eq.f32.partialorder %v6979_v46, %v3700_v36 }
0x1353   :  { %v5892_v50 = vsel %vm3706_vm6, 1.0, %v6339_v21  ;;  %v3718_v5 = vsel %vm3706_vm6, -1e+30, %v3670_v29  ;;  %v3918_v29 = vld [vmem:[#allocation2 + $0x9a8] sm:$0xff] }
0x1354   :  { %v3726_v51 = vsel %vm1789_vm9, %v3718_v5, -inf  ;;  %5908 = vmatmul.msk.f32.gmra.mxu0 %vm1789_vm9, %v5892_v50  ;;  %3962 = vmatpush.msra.mxu2 %v3918_v29  ;;  %v3877_v50 = vmax.f32 %v3829_v38, %v3841_v18  ;;  %v4150_v18 = vld [vmem:[#allocation2 + $0xa08] sm:$0xff] }
0x1355   :  { %3727 = vmax.xlane.f32.xlu2 %v3726_v51 }
0x1356   :  { %3963 = vmatpush.msra.mxu2 %v3917_v58  ;;  %v4155_v58 = vld [vmem:[#allocation2 + $0xa30] sm:$0xff] }
0x1358   :  { %3964 = vmatpush.msra.mxu2 %v3916_v55 }
0x1359   :  { %v3703_v3 = vpop.xlane.xlu2 %3702 }
0x135a   :  { %vm3707_vm10 = vcmp.eq.f32.partialorder %v6979_v46, %v3703_v3  ;;  %3965 = vmatpush.msra.mxu2 %v3915_v9  ;;  %v4154_v9 = vld [vmem:[#allocation2 + $0xa28] sm:$0xff] }
0x135b   :  { %v5893_v15 = vsel %vm3707_vm10, 1.0, %v6339_v21  ;;  %v3719_v35 = vsel %vm3707_vm10, -1e+30, %v3671_v34 }
0x135c   :  { %v3729_v63 = vsel %vm1789_vm9, %v3719_v35, -inf  ;;  %5909 = vmatmul.msk.f32.gmra.mxu0 %vm1789_vm9, %v5893_v15  ;;  %3966 = vmatpush.msra.mxu2 %v3914_v37  ;;  %v3878_v15 = vmax.f32 %v3832_v56, %v3844_v57  ;;  %v4151_v56 = vld [vmem:[#allocation2 + $0xa10] sm:$0xff] }
0x135d   :  { %3730 = vmax.xlane.f32.xlu0 %v3729_v63 }
0x135e   :  { %3967 = vmatpush.msra.mxu2 %v3913_v32  ;;  %v4153_v32 = vld [vmem:[#allocation2 + $0xa20] sm:$0xff] }
0x1360   :  { %3968 = vmatpush.msra.mxu2 %v3912_v10  ;;  %v4152_v10 = vld [vmem:[#allocation2 + $0xa18] sm:$0xff] }
0x1362   :  { %3969 = vmatpush.msra.mxu2 %v3911_v25  ;;  %v4149_v25 = vld [vmem:[#allocation2 + $0xa00] sm:$0xff] }
0x1364   :  { %3970 = vmatpush.msra.mxu2 %v3910_v60 }
0x13b8   :  { %v3722_v27 = vpop.xlane.xlu0 %3721 }
0x13b9   :  { %vm3732_vm7 = vcmp.eq.f32.partialorder %v3716_v41, %v3722_v27  ;;  %v3850_v41 = vpop.f32.mrf.mxu0 }
0x13ba   :  { %v3736_v19 = vsel %vm3732_vm7, %v6979_v46, 32.0 }
0x13bb   :  { %v3740_v2 = vsel %vm1789_vm9, %v3736_v19, inf }
0x13bc   :  { %3741 = vmin.xlane.f32.xlu1 %v3740_v2  ;;  %v3879_v2 = vmax.f32 %v3835_v6, %v3847_v42 }
0x13c0   :  { %v3725_v48 = vpop.xlane.xlu0 %3724 }
0x13c1   :  { %vm3733_vm11 = vcmp.eq.f32.partialorder %v3717_v0, %v3725_v48  ;;  %v3853_v11 = vpop.f32.mrf.mxu0  ;;  %v3909_v0 = vld [vmem:[#allocation2 + $0x960] sm:$0xff] }
0x13c2   :  { %v3737_v43 = vsel %vm3733_vm11, %v6979_v46, 32.0  ;;  %3971 = vmatpush.msra.mxu2 %v3909_v0 }
0x13c3   :  { %v3743_v40 = vsel %vm1789_vm9, %v3737_v43, inf }
0x13c4   :  { %3744 = vmin.xlane.f32.xlu1 %v3743_v40 }
0x13c8   :  { %v3728_v12 = vpop.xlane.xlu2 %3727 }
0x13c9   :  { %vm3734_vm12 = vcmp.eq.f32.partialorder %v3718_v5, %v3728_v12  ;;  %v3856_v59 = vpop.f32.mrf.mxu0 }
0x13ca   :  { %v3738_v30 = vsel %vm3734_vm12, %v6979_v46, 32.0 }
0x13cb   :  { %v3746_v49 = vsel %vm1789_vm9, %v3738_v30, inf  ;;  %v3880_v30 = vmax.f32 %v3838_v28, %v3850_v41 }
0x13cc   :  { %3747 = vmin.xlane.f32.xlu2 %v3746_v49 }
0x13d0   :  { %v3731_v13 = vpop.xlane.xlu0 %3730 }
0x13d1   :  { %vm3735_vm15 = vcmp.eq.f32.partialorder %v3719_v35, %v3731_v13  ;;  %v3882_v35 = vmax.f32 %v3878_v15, %v3856_v59 }
0x13d2   :  { %v3739_v39 = vsel %vm3735_vm15, %v6979_v46, 32.0 }
0x13d3   :  { %v3749_v26 = vsel %vm1789_vm9, %v3739_v39, inf }
0x13d4   :  { %3750 = vmin.xlane.f32.xlu0 %v3749_v26  ;;  %v3944_v26 = vpop.f32.mrf.mxu1 }
0x13d5   :  { %v3945_v61 = vadd.f32 %v5951_v33, %v3944_v26 }
0x13dc   :  { %v3947_v16 = vpop.f32.mrf.mxu1 }
0x142f   :  { %v3742_v8 = vpop.xlane.xlu1 %3741 }
0x1430   :  { %vm3752_vm4 = vcmp.eq.f32.partialorder %v6979_v46, %v3742_v8 }
0x1431   :  { %v5894_v54 = vsel %vm3752_vm4, 1.0, %v6339_v21 }
0x1432   :  { %5910 = vmatmul.msk.f32.gmra.mxu0 %vm1789_vm9, %v5894_v54 }
0x1437   :  { %v3745_v4 = vpop.xlane.xlu1 %3744 }
0x1438   :  { %vm3753_vm13 = vcmp.eq.f32.partialorder %v6979_v46, %v3745_v4  ;;  %v3948_v4 = vadd.f32 %v5951_v33, %v3947_v16 }
0x1439   :  { %v5895_v34 = vsel %vm3753_vm13, 1.0, %v6339_v21 }
0x143a   :  { %5911 = vmatmul.msk.f32.gmra.mxu0 %vm1789_vm9, %v5895_v34 }
0x143f   :  { %v3748_v52 = vpop.xlane.xlu2 %3747 }
0x1440   :  { %vm3754_vm14 = vcmp.eq.f32.partialorder %v6979_v46, %v3748_v52  ;;  %v3950_v52 = vpop.f32.mrf.mxu1 }
0x1441   :  { %v5896_v47 = vsel %vm3754_vm14, 1.0, %v6339_v21 }
0x1442   :  { %5912 = vmatmul.msk.f32.gmra.mxu0 %vm1789_vm9, %v5896_v47 }
0x1447   :  { %v3751_v22 = vpop.xlane.xlu0 %3750 }
0x1448   :  { %vm3755_vm0 = vcmp.eq.f32.partialorder %v6979_v46, %v3751_v22  ;;  %v3859_v46 = vpop.f32.mrf.mxu0  ;;  %v3953_v0 = vpop.f32.mrf.mxu1 }
0x1449   :  { %v5897_v7 = vsel %vm3755_vm0, 1.0, %v6339_v21  ;;  %v3881_v21 = vmax.f32 %v3877_v50, %v3853_v11  ;;  %v3883_v48 = vmax.f32 %v3879_v2, %v3859_v46  ;;  %v4148_v46 = vld [vmem:[#allocation2 + $0x9f8] sm:$0xff] }
0x144a   :  { %5913 = vmatmul.msk.f32.gmra.mxu0 %vm1789_vm9, %v5897_v7  ;;  %v3951_v7 = vadd.f32 %v5951_v33, %v3950_v52 }
0x1450   :  { %v3862_v36 = vpop.f32.mrf.mxu0 }
0x1451   :  { %v3884_v49 = vmax.f32 %v3880_v30, %v3862_v36 }
0x14af   :  { %v3865_v5 = vpop.f32.mrf.mxu0 }
0x14b0   :  { %v3885_v51 = vmax.f32 %v3881_v21, %v3865_v5 }
0x14b2   :  { %v3889_v3 = vsub.f32 %v3885_v51, %v7542_v53  ;;  %v4147_v51 = vld [vmem:[#allocation2 + $0x9f0] sm:$0xff] }
0x14b4   :  { %3972 = vmatmul.f32.vlgmr.msra.gmra.mxu2 %v3889_v3  ;;  %v3954_v3 = vadd.f32 %v5951_v33, %v3953_v0 }
0x14b7   :  { %v3868_v63 = vpop.f32.mrf.mxu0 }
0x14b8   :  { %v3886_v27 = vmax.f32 %v3882_v35, %v3868_v63  ;;  %v4146_v35 = vld [vmem:[#allocation2 + $0x9e8] sm:$0xff] }
0x14ba   :  { %v3890_v19 = vsub.f32 %v3886_v27, %v7545_v62  ;;  %v4159_v62 = vld [vmem:[#allocation2 + $0xa50] sm:$0xff] }
0x14bb   :  { %4164 = vmatpush.msra.mxu3 %v4159_v62 }
0x14bc   :  { %3975 = vmatmul.f32.gmra.mxu2 %v3890_v19  ;;  %v4145_v19 = vld [vmem:[#allocation2 + $0x9e0] sm:$0xff] }
0x14bd   :  { %4165 = vmatpush.msra.mxu3 %v4158_v17 }
0x14bf   :  { %v3871_v43 = vpop.f32.mrf.mxu0 }
0x14c0   :  { %v3887_v40 = vmax.f32 %v3883_v48, %v3871_v43 }
0x14c2   :  { %v3891_v12 = vsub.f32 %v3887_v40, %v7548_v44  ;;  %v4157_v44 = vld [vmem:[#allocation2 + $0xa40] sm:$0xff] }
0x14c3   :  { %4166 = vmatpush.msra.mxu3 %v4157_v44 }
0x14c4   :  { %3978 = vmatmul.f32.gmra.mxu2 %v3891_v12 }
0x14c7   :  { %v3874_v13 = vpop.f32.mrf.mxu0 }
0x14c8   :  { %v3888_v39 = vmax.f32 %v3884_v49, %v3874_v13 }
0x14ca   :  { %v3892_v53 = vsub.f32 %v3888_v39, %v7551_v14  ;;  %v4156_v14 = vld [vmem:[#allocation2 + $0xa38] sm:$0xff] }
0x14cb   :  { %4167 = vmatpush.msra.mxu3 %v4156_v14 }
0x14cc   :  { %3981 = vmatmul.f32.gmra.mxu2 %v3892_v53 }
0x14cd   :  { %4168 = vmatpush.msra.mxu3 %v4155_v58 }
0x14cf   :  { %4169 = vmatpush.msra.mxu3 %v4154_v9 }
0x14d1   :  { %4170 = vmatpush.msra.mxu3 %v4153_v32 }
0x14d3   :  { %4171 = vmatpush.msra.mxu3 %v4152_v10 }
0x14d5   :  { %4172 = vmatpush.msra.mxu3 %v4151_v56 }
0x14d7   :  { %4173 = vmatpush.msra.mxu3 %v4150_v18 }
0x14d9   :  { %4174 = vmatpush.msra.mxu3 %v4149_v25 }
0x14db   :  { %4175 = vmatpush.msra.mxu3 %v4148_v46 }
0x14dd   :  { %4176 = vmatpush.msra.mxu3 %v4147_v51 }
0x14df   :  { %4177 = vmatpush.msra.mxu3 %v4146_v35 }
0x14e1   :  { %4178 = vmatpush.msra.mxu3 %v4145_v19 }
0x1537   :  { %v3973_v8 = vpop.f32.mrf.mxu2 }
0x1538   :  { %v7650_v54 = vadd.f32 %v3973_v8, %v3945_v61 }
0x153a   :  { %v7653_v23 = vmul.f32 0.70710677, %v7650_v54 }
0x153c   :  { %v3989_v29 = vand.u32 2147483647, %v7653_v23  ;;  %vm4121_vm0 = vcmp.lt.f32.partialorder %v7653_v23, 0.0 }
0x153e   :  { %v3993_v55 = vmul.f32 0.3275911, %v3989_v29  ;;  %v4097_v30 = vmul.f32 %v3989_v29, %v3989_v29 }
0x153f   :  { %v3976_v34 = vpop.f32.mrf.mxu2 }
0x1540   :  { %v3997_v37 = vadd.f32 1.0, %v3993_v55  ;;  %v7656_v38 = vadd.f32 %v3976_v34, %v3948_v4  ;;  %v4101_v45 = vsub.f32 0.0, %v4097_v30 }
0x1542   :  { %6168 = vrcp.f32 %v3997_v37  ;;  %v7659_v47 = vmul.f32 0.70710677, %v7656_v38  ;;  %v4012_v36 = vand.u32 2147483648, %v3997_v37  ;;  %v4010_v5 = vand.u32 2147483647, %v3997_v37 }
0x1543   :  { %vm4006_vm8 = vweird.f32 %v3997_v37  ;;  %v4105_v34 = vmul.f32 1.442695, %v4101_v45 }
0x1544   :  { %v7662_v22 = vand.u32 2147483647, %v7659_v47  ;;  %v4013_v2 = vor.u32 1.1754944e-38, %v4012_v36  ;;  %vm4011_vm3 = vcmp.eq.f32.partialorder %v4010_v5, 8.507059e+37 }
0x1546   :  { %v3994_v6 = vmul.f32 0.3275911, %v7662_v22  ;;  %v4098_v56 = vmul.f32 %v7662_v22, %v7662_v22 }
0x1547   :  { %v3979_v28 = vpop.f32.mrf.mxu2 }
0x1548   :  { %v6169_v57 = vpop.eup %6168  ;;  %v7665_v42 = vadd.f32 %v3979_v28, %v3951_v7  ;;  %v3998_v11 = vadd.f32 1.0, %v3994_v6  ;;  %v4102_v0 = vsub.f32 0.0, %v4098_v56 }
0x1549   :  { %v4002_v41 = vmul.f32 %v6169_v57, %v3997_v37  ;;  %vm4007_vm1 = vweird.f32 %v6169_v57 }
0x154a   :  { %v7668_v60 = vmul.f32 0.70710677, %v7665_v42  ;;  %6170 = vrcp.f32 %v3998_v11  ;;  %vm4008_vm2 = vmor %vm4006_vm8, %vm4007_vm1  ;;  %v4027_v62 = vand.u32 2147483648, %v3998_v11  ;;  %v4025_v16 = vand.u32 2147483647, %v3998_v11 }
0x154b   :  { %v4003_v59 = vsub.f32 1.0, %v4002_v41  ;;  %vm4021_vm6 = vweird.f32 %v3998_v11 }
0x154c   :  { %v7671_v50 = vand.u32 2147483647, %v7668_v60  ;;  %v4028_v4 = vor.u32 1.1754944e-38, %v4027_v62  ;;  %vm4026_vm7 = vcmp.eq.f32.partialorder %v4025_v16, 8.507059e+37 }
0x154d   :  { %v4004_v21 = vmul.f32 %v6169_v57, %v4003_v59 }
0x154e   :  { %v3995_v15 = vmul.f32 0.3275911, %v7671_v50  ;;  %v4099_v5 = vmul.f32 %v7671_v50, %v7671_v50  ;;  %v4133_v50 = vmul.f32 0.5, %v7650_v54 }
0x154f   :  { %v4005_v63 = vadd.f32 %v6169_v57, %v4004_v21  ;;  %v3982_v27 = vpop.f32.mrf.mxu2 }
0x1550   :  { %v3999_v48 = vadd.f32 1.0, %v3995_v15  ;;  %v7674_v43 = vadd.f32 %v3982_v27, %v3954_v3  ;;  %v6171_v40 = vpop.eup %6170  ;;  %v4107_v27 = vmul.f32 1.442695, %v4102_v0 }
0x1551   :  { %v4009_v12 = vsel %vm4008_vm2, %v6169_v57, %v4005_v63  ;;  %v4017_v13 = vmul.f32 %v6171_v40, %v3998_v11  ;;  %vm4022_vm5 = vweird.f32 %v6171_v40  ;;  %vm4122_vm2 = vcmp.lt.f32.partialorder %v7659_v47, 0.0 }
0x1552   :  { %v4014_v49 = vsel %vm4011_vm3, %v4013_v2, %v4009_v12  ;;  %6172 = vrcp.f32 %v3999_v48  ;;  %v7677_v26 = vmul.f32 0.70710677, %v7674_v43  ;;  %vm4023_vm10 = vmor %vm4021_vm6, %vm4022_vm5  ;;  %v4040_v7 = vand.u32 2147483647, %v3999_v48 }
0x1553   :  { %v4061_v39 = vmul.f32 1.0614054, %v4014_v49  ;;  %v4018_v53 = vsub.f32 1.0, %v4017_v13  ;;  %v4042_v6 = vand.u32 2147483648, %v3999_v48  ;;  %vm4036_vm12 = vweird.f32 %v3999_v48 }
0x1554   :  { %v7680_v8 = vand.u32 2147483647, %v7677_v26  ;;  %vm4041_vm4 = vcmp.eq.f32.partialorder %v4040_v7, 8.507059e+37  ;;  %v4103_v12 = vsub.f32 0.0, %v4099_v5  ;;  %vm4123_vm3 = vcmp.lt.f32.partialorder %v7668_v60, 0.0 }
0x1555   :  { %v4065_v33 = vadd.f32 -1.4531521, %v4061_v39  ;;  %v4019_v61 = vmul.f32 %v6171_v40, %v4018_v53  ;;  %v4043_v59 = vor.u32 1.1754944e-38, %v4042_v6  ;;  %vm4124_vm5 = vcmp.lt.f32.partialorder %v7677_v26, 0.0  ;;  %v7697_v60 = vld [vmem:[#allocation5 + $0x1e] ss:$0 sm:$0xff] }
0x1556   :  { %v3996_v29 = vmul.f32 0.3275911, %v7680_v8  ;;  %v4100_v54 = vmul.f32 %v7680_v8, %v7680_v8  ;;  %v4364_v26 = vld [vmem:[#allocation2 + $0xac0] sm:$0xff] }
0x1557   :  { %v4069_v17 = vmul.f32 %v4065_v33, %v4014_v49  ;;  %v4020_v14 = vadd.f32 %v6171_v40, %v4019_v61 }
0x1558   :  { %v6173_v44 = vpop.eup %6172  ;;  %v4000_v9 = vadd.f32 1.0, %v3996_v29 }
0x1559   :  { %v4073_v58 = vadd.f32 1.4214138, %v4069_v17  ;;  %v4032_v55 = vmul.f32 %v6173_v44, %v3999_v48  ;;  %v4024_v37 = vsel %vm4023_vm10, %v6171_v40, %v4020_v14  ;;  %vm4037_vm11 = vweird.f32 %v6173_v44 }
0x155a   :  { %v4029_v10 = vsel %vm4026_vm7, %v4028_v4, %v4024_v37  ;;  %6174 = vrcp.f32 %v4000_v9  ;;  %vm4038_vm15 = vmor %vm4036_vm12, %vm4037_vm11  ;;  %v4055_v30 = vand.u32 2147483647, %v4000_v9  ;;  %v4057_v13 = vand.u32 2147483648, %v4000_v9 }
0x155b   :  { %v4077_v52 = vmul.f32 %v4073_v58, %v4014_v49  ;;  %v4033_v32 = vsub.f32 1.0, %v4032_v55  ;;  %v4062_v57 = vmul.f32 1.0614054, %v4029_v10  ;;  %6176 = vpow2.f32 %v4105_v34 }
0x155c   :  { %6178 = vpow2.f32 %v4107_v27  ;;  %vm4051_vm14 = vweird.f32 %v4000_v9  ;;  %v4109_v17 = vmul.f32 1.442695, %v4103_v12  ;;  %vm4056_vm8 = vcmp.eq.f32.partialorder %v4055_v30, 8.507059e+37 }
0x155d   :  { %v4081_v28 = vadd.f32 -0.28449672, %v4077_v52  ;;  %v4034_v18 = vmul.f32 %v6173_v44, %v4033_v32  ;;  %v4066_v25 = vadd.f32 -1.4531521, %v4062_v57 }
0x155e   :  { %6180 = vpow2.f32 %v4109_v17  ;;  %v4363_v17 = vld [vmem:[#allocation2 + $0xab8] sm:$0xff] }
0x155f   :  { %v4085_v41 = vmul.f32 %v4081_v28, %v4014_v49  ;;  %v4035_v11 = vadd.f32 %v6173_v44, %v4034_v18  ;;  %v4070_v36 = vmul.f32 %v4066_v25, %v4029_v10  ;;  %v4104_v28 = vsub.f32 0.0, %v4100_v54  ;;  %v4360_v54 = vld [vmem:[#allocation2 + $0xaa0] sm:$0xff] }
0x1560   :  { %v6175_v22 = vpop.eup %6174 }
0x1561   :  { %v4089_v46 = vadd.f32 0.2548296, %v4085_v41  ;;  %v4039_v21 = vsel %vm4038_vm15, %v6173_v44, %v4035_v11  ;;  %v4047_v15 = vmul.f32 %v6175_v22, %v4000_v9  ;;  %v4074_v35 = vadd.f32 1.4214138, %v4070_v36  ;;  %v6177_v63 = vpop.eup %6176 }
0x1562   :  { %v4044_v51 = vsel %vm4041_vm4, %v4043_v59, %v4039_v21  ;;  %vm4052_vm13 = vweird.f32 %v6175_v22  ;;  %v4058_v44 = vor.u32 1.1754944e-38, %v4057_v13  ;;  %v6179_v9 = vpop.eup %6178  ;;  %v4111_v8 = vmul.f32 1.442695, %v4104_v28 }
0x1563   :  { %v4093_v3 = vmul.f32 %v4089_v46, %v4014_v49  ;;  %v4063_v19 = vmul.f32 1.0614054, %v4044_v51  ;;  %v4048_v48 = vsub.f32 1.0, %v4047_v15  ;;  %v4078_v40 = vmul.f32 %v4074_v35, %v4029_v10  ;;  %vm4053_vm1 = vmor %vm4051_vm14, %vm4052_vm13 }
0x1564   :  { %v4134_v21 = vmul.f32 0.5, %v7656_v38  ;;  %6182 = vpow2.f32 %v4111_v8 }
0x1565   :  { %v4113_v2 = vmul.f32 %v6177_v63, %v4093_v3  ;;  %v4067_v39 = vadd.f32 -1.4531521, %v4063_v19  ;;  %v4049_v33 = vmul.f32 %v6175_v22, %v4048_v48  ;;  %v4082_v45 = vadd.f32 -0.28449672, %v4078_v40 }
0x1567   :  { %v4117_v53 = vsub.f32 1.0, %v4113_v2  ;;  %v4071_v49 = vmul.f32 %v4067_v39, %v4044_v51  ;;  %v4050_v61 = vadd.f32 %v6175_v22, %v4049_v33  ;;  %v4086_v16 = vmul.f32 %v4082_v45, %v4029_v10 }
0x1569   :  { %v4125_v62 = vsub.f32 0.0, %v4117_v53  ;;  %v4075_v14 = vadd.f32 1.4214138, %v4071_v49  ;;  %v4090_v58 = vadd.f32 0.2548296, %v4086_v16  ;;  %v4054_v4 = vsel %vm4053_vm1, %v6175_v22, %v4050_v61  ;;  %v4366_v49 = vld [vmem:[#allocation2 + $0xad0] sm:$0xff] }
0x156a   :  { %v4059_v37 = vsel %vm4056_vm8, %v4058_v44, %v4054_v4  ;;  %v4365_v61 = vld [vmem:[#allocation2 + $0xac8] sm:$0xff] }
0x156b   :  { %v4129_v29 = vsel %vm4121_vm0, %v4125_v62, %v4117_v53  ;;  %v4079_v34 = vmul.f32 %v4075_v14, %v4044_v51  ;;  %v4094_v52 = vmul.f32 %v4090_v58, %v4029_v10  ;;  %v4064_v32 = vmul.f32 1.0614054, %v4059_v37  ;;  %v6181_v10 = vpop.eup %6180  ;;  %v4362_v14 = vld [vmem:[#allocation2 + $0xab0] sm:$0xff]  ;;  %v4361_v4 = vld [vmem:[#allocation2 + $0xaa8] sm:$0xff] }
0x156c   :  { %v4137_v55 = vadd.f32 1.0, %v4129_v29  ;;  %v6183_v40 = vpop.eup %6182  ;;  %v4136_v53 = vmul.f32 0.5, %v7674_v43 }
0x156d   :  { %v4083_v7 = vadd.f32 -0.28449672, %v4079_v34  ;;  %v4114_v23 = vmul.f32 %v6179_v9, %v4094_v52  ;;  %v4068_v6 = vadd.f32 -1.4531521, %v4064_v32  ;;  %v4358_v32 = vld [vmem:[#allocation2 + $0xa90] sm:$0xff] }
0x156e   :  { %v4141_v56 = vmul.f32 %v4137_v55, %v4133_v50  ;;  %v4367_v50 = vld [vmem:[#allocation2 + $0xad8] sm:$0xff] }
0x156f   :  { %v4087_v18 = vmul.f32 %v4083_v7, %v4044_v51  ;;  %v4118_v57 = vsub.f32 1.0, %v4114_v23  ;;  %v4072_v41 = vmul.f32 %v4068_v6, %v4059_v37  ;;  %4370 = vmatpush.msra.mxu1 %v4367_v50  ;;  %v4357_v6 = vld [vmem:[#allocation2 + $0xa88] sm:$0xff] }
0x1570   :  { %4179 = vmatmul.f32.vlgmr.msra.gmra.mxu3 %v4141_v56 }
0x1571   :  { %v4091_v11 = vadd.f32 0.2548296, %v4087_v18  ;;  %v4126_v25 = vsub.f32 0.0, %v4118_v57  ;;  %v4076_v0 = vadd.f32 1.4214138, %v4072_v41  ;;  %4371 = vmatpush.msra.mxu1 %v4366_v49  ;;  %v4356_v41 = vld [vmem:[#allocation2 + $0xa80] sm:$0xff] }
0x1573   :  { %v4095_v59 = vmul.f32 %v4091_v11, %v4044_v51  ;;  %v4130_v46 = vsel %vm4122_vm2, %v4126_v25, %v4118_v57  ;;  %v4080_v36 = vmul.f32 %v4076_v0, %v4059_v37  ;;  %v4135_v51 = vmul.f32 0.5, %v7665_v42  ;;  %4372 = vmatpush.msra.mxu1 %v4365_v61 }
0x1574   :  { %v4138_v22 = vadd.f32 1.0, %v4130_v46 }
0x1575   :  { %v4115_v5 = vmul.f32 %v6181_v10, %v4095_v59  ;;  %v4084_v3 = vadd.f32 -0.28449672, %v4080_v36  ;;  %4373 = vmatpush.msra.mxu1 %v4364_v26  ;;  %v4355_v59 = vld [vmem:[#allocation2 + $0xa78] sm:$0xff]  ;;  %v4354_v36 = vld [vmem:[#allocation2 + $0xa70] sm:$0xff] }
0x1576   :  { %v4142_v15 = vmul.f32 %v4138_v22, %v4134_v21  ;;  %v4353_v21 = vld [vmem:[#allocation2 + $0xa68] sm:$0xff] }
0x1577   :  { %v4119_v35 = vsub.f32 1.0, %v4115_v5  ;;  %v4088_v63 = vmul.f32 %v4084_v3, %v4059_v37  ;;  %4374 = vmatpush.msra.mxu1 %v4363_v17 }
0x1578   :  { %4182 = vmatmul.f32.gmra.mxu3 %v4142_v15 }
0x1579   :  { %v4127_v27 = vsub.f32 0.0, %v4119_v35  ;;  %v4092_v19 = vadd.f32 0.2548296, %v4088_v63  ;;  %4375 = vmatpush.msra.mxu1 %v4362_v14  ;;  %v4352_v63 = vld [vmem:[#allocation2 + $0xa60] sm:$0xff] }
0x157b   :  { %v4131_v47 = vsel %vm4123_vm3, %v4127_v27, %v4119_v35  ;;  %v4096_v48 = vmul.f32 %v4092_v19, %v4059_v37  ;;  %4376 = vmatpush.msra.mxu1 %v4361_v4  ;;  %v4359_v37 = vld [vmem:[#allocation2 + $0xa98] sm:$0xff] }
0x157c   :  { %v4139_v2 = vadd.f32 1.0, %v4131_v47 }
0x157d   :  { %v4116_v38 = vmul.f32 %v6183_v40, %v4096_v48  ;;  %4377 = vmatpush.msra.mxu1 %v4360_v54 }
0x157e   :  { %v4143_v12 = vmul.f32 %v4139_v2, %v4135_v51 }
0x157f   :  { %v4120_v30 = vsub.f32 1.0, %v4116_v38  ;;  %4378 = vmatpush.msra.mxu1 %v4359_v37 }
0x1580   :  { %4185 = vmatmul.f32.gmra.mxu3 %v4143_v12 }
0x1581   :  { %v4128_v13 = vsub.f32 0.0, %v4120_v30  ;;  %4379 = vmatpush.msra.mxu1 %v4358_v32 }
0x1583   :  { %v4132_v39 = vsel %vm4124_vm5, %v4128_v13, %v4120_v30  ;;  %4380 = vmatpush.msra.mxu1 %v4357_v6 }
0x1584   :  { %v4140_v33 = vadd.f32 1.0, %v4132_v39 }
0x1585   :  { %4381 = vmatpush.msra.mxu1 %v4356_v41 }
0x1586   :  { %v4144_v45 = vmul.f32 %v4140_v33, %v4136_v53 }
0x1587   :  { %4382 = vmatpush.msra.mxu1 %v4355_v59 }
0x1588   :  { %4188 = vmatmul.f32.gmra.mxu3 %v4144_v45 }
0x1589   :  { %4383 = vmatpush.msra.mxu1 %v4354_v36 }
0x158b   :  { %4384 = vmatpush.msra.mxu1 %v4353_v21 }
0x158d   :  { %4385 = vmatpush.msra.mxu1 %v4352_v63 }
0x15f3   :  { %v4180_v42 = vpop.f32.mrf.mxu3 }
0x15f4   :  { %v7700_v62 = vadd.f32 %v7697_v60, %v4180_v42 }
0x15f6   :  { %v7703_v16 = vmul.f32 0.70710677, %v7700_v62 }
0x15f8   :  { %v4196_v43 = vand.u32 2147483647, %v7703_v16  ;;  %vm4328_vm3 = vcmp.lt.f32.partialorder %v7703_v16, 0.0 }
0x15fa   :  { %v4200_v44 = vmul.f32 0.3275911, %v4196_v43  ;;  %v4304_v15 = vmul.f32 %v4196_v43, %v4196_v43 }
0x15fb   :  { %v4183_v58 = vpop.f32.mrf.mxu3 }
0x15fc   :  { %v4204_v29 = vadd.f32 1.0, %v4200_v44  ;;  %v7707_v55 = vadd.f32 %v7697_v60, %v4183_v58  ;;  %v4308_v12 = vsub.f32 0.0, %v4304_v15 }
0x15fe   :  { %6184 = vrcp.f32 %v4204_v29  ;;  %v7710_v34 = vmul.f32 0.70710677, %v7707_v55  ;;  %v4219_v11 = vand.u32 2147483648, %v4204_v29  ;;  %v4217_v8 = vand.u32 2147483647, %v4204_v29 }
0x15ff   :  { %vm4213_vm10 = vweird.f32 %v4204_v29  ;;  %v4312_v50 = vmul.f32 1.442695, %v4308_v12 }
0x1600   :  { %v7713_v52 = vand.u32 2147483647, %v7710_v34  ;;  %v4220_v22 = vor.u32 1.1754944e-38, %v4219_v11  ;;  %vm4218_vm11 = vcmp.eq.f32.partialorder %v4217_v8, 8.507059e+37 }
0x1602   :  { %v4201_v7 = vmul.f32 0.3275911, %v7713_v52  ;;  %v4305_v54 = vmul.f32 %v7713_v52, %v7713_v52 }
0x1603   :  { %v4186_v23 = vpop.f32.mrf.mxu3 }
0x1604   :  { %v6185_v9 = vpop.eup %6184  ;;  %v7717_v28 = vadd.f32 %v7697_v60, %v4186_v23  ;;  %v4205_v57 = vadd.f32 1.0, %v4201_v7 }
0x1605   :  { %v4209_v56 = vmul.f32 %v6185_v9, %v4204_v29  ;;  %vm4214_vm6 = vweird.f32 %v6185_v9 }
0x1606   :  { %v7720_v25 = vmul.f32 0.70710677, %v7717_v28  ;;  %6186 = vrcp.f32 %v4205_v57  ;;  %vm4215_vm7 = vmor %vm4213_vm10, %vm4214_vm6  ;;  %v4234_v39 = vand.u32 2147483648, %v4205_v57  ;;  %v4232_v33 = vand.u32 2147483647, %v4205_v57 }
0x1607   :  { %v4210_v18 = vsub.f32 1.0, %v4209_v56  ;;  %vm4228_vm15 = vweird.f32 %v4205_v57 }
0x1608   :  { %v7723_v10 = vand.u32 2147483647, %v7720_v25  ;;  %v4235_v43 = vor.u32 1.1754944e-38, %v4234_v39  ;;  %vm4233_vm13 = vcmp.eq.f32.partialorder %v4232_v33, 8.507059e+37 }
0x1609   :  { %v4211_v0 = vmul.f32 %v6185_v9, %v4210_v18 }
0x160a   :  { %v4202_v5 = vmul.f32 0.3275911, %v7723_v10 }
0x160b   :  { %v4212_v46 = vadd.f32 %v6185_v9, %v4211_v0  ;;  %v4189_v35 = vpop.f32.mrf.mxu3 }
0x160c   :  { %v4206_v19 = vadd.f32 1.0, %v4202_v5  ;;  %v7727_v47 = vadd.f32 %v7697_v60, %v4189_v35  ;;  %v6187_v51 = vpop.eup %6186 }
0x160d   :  { %v4216_v3 = vsel %vm4215_vm7, %v6185_v9, %v4212_v46  ;;  %v4224_v48 = vmul.f32 %v6187_v51, %v4205_v57  ;;  %vm4229_vm12 = vweird.f32 %v6187_v51  ;;  %v4309_v57 = vsub.f32 0.0, %v4305_v54 }
0x160e   :  { %v4221_v27 = vsel %vm4218_vm11, %v4220_v22, %v4216_v3  ;;  %6188 = vrcp.f32 %v4206_v19  ;;  %v7730_v30 = vmul.f32 0.70710677, %v7727_v47  ;;  %vm4230_vm4 = vmor %vm4228_vm15, %vm4229_vm12  ;;  %v4247_v37 = vand.u32 2147483647, %v4206_v19 }
0x160f   :  { %v4268_v2 = vmul.f32 1.0614054, %v4221_v27  ;;  %v4225_v38 = vsub.f32 1.0, %v4224_v48  ;;  %6190 = vpow2.f32 %v4312_v50  ;;  %v4249_v32 = vand.u32 2147483648, %v4206_v19 }
0x1610   :  { %v7733_v45 = vand.u32 2147483647, %v7730_v30  ;;  %vm4243_vm0 = vweird.f32 %v4206_v19  ;;  %vm4248_vm8 = vcmp.eq.f32.partialorder %v4247_v37, 8.507059e+37  ;;  %v4306_v46 = vmul.f32 %v7723_v10, %v7723_v10 }
0x1611   :  { %v4272_v40 = vadd.f32 -1.4531521, %v4268_v2  ;;  %v4226_v53 = vmul.f32 %v6187_v51, %v4225_v38  ;;  %v4250_v41 = vor.u32 1.1754944e-38, %v4249_v32  ;;  %v4314_v3 = vmul.f32 1.442695, %v4309_v57 }
0x1612   :  { %v4203_v61 = vmul.f32 0.3275911, %v7733_v45  ;;  %v4340_v38 = vmul.f32 0.5, %v7700_v62  ;;  %vm4329_vm7 = vcmp.lt.f32.partialorder %v7710_v34, 0.0  ;;  %vm4330_vm11 = vcmp.lt.f32.partialorder %v7720_v25, 0.0 }
0x1613   :  { %v4276_v13 = vmul.f32 %v4272_v40, %v4221_v27  ;;  %v4227_v49 = vadd.f32 %v6187_v51, %v4226_v53  ;;  %vm4331_vm12 = vcmp.lt.f32.partialorder %v7730_v30, 0.0 }
0x1614   :  { %v6189_v42 = vpop.eup %6188  ;;  %v4207_v44 = vadd.f32 1.0, %v4203_v61  ;;  %v4417_v61 = vld [vmem:[#allocation2 + $0xb50] sm:$0xff] }
0x1615   :  { %v4280_v60 = vadd.f32 1.4214138, %v4276_v13  ;;  %v4239_v17 = vmul.f32 %v6189_v42, %v4206_v19  ;;  %v4231_v14 = vsel %vm4230_vm4, %v6187_v51, %v4227_v49  ;;  %vm4244_vm14 = vweird.f32 %v6189_v42  ;;  %v6191_v11 = vpop.eup %6190  ;;  %v4418_v49 = vld [vmem:[#allocation2 + $0xb58] sm:$0xff] }
0x1616   :  { %v7736_v4 = vsel %vm4233_vm13, %v4235_v43, %v4231_v14  ;;  %6192 = vrcp.f32 %v4207_v44  ;;  %vm4245_vm1 = vmor %vm4243_vm0, %vm4244_vm14  ;;  %v4310_v19 = vsub.f32 0.0, %v4306_v46  ;;  %v4262_v51 = vand.u32 2147483647, %v4207_v44  ;;  %4421 = vmatpush.msrb.mxu2 %v4418_v49 }
0x1617   :  { %v4284_v26 = vmul.f32 %v4280_v60, %v4221_v27  ;;  %v4240_v58 = vsub.f32 1.0, %v4239_v17  ;;  %v4269_v7 = vmul.f32 1.0614054, %v7736_v4  ;;  %v4264_v2 = vand.u32 2147483648, %v4207_v44 }
0x1618   :  { %6194 = vpow2.f32 %v4314_v3  ;;  %vm4258_vm5 = vweird.f32 %v4207_v44  ;;  %vm4263_vm10 = vcmp.eq.f32.partialorder %v4262_v51, 8.507059e+37  ;;  %v4307_v17 = vmul.f32 %v7733_v45, %v7733_v45  ;;  %4422 = vmatpush.msrb.mxu2 %v4417_v61  ;;  %v4414_v45 = vld [vmem:[#allocation2 + $0xb38] sm:$0xff] }
0x1619   :  { %v4288_v29 = vadd.f32 -0.28449672, %v4284_v26  ;;  %v4241_v56 = vmul.f32 %v6189_v42, %v4240_v58  ;;  %v4273_v18 = vadd.f32 -1.4531521, %v4269_v7  ;;  %v4265_v50 = vor.u32 1.1754944e-38, %v4264_v2  ;;  %v4410_v51 = vld [vmem:[#allocation2 + $0xb18] sm:$0xff] }
0x161a   :  { %v4316_v26 = vmul.f32 1.442695, %v4310_v19  ;;  %v4409_v2 = vld [vmem:[#allocation2 + $0xb10] sm:$0xff]  ;;  %v4343_v49 = vmul.f32 0.5, %v7727_v47 }
0x161b   :  { %v4292_v9 = vmul.f32 %v4288_v29, %v4221_v27  ;;  %v4242_v6 = vadd.f32 %v6189_v42, %v4241_v56  ;;  %v4277_v52 = vmul.f32 %v4273_v18, %v7736_v4  ;;  %v4416_v29 = vld [vmem:[#allocation2 + $0xb48] sm:$0xff] }
0x161c   :  { %v6193_v59 = vpop.eup %6192  ;;  %6196 = vpow2.f32 %v4316_v26  ;;  %4423 = vmatpush.msrb.mxu2 %v4416_v29  ;;  %v4405_v26 = vld [vmem:[#allocation2 + $0xaf0] sm:$0xff] }
0x161d   :  { %v4296_v23 = vadd.f32 0.2548296, %v4292_v9  ;;  %v4246_v8 = vsel %vm4245_vm1, %v6189_v42, %v4242_v6  ;;  %v4254_v22 = vmul.f32 %v6193_v59, %v4207_v44  ;;  %v4281_v5 = vadd.f32 1.4214138, %v4277_v52  ;;  %v4415_v9 = vld [vmem:[#allocation2 + $0xb40] sm:$0xff] }
0x161e   :  { %v7744_v36 = vsel %vm4248_vm8, %v4250_v41, %v4246_v8  ;;  %vm4259_vm2 = vweird.f32 %v6193_v59  ;;  %v6195_v37 = vpop.eup %6194  ;;  %4424 = vmatpush.msrb.mxu2 %v4415_v9 }
0x161f   :  { %v4300_v0 = vmul.f32 %v4296_v23, %v4221_v27  ;;  %v4270_v15 = vmul.f32 1.0614054, %v7744_v36  ;;  %v4255_v63 = vsub.f32 1.0, %v4254_v22  ;;  %v4285_v27 = vmul.f32 %v4281_v5, %v7736_v4  ;;  %vm4260_vm6 = vmor %vm4258_vm5, %vm4259_vm2 }
0x1620   :  { %v4311_v23 = vsub.f32 0.0, %v4307_v17  ;;  %4425 = vmatpush.msrb.mxu2 %v4414_v45  ;;  %v4341_v5 = vmul.f32 0.5, %v7707_v55  ;;  %v4408_v55 = vld [vmem:[#allocation2 + $0xb08] sm:$0xff] }
0x1621   :  { %v4320_v21 = vmul.f32 %v6191_v11, %v4300_v0  ;;  %v4274_v48 = vadd.f32 -1.4531521, %v4270_v15  ;;  %v4256_v12 = vmul.f32 %v6193_v59, %v4255_v63  ;;  %v4289_v10 = vadd.f32 -0.28449672, %v4285_v27  ;;  %v4413_v11 = vld [vmem:[#allocation2 + $0xb30] sm:$0xff]  ;;  %v4623_v45 = vld [vmem:[#allocation2 + $0xbc8] sm:$0xff] }
0x1622   :  { %v4318_v52 = vmul.f32 1.442695, %v4311_v23  ;;  %v6197_v46 = vpop.eup %6196  ;;  %4426 = vmatpush.msrb.mxu2 %v4413_v11 }
0x1623   :  { %v4324_v35 = vsub.f32 1.0, %v4320_v21  ;;  %v4278_v13 = vmul.f32 %v4274_v48, %v7744_v36  ;;  %v4257_v53 = vadd.f32 %v6193_v59, %v4256_v12  ;;  %v4293_v33 = vmul.f32 %v4289_v10, %v7736_v4 }
0x1624   :  { %6198 = vpow2.f32 %v4318_v52  ;;  %v4342_v12 = vmul.f32 0.5, %v7717_v28 }
0x1625   :  { %v4332_v40 = vsub.f32 0.0, %v4324_v35  ;;  %v4282_v42 = vadd.f32 1.4214138, %v4278_v13  ;;  %v4297_v43 = vadd.f32 0.2548296, %v4293_v33  ;;  %v4261_v16 = vsel %vm4260_vm6, %v6193_v59, %v4257_v53  ;;  %v4412_v59 = vld [vmem:[#allocation2 + $0xb28] sm:$0xff] }
0x1626   :  { %v4266_v44 = vsel %vm4263_vm10, %v4265_v50, %v4261_v16  ;;  %4427 = vmatpush.msrb.mxu2 %v4412_v59  ;;  %v4403_v16 = vld [vmem:[#allocation2 + $0xae0] sm:$0xff] }
0x1627   :  { %v4336_v39 = vsel %vm4328_vm3, %v4332_v40, %v4324_v35  ;;  %v4286_v14 = vmul.f32 %v4282_v42, %v7744_v36  ;;  %v4301_v58 = vmul.f32 %v4297_v43, %v7736_v4  ;;  %v4271_v54 = vmul.f32 1.0614054, %v4266_v44  ;;  %v4411_v35 = vld [vmem:[#allocation2 + $0xb20] sm:$0xff]  ;;  %v4404_v43 = vld [vmem:[#allocation2 + $0xae8] sm:$0xff] }
0x1628   :  { %v4344_v60 = vadd.f32 1.0, %v4336_v39  ;;  %4428 = vmatpush.msrb.mxu2 %v4411_v35  ;;  %v4407_v39 = vld [vmem:[#allocation2 + $0xb00] sm:$0xff] }
0x1629   :  { %v4290_v32 = vadd.f32 -0.28449672, %v4286_v14  ;;  %v4321_v56 = vmul.f32 %v6195_v37, %v4301_v58  ;;  %v4275_v7 = vadd.f32 -1.4531521, %v4271_v54  ;;  %v4618_v59 = vld [vmem:[#allocation2 + $0xba0] sm:$0xff] }
0x162a   :  { %v4348_v62 = vmul.f32 %v4344_v60, %v4340_v38  ;;  %4429 = vmatpush.msrb.mxu2 %v4410_v51  ;;  %v6199_v13 = vpop.eup %6198  ;;  %v4406_v60 = vld [vmem:[#allocation2 + $0xaf8] sm:$0xff] }
0x162b   :  { %v4294_v6 = vmul.f32 %v4290_v32, %v7744_v36  ;;  %v4325_v18 = vsub.f32 1.0, %v4321_v56  ;;  %v4279_v57 = vmul.f32 %v4275_v7, %v4266_v44  ;;  %v7780_v56 = vld [vmem:[#allocation5 + $0x20] ss:$0 sm:$0xff] }
0x162c   :  { %4386 = vmatmul.f32.vlgmr.msra.gmra.mxu1 %v4348_v62  ;;  %4430 = vmatpush.msrb.mxu2 %v4409_v2  ;;  %v5953_v62 = vld [vmem:[#allocation5 + $0x1f] ss:$0 sm:$0xff]  ;;  %v4614_v2 = vld [vmem:[#allocation2 + $0xb80] sm:$0xff] }
0x162d   :  { %v4298_v41 = vadd.f32 0.2548296, %v4294_v6  ;;  %v4333_v4 = vsub.f32 0.0, %v4325_v18  ;;  %v4283_v0 = vadd.f32 1.4214138, %v4279_v57  ;;  %v4624_v6 = vld [vmem:[#allocation2 + $0xbd0] sm:$0xff] }
0x162e   :  { %4431 = vmatpush.msrb.mxu2 %v4408_v55  ;;  %v4613_v55 = vld [vmem:[#allocation2 + $0xb78] sm:$0xff] }
0x162f   :  { %v4302_v8 = vmul.f32 %v4298_v41, %v7744_v36  ;;  %v4337_v21 = vsel %vm4329_vm7, %v4333_v4, %v4325_v18  ;;  %v4287_v22 = vmul.f32 %v4283_v0, %v4266_v44  ;;  %v4622_v18 = vld [vmem:[#allocation2 + $0xbc0] sm:$0xff]  ;;  %v4621_v41 = vld [vmem:[#allocation2 + $0xbb8] sm:$0xff]  ;;  %v4620_v4 = vld [vmem:[#allocation2 + $0xbb0] sm:$0xff] }
0x1630   :  { %v4345_v3 = vadd.f32 1.0, %v4337_v21  ;;  %4432 = vmatpush.msrb.mxu2 %v4407_v39  ;;  %v4619_v0 = vld [vmem:[#allocation2 + $0xba8] sm:$0xff]  ;;  %v4617_v21 = vld [vmem:[#allocation2 + $0xb98] sm:$0xff] }
0x1631   :  { %v4322_v15 = vmul.f32 %v6197_v46, %v4302_v8  ;;  %v4291_v63 = vadd.f32 -0.28449672, %v4287_v22  ;;  %v4611_v39 = vld [vmem:[#allocation2 + $0xb68] sm:$0xff] }
0x1632   :  { %v4349_v27 = vmul.f32 %v4345_v3, %v4341_v5  ;;  %4433 = vmatpush.msrb.mxu2 %v4406_v60  ;;  %v4616_v3 = vld [vmem:[#allocation2 + $0xb90] sm:$0xff] }
0x1633   :  { %v4326_v19 = vsub.f32 1.0, %v4322_v15  ;;  %v4295_v34 = vmul.f32 %v4291_v63, %v4266_v44  ;;  %v4615_v63 = vld [vmem:[#allocation2 + $0xb88] sm:$0xff] }
0x1634   :  { %4389 = vmatmul.f32.gmra.mxu1 %v4349_v27  ;;  %4434 = vmatpush.msrb.mxu2 %v4405_v26 }
0x1635   :  { %v4334_v36 = vsub.f32 0.0, %v4326_v19  ;;  %v4299_v48 = vadd.f32 0.2548296, %v4295_v34 }
0x1636   :  { %4435 = vmatpush.msrb.mxu2 %v4404_v43 }
0x1637   :  { %v4338_v40 = vsel %vm4330_vm11, %v4334_v36, %v4326_v19  ;;  %v4303_v38 = vmul.f32 %v4299_v48, %v4266_v44 }
0x1638   :  { %v4346_v10 = vadd.f32 1.0, %v4338_v40  ;;  %4436 = vmatpush.msrb.mxu2 %v4403_v16 }
0x1639   :  { %v4323_v33 = vmul.f32 %v6199_v13, %v4303_v38 }
0x163a   :  { %v4350_v53 = vmul.f32 %v4346_v10, %v4342_v12  ;;  %v4612_v12 = vld [vmem:[#allocation2 + $0xb70] sm:$0xff] }
0x163b   :  { %v4327_v50 = vsub.f32 1.0, %v4323_v33 }
0x163c   :  { %4392 = vmatmul.f32.gmra.mxu1 %v4350_v53 }
0x163d   :  { %v4335_v42 = vsub.f32 0.0, %v4327_v50 }
0x163f   :  { %v4339_v25 = vsel %vm4331_vm12, %v4335_v42, %v4327_v50  ;;  %v4610_v42 = vld [vmem:[#allocation2 + $0xb60] sm:$0xff] }
0x1640   :  { %v4347_v28 = vadd.f32 1.0, %v4339_v25 }
0x1642   :  { %v4351_v61 = vmul.f32 %v4347_v28, %v4343_v49 }
0x1644   :  { %4395 = vmatmul.f32.gmra.mxu1 %v4351_v61 }
0x16a9   :  { %v4387_v17 = vpop.f32.mrf.mxu1 }
0x16aa   :  { %v4388_v14 = vadd.f32 %v5953_v62, %v4387_v17 }
0x16ac   :  { %v7765_v44 = vadd.f32 %v4388_v14, %v7413_v20 }
0x16ae   :  { %4437 = vmatmul.f32.vlgmr.msrb.gmra.mxu2 %v7765_v44 }
0x16b1   :  { %v4390_v30 = vpop.f32.mrf.mxu1 }
0x16b2   :  { %v4391_v29 = vadd.f32 %v5953_v62, %v4390_v30 }
0x16b4   :  { %v7769_v47 = vadd.f32 %v4391_v29, %v7417_v1  ;;  %v4625_v1 = vld [vmem:[#allocation2 + $0xbd8] sm:$0xff] }
0x16b5   :  { %4628 = vmatpush.msrb.mxu3 %v4625_v1 }
0x16b6   :  { %4440 = vmatmul.f32.gmra.mxu2 %v7769_v47 }
0x16b7   :  { %4629 = vmatpush.msrb.mxu3 %v4624_v6 }
0x16b9   :  { %v4393_v58 = vpop.f32.mrf.mxu1  ;;  %4630 = vmatpush.msrb.mxu3 %v4623_v45 }
0x16ba   :  { %v4394_v54 = vadd.f32 %v5953_v62, %v4393_v58 }
0x16bb   :  { %4631 = vmatpush.msrb.mxu3 %v4622_v18 }
0x16bc   :  { %v7773_v37 = vadd.f32 %v4394_v54, %v7421_v24 }
0x16bd   :  { %4632 = vmatpush.msrb.mxu3 %v4621_v41 }
0x16be   :  { %4443 = vmatmul.f32.gmra.mxu2 %v7773_v37 }
0x16bf   :  { %4633 = vmatpush.msrb.mxu3 %v4620_v4 }
0x16c1   :  { %v4396_v32 = vpop.f32.mrf.mxu1  ;;  %4634 = vmatpush.msrb.mxu3 %v4619_v0 }
0x16c2   :  { %v4397_v9 = vadd.f32 %v5953_v62, %v4396_v32 }
0x16c3   :  { %4635 = vmatpush.msrb.mxu3 %v4618_v59 }
0x16c4   :  { %v7777_v20 = vadd.f32 %v4397_v9, %v7425_v31 }
0x16c5   :  { %4636 = vmatpush.msrb.mxu3 %v4617_v21 }
0x16c6   :  { %4446 = vmatmul.f32.gmra.mxu2 %v7777_v20 }
0x16c7   :  { %4637 = vmatpush.msrb.mxu3 %v4616_v3 }
0x16c9   :  { %4638 = vmatpush.msrb.mxu3 %v4615_v63 }
0x16cb   :  { %4639 = vmatpush.msrb.mxu3 %v4614_v2 }
0x16cd   :  { %4640 = vmatpush.msrb.mxu3 %v4613_v55 }
0x16cf   :  { %4641 = vmatpush.msrb.mxu3 %v4612_v12 }
0x16d1   :  { %4642 = vmatpush.msrb.mxu3 %v4611_v39 }
0x16d3   :  { %4643 = vmatpush.msrb.mxu3 %v4610_v42 }
0x1731   :  { %v4438_v7 = vpop.f32.mrf.mxu2 }
0x1732   :  { %v7783_v23 = vadd.f32 %v7780_v56, %v4438_v7 }
0x1734   :  { %v7786_v24 = vmul.f32 0.70710677, %v7783_v23 }
0x1736   :  { %v4454_v31 = vand.u32 2147483647, %v7786_v24  ;;  %vm4586_vm7 = vcmp.lt.f32.partialorder %v7786_v24, 0.0 }
0x1738   :  { %v4458_v57 = vmul.f32 0.3275911, %v4454_v31  ;;  %v4562_v50 = vmul.f32 %v4454_v31, %v4454_v31 }
0x1739   :  { %v4441_v52 = vpop.f32.mrf.mxu2 }
0x173a   :  { %v4462_v11 = vadd.f32 1.0, %v4458_v57  ;;  %v7790_v8 = vadd.f32 %v7780_v56, %v4441_v52  ;;  %v4566_v17 = vsub.f32 0.0, %v4562_v50 }
0x173c   :  { %6200 = vrcp.f32 %v4462_v11  ;;  %v7793_v46 = vmul.f32 0.70710677, %v7790_v8  ;;  %v4477_v51 = vand.u32 2147483648, %v4462_v11  ;;  %v4475_v40 = vand.u32 2147483647, %v4462_v11 }
0x173d   :  { %vm4471_vm4 = vweird.f32 %v4462_v11 }
0x173e   :  { %v7796_v5 = vand.u32 2147483647, %v7793_v46  ;;  %v4478_v13 = vor.u32 1.1754944e-38, %v4477_v51  ;;  %vm4476_vm14 = vcmp.eq.f32.partialorder %v4475_v40, 8.507059e+37 }
0x1740   :  { %v4459_v35 = vmul.f32 0.3275911, %v7796_v5  ;;  %v4563_v59 = vmul.f32 %v7796_v5, %v7796_v5 }
0x1741   :  { %v4444_v19 = vpop.f32.mrf.mxu2 }
0x1742   :  { %v6201_v22 = vpop.eup %6200  ;;  %v4463_v34 = vadd.f32 1.0, %v4459_v35  ;;  %v7800_v36 = vadd.f32 %v7780_v56, %v4444_v19  ;;  %v4567_v51 = vsub.f32 0.0, %v4563_v59 }
0x1743   :  { %v4467_v15 = vmul.f32 %v6201_v22, %v4462_v11  ;;  %vm4472_vm15 = vweird.f32 %v6201_v22 }
0x1744   :  { %6202 = vrcp.f32 %v4463_v34  ;;  %v7803_v38 = vmul.f32 0.70710677, %v7800_v36  ;;  %vm4473_vm13 = vmor %vm4471_vm4, %vm4472_vm15  ;;  %v4490_v58 = vand.u32 2147483647, %v4463_v34  ;;  %v4492_v54 = vand.u32 2147483648, %v4463_v34 }
0x1745   :  { %v4468_v27 = vsub.f32 1.0, %v4467_v15  ;;  %vm4486_vm1 = vweird.f32 %v4463_v34 }
0x1746   :  { %v7806_v33 = vand.u32 2147483647, %v7803_v38  ;;  %v4493_v31 = vor.u32 1.1754944e-38, %v4492_v54  ;;  %vm4491_vm2 = vcmp.eq.f32.partialorder %v4490_v58, 8.507059e+37 }
0x1747   :  { %v4469_v48 = vmul.f32 %v6201_v22, %v4468_v27 }
0x1748   :  { %v4460_v49 = vmul.f32 0.3275911, %v7806_v33  ;;  %v4564_v50 = vmul.f32 %v7806_v33, %v7806_v33 }
0x1749   :  { %v4470_v10 = vadd.f32 %v6201_v22, %v4469_v48  ;;  %v4447_v28 = vpop.f32.mrf.mxu2 }
0x174a   :  { %v6203_v61 = vpop.eup %6202  ;;  %v7810_v26 = vadd.f32 %v7780_v56, %v4447_v28  ;;  %v4464_v62 = vadd.f32 1.0, %v4460_v49  ;;  %v4570_v56 = vmul.f32 1.442695, %v4566_v17  ;;  %v4568_v58 = vsub.f32 0.0, %v4564_v50 }
0x174b   :  { %v4474_v53 = vsel %vm4473_vm13, %v6201_v22, %v4470_v10  ;;  %v4482_v16 = vmul.f32 %v6203_v61, %v4463_v34  ;;  %vm4487_vm0 = vweird.f32 %v6203_v61  ;;  %vm4587_vm13 = vcmp.lt.f32.partialorder %v7793_v46, 0.0 }
0x174c   :  { %v4479_v60 = vsel %vm4476_vm14, %v4478_v13, %v4474_v53  ;;  %v7813_v14 = vmul.f32 0.70710677, %v7810_v26  ;;  %6204 = vrcp.f32 %v4464_v62  ;;  %vm4488_vm8 = vmor %vm4486_vm1, %vm4487_vm0  ;;  %v4507_v15 = vand.u32 2147483648, %v4464_v62 }
0x174d   :  { %v4526_v25 = vmul.f32 1.0614054, %v4479_v60  ;;  %v4483_v29 = vsub.f32 1.0, %v4482_v16  ;;  %6206 = vpow2.f32 %v4570_v56  ;;  %v4505_v63 = vand.u32 2147483647, %v4464_v62 }
0x174e   :  { %v7816_v1 = vand.u32 2147483647, %v7813_v14  ;;  %vm4501_vm5 = vweird.f32 %v4464_v62  ;;  %v4508_v12 = vor.u32 1.1754944e-38, %v4507_v15  ;;  %v4572_v53 = vmul.f32 1.442695, %v4567_v51 }
0x174f   :  { %v4530_v43 = vadd.f32 -1.4531521, %v4526_v25  ;;  %v4484_v9 = vmul.f32 %v6203_v61, %v4483_v29  ;;  %vm4506_vm10 = vcmp.eq.f32.partialorder %v4505_v63, 8.507059e+37  ;;  %vm4588_vm14 = vcmp.lt.f32.partialorder %v7803_v38, 0.0  ;;  %v7833_v38 = vld [vmem:[#allocation5 + $0x21] ss:$0 sm:$0xff] }
0x1750   :  { %v4461_v45 = vmul.f32 0.3275911, %v7816_v1  ;;  %vm4589_vm0 = vcmp.lt.f32.partialorder %v7813_v14, 0.0  ;;  %v4830_v14 = vld [vmem:[#allocation2 + $0xc48] sm:$0xff] }
0x1751   :  { %v4534_v30 = vmul.f32 %v4530_v43, %v4479_v60  ;;  %v4485_v6 = vadd.f32 %v6203_v61, %v4484_v9 }
0x1752   :  { %v6205_v18 = vpop.eup %6204  ;;  %v4465_v41 = vadd.f32 1.0, %v4461_v45  ;;  %v4574_v45 = vmul.f32 1.442695, %v4568_v58  ;;  %v4831_v58 = vld [vmem:[#allocation2 + $0xc50] sm:$0xff] }
0x1753   :  { %v4538_v32 = vadd.f32 1.4214138, %v4534_v30  ;;  %v4489_v11 = vsel %vm4488_vm8, %v6203_v61, %v4485_v6  ;;  %v4497_v4 = vmul.f32 %v6205_v18, %v4464_v62  ;;  %vm4502_vm3 = vweird.f32 %v6205_v18  ;;  %v6207_v34 = vpop.eup %6206 }
0x1754   :  { %v4494_v0 = vsel %vm4491_vm2, %v4493_v31, %v4489_v11  ;;  %6208 = vrcp.f32 %v4465_v41  ;;  %vm4503_vm6 = vmor %vm4501_vm5, %vm4502_vm3  ;;  %v4520_v43 = vand.u32 2147483647, %v4465_v41  ;;  %v4522_v16 = vand.u32 2147483648, %v4465_v41 }
0x1755   :  { %v4542_v7 = vmul.f32 %v4538_v32, %v4479_v60  ;;  %v4498_v21 = vsub.f32 1.0, %v4497_v4  ;;  %v4527_v22 = vmul.f32 1.0614054, %v4494_v0  ;;  %6210 = vpow2.f32 %v4572_v53 }
0x1756   :  { %vm4516_vm12 = vweird.f32 %v4465_v41  ;;  %vm4521_vm4 = vcmp.eq.f32.partialorder %v4520_v43, 8.507059e+37  ;;  %v4523_v9 = vor.u32 1.1754944e-38, %v4522_v16  ;;  %v4565_v31 = vmul.f32 %v7816_v1, %v7816_v1 }
0x1757   :  { %v4546_v57 = vadd.f32 -0.28449672, %v4542_v7  ;;  %v4499_v35 = vmul.f32 %v6205_v18, %v4498_v21  ;;  %v4531_v27 = vadd.f32 -1.4531521, %v4527_v22  ;;  %6212 = vpow2.f32 %v4574_v45  ;;  %v4825_v45 = vld [vmem:[#allocation2 + $0xc20] sm:$0xff] }
0x1758   :  { %v4569_v22 = vsub.f32 0.0, %v4565_v31  ;;  %v4601_v16 = vmul.f32 0.5, %v7810_v26  ;;  %v4829_v26 = vld [vmem:[#allocation2 + $0xc40] sm:$0xff] }
0x1759   :  { %v4550_v52 = vmul.f32 %v4546_v57, %v4479_v60  ;;  %v4500_v2 = vadd.f32 %v6205_v18, %v4499_v35  ;;  %v4535_v48 = vmul.f32 %v4531_v27, %v4494_v0 }
0x175a   :  { %v6209_v40 = vpop.eup %6208  ;;  %v4576_v1 = vmul.f32 1.442695, %v4569_v22 }
0x175b   :  { %v4554_v3 = vadd.f32 0.2548296, %v4550_v52  ;;  %v4512_v5 = vmul.f32 %v6209_v40, %v4465_v41  ;;  %v4539_v10 = vadd.f32 1.4214138, %v4535_v48  ;;  %v4504_v13 = vsel %vm4503_vm6, %v6205_v18, %v4500_v2  ;;  %v6211_v4 = vpop.eup %6210 }
0x175c   :  { %v4509_v42 = vsel %vm4506_vm10, %v4508_v12, %v4504_v13  ;;  %vm4517_vm11 = vweird.f32 %v6209_v40  ;;  %v4599_v48 = vmul.f32 0.5, %v7790_v8  ;;  %6214 = vpow2.f32 %v4576_v1  ;;  %v4820_v1 = vld [vmem:[#allocation2 + $0xbf8] sm:$0xff] }
0x175d   :  { %v4558_v19 = vmul.f32 %v4554_v3, %v4479_v60  ;;  %v4598_v60 = vmul.f32 0.5, %v7783_v23  ;;  %v4513_v25 = vsub.f32 1.0, %v4512_v5  ;;  %v4543_v49 = vmul.f32 %v4539_v10, %v4494_v0  ;;  %vm4518_vm15 = vmor %vm4516_vm12, %vm4517_vm11  ;;  %v6213_v2 = vpop.eup %6212 }
0x175e   :  { %v4528_v28 = vmul.f32 1.0614054, %v4509_v42 }
0x175f   :  { %v4578_v55 = vmul.f32 %v6207_v34, %v4558_v19  ;;  %v4514_v62 = vmul.f32 %v6209_v40, %v4513_v25  ;;  %v4547_v17 = vadd.f32 -0.28449672, %v4543_v49 }
0x1760   :  { %v4532_v30 = vadd.f32 -1.4531521, %v4528_v28 }
0x1761   :  { %v4582_v39 = vsub.f32 1.0, %v4578_v55  ;;  %v4515_v54 = vadd.f32 %v6209_v40, %v4514_v62  ;;  %v4551_v32 = vmul.f32 %v4547_v17, %v4494_v0 }
0x1762   :  { %v4536_v23 = vmul.f32 %v4532_v30, %v4509_v42 }
0x1763   :  { %v4590_v61 = vsub.f32 0.0, %v4582_v39  ;;  %v4555_v24 = vadd.f32 0.2548296, %v4551_v32  ;;  %v4519_v6 = vsel %vm4518_vm15, %v6209_v40, %v4515_v54 }
0x1764   :  { %v4540_v7 = vadd.f32 1.4214138, %v4536_v23  ;;  %v4524_v18 = vsel %vm4521_vm4, %v4523_v9, %v4519_v6  ;;  %v4828_v23 = vld [vmem:[#allocation2 + $0xc38] sm:$0xff] }
0x1765   :  { %v4594_v29 = vsel %vm4586_vm7, %v4590_v61, %v4582_v39  ;;  %v4559_v57 = vmul.f32 %v4555_v24, %v4494_v0  ;;  %v4529_v41 = vmul.f32 1.0614054, %v4524_v18  ;;  %v4826_v24 = vld [vmem:[#allocation2 + $0xc28] sm:$0xff] }
0x1766   :  { %v4602_v33 = vadd.f32 1.0, %v4594_v29  ;;  %v4544_v11 = vmul.f32 %v4540_v7, %v4509_v42  ;;  %v4832_v29 = vld [vmem:[#allocation2 + $0xc58] sm:$0xff] }
0x1767   :  { %v4579_v52 = vmul.f32 %v6211_v4, %v4559_v57  ;;  %v4533_v21 = vadd.f32 -1.4531521, %v4529_v41  ;;  %4835 = vmatpush.msrb.mxu1 %v4832_v29  ;;  %v4823_v4 = vld [vmem:[#allocation2 + $0xc10] sm:$0xff] }
0x1768   :  { %v4606_v56 = vmul.f32 %v4602_v33, %v4598_v60  ;;  %v4548_v59 = vadd.f32 -0.28449672, %v4544_v11  ;;  %v6215_v60 = vpop.eup %6214 }
0x1769   :  { %v4583_v3 = vsub.f32 1.0, %v4579_v52  ;;  %v4537_v35 = vmul.f32 %v4533_v21, %v4524_v18  ;;  %4836 = vmatpush.msrb.mxu1 %v4831_v58  ;;  %v4822_v21 = vld [vmem:[#allocation2 + $0xc08] sm:$0xff] }
0x176a   :  { %4644 = vmatmul.f32.vlgmr.msrb.gmra.mxu3 %v4606_v56  ;;  %v4552_v15 = vmul.f32 %v4548_v59, %v4509_v42  ;;  %v4827_v56 = vld [vmem:[#allocation2 + $0xc30] sm:$0xff] }
0x176b   :  { %v4591_v63 = vsub.f32 0.0, %v4583_v3  ;;  %v4541_v19 = vadd.f32 1.4214138, %v4537_v35  ;;  %4837 = vmatpush.msrb.mxu1 %v4830_v14 }
0x176c   :  { %v4556_v27 = vadd.f32 0.2548296, %v4552_v15 }
0x176d   :  { %v4595_v51 = vsel %vm4587_vm13, %v4591_v63, %v4583_v3  ;;  %v4545_v0 = vmul.f32 %v4541_v19, %v4524_v18  ;;  %4838 = vmatpush.msrb.mxu1 %v4829_v26  ;;  %v4821_v19 = vld [vmem:[#allocation2 + $0xc00] sm:$0xff] }
0x176e   :  { %v4560_v34 = vmul.f32 %v4556_v27, %v4509_v42  ;;  %v4603_v40 = vadd.f32 1.0, %v4595_v51  ;;  %v4600_v42 = vmul.f32 0.5, %v7800_v36 }
0x176f   :  { %v4549_v12 = vadd.f32 -0.28449672, %v4545_v0  ;;  %4839 = vmatpush.msrb.mxu1 %v4828_v23 }
0x1770   :  { %v4580_v55 = vmul.f32 %v6213_v2, %v4560_v34  ;;  %v4607_v5 = vmul.f32 %v4603_v40, %v4599_v48  ;;  %v4819_v34 = vld [vmem:[#allocation2 + $0xbf0] sm:$0xff] }
0x1771   :  { %v4553_v13 = vmul.f32 %v4549_v12, %v4524_v18  ;;  %4840 = vmatpush.msrb.mxu1 %v4827_v56 }
0x1772   :  { %v4584_v10 = vsub.f32 1.0, %v4580_v55  ;;  %4647 = vmatmul.f32.gmra.mxu3 %v4607_v5  ;;  %v4818_v55 = vld [vmem:[#allocation2 + $0xbe8] sm:$0xff] }
0x1773   :  { %v4557_v53 = vadd.f32 0.2548296, %v4553_v13  ;;  %4841 = vmatpush.msrb.mxu1 %v4826_v24  ;;  %v4817_v13 = vld [vmem:[#allocation2 + $0xbe0] sm:$0xff] }
0x1774   :  { %v4592_v39 = vsub.f32 0.0, %v4584_v10 }
0x1775   :  { %v4561_v50 = vmul.f32 %v4557_v53, %v4524_v18  ;;  %4842 = vmatpush.msrb.mxu1 %v4825_v45  ;;  %v4824_v18 = vld [vmem:[#allocation2 + $0xc18] sm:$0xff] }
0x1776   :  { %v4596_v46 = vsel %vm4588_vm14, %v4592_v39, %v4584_v10 }
0x1777   :  { %v4604_v25 = vadd.f32 1.0, %v4596_v46  ;;  %v4581_v49 = vmul.f32 %v6215_v60, %v4561_v50  ;;  %4843 = vmatpush.msrb.mxu1 %v4824_v18 }
0x1779   :  { %v4608_v8 = vmul.f32 %v4604_v25, %v4600_v42  ;;  %v4585_v28 = vsub.f32 1.0, %v4581_v49  ;;  %4844 = vmatpush.msrb.mxu1 %v4823_v4 }
0x177b   :  { %4650 = vmatmul.f32.gmra.mxu3 %v4608_v8  ;;  %v4593_v61 = vsub.f32 0.0, %v4585_v28  ;;  %4845 = vmatpush.msrb.mxu1 %v4822_v21 }
0x177d   :  { %v4597_v43 = vsel %vm4589_vm0, %v4593_v61, %v4585_v28  ;;  %4846 = vmatpush.msrb.mxu1 %v4821_v19 }
0x177e   :  { %v4605_v62 = vadd.f32 1.0, %v4597_v43 }
0x177f   :  { %4847 = vmatpush.msrb.mxu1 %v4820_v1 }
0x1780   :  { %v4609_v17 = vmul.f32 %v4605_v62, %v4601_v16 }
0x1781   :  { %4848 = vmatpush.msrb.mxu1 %v4819_v34 }
0x1783   :  { %4653 = vmatmul.f32.gmra.mxu3 %v4609_v17  ;;  %4849 = vmatpush.msrb.mxu1 %v4818_v55 }
0x1785   :  { %4850 = vmatpush.msrb.mxu1 %v4817_v13 }
0x17ed   :  { %v4645_v30 = vpop.f32.mrf.mxu3 }
0x17ee   :  { %v7836_v36 = vadd.f32 %v7833_v38, %v4645_v30 }
0x17f0   :  { %v7839_v33 = vmul.f32 0.70710677, %v7836_v36 }
0x17f2   :  { %v4661_v54 = vand.u32 2147483647, %v7839_v33  ;;  %vm4793_vm13 = vcmp.lt.f32.partialorder %v7839_v33, 0.0 }
0x17f4   :  { %v4665_v32 = vmul.f32 0.3275911, %v4661_v54  ;;  %v4769_v40 = vmul.f32 %v4661_v54, %v4661_v54 }
0x17f5   :  { %v4648_v7 = vpop.f32.mrf.mxu3 }
0x17f6   :  { %v4669_v9 = vadd.f32 1.0, %v4665_v32  ;;  %v7843_v6 = vadd.f32 %v7833_v38, %v4648_v7  ;;  %v4773_v60 = vsub.f32 0.0, %v4769_v40 }
0x17f8   :  { %6216 = vrcp.f32 %v4669_v9  ;;  %v7846_v31 = vmul.f32 0.70710677, %v7843_v6  ;;  %v4682_v22 = vand.u32 2147483647, %v4669_v9  ;;  %v4684_v3 = vand.u32 2147483648, %v4669_v9 }
0x17f9   :  { %vm4678_vm8 = vweird.f32 %v4669_v9  ;;  %v4777_v16 = vmul.f32 1.442695, %v4773_v60 }
0x17fa   :  { %v7849_v41 = vand.u32 2147483647, %v7846_v31  ;;  %v4685_v0 = vor.u32 1.1754944e-38, %v4684_v3  ;;  %vm4683_vm3 = vcmp.eq.f32.partialorder %v4682_v22, 8.507059e+37 }
0x17fc   :  { %v4666_v59 = vmul.f32 0.3275911, %v7849_v41  ;;  %v4770_v18 = vmul.f32 %v7849_v41, %v7849_v41 }
0x17fe   :  { %v6217_v57 = vpop.eup %6216  ;;  %v4651_v15 = vpop.f32.mrf.mxu3  ;;  %v4670_v63 = vadd.f32 1.0, %v4666_v59 }
0x17ff   :  { %v4674_v11 = vmul.f32 %v6217_v57, %v4669_v9  ;;  %vm4679_vm1 = vweird.f32 %v6217_v57  ;;  %v7853_v27 = vadd.f32 %v7833_v38, %v4651_v15 }
0x1800   :  { %6218 = vrcp.f32 %v4670_v63  ;;  %vm4680_vm2 = vmor %vm4678_vm8, %vm4679_vm1  ;;  %v4699_v62 = vand.u32 2147483648, %v4670_v63  ;;  %v4697_v30 = vand.u32 2147483647, %v4670_v63  ;;  %vm4693_vm6 = vweird.f32 %v4670_v63 }
0x1801   :  { %v4675_v52 = vsub.f32 1.0, %v4674_v11  ;;  %v7856_v2 = vmul.f32 0.70710677, %v7853_v27 }
0x1802   :  { %v4700_v26 = vor.u32 1.1754944e-38, %v4699_v62  ;;  %vm4698_vm7 = vcmp.eq.f32.partialorder %v4697_v30, 8.507059e+37 }
0x1803   :  { %v4676_v35 = vmul.f32 %v6217_v57, %v4675_v52  ;;  %v7859_v5 = vand.u32 2147483647, %v7856_v2 }
0x1805   :  { %v4677_v51 = vadd.f32 %v6217_v57, %v4676_v35  ;;  %v4667_v39 = vmul.f32 0.3275911, %v7859_v5  ;;  %v4774_v35 = vsub.f32 0.0, %v4770_v18 }
0x1806   :  { %v4654_v53 = vpop.f32.mrf.mxu3  ;;  %v6219_v46 = vpop.eup %6218 }
0x1807   :  { %v4681_v48 = vsel %vm4680_vm2, %v6217_v57, %v4677_v51  ;;  %v7863_v42 = vadd.f32 %v7833_v38, %v4654_v53  ;;  %v4689_v25 = vmul.f32 %v6219_v46, %v4670_v63  ;;  %v4671_v49 = vadd.f32 1.0, %v4667_v39 }
0x1808   :  { %v4686_v12 = vsel %vm4683_vm3, %v4685_v0, %v4681_v48  ;;  %vm4694_vm5 = vweird.f32 %v6219_v46  ;;  %v4771_v48 = vmul.f32 %v7859_v5, %v7859_v5  ;;  %vm4794_vm2 = vcmp.lt.f32.partialorder %v7846_v31, 0.0 }
0x1809   :  { %v4733_v10 = vmul.f32 1.0614054, %v4686_v12  ;;  %v7866_v28 = vmul.f32 0.70710677, %v7863_v42  ;;  %v4690_v61 = vsub.f32 1.0, %v4689_v25  ;;  %6220 = vrcp.f32 %v4671_v49  ;;  %vm4695_vm10 = vmor %vm4693_vm6, %vm4694_vm5 }
0x180a   :  { %6222 = vpow2.f32 %v4777_v16  ;;  %v4714_v11 = vand.u32 2147483648, %v4671_v49  ;;  %v4712_v21 = vand.u32 2147483647, %v4671_v49  ;;  %vm4708_vm12 = vweird.f32 %v4671_v49 }
0x180b   :  { %v4737_v50 = vadd.f32 -1.4531521, %v4733_v10  ;;  %v4691_v17 = vmul.f32 %v6219_v46, %v4690_v61  ;;  %v7869_v29 = vand.u32 2147483647, %v7866_v28  ;;  %v4779_v10 = vmul.f32 1.442695, %v4774_v35 }
0x180c   :  { %v4715_v1 = vor.u32 1.1754944e-38, %v4714_v11  ;;  %vm4713_vm4 = vcmp.eq.f32.partialorder %v4712_v21, 8.507059e+37  ;;  %vm4795_vm3 = vcmp.lt.f32.partialorder %v7856_v2, 0.0  ;;  %vm4796_vm5 = vcmp.lt.f32.partialorder %v7866_v28, 0.0  ;;  %v7886_v2 = vld [vmem:[#allocation5 + $0x22] ss:$0 sm:$0xff] }
0x180d   :  { %v4741_v8 = vmul.f32 %v4737_v50, %v4686_v12  ;;  %v4692_v58 = vadd.f32 %v6219_v46, %v4691_v17  ;;  %v4668_v14 = vmul.f32 0.3275911, %v7869_v29 }
0x180f   :  { %v4745_v43 = vadd.f32 1.4214138, %v4741_v8  ;;  %v6221_v32 = vpop.eup %6220  ;;  %v4672_v23 = vadd.f32 1.0, %v4668_v14  ;;  %v4696_v9 = vsel %vm4695_vm10, %v6219_v46, %v4692_v58  ;;  %v4805_v8 = vmul.f32 0.5, %v7836_v36 }
0x1810   :  { %v4704_v24 = vmul.f32 %v6221_v32, %v4671_v49  ;;  %v4701_v7 = vsel %vm4698_vm7, %v4700_v26, %v4696_v9  ;;  %vm4709_vm11 = vweird.f32 %v6221_v32  ;;  %v6223_v22 = vpop.eup %6222 }
0x1811   :  { %v4749_v38 = vmul.f32 %v4745_v43, %v4686_v12  ;;  %6224 = vrcp.f32 %v4672_v23  ;;  %v4734_v4 = vmul.f32 1.0614054, %v4701_v7  ;;  %vm4710_vm15 = vmor %vm4708_vm12, %vm4709_vm11  ;;  %v4727_v53 = vand.u32 2147483647, %v4672_v23 }
0x1812   :  { %v4705_v57 = vsub.f32 1.0, %v4704_v24  ;;  %v4729_v46 = vand.u32 2147483648, %v4672_v23  ;;  %v4775_v43 = vsub.f32 0.0, %v4771_v48  ;;  %6226 = vpow2.f32 %v4779_v10 }
0x1813   :  { %v4753_v54 = vadd.f32 -0.28449672, %v4749_v38  ;;  %v4738_v3 = vadd.f32 -1.4531521, %v4734_v4  ;;  %vm4723_vm0 = vweird.f32 %v4672_v23  ;;  %vm4728_vm8 = vcmp.eq.f32.partialorder %v4727_v53, 8.507059e+37 }
0x1814   :  { %v4706_v59 = vmul.f32 %v6221_v32, %v4705_v57  ;;  %v4730_v30 = vor.u32 1.1754944e-38, %v4729_v46  ;;  %v4781_v14 = vmul.f32 1.442695, %v4775_v43  ;;  %v4807_v10 = vmul.f32 0.5, %v7853_v27  ;;  %v5039_v27 = vld [vmem:[#allocation2 + $0xcd8] sm:$0xff] }
0x1815   :  { %v4757_v56 = vmul.f32 %v4753_v54, %v4686_v12  ;;  %v4742_v51 = vmul.f32 %v4738_v3, %v4701_v7  ;;  %v4772_v54 = vmul.f32 %v7869_v29, %v7869_v29  ;;  %5042 = vmatpush.msra.mxu2 %v5039_v27 }
0x1816   :  { %v4707_v63 = vadd.f32 %v6221_v32, %v4706_v59  ;;  %6228 = vpow2.f32 %v4781_v14 }
0x1817   :  { %v4761_v45 = vadd.f32 0.2548296, %v4757_v56  ;;  %v6225_v19 = vpop.eup %6224  ;;  %v4746_v40 = vadd.f32 1.4214138, %v4742_v51  ;;  %v4776_v18 = vsub.f32 0.0, %v4772_v54  ;;  %v5032_v54 = vld [vmem:[#allocation2 + $0xca0] sm:$0xff] }
0x1818   :  { %v4719_v41 = vmul.f32 %v6225_v19, %v4672_v23  ;;  %v4711_v0 = vsel %vm4710_vm15, %v6221_v32, %v4707_v63  ;;  %vm4724_vm14 = vweird.f32 %v6225_v19  ;;  %v6227_v24 = vpop.eup %6226 }
0x1819   :  { %v4765_v52 = vmul.f32 %v4761_v45, %v4686_v12  ;;  %v4716_v55 = vsel %vm4713_vm4, %v4715_v1, %v4711_v0  ;;  %v4750_v50 = vmul.f32 %v4746_v40, %v4701_v7  ;;  %vm4725_vm1 = vmor %vm4723_vm0, %vm4724_vm14 }
0x181a   :  { %v4720_v13 = vsub.f32 1.0, %v4719_v41  ;;  %v4735_v39 = vmul.f32 1.0614054, %v4716_v55 }
0x181b   :  { %v4785_v15 = vmul.f32 %v6223_v22, %v4765_v52  ;;  %v4754_v5 = vadd.f32 -0.28449672, %v4750_v50  ;;  %v4783_v22 = vmul.f32 1.442695, %v4776_v18 }
0x181c   :  { %v4721_v25 = vmul.f32 %v6225_v19, %v4720_v13  ;;  %v4739_v49 = vadd.f32 -1.4531521, %v4735_v39  ;;  %v6229_v35 = vpop.eup %6228 }
0x181d   :  { %v4789_v34 = vsub.f32 1.0, %v4785_v15  ;;  %v4758_v33 = vmul.f32 %v4754_v5, %v4701_v7  ;;  %6230 = vpow2.f32 %v4783_v22  ;;  %v5038_v5 = vld [vmem:[#allocation2 + $0xcd0] sm:$0xff] }
0x181e   :  { %v4722_v16 = vadd.f32 %v6225_v19, %v4721_v25  ;;  %v4743_v62 = vmul.f32 %v4739_v49, %v4716_v55  ;;  %5043 = vmatpush.msra.mxu2 %v5038_v5 }
0x181f   :  { %v4797_v12 = vsub.f32 0.0, %v4789_v34  ;;  %v4762_v36 = vadd.f32 0.2548296, %v4758_v33  ;;  %v5034_v33 = vld [vmem:[#allocation2 + $0xcb0] sm:$0xff] }
0x1820   :  { %v4747_v38 = vadd.f32 1.4214138, %v4743_v62  ;;  %v4726_v58 = vsel %vm4725_vm1, %v6225_v19, %v4722_v16  ;;  %v5037_v16 = vld [vmem:[#allocation2 + $0xcc8] sm:$0xff]  ;;  %v5036_v62 = vld [vmem:[#allocation2 + $0xcc0] sm:$0xff] }
0x1821   :  { %v4801_v60 = vsel %vm4793_vm13, %v4797_v12, %v4789_v34  ;;  %v4731_v26 = vsel %vm4728_vm8, %v4730_v30, %v4726_v58  ;;  %v4766_v56 = vmul.f32 %v4762_v36, %v4701_v7  ;;  %v4806_v7 = vmul.f32 0.5, %v7843_v6  ;;  %5044 = vmatpush.msra.mxu2 %v5037_v16  ;;  %v5035_v30 = vld [vmem:[#allocation2 + $0xcb8] sm:$0xff] }
0x1822   :  { %v4809_v61 = vadd.f32 1.0, %v4801_v60  ;;  %v4751_v32 = vmul.f32 %v4747_v38, %v4716_v55  ;;  %v4736_v9 = vmul.f32 1.0614054, %v4731_v26  ;;  %v4808_v60 = vmul.f32 0.5, %v7863_v42  ;;  %v5033_v38 = vld [vmem:[#allocation2 + $0xca8] sm:$0xff] }
0x1823   :  { %v4786_v57 = vmul.f32 %v6227_v24, %v4766_v56  ;;  %5045 = vmatpush.msra.mxu2 %v5036_v62 }
0x1824   :  { %v4813_v17 = vmul.f32 %v4809_v61, %v4805_v8  ;;  %v4755_v23 = vadd.f32 -0.28449672, %v4751_v32  ;;  %v4740_v45 = vadd.f32 -1.4531521, %v4736_v9  ;;  %v5031_v9 = vld [vmem:[#allocation2 + $0xc98] sm:$0xff] }
0x1825   :  { %v4790_v52 = vsub.f32 1.0, %v4786_v57  ;;  %5046 = vmatpush.msra.mxu2 %v5035_v30 }
0x1826   :  { %4851 = vmatmul.f32.vlgmr.msrb.gmra.mxu1 %v4813_v17  ;;  %v4759_v11 = vmul.f32 %v4755_v23, %v4716_v55  ;;  %v4744_v4 = vmul.f32 %v4740_v45, %v4731_v26  ;;  %v5030_v23 = vld [vmem:[#allocation2 + $0xc90] sm:$0xff] }
0x1827   :  { %v4798_v3 = vsub.f32 0.0, %v4790_v52  ;;  %5047 = vmatpush.msra.mxu2 %v5034_v33 }
0x1828   :  { %v4763_v59 = vadd.f32 0.2548296, %v4759_v11  ;;  %v4748_v21 = vadd.f32 1.4214138, %v4744_v4  ;;  %v5029_v4 = vld [vmem:[#allocation2 + $0xc88] sm:$0xff] }
0x1829   :  { %v4802_v63 = vsel %vm4794_vm2, %v4798_v3, %v4790_v52  ;;  %5048 = vmatpush.msra.mxu2 %v5033_v38 }
0x182a   :  { %v4767_v29 = vmul.f32 %v4763_v59, %v4716_v55  ;;  %v4752_v15 = vmul.f32 %v4748_v21, %v4731_v26  ;;  %v4810_v19 = vadd.f32 1.0, %v4802_v63  ;;  %v6231_v55 = vpop.eup %6230  ;;  %v5028_v59 = vld [vmem:[#allocation2 + $0xc80] sm:$0xff]  ;;  %v5026_v63 = vld [vmem:[#allocation2 + $0xc70] sm:$0xff] }
0x182b   :  { %5049 = vmatpush.msra.mxu2 %v5032_v54 }
0x182c   :  { %v4787_v1 = vmul.f32 %v6229_v35, %v4767_v29  ;;  %v4756_v51 = vadd.f32 -0.28449672, %v4752_v15  ;;  %v4814_v34 = vmul.f32 %v4810_v19, %v4806_v7  ;;  %v5027_v29 = vld [vmem:[#allocation2 + $0xc78] sm:$0xff] }
0x182d   :  { %5050 = vmatpush.msra.mxu2 %v5031_v9 }
0x182e   :  { %v4791_v41 = vsub.f32 1.0, %v4787_v1  ;;  %v4760_v0 = vmul.f32 %v4756_v51, %v4731_v26  ;;  %4854 = vmatmul.f32.gmra.mxu1 %v4814_v34  ;;  %v5025_v34 = vld [vmem:[#allocation2 + $0xc68] sm:$0xff] }
0x182f   :  { %5051 = vmatpush.msra.mxu2 %v5030_v23 }
0x1830   :  { %v4799_v48 = vsub.f32 0.0, %v4791_v41  ;;  %v4764_v40 = vadd.f32 0.2548296, %v4760_v0 }
0x1831   :  { %5052 = vmatpush.msra.mxu2 %v5029_v4 }
0x1832   :  { %v4803_v12 = vsel %vm4795_vm3, %v4799_v48, %v4791_v41  ;;  %v4768_v31 = vmul.f32 %v4764_v40, %v4731_v26  ;;  %v5024_v48 = vld [vmem:[#allocation2 + $0xc60] sm:$0xff] }
0x1833   :  { %v4811_v13 = vadd.f32 1.0, %v4803_v12  ;;  %5053 = vmatpush.msra.mxu2 %v5028_v59 }
0x1834   :  { %v4788_v39 = vmul.f32 %v6231_v55, %v4768_v31 }
0x1835   :  { %v4815_v6 = vmul.f32 %v4811_v13, %v4807_v10  ;;  %5054 = vmatpush.msra.mxu2 %v5027_v29 }
0x1836   :  { %v4792_v53 = vsub.f32 1.0, %v4788_v39 }
0x1837   :  { %4857 = vmatmul.f32.gmra.mxu1 %v4815_v6  ;;  %5055 = vmatpush.msra.mxu2 %v5026_v63 }
0x1838   :  { %v4800_v46 = vsub.f32 0.0, %v4792_v53 }
0x1839   :  { %5056 = vmatpush.msra.mxu2 %v5025_v34 }
0x183a   :  { %v4804_v50 = vsel %vm4796_vm5, %v4800_v46, %v4792_v53 }
0x183b   :  { %v4812_v25 = vadd.f32 1.0, %v4804_v50  ;;  %5057 = vmatpush.msra.mxu2 %v5024_v48 }
0x183d   :  { %v4816_v49 = vmul.f32 %v4812_v25, %v4808_v60 }
0x183f   :  { %4860 = vmatmul.f32.gmra.mxu1 %v4816_v49 }
0x18a3   :  { %v4852_v8 = vpop.f32.mrf.mxu1 }
0x18a4   :  { %v7889_v61 = vadd.f32 %v7886_v2, %v4852_v8 }
0x18a6   :  { %v7892_v43 = vmul.f32 0.70710677, %v7889_v61 }
0x18a8   :  { %v4868_v28 = vand.u32 2147483647, %v7892_v43  ;;  %vm5000_vm1 = vcmp.lt.f32.partialorder %v7892_v43, 0.0 }
0x18aa   :  { %v4872_v42 = vmul.f32 0.3275911, %v4868_v28  ;;  %v4976_v19 = vmul.f32 %v4868_v28, %v4868_v28 }
0x18ab   :  { %v4855_v58 = vpop.f32.mrf.mxu1 }
0x18ac   :  { %v4876_v17 = vadd.f32 1.0, %v4872_v42  ;;  %v7896_v14 = vadd.f32 %v7886_v2, %v4855_v58  ;;  %v4980_v40 = vsub.f32 0.0, %v4976_v19 }
0x18ae   :  { %6232 = vrcp.f32 %v4876_v17  ;;  %v7899_v32 = vmul.f32 0.70710677, %v7896_v14  ;;  %v4891_v45 = vand.u32 2147483648, %v4876_v17  ;;  %v4889_v57 = vand.u32 2147483647, %v4876_v17 }
0x18af   :  { %vm4885_vm10 = vweird.f32 %v4876_v17  ;;  %v4984_v50 = vmul.f32 1.442695, %v4980_v40 }
0x18b0   :  { %v7902_v24 = vand.u32 2147483647, %v7899_v32  ;;  %v4892_v15 = vor.u32 1.1754944e-38, %v4891_v45  ;;  %vm4890_vm11 = vcmp.eq.f32.partialorder %v4889_v57, 8.507059e+37 }
0x18b2   :  { %v4873_v11 = vmul.f32 0.3275911, %v7902_v24  ;;  %v4977_v30 = vmul.f32 %v7902_v24, %v7902_v24 }
0x18b4   :  { %v6233_v36 = vpop.eup %6232  ;;  %v4858_v52 = vpop.f32.mrf.mxu1  ;;  %v4877_v22 = vadd.f32 1.0, %v4873_v11  ;;  %v4981_v23 = vsub.f32 0.0, %v4977_v30 }
0x18b5   :  { %v4881_v26 = vmul.f32 %v6233_v36, %v4876_v17  ;;  %vm4886_vm6 = vweird.f32 %v6233_v36  ;;  %v7906_v3 = vadd.f32 %v7886_v2, %v4858_v52 }
0x18b6   :  { %vm4887_vm7 = vmor %vm4885_vm10, %vm4886_vm6  ;;  %6234 = vrcp.f32 %v4877_v22  ;;  %v4906_v5 = vand.u32 2147483648, %v4877_v22  ;;  %vm4900_vm15 = vweird.f32 %v4877_v22  ;;  %v4904_v16 = vand.u32 2147483647, %v4877_v22 }
0x18b7   :  { %v4882_v56 = vsub.f32 1.0, %v4881_v26  ;;  %v7909_v1 = vmul.f32 0.70710677, %v7906_v3  ;;  %v4986_v19 = vmul.f32 1.442695, %v4981_v23 }
0x18b8   :  { %v4907_v58 = vor.u32 1.1754944e-38, %v4906_v5  ;;  %vm4905_vm13 = vcmp.eq.f32.partialorder %v4904_v16, 8.507059e+37 }
0x18b9   :  { %v4883_v18 = vmul.f32 %v6233_v36, %v4882_v56  ;;  %v4870_v41 = vand.u32 2147483647, %v7909_v1 }
0x18bb   :  { %v4884_v21 = vadd.f32 %v6233_v36, %v4883_v18  ;;  %v4874_v12 = vmul.f32 0.3275911, %v4870_v41  ;;  %v4978_v24 = vmul.f32 %v4870_v41, %v4870_v41 }
0x18bc   :  { %v4861_v31 = vpop.f32.mrf.mxu1  ;;  %v6235_v55 = vpop.eup %6234 }
0x18bd   :  { %v4888_v35 = vsel %vm4887_vm7, %v6233_v36, %v4884_v21  ;;  %v7913_v13 = vadd.f32 %v7886_v2, %v4861_v31  ;;  %v4896_v39 = vmul.f32 %v6235_v55, %v4877_v22  ;;  %v4878_v6 = vadd.f32 1.0, %v4874_v12 }
0x18be   :  { %v4893_v7 = vsel %vm4890_vm11, %v4892_v15, %v4888_v35  ;;  %vm4901_vm12 = vweird.f32 %v6235_v55  ;;  %v5012_v22 = vmul.f32 0.5, %v7889_v61  ;;  %v4982_v34 = vsub.f32 0.0, %v4978_v24  ;;  %v5091_v24 = vld [vmem:[#allocation2 + $0xd40] sm:$0xff] }
0x18bf   :  { %v4940_v51 = vmul.f32 1.0614054, %v4893_v7  ;;  %v7916_v46 = vmul.f32 0.70710677, %v7913_v13  ;;  %v4897_v60 = vsub.f32 1.0, %v4896_v39  ;;  %6236 = vrcp.f32 %v4878_v6  ;;  %vm4902_vm4 = vmor %vm4900_vm15, %vm4901_vm12 }
0x18c0   :  { %6238 = vpow2.f32 %v4984_v50  ;;  %v4921_v45 = vand.u32 2147483648, %v4878_v6  ;;  %v4919_v4 = vand.u32 2147483647, %v4878_v6  ;;  %vm4915_vm0 = vweird.f32 %v4878_v6 }
0x18c1   :  { %v4944_v0 = vadd.f32 -1.4531521, %v4940_v51  ;;  %v7919_v49 = vand.u32 2147483647, %v7916_v46  ;;  %v4898_v8 = vmul.f32 %v6235_v55, %v4897_v60  ;;  %vm5001_vm7 = vcmp.lt.f32.partialorder %v7899_v32, 0.0  ;;  %v5087_v32 = vld [vmem:[#allocation2 + $0xd20] sm:$0xff] }
0x18c2   :  { %v4922_v15 = vor.u32 1.1754944e-38, %v4921_v45  ;;  %vm4920_vm2 = vcmp.eq.f32.partialorder %v4919_v4, 8.507059e+37  ;;  %v5108_v45 = vld [vmem:[#allocation2 + $0xdc8] sm:$0xff]  ;;  %vm5002_vm11 = vcmp.lt.f32.partialorder %v7909_v1, 0.0  ;;  %v5239_v1 = vld [vmem:[#allocation2 + $0xf18] sm:$0xff]  ;;  %vm5003_vm12 = vcmp.lt.f32.partialorder %v7916_v46, 0.0 }
0x18c3   :  { %v4948_v10 = vmul.f32 %v4944_v0, %v4893_v7  ;;  %v4875_v2 = vmul.f32 0.3275911, %v7919_v49  ;;  %v4899_v28 = vadd.f32 %v6235_v55, %v4898_v8  ;;  %v4988_v8 = vmul.f32 1.442695, %v4982_v34  ;;  %v5236_v46 = vld [vmem:[#allocation2 + $0xf00] sm:$0xff] }
0x18c5   :  { %v4952_v53 = vadd.f32 1.4214138, %v4948_v10  ;;  %v4879_v62 = vadd.f32 1.0, %v4875_v2  ;;  %v6237_v17 = vpop.eup %6236  ;;  %v4903_v33 = vsel %vm4902_vm4, %v6235_v55, %v4899_v28  ;;  %v4979_v2 = vmul.f32 %v7919_v49, %v7919_v49  ;;  %v5168_v49 = vld [vmem:[#allocation2 + $0xe50] sm:$0xff] }
0x18c6   :  { %v4911_v54 = vmul.f32 %v6237_v17, %v4878_v6  ;;  %v7924_v9 = vsel %vm4905_vm13, %v4907_v58, %v4903_v33  ;;  %v6239_v56 = vpop.eup %6238  ;;  %vm4916_vm14 = vweird.f32 %v6237_v17  ;;  %v5169_v58 = vld [vmem:[#allocation2 + $0xe58] sm:$0xff] }
0x18c7   :  { %v4956_v25 = vmul.f32 %v4952_v53, %v4893_v7  ;;  %6240 = vrcp.f32 %v4879_v62  ;;  %v4941_v18 = vmul.f32 1.0614054, %v7924_v9  ;;  %vm4917_vm8 = vmor %vm4915_vm0, %vm4916_vm14  ;;  %v4934_v61 = vand.u32 2147483647, %v4879_v62  ;;  %5172 = vmatpush.msrb.mxu2 %v5169_v58 }
0x18c8   :  { %v4912_v26 = vsub.f32 1.0, %v4911_v54  ;;  %v4936_v12 = vand.u32 2147483648, %v4879_v62  ;;  %vm4930_vm5 = vweird.f32 %v4879_v62  ;;  %6242 = vpow2.f32 %v4986_v19  ;;  %v5165_v19 = vld [vmem:[#allocation2 + $0xe38] sm:$0xff] }
0x18c9   :  { %v4960_v27 = vadd.f32 -0.28449672, %v4956_v25  ;;  %v4945_v52 = vadd.f32 -1.4531521, %v4941_v18  ;;  %vm4935_vm10 = vcmp.eq.f32.partialorder %v4934_v61, 8.507059e+37  ;;  %v5167_v18 = vld [vmem:[#allocation2 + $0xe48] sm:$0xff]  ;;  %5173 = vmatpush.msrb.mxu2 %v5168_v49  ;;  %6244 = vpow2.f32 %v4988_v8 }
0x18ca   :  { %v4913_v11 = vmul.f32 %v6237_v17, %v4912_v26  ;;  %v4937_v60 = vor.u32 1.1754944e-38, %v4936_v12  ;;  %v5092_v26 = vld [vmem:[#allocation2 + $0xd48] sm:$0xff]  ;;  %v5013_v8 = vmul.f32 0.5, %v7896_v14  ;;  %v5102_v14 = vld [vmem:[#allocation2 + $0xd98] sm:$0xff]  ;;  %v5101_v49 = vld [vmem:[#allocation2 + $0xd90] sm:$0xff] }
0x18cb   :  { %v4964_v42 = vmul.f32 %v4960_v27, %v4893_v7  ;;  %v4949_v63 = vmul.f32 %v4945_v52, %v7924_v9  ;;  %v5246_v52 = vld [vmem:[#allocation2 + $0xf50] sm:$0xff]  ;;  %5174 = vmatpush.msrb.mxu2 %v5167_v18  ;;  %v5084_v18 = vld [vmem:[#allocation2 + $0xd08] sm:$0xff] }
0x18cc   :  { %v4914_v29 = vadd.f32 %v6237_v17, %v4913_v11  ;;  %v4983_v11 = vsub.f32 0.0, %v4979_v2 }
0x18cd   :  { %v4968_v38 = vadd.f32 0.2548296, %v4964_v42  ;;  %v6241_v59 = vpop.eup %6240  ;;  %v4953_v0 = vadd.f32 1.4214138, %v4949_v63  ;;  %v5247_v42 = vld [vmem:[#allocation2 + $0xf58] sm:$0xff] }
0x18ce   :  { %v4926_v35 = vmul.f32 %v6241_v59, %v4879_v62  ;;  %v4918_v51 = vsel %vm4917_vm8, %v6237_v17, %v4914_v29  ;;  %vm4931_vm3 = vweird.f32 %v6241_v59  ;;  %v5094_v62 = vld [vmem:[#allocation2 + $0xd58] sm:$0xff]  ;;  %5248 = vmatpush.msrb.mxu0 %v5247_v42  ;;  %v5166_v29 = vld [vmem:[#allocation2 + $0xe40] sm:$0xff]  ;;  %v4990_v34 = vmul.f32 1.442695, %v4983_v11 }
0x18cf   :  { %v4972_v36 = vmul.f32 %v4968_v38, %v4893_v7  ;;  %v7930_v48 = vsel %vm4920_vm2, %v4922_v15, %v4918_v51  ;;  %v4957_v10 = vmul.f32 %v4953_v0, %v7924_v9  ;;  %vm4932_vm6 = vmor %vm4930_vm5, %vm4931_vm3  ;;  %v5110_v17 = vld [vmem:[#allocation2 + $0xdd8] sm:$0xff]  ;;  %5134 = vmatpush.msra.mxu1 %v5094_v62  ;;  %v5093_v38 = vld [vmem:[#allocation2 + $0xd50] sm:$0xff]  ;;  %5175 = vmatpush.msrb.mxu2 %v5166_v29  ;;  %v5014_v11 = vmul.f32 0.5, %v7906_v3 }
0x18d0   :  { %v4927_v41 = vsub.f32 1.0, %v4926_v35  ;;  %v4942_v31 = vmul.f32 1.0614054, %v7930_v48  ;;  %5114 = vmatpush.msra.mxu3 %v5110_v17  ;;  %5249 = vmatpush.msrb.mxu0 %v5246_v52  ;;  %v5090_v15 = vld [vmem:[#allocation2 + $0xd38] sm:$0xff]  ;;  %v5245_v51 = vld [vmem:[#allocation2 + $0xf48] sm:$0xff]  ;;  %v5089_v0 = vld [vmem:[#allocation2 + $0xd30] sm:$0xff]  ;;  %6246 = vpow2.f32 %v4990_v34 }
0x18d1   :  { %v4992_v57 = vmul.f32 %v6239_v56, %v4972_v36  ;;  %v4961_v50 = vadd.f32 -0.28449672, %v4957_v10  ;;  %v5109_v36 = vld [vmem:[#allocation2 + $0xdd0] sm:$0xff]  ;;  %5135 = vmatpush.msra.mxu1 %v5093_v38  ;;  %5176 = vmatpush.msrb.mxu2 %v5165_v19  ;;  %v5088_v10 = vld [vmem:[#allocation2 + $0xd28] sm:$0xff]  ;;  %v5086_v17 = vld [vmem:[#allocation2 + $0xd18] sm:$0xff]  ;;  %vm5822_vm5 = vcmask 74752  }
0x18d2   :  { %v4928_v55 = vmul.f32 %v6241_v59, %v4927_v41  ;;  %v4946_v39 = vadd.f32 -1.4531521, %v4942_v31  ;;  %5115 = vmatpush.msra.mxu3 %v5109_v36  ;;  %v5105_v31 = vld [vmem:[#allocation2 + $0xdb0] sm:$0xff]  ;;  %5250 = vmatpush.msrb.mxu0 %v5245_v51  ;;  %v5241_v38 = vld [vmem:[#allocation2 + $0xf28] sm:$0xff]  ;;  %v5161_v36 = vld [vmem:[#allocation2 + $0xe18] sm:$0xff] }
0x18d3   :  { %v4996_v21 = vsub.f32 1.0, %v4992_v57  ;;  %v4965_v27 = vmul.f32 %v4961_v50, %v7924_v9  ;;  %v6243_v57 = vpop.eup %6242  ;;  %5136 = vmatpush.msra.mxu1 %v5092_v26  ;;  %v5100_v52 = vld [vmem:[#allocation2 + $0xd88] sm:$0xff]  ;;  %v5099_v29 = vld [vmem:[#allocation2 + $0xd80] sm:$0xff]  ;;  %v5157_v19 = vld [vmem:[#allocation2 + $0xdf8] sm:$0xff] }
0x18d4   :  { %v4929_v53 = vadd.f32 %v6241_v59, %v4928_v55  ;;  %v4950_v25 = vmul.f32 %v4946_v39, %v7930_v48  ;;  %5116 = vmatpush.msra.mxu3 %v5108_v45  ;;  %v5243_v39 = vld [vmem:[#allocation2 + $0xf38] sm:$0xff]  ;;  %v5097_v34 = vld [vmem:[#allocation2 + $0xd70] sm:$0xff] }
0x18d5   :  { %v5004_v7 = vsub.f32 0.0, %v4996_v21  ;;  %v4969_v30 = vadd.f32 0.2548296, %v4965_v27  ;;  %5137 = vmatpush.msra.mxu1 %v5091_v24 }
0x18d6   :  { %v4933_v5 = vsel %vm4932_vm6, %v6241_v59, %v4929_v53  ;;  %v4954_v28 = vadd.f32 1.4214138, %v4950_v25  ;;  %v5163_v25 = vld [vmem:[#allocation2 + $0xe28] sm:$0xff] }
0x18d7   :  { %v5008_v40 = vsel %vm5000_vm1, %v5004_v7, %v4996_v21  ;;  %v7938_v16 = vsel %vm4935_vm10, %v4937_v60, %v4933_v5  ;;  %v4973_v56 = vmul.f32 %v4969_v30, %v7924_v9  ;;  %v5106_v7 = vld [vmem:[#allocation2 + $0xdb8] sm:$0xff]  ;;  %5138 = vmatpush.msra.mxu1 %v5090_v15  ;;  %v5104_v60 = vld [vmem:[#allocation2 + $0xda8] sm:$0xff]  ;;  %v5162_v30 = vld [vmem:[#allocation2 + $0xe20] sm:$0xff] }
0x18d8   :  { %v5016_v43 = vadd.f32 1.0, %v5008_v40  ;;  %v4943_v33 = vmul.f32 1.0614054, %v7938_v16  ;;  %v4958_v54 = vmul.f32 %v4954_v28, %v7930_v48  ;;  %v5244_v40 = vld [vmem:[#allocation2 + $0xf40] sm:$0xff] }
0x18d9   :  { %v4993_v59 = vmul.f32 %v6243_v57, %v4973_v56  ;;  %5139 = vmatpush.msra.mxu1 %v5089_v0  ;;  %5251 = vmatpush.msrb.mxu0 %v5244_v40  ;;  %v5103_v28 = vld [vmem:[#allocation2 + $0xda0] sm:$0xff]  ;;  %v5160_v57 = vld [vmem:[#allocation2 + $0xe10] sm:$0xff]  ;;  %v5015_v0 = vmul.f32 0.5, %v7913_v13 }
0x18da   :  { %v5020_v6 = vmul.f32 %v5016_v43, %v5012_v22  ;;  %v4947_v23 = vadd.f32 -1.4531521, %v4943_v33  ;;  %v4962_v4 = vadd.f32 -0.28449672, %v4958_v54  ;;  %v5107_v22 = vld [vmem:[#allocation2 + $0xdc0] sm:$0xff]  ;;  %v5164_v43 = vld [vmem:[#allocation2 + $0xe30] sm:$0xff] }
0x18db   :  { %v4997_v35 = vsub.f32 1.0, %v4993_v59  ;;  %5117 = vmatpush.msra.mxu3 %v5107_v22  ;;  %5177 = vmatpush.msrb.mxu2 %v5164_v43  ;;  %v5085_v54 = vld [vmem:[#allocation2 + $0xd10] sm:$0xff]  ;;  %v5240_v56 = vld [vmem:[#allocation2 + $0xf20] sm:$0xff]  ;;  %v5159_v59 = vld [vmem:[#allocation2 + $0xe08] sm:$0xff] }
0x18dc   :  { %5058 = vmatmul.f32.vlgmr.msra.gmra.mxu2 %v5020_v6  ;;  %v4951_v21 = vmul.f32 %v4947_v23, %v7938_v16  ;;  %v4966_v9 = vmul.f32 %v4962_v4, %v7930_v48  ;;  %v6245_v6 = vpop.eup %6244  ;;  %5140 = vmatpush.msra.mxu1 %v5088_v10  ;;  %v5158_v15 = vld [vmem:[#allocation2 + $0xe00] sm:$0xff]  ;;  %v5155_v10 = vld [vmem:[#allocation2 + $0xde8] sm:$0xff] }
0x18dd   :  { %v5005_v61 = vsub.f32 0.0, %v4997_v35  ;;  %5118 = vmatpush.msra.mxu3 %v5106_v7  ;;  %5252 = vmatpush.msrb.mxu0 %v5243_v39  ;;  %v6247_v23 = vpop.eup %6246  ;;  %v5081_v7 = vld [vmem:[#allocation2 + $0xcf0] sm:$0xff]  ;;  %v5284_v39 = vld [vmem:[#allocation2 + $0xfd8] sm:$0xff]  ;;  %v5095_v13 = vld [vmem:[#allocation2 + $0xd60] sm:$0xff] }
0x18de   :  { %v4955_v63 = vadd.f32 1.4214138, %v4951_v21  ;;  %v4970_v41 = vadd.f32 0.2548296, %v4966_v9  ;;  %5178 = vmatpush.msrb.mxu2 %v5163_v25  ;;  %5141 = vmatpush.msra.mxu1 %v5087_v32  ;;  %v5082_v9 = vld [vmem:[#allocation2 + $0xcf8] sm:$0xff]  ;;  %v5323_v32 = vld [vmem:[#allocation2 + $0x1050] sm:$0xff] }
0x18df   :  { %v5009_v53 = vsel %vm5001_vm7, %v5005_v61, %v4997_v35  ;;  %5119 = vmatpush.msra.mxu3 %v5105_v31  ;;  %v5098_v35 = vld [vmem:[#allocation2 + $0xd78] sm:$0xff]  ;;  %v5080_v61 = vld [vmem:[#allocation2 + $0xce8] sm:$0xff] }
0x18e0   :  { %v4959_v12 = vmul.f32 %v4955_v63, %v7938_v16  ;;  %v4974_v55 = vmul.f32 %v4970_v41, %v7930_v48  ;;  %v5017_v27 = vadd.f32 1.0, %v5009_v53  ;;  %v5242_v48 = vld [vmem:[#allocation2 + $0xf30] sm:$0xff]  ;;  %5142 = vmatpush.msra.mxu1 %v5086_v17  ;;  %5179 = vmatpush.msrb.mxu2 %v5162_v30  ;;  %v5237_v41 = vld [vmem:[#allocation2 + $0xf08] sm:$0xff]  ;;  %v5235_v53 = vld [vmem:[#allocation2 + $0xef8] sm:$0xff] }
0x18e1   :  { %5120 = vmatpush.msra.mxu3 %v5104_v60  ;;  %5253 = vmatpush.msrb.mxu0 %v5242_v48  ;;  %v5238_v63 = vld [vmem:[#allocation2 + $0xf10] sm:$0xff]  ;;  %v5096_v31 = vld [vmem:[#allocation2 + $0xd68] sm:$0xff]  ;;  %v5324_v25 = vld [vmem:[#allocation2 + $0x1058] sm:$0xff] }
0x18e2   :  { %v4963_v50 = vadd.f32 -0.28449672, %v4959_v12  ;;  %v4994_v5 = vmul.f32 %v6245_v6, %v4974_v55  ;;  %v5021_v42 = vmul.f32 %v5017_v27, %v5013_v8  ;;  %5143 = vmatpush.msra.mxu1 %v5085_v54  ;;  %5180 = vmatpush.msrb.mxu2 %v5161_v36  ;;  %v5156_v12 = vld [vmem:[#allocation2 + $0xdf0] sm:$0xff]  ;;  %v5079_v55 = vld [vmem:[#allocation2 + $0xce0] sm:$0xff]  ;;  %v5233_v48 = vld [vmem:[#allocation2 + $0xee8] sm:$0xff] }
0x18e3   :  { %5121 = vmatpush.msra.mxu3 %v5103_v28  ;;  %5254 = vmatpush.msrb.mxu0 %v5241_v38  ;;  %v5154_v6 = vld [vmem:[#allocation2 + $0xde0] sm:$0xff]  ;;  %v5283_v60 = vld [vmem:[#allocation2 + $0xfd0] sm:$0xff]  ;;  %v5280_v30 = vld [vmem:[#allocation2 + $0xfb8] sm:$0xff] }
0x18e4   :  { %v4967_v2 = vmul.f32 %v4963_v50, %v7938_v16  ;;  %v4998_v62 = vsub.f32 1.0, %v4994_v5  ;;  %5061 = vmatmul.f32.gmra.mxu2 %v5021_v42  ;;  %5144 = vmatpush.msra.mxu1 %v5084_v18  ;;  %v5208_v50 = vld [vmem:[#allocation2 + $0xed8] sm:$0xff]  ;;  %v5234_v8 = vld [vmem:[#allocation2 + $0xef0] sm:$0xff]  ;;  %v5282_v5 = vld [vmem:[#allocation2 + $0xfc8] sm:$0xff] }
0x18e5   :  { %5122 = vmatpush.msra.mxu3 %v5102_v14  ;;  %5255 = vmatpush.msrb.mxu0 %v5240_v56  ;;  %v5207_v27 = vld [vmem:[#allocation2 + $0xed0] sm:$0xff]  ;;  %v5281_v28 = vld [vmem:[#allocation2 + $0xfc0] sm:$0xff]  ;;  %v5322_v42 = vld [vmem:[#allocation2 + $0x1048] sm:$0xff] }
0x18e6   :  { %v4971_v33 = vadd.f32 0.2548296, %v4967_v2  ;;  %v5006_v58 = vsub.f32 0.0, %v4998_v62  ;;  %5181 = vmatpush.msrb.mxu2 %v5160_v57  ;;  %v5206_v2 = vld [vmem:[#allocation2 + $0xec8] sm:$0xff]  ;;  %v5205_v17 = vld [vmem:[#allocation2 + $0xec0] sm:$0xff]  ;;  %v5402_v14 = vld [vmem:[#allocation2 + $0x1158] sm:$0xff] }
0x18e7   :  { %5123 = vmatpush.msra.mxu3 %v5101_v49  ;;  %5256 = vmatpush.msrb.mxu0 %v5239_v1  ;;  %v5204_v38 = vld [vmem:[#allocation2 + $0xeb8] sm:$0xff]  ;;  %v5401_v36 = vld [vmem:[#allocation2 + $0x1150] sm:$0xff]  ;;  %v5278_v49 = vld [vmem:[#allocation2 + $0xfa8] sm:$0xff] }
0x18e8   :  { %v4975_v26 = vmul.f32 %v4971_v33, %v7938_v16  ;;  %v5010_v45 = vsel %vm5002_vm11, %v5006_v58, %v4998_v62  ;;  %v5083_v16 = vld [vmem:[#allocation2 + $0xd00] sm:$0xff]  ;;  %5182 = vmatpush.msrb.mxu2 %v5159_v59  ;;  %v5279_v58 = vld [vmem:[#allocation2 + $0xfb0] sm:$0xff]  ;;  %v5320_v54 = vld [vmem:[#allocation2 + $0x1038] sm:$0xff] }
0x18e9   :  { %v5018_v4 = vadd.f32 1.0, %v5010_v45  ;;  %5124 = vmatpush.msra.mxu3 %v5100_v52  ;;  %5145 = vmatpush.msra.mxu1 %v5083_v16  ;;  %v5232_v62 = vld [vmem:[#allocation2 + $0xee0] sm:$0xff]  ;;  %v5319_v56 = vld [vmem:[#allocation2 + $0x1030] sm:$0xff]  ;;  %v5202_v45 = vld [vmem:[#allocation2 + $0xea8] sm:$0xff] }
0x18ea   :  { %v4995_v24 = vmul.f32 %v6247_v23, %v4975_v26  ;;  %5183 = vmatpush.msrb.mxu2 %v5158_v15  ;;  %5257 = vmatpush.msrb.mxu0 %v5238_v63  ;;  %v5321_v33 = vld [vmem:[#allocation2 + $0x1040] sm:$0xff]  ;;  %v5203_v26 = vld [vmem:[#allocation2 + $0xeb0] sm:$0xff]  ;;  %v5400_v23 = vld [vmem:[#allocation2 + $0x1148] sm:$0xff] }
0x18eb   :  { %v5022_v21 = vmul.f32 %v5018_v4, %v5014_v11  ;;  %5125 = vmatpush.msra.mxu3 %v5099_v29  ;;  %5146 = vmatpush.msra.mxu1 %v5082_v9  ;;  %v5277_v18 = vld [vmem:[#allocation2 + $0xfa0] sm:$0xff]  ;;  %v5318_v57 = vld [vmem:[#allocation2 + $0x1028] sm:$0xff]  ;;  %v5398_v1 = vld [vmem:[#allocation2 + $0x1138] sm:$0xff] }
0x18ec   :  { %v4999_v22 = vsub.f32 1.0, %v4995_v24  ;;  %5184 = vmatpush.msrb.mxu2 %v5157_v19  ;;  %5258 = vmatpush.msrb.mxu0 %v5237_v41  ;;  %v5399_v11 = vld [vmem:[#allocation2 + $0x1140] sm:$0xff]  ;;  %v5276_v24 = vld [vmem:[#allocation2 + $0xf98] sm:$0xff]  ;;  %v5275_v59 = vld [vmem:[#allocation2 + $0xf90] sm:$0xff] }
0x18ed   :  { %5064 = vmatmul.f32.gmra.mxu2 %v5022_v21  ;;  %5126 = vmatpush.msra.mxu3 %v5098_v35  ;;  %v5201_v4 = vld [vmem:[#allocation2 + $0xea0] sm:$0xff]  ;;  %v5200_v16 = vld [vmem:[#allocation2 + $0xe98] sm:$0xff]  ;;  %v5199_v29 = vld [vmem:[#allocation2 + $0xe90] sm:$0xff] }
0x18ee   :  { %v5007_v3 = vsub.f32 0.0, %v4999_v22  ;;  %5147 = vmatpush.msra.mxu1 %v5081_v7  ;;  %5185 = vmatpush.msrb.mxu2 %v5156_v12  ;;  %v5317_v52 = vld [vmem:[#allocation2 + $0x1020] sm:$0xff]  ;;  %v5316_v21 = vld [vmem:[#allocation2 + $0x1018] sm:$0xff]  ;;  %v5274_v9 = vld [vmem:[#allocation2 + $0xf88] sm:$0xff] }
0x18ef   :  { %5127 = vmatpush.msra.mxu3 %v5097_v34  ;;  %5259 = vmatpush.msrb.mxu0 %v5236_v46  ;;  %v5315_v15 = vld [vmem:[#allocation2 + $0x1010] sm:$0xff]  ;;  %v5198_v35 = vld [vmem:[#allocation2 + $0xe88] sm:$0xff]  ;;  %v5273_v63 = vld [vmem:[#allocation2 + $0xf80] sm:$0xff] }
0x18f0   :  { %v5011_v51 = vsel %vm5003_vm12, %v5007_v3, %v4999_v22  ;;  %5148 = vmatpush.msra.mxu1 %v5080_v61  ;;  %5186 = vmatpush.msrb.mxu2 %v5155_v10  ;;  %v5397_v22 = vld [vmem:[#allocation2 + $0x1130] sm:$0xff]  ;;  %v5396_v3 = vld [vmem:[#allocation2 + $0x1128] sm:$0xff]  ;;  %v5395_v19 = vld [vmem:[#allocation2 + $0x1120] sm:$0xff] }
0x18f1   :  { %v5019_v40 = vadd.f32 1.0, %v5011_v51  ;;  %5128 = vmatpush.msra.mxu3 %v5096_v31  ;;  %5260 = vmatpush.msrb.mxu0 %v5235_v53  ;;  %v5314_v7 = vld [vmem:[#allocation2 + $0x1008] sm:$0xff]  ;;  %v5197_v51 = vld [vmem:[#allocation2 + $0xe80] sm:$0xff]  ;;  %v5272_v34 = vld [vmem:[#allocation2 + $0xf78] sm:$0xff] }
0x18f2   :  { %5149 = vmatpush.msra.mxu1 %v5079_v55  ;;  %5187 = vmatpush.msrb.mxu2 %v5154_v6  ;;  %v5313_v41 = vld [vmem:[#allocation2 + $0x1000] sm:$0xff]  ;;  %v5271_v61 = vld [vmem:[#allocation2 + $0xf70] sm:$0xff]  ;;  %v5312_v12 = vld [vmem:[#allocation2 + $0xff8] sm:$0xff] }
0x18f3   :  { %v5023_v43 = vmul.f32 %v5019_v40, %v5015_v0  ;;  %5129 = vmatpush.msra.mxu3 %v5095_v13  ;;  %5261 = vmatpush.msrb.mxu0 %v5234_v8  ;;  %v5394_v0 = vld [vmem:[#allocation2 + $0x1118] sm:$0xff]  ;;  %v5393_v31 = vld [vmem:[#allocation2 + $0x1110] sm:$0xff]  ;;  %v5392_v10 = vld [vmem:[#allocation2 + $0x1108] sm:$0xff] }
0x18f4   :  { %5288 = vmatpush.msrb.mxu1 %v5284_v39  ;;  %5327 = vmatpush.msra.mxu2 %v5324_v25  ;;  %v5196_v40 = vld [vmem:[#allocation2 + $0xe78] sm:$0xff]  ;;  %v5195_v46 = vld [vmem:[#allocation2 + $0xe70] sm:$0xff]  ;;  %v5194_v39 = vld [vmem:[#allocation2 + $0xe68] sm:$0xff] }
0x18f5   :  { %5067 = vmatmul.f32.gmra.mxu2 %v5023_v43  ;;  %5211 = vmatpush.msrb.mxu3 %v5208_v50  ;;  %v5270_v43 = vld [vmem:[#allocation2 + $0xf68] sm:$0xff]  ;;  %v5311_v55 = vld [vmem:[#allocation2 + $0xff0] sm:$0xff]  ;;  %v5269_v13 = vld [vmem:[#allocation2 + $0xf60] sm:$0xff] }
0x18f6   :  { %5289 = vmatpush.msrb.mxu1 %v5283_v60  ;;  %5328 = vmatpush.msra.mxu2 %v5323_v32  ;;  %v5310_v6 = vld [vmem:[#allocation2 + $0xfe8] sm:$0xff]  ;;  %v5391_v53 = vld [vmem:[#allocation2 + $0x1100] sm:$0xff]  ;;  %v5390_v25 = vld [vmem:[#allocation2 + $0x10f8] sm:$0xff] }
0x18f7   :  { %5212 = vmatpush.msrb.mxu3 %v5207_v27  ;;  %5262 = vmatpush.msrb.mxu0 %v5233_v48  ;;  %v5193_v50 = vld [vmem:[#allocation2 + $0xe60] sm:$0xff]  ;;  %v5389_v8 = vld [vmem:[#allocation2 + $0x10f0] sm:$0xff]  ;;  %v5388_v27 = vld [vmem:[#allocation2 + $0x10e8] sm:$0xff] }
0x18f8   :  { %5290 = vmatpush.msrb.mxu1 %v5282_v5  ;;  %5329 = vmatpush.msra.mxu2 %v5322_v42  ;;  %v5309_v60 = vld [vmem:[#allocation2 + $0xfe0] sm:$0xff]  ;;  %v5439_v42 = vld [vmem:[#allocation2 + $0x11d8] sm:$0xff] }
0x18f9   :  { %5213 = vmatpush.msrb.mxu3 %v5206_v2  ;;  %5263 = vmatpush.msrb.mxu0 %v5232_v62  ;;  %v5387_v5 = vld [vmem:[#allocation2 + $0x10e0] sm:$0xff] }
0x18fa   :  { %5291 = vmatpush.msrb.mxu1 %v5281_v28  ;;  %5330 = vmatpush.msra.mxu2 %v5321_v33  ;;  %v7955_v32 = vld [vmem:[#allocation5 + $0x23] ss:$0 sm:$0xff]  ;;  %v5438_v33 = vld [vmem:[#allocation2 + $0x11d0] sm:$0xff] }
0x18fb   :  { %5214 = vmatpush.msrb.mxu3 %v5205_v17  ;;  %5403 = vmatpush.msra.mxu0 %v5402_v14  ;;  %v5479_v14 = vld [vmem:[#allocation2 + $0x1258] sm:$0xff] }
0x18fc   :  { %5292 = vmatpush.msrb.mxu1 %v5280_v30  ;;  %5331 = vmatpush.msra.mxu2 %v5320_v54  ;;  %v5363_v30 = vld [vmem:[#allocation2 + $0x10d8] sm:$0xff]  ;;  %v5361_v54 = vld [vmem:[#allocation2 + $0x10c8] sm:$0xff] }
0x18fd   :  { %5215 = vmatpush.msrb.mxu3 %v5204_v38  ;;  %5404 = vmatpush.msra.mxu0 %v5401_v36  ;;  %v5362_v38 = vld [vmem:[#allocation2 + $0x10d0] sm:$0xff]  ;;  %v5436_v36 = vld [vmem:[#allocation2 + $0x11c0] sm:$0xff] }
0x18fe   :  { %5293 = vmatpush.msrb.mxu1 %v5279_v58  ;;  %5332 = vmatpush.msra.mxu2 %v5319_v56  ;;  %v5437_v58 = vld [vmem:[#allocation2 + $0x11c8] sm:$0xff]  ;;  %v5435_v56 = vld [vmem:[#allocation2 + $0x11b8] sm:$0xff] }
0x18ff   :  { %5216 = vmatpush.msrb.mxu3 %v5203_v26  ;;  %5405 = vmatpush.msra.mxu0 %v5400_v23  ;;  %v5477_v26 = vld [vmem:[#allocation2 + $0x1248] sm:$0xff]  ;;  %v5476_v23 = vld [vmem:[#allocation2 + $0x1240] sm:$0xff] }
0x1900   :  { %5294 = vmatpush.msrb.mxu1 %v5278_v49  ;;  %5333 = vmatpush.msra.mxu2 %v5318_v57  ;;  %v5360_v49 = vld [vmem:[#allocation2 + $0x10c0] sm:$0xff]  ;;  %v5434_v57 = vld [vmem:[#allocation2 + $0x11b0] sm:$0xff] }
0x1901   :  { %5217 = vmatpush.msrb.mxu3 %v5202_v45  ;;  %5406 = vmatpush.msra.mxu0 %v5399_v11  ;;  %v5475_v11 = vld [vmem:[#allocation2 + $0x1238] sm:$0xff] }
0x1902   :  { %5295 = vmatpush.msrb.mxu1 %v5277_v18  ;;  %5334 = vmatpush.msra.mxu2 %v5317_v52  ;;  %v5359_v18 = vld [vmem:[#allocation2 + $0x10b8] sm:$0xff]  ;;  %v5474_v52 = vld [vmem:[#allocation2 + $0x1230] sm:$0xff] }
0x1903   :  { %5218 = vmatpush.msrb.mxu3 %v5201_v4  ;;  %5407 = vmatpush.msra.mxu0 %v5398_v1  ;;  %v5358_v4 = vld [vmem:[#allocation2 + $0x10b0] sm:$0xff] }
0x1904   :  { %5296 = vmatpush.msrb.mxu1 %v5276_v24  ;;  %5335 = vmatpush.msra.mxu2 %v5316_v21  ;;  %v5433_v24 = vld [vmem:[#allocation2 + $0x11a8] sm:$0xff] }
0x1905   :  { %5219 = vmatpush.msrb.mxu3 %v5200_v16  ;;  %5408 = vmatpush.msra.mxu0 %v5397_v22  ;;  %v5357_v16 = vld [vmem:[#allocation2 + $0x10a8] sm:$0xff] }
0x1906   :  { %5297 = vmatpush.msrb.mxu1 %v5275_v59  ;;  %5336 = vmatpush.msra.mxu2 %v5315_v15  ;;  %v5432_v59 = vld [vmem:[#allocation2 + $0x11a0] sm:$0xff]  ;;  %v5473_v22 = vld [vmem:[#allocation2 + $0x1228] sm:$0xff]  ;;  %v5557_v15 = vld [vmem:[#allocation2 + $0x1358] sm:$0xff] }
0x1907   :  { %5220 = vmatpush.msrb.mxu3 %v5199_v29  ;;  %5409 = vmatpush.msra.mxu0 %v5396_v3  ;;  %v5356_v29 = vld [vmem:[#allocation2 + $0x10a0] sm:$0xff]  ;;  %v5431_v3 = vld [vmem:[#allocation2 + $0x1198] sm:$0xff] }
0x1908   :  { %5298 = vmatpush.msrb.mxu1 %v5274_v9  ;;  %5337 = vmatpush.msra.mxu2 %v5314_v7  ;;  %v5556_v7 = vld [vmem:[#allocation2 + $0x1350] sm:$0xff] }
0x1909   :  { %5221 = vmatpush.msrb.mxu3 %v5198_v35  ;;  %5410 = vmatpush.msra.mxu0 %v5395_v19  ;;  %v5355_v19 = vld [vmem:[#allocation2 + $0x1098] sm:$0xff] }
0x190a   :  { %5299 = vmatpush.msrb.mxu1 %v5273_v63  ;;  %5338 = vmatpush.msra.mxu2 %v5313_v41  ;;  %v5471_v41 = vld [vmem:[#allocation2 + $0x1218] sm:$0xff] }
0x190b   :  { %5222 = vmatpush.msrb.mxu3 %v5197_v51  ;;  %5411 = vmatpush.msra.mxu0 %v5394_v0  ;;  %v5430_v51 = vld [vmem:[#allocation2 + $0x1190] sm:$0xff] }
0x190c   :  { %5300 = vmatpush.msrb.mxu1 %v5272_v34  ;;  %5339 = vmatpush.msra.mxu2 %v5312_v12  ;;  %v5555_v34 = vld [vmem:[#allocation2 + $0x1348] sm:$0xff] }
0x190d   :  { %5223 = vmatpush.msrb.mxu3 %v5196_v40  ;;  %5412 = vmatpush.msra.mxu0 %v5393_v31  ;;  %v5354_v40 = vld [vmem:[#allocation2 + $0x1090] sm:$0xff]  ;;  %v5554_v31 = vld [vmem:[#allocation2 + $0x1340] sm:$0xff] }
0x190e   :  { %5301 = vmatpush.msrb.mxu1 %v5271_v61  ;;  %5340 = vmatpush.msra.mxu2 %v5311_v55  ;;  %v5429_v61 = vld [vmem:[#allocation2 + $0x1188] sm:$0xff] }
0x190f   :  { %5224 = vmatpush.msrb.mxu3 %v5195_v46  ;;  %5413 = vmatpush.msra.mxu0 %v5392_v10  ;;  %v5470_v46 = vld [vmem:[#allocation2 + $0x1210] sm:$0xff]  ;;  %v5553_v10 = vld [vmem:[#allocation2 + $0x1338] sm:$0xff] }
0x1910   :  { %5302 = vmatpush.msrb.mxu1 %v5270_v43  ;;  %5341 = vmatpush.msra.mxu2 %v5310_v6  ;;  %v5353_v43 = vld [vmem:[#allocation2 + $0x1088] sm:$0xff]  ;;  %v5352_v6 = vld [vmem:[#allocation2 + $0x1080] sm:$0xff] }
0x1911   :  { %5225 = vmatpush.msrb.mxu3 %v5194_v39  ;;  %5414 = vmatpush.msra.mxu0 %v5391_v53  ;;  %v5428_v39 = vld [vmem:[#allocation2 + $0x1180] sm:$0xff]  ;;  %v5552_v53 = vld [vmem:[#allocation2 + $0x1330] sm:$0xff] }
0x1912   :  { %5303 = vmatpush.msrb.mxu1 %v5269_v13  ;;  %5342 = vmatpush.msra.mxu2 %v5309_v60  ;;  %v5469_v13 = vld [vmem:[#allocation2 + $0x1208] sm:$0xff]  ;;  %v5351_v60 = vld [vmem:[#allocation2 + $0x1078] sm:$0xff] }
0x1913   :  { %5226 = vmatpush.msrb.mxu3 %v5193_v50  ;;  %5415 = vmatpush.msra.mxu0 %v5390_v25  ;;  %v5468_v50 = vld [vmem:[#allocation2 + $0x1200] sm:$0xff]  ;;  %v5551_v25 = vld [vmem:[#allocation2 + $0x1328] sm:$0xff] }
0x1915   :  { %5416 = vmatpush.msra.mxu0 %v5389_v8  ;;  %v5426_v8 = vld [vmem:[#allocation2 + $0x1170] sm:$0xff] }
0x1917   :  { %5417 = vmatpush.msra.mxu0 %v5388_v27 }
0x1919   :  { %5418 = vmatpush.msra.mxu0 %v5387_v5  ;;  %v5467_v5 = vld [vmem:[#allocation2 + $0x11f8] sm:$0xff] }
0x195f   :  { %v5059_v48 = vpop.f32.mrf.mxu2 }
0x1960   :  { %v5060_v2 = vadd.f32 %v7955_v32, %v5059_v48  ;;  %v5350_v48 = vld [vmem:[#allocation2 + $0x1070] sm:$0xff] }
0x1962   :  { %v5071_v28 = vadd.f32 %v5060_v2, %v7765_v44  ;;  %v5478_v44 = vld [vmem:[#allocation2 + $0x1250] sm:$0xff] }
0x1964   :  { %5075 = vst.msk [vmem:[%s8010_s3] sm:$0xff] %vm1789_vm9, %v5071_v28  ;;  %5150 = vmatmul.f32.vlgmr.msra.gmra.mxu1 %v5071_v28  ;;  %v5112_v62 = vrot.slane %v5071_v28, 2  ;;  %v5170_v17 = vrot.slane %v5071_v28, 4  ;;  %v5209_v45 = vrot.slane %v5071_v28, 6  ;;  %v5550_v28 = vld [vmem:[#allocation2 + $0x1320] sm:$0xff] }
0x1965   :  { %5443 = vmatpush.msra.mxu1 %v5439_v42  ;;  %v5425_v42 = vld [vmem:[#allocation2 + $0x1168] sm:$0xff] }
0x1966   :  { %5130 = vmatmul.f32.vlgmr.msra.gmra.mxu3 %v5112_v62  ;;  %5188 = vmatmul.f32.vlgmr.msrb.gmra.mxu2 %v5170_v17  ;;  %v5466_v62 = vld [vmem:[#allocation2 + $0x11f0] sm:$0xff]  ;;  %v5349_v17 = vld [vmem:[#allocation2 + $0x1068] sm:$0xff] }
0x1967   :  { %5366 = vmatpush.msra.mxu3 %v5363_v30  ;;  %5444 = vmatpush.msra.mxu1 %v5438_v33  ;;  %v5062_v1 = vpop.f32.mrf.mxu2  ;;  %v5549_v33 = vld [vmem:[#allocation2 + $0x1318] sm:$0xff] }
0x1968   :  { %5482 = vmatpush.msrb.mxu2 %v5479_v14  ;;  %v5063_v21 = vadd.f32 %v7955_v32, %v5062_v1  ;;  %v5424_v14 = vld [vmem:[#allocation2 + $0x1160] sm:$0xff]  ;;  %v5544_v1 = vld [vmem:[#allocation2 + $0x12f0] sm:$0xff] }
0x1969   :  { %5367 = vmatpush.msra.mxu3 %v5362_v38  ;;  %5445 = vmatpush.msra.mxu1 %v5437_v58  ;;  %v5465_v38 = vld [vmem:[#allocation2 + $0x11e8] sm:$0xff] }
0x196a   :  { %5483 = vmatpush.msrb.mxu2 %v5478_v44  ;;  %v7965_v9 = vadd.f32 %v5063_v21, %v7769_v47  ;;  %v5472_v47 = vld [vmem:[#allocation2 + $0x1220] sm:$0xff] }
0x196b   :  { %5368 = vmatpush.msra.mxu3 %v5361_v54  ;;  %5446 = vmatpush.msra.mxu1 %v5436_v36  ;;  %v5348_v44 = vld [vmem:[#allocation2 + $0x1060] sm:$0xff]  ;;  %v5547_v36 = vld [vmem:[#allocation2 + $0x1308] sm:$0xff] }
0x196c   :  { %5484 = vmatpush.msrb.mxu2 %v5477_v26  ;;  %5076 = vst.msk [vmem:[%s8010_s3 + $0x8] sm:$0xff] %vm1789_vm9, %v7965_v9  ;;  %5264 = vmatmul.f32.vlgmr.msrb.gmra.mxu0 %v7965_v9  ;;  %v5286_v35 = vrot.slane %v7965_v9, 2  ;;  %v5325_v63 = vrot.slane %v7965_v9, 4  ;;  %v5464_v54 = vld [vmem:[#allocation2 + $0x11e0] sm:$0xff]  ;;  %v5364_v26 = vrot.slane %v7965_v9, 6 }
0x196d   :  { %5369 = vmatpush.msra.mxu3 %v5360_v49  ;;  %5447 = vmatpush.msra.mxu1 %v5435_v56  ;;  %v5518_v49 = vld [vmem:[#allocation2 + $0x12d8] sm:$0xff]  ;;  %v5546_v56 = vld [vmem:[#allocation2 + $0x1300] sm:$0xff] }
0x196e   :  { %5485 = vmatpush.msrb.mxu2 %v5476_v23  ;;  %5227 = vmatmul.f32.vlgmr.msrb.gmra.mxu3 %v5209_v45  ;;  %v5593_v45 = vld [vmem:[#allocation2 + $0x13d0] sm:$0xff]  ;;  %v5515_v21 = vld [vmem:[#allocation2 + $0x12c0] sm:$0xff] }
0x196f   :  { %5370 = vmatpush.msra.mxu3 %v5359_v18  ;;  %5448 = vmatpush.msra.mxu1 %v5434_v57  ;;  %v5634_v18 = vld [vmem:[#allocation2 + $0x1458] sm:$0xff]  ;;  %v5517_v57 = vld [vmem:[#allocation2 + $0x12d0] sm:$0xff]  ;;  %v5631_v9 = vld [vmem:[#allocation2 + $0x1440] sm:$0xff] }
0x1970   :  { %5486 = vmatpush.msrb.mxu2 %v5475_v11  ;;  %5558 = vmatpush.msrb.mxu0 %v5557_v15  ;;  %v5065_v0 = vpop.f32.mrf.mxu2  ;;  %v5545_v11 = vld [vmem:[#allocation2 + $0x12f8] sm:$0xff] }
0x1971   :  { %5371 = vmatpush.msra.mxu3 %v5358_v4  ;;  %5449 = vmatpush.msra.mxu1 %v5433_v24  ;;  %v5066_v12 = vadd.f32 %v7955_v32, %v5065_v0  ;;  %v5592_v4 = vld [vmem:[#allocation2 + $0x13c8] sm:$0xff]  ;;  %v5633_v24 = vld [vmem:[#allocation2 + $0x1450] sm:$0xff]  ;;  %v5514_v15 = vld [vmem:[#allocation2 + $0x12b8] sm:$0xff] }
0x1972   :  { %5487 = vmatpush.msrb.mxu2 %v5474_v52  ;;  %5304 = vmatmul.f32.vlgmr.msrb.gmra.mxu1 %v5286_v35  ;;  %v5516_v52 = vld [vmem:[#allocation2 + $0x12c8] sm:$0xff]  ;;  %v5589_v35 = vld [vmem:[#allocation2 + $0x13b0] sm:$0xff]  ;;  %v5511_v0 = vld [vmem:[#allocation2 + $0x12a0] sm:$0xff] }
0x1973   :  { %5372 = vmatpush.msra.mxu3 %v5357_v16  ;;  %5450 = vmatpush.msra.mxu1 %v5432_v59  ;;  %v7977_v55 = vadd.f32 %v5066_v12, %v7773_v37  ;;  %v5427_v37 = vld [vmem:[#allocation2 + $0x1178] sm:$0xff]  ;;  %v5591_v16 = vld [vmem:[#allocation2 + $0x13c0] sm:$0xff]  ;;  %v5632_v59 = vld [vmem:[#allocation2 + $0x1448] sm:$0xff] }
0x1974   :  { %5488 = vmatpush.msrb.mxu2 %v5473_v22  ;;  %5559 = vmatpush.msrb.mxu0 %v5556_v7  ;;  %v5543_v22 = vld [vmem:[#allocation2 + $0x12e8] sm:$0xff]  ;;  %v5513_v7 = vld [vmem:[#allocation2 + $0x12b0] sm:$0xff]  ;;  %v5510_v12 = vld [vmem:[#allocation2 + $0x1298] sm:$0xff] }
0x1975   :  { %5373 = vmatpush.msra.mxu3 %v5356_v29  ;;  %5451 = vmatpush.msra.mxu1 %v5431_v3  ;;  %5077 = vst.msk [vmem:[%s8010_s3 + $0x10] sm:$0xff] %vm1789_vm9, %v7977_v55  ;;  %v5441_v58 = vrot.slane %v7977_v55, 2  ;;  %v5480_v23 = vrot.slane %v7977_v55, 4  ;;  %v5590_v29 = vld [vmem:[#allocation2 + $0x13b8] sm:$0xff]  ;;  %v5542_v3 = vld [vmem:[#allocation2 + $0x12e0] sm:$0xff] }
0x1976   :  { %5343 = vmatmul.f32.vlgmr.msra.gmra.mxu2 %v5325_v63  ;;  %5560 = vmatpush.msrb.mxu0 %v5555_v34  ;;  %v5630_v63 = vld [vmem:[#allocation2 + $0x1438] sm:$0xff]  ;;  %v5587_v34 = vld [vmem:[#allocation2 + $0x13a0] sm:$0xff] }
0x1977   :  { %5489 = vmatpush.msrb.mxu2 %v5472_v47  ;;  %5374 = vmatpush.msra.mxu3 %v5355_v19  ;;  %v5588_v47 = vld [vmem:[#allocation2 + $0x13a8] sm:$0xff]  ;;  %v5629_v19 = vld [vmem:[#allocation2 + $0x1430] sm:$0xff] }
0x1978   :  { %5452 = vmatpush.msra.mxu1 %v5430_v51  ;;  %5561 = vmatpush.msrb.mxu0 %v5554_v31  ;;  %v5068_v27 = vpop.f32.mrf.mxu2  ;;  %v5512_v51 = vld [vmem:[#allocation2 + $0x12a8] sm:$0xff]  ;;  %v5585_v31 = vld [vmem:[#allocation2 + $0x1390] sm:$0xff] }
0x1979   :  { %5490 = vmatpush.msrb.mxu2 %v5471_v41  ;;  %5375 = vmatpush.msra.mxu3 %v5354_v40  ;;  %v5069_v2 = vadd.f32 %v7955_v32, %v5068_v27  ;;  %v5548_v32 = vld [vmem:[#allocation2 + $0x1310] sm:$0xff]  ;;  %v5628_v41 = vld [vmem:[#allocation2 + $0x1428] sm:$0xff]  ;;  %v5586_v40 = vld [vmem:[#allocation2 + $0x1398] sm:$0xff] }
0x197a   :  { %5453 = vmatpush.msra.mxu1 %v5429_v61  ;;  %5419 = vmatmul.f32.vlgmr.msra.gmra.mxu0 %v7977_v55  ;;  %v5627_v61 = vld [vmem:[#allocation2 + $0x1420] sm:$0xff]  ;;  %v5622_v27 = vld [vmem:[#allocation2 + $0x13f8] sm:$0xff] }
0x197b   :  { %5491 = vmatpush.msrb.mxu2 %v5470_v46  ;;  %5376 = vmatpush.msra.mxu3 %v5353_v43  ;;  %v7987_v30 = vadd.f32 %v5069_v2, %v7777_v20  ;;  %v5594_v20 = vld [vmem:[#allocation2 + $0x13d8] sm:$0xff]  ;;  %v5509_v43 = vld [vmem:[#allocation2 + $0x1290] sm:$0xff] }
0x197c   :  { %5562 = vmatpush.msrb.mxu0 %v5553_v10  ;;  %5454 = vmatpush.msra.mxu1 %v5428_v39  ;;  %v5626_v46 = vld [vmem:[#allocation2 + $0x1418] sm:$0xff]  ;;  %v5584_v10 = vld [vmem:[#allocation2 + $0x1388] sm:$0xff]  ;;  %v5625_v39 = vld [vmem:[#allocation2 + $0x1410] sm:$0xff] }
0x197d   :  { %5492 = vmatpush.msrb.mxu2 %v5469_v13  ;;  %5377 = vmatpush.msra.mxu3 %v5352_v6  ;;  %5078 = vst.msk [vmem:[%s8010_s3 + $0x18] sm:$0xff] %vm1789_vm9, %v7987_v30  ;;  %v5508_v13 = vld [vmem:[#allocation2 + $0x1288] sm:$0xff]  ;;  %v5583_v6 = vld [vmem:[#allocation2 + $0x1380] sm:$0xff]  ;;  %v5621_v2 = vld [vmem:[#allocation2 + $0x13f0] sm:$0xff]  ;;  %vm5702_vm9 = vcmask 1041408   ;;  %s6341_s3 = smov [#allocation7]  }
0x197e   :  { %5563 = vmatpush.msrb.mxu0 %v5552_v53  ;;  %5455 = vmatpush.msra.mxu1 %v5427_v37  ;;  %v5624_v53 = vld [vmem:[#allocation2 + $0x1408] sm:$0xff]  ;;  %v5507_v37 = vld [vmem:[#allocation2 + $0x1280] sm:$0xff]  ;;  %s5831_s14 = sshll.u32 %s6341_s3, 4  ;;  %s5832_s14 = int_to_ptr.vmem [resolvable:$true] %s5831_s14 }
0x197f   :  { %5493 = vmatpush.msrb.mxu2 %v5468_v50  ;;  %5378 = vmatpush.msra.mxu3 %v5351_v60  ;;  %v5582_v50 = vld [vmem:[#allocation2 + $0x1378] sm:$0xff]  ;;  %v5623_v60 = vld [vmem:[#allocation2 + $0x1400] sm:$0xff] }
0x1980   :  { %5564 = vmatpush.msrb.mxu0 %v5551_v25  ;;  %5456 = vmatpush.msra.mxu1 %v5426_v8  ;;  %v5506_v25 = vld [vmem:[#allocation2 + $0x1278] sm:$0xff]  ;;  %v5581_v8 = vld [vmem:[#allocation2 + $0x1370] sm:$0xff] }
0x1981   :  { %5494 = vmatpush.msrb.mxu2 %v5467_v5  ;;  %5379 = vmatpush.msra.mxu3 %v5350_v48  ;;  %v5505_v5 = vld [vmem:[#allocation2 + $0x1270] sm:$0xff]  ;;  %v5580_v48 = vld [vmem:[#allocation2 + $0x1368] sm:$0xff] }
0x1982   :  { %5565 = vmatpush.msrb.mxu0 %v5550_v28  ;;  %5457 = vmatpush.msra.mxu1 %v5425_v42  ;;  %v5504_v28 = vld [vmem:[#allocation2 + $0x1268] sm:$0xff]  ;;  %v5579_v42 = vld [vmem:[#allocation2 + $0x1360] sm:$0xff] }
0x1983   :  { %5495 = vmatpush.msrb.mxu2 %v5466_v62  ;;  %5380 = vmatpush.msra.mxu3 %v5349_v17  ;;  %v5620_v62 = vld [vmem:[#allocation2 + $0x13e8] sm:$0xff]  ;;  %v5596_v17 = vrot.slane %v7987_v30, 2 }
0x1984   :  { %5566 = vmatpush.msrb.mxu0 %v5549_v33  ;;  %5458 = vmatpush.msra.mxu1 %v5424_v14  ;;  %v5503_v33 = vld [vmem:[#allocation2 + $0x1260] sm:$0xff] }
0x1985   :  { %5496 = vmatpush.msrb.mxu2 %v5465_v38  ;;  %5459 = vmatmul.f32.vlgmr.msra.gmra.mxu1 %v5441_v58  ;;  %v5619_v14 = vld [vmem:[#allocation2 + $0x13e0] sm:$0xff]  ;;  %v5519_v38 = vrot.slane %v7977_v55, 6  ;;  %v5635_v58 = vrot.slane %v7987_v30, 4 }
0x1986   :  { %5567 = vmatpush.msrb.mxu0 %v5548_v32  ;;  %5598 = vmatpush.msrb.mxu1 %v5594_v20  ;;  %v5673_v32 = vld [vmem:[#allocation2 + $0x14d8] sm:$0xff]  ;;  %v5672_v20 = vld [vmem:[#allocation2 + $0x14d0] sm:$0xff]  ;;  %v5666_v55 = vld [vmem:[#allocation2 + $0x14a0] sm:$0xff] }
0x1987   :  { %5381 = vmatpush.msra.mxu3 %v5348_v44  ;;  %5497 = vmatpush.msrb.mxu2 %v5464_v54  ;;  %v5671_v44 = vld [vmem:[#allocation2 + $0x14c8] sm:$0xff]  ;;  %v5670_v54 = vld [vmem:[#allocation2 + $0x14c0] sm:$0xff] }
0x1988   :  { %5568 = vmatpush.msrb.mxu0 %v5547_v36  ;;  %5382 = vmatmul.f32.vlgmr.msra.gmra.mxu3 %v5364_v26  ;;  %v5669_v36 = vld [vmem:[#allocation2 + $0x14b8] sm:$0xff]  ;;  %v5668_v26 = vld [vmem:[#allocation2 + $0x14b0] sm:$0xff] }
0x1989   :  { %5498 = vmatmul.f32.vlgmr.msrb.gmra.mxu2 %v5480_v23  ;;  %5521 = vmatpush.msrb.mxu3 %v5518_v49  ;;  %v5667_v49 = vld [vmem:[#allocation2 + $0x14a8] sm:$0xff]  ;;  %v5664_v23 = vld [vmem:[#allocation2 + $0x1490] sm:$0xff] }
0x198a   :  { %5569 = vmatpush.msrb.mxu0 %v5546_v56  ;;  %5599 = vmatpush.msrb.mxu1 %v5593_v45  ;;  %v5665_v56 = vld [vmem:[#allocation2 + $0x1498] sm:$0xff]  ;;  %v5663_v45 = vld [vmem:[#allocation2 + $0x1488] sm:$0xff] }
0x198b   :  { %5637 = vmatpush.msra.mxu2 %v5634_v18  ;;  %5522 = vmatpush.msrb.mxu3 %v5517_v57  ;;  %v5662_v18 = vld [vmem:[#allocation2 + $0x1480] sm:$0xff]  ;;  %v5661_v57 = vld [vmem:[#allocation2 + $0x1478] sm:$0xff] }
0x198c   :  { %5570 = vmatpush.msrb.mxu0 %v5545_v11  ;;  %5600 = vmatpush.msrb.mxu1 %v5592_v4  ;;  %v5660_v11 = vld [vmem:[#allocation2 + $0x1470] sm:$0xff]  ;;  %v5659_v4 = vld [vmem:[#allocation2 + $0x1468] sm:$0xff] }
0x198d   :  { %5638 = vmatpush.msra.mxu2 %v5633_v24  ;;  %5523 = vmatpush.msrb.mxu3 %v5516_v52  ;;  %v5658_v24 = vld [vmem:[#allocation2 + $0x1460] sm:$0xff]  ;;  %v5674_v52 = vrot.slane %v7987_v30, 6 }
0x198e   :  { %5571 = vmatpush.msrb.mxu0 %v5544_v1  ;;  %5601 = vmatpush.msrb.mxu1 %v5591_v16 }
0x198f   :  { %5639 = vmatpush.msra.mxu2 %v5632_v59  ;;  %5524 = vmatpush.msrb.mxu3 %v5515_v21 }
0x1990   :  { %5572 = vmatpush.msrb.mxu0 %v5543_v22  ;;  %5602 = vmatpush.msrb.mxu1 %v5590_v29 }
0x1991   :  { %5640 = vmatpush.msra.mxu2 %v5631_v9  ;;  %5525 = vmatpush.msrb.mxu3 %v5514_v15 }
0x1992   :  { %5573 = vmatpush.msrb.mxu0 %v5542_v3  ;;  %5603 = vmatpush.msrb.mxu1 %v5589_v35 }
0x1993   :  { %5574 = vmatmul.f32.vlgmr.msrb.gmra.mxu0 %v7987_v30  ;;  %5641 = vmatpush.msra.mxu2 %v5630_v63 }
0x1994   :  { %5526 = vmatpush.msrb.mxu3 %v5513_v7  ;;  %5604 = vmatpush.msrb.mxu1 %v5588_v47 }
0x1995   :  { %5642 = vmatpush.msra.mxu2 %v5629_v19 }
0x1996   :  { %5527 = vmatpush.msrb.mxu3 %v5512_v51  ;;  %5605 = vmatpush.msrb.mxu1 %v5587_v34 }
0x1997   :  { %5643 = vmatpush.msra.mxu2 %v5628_v41 }
0x1998   :  { %5528 = vmatpush.msrb.mxu3 %v5511_v0  ;;  %5606 = vmatpush.msrb.mxu1 %v5586_v40 }
0x1999   :  { %5644 = vmatpush.msra.mxu2 %v5627_v61 }
0x199a   :  { %5529 = vmatpush.msrb.mxu3 %v5510_v12  ;;  %5607 = vmatpush.msrb.mxu1 %v5585_v31 }
0x199b   :  { %5645 = vmatpush.msra.mxu2 %v5626_v46 }
0x199c   :  { %5530 = vmatpush.msrb.mxu3 %v5509_v43  ;;  %5608 = vmatpush.msrb.mxu1 %v5584_v10  ;;  %v6340_v43 = vmov 2.0  }
0x199d   :  { %5646 = vmatpush.msra.mxu2 %v5625_v39  ;;  %6248 = vrcp.f32 %v6340_v43  ;;  %v5786_v43 = vld [vmem:[#allocation2 + $0x14f0] sm:$0xff] }
0x199e   :  { %5531 = vmatpush.msrb.mxu3 %v5508_v13  ;;  %5609 = vmatpush.msrb.mxu1 %v5583_v6 }
0x199f   :  { %5647 = vmatpush.msra.mxu2 %v5624_v53 }
0x19a0   :  { %5532 = vmatpush.msrb.mxu3 %v5507_v37  ;;  %5610 = vmatpush.msrb.mxu1 %v5582_v50  ;;  %v5958_v50 = vld [vmem:[#allocation5 + $0x24] ss:$0 sm:$0xff] }
0x19a1   :  { %5648 = vmatpush.msra.mxu2 %v5623_v60 }
0x19a2   :  { %5533 = vmatpush.msrb.mxu3 %v5506_v25  ;;  %5611 = vmatpush.msrb.mxu1 %v5581_v8 }
0x19a3   :  { %5649 = vmatpush.msra.mxu2 %v5622_v27  ;;  %v6249_v6 = vpop.eup %6248 }
0x19a4   :  { %5534 = vmatpush.msrb.mxu3 %v5505_v5  ;;  %5612 = vmatpush.msrb.mxu1 %v5580_v48  ;;  %v5711_v60 = vmul.f32 2.0, %v6249_v6  ;;  %vm5715_vm15 = vweird.f32 %v6249_v6 }
0x19a5   :  { %5650 = vmatpush.msra.mxu2 %v5621_v2 }
0x19a6   :  { %5535 = vmatpush.msrb.mxu3 %v5504_v28  ;;  %5613 = vmatpush.msrb.mxu1 %v5579_v42  ;;  %v5712_v5 = vsub.f32 1.0, %v5711_v60 }
0x19a7   :  { %5651 = vmatpush.msra.mxu2 %v5620_v62  ;;  %5614 = vmatmul.f32.vlgmr.msrb.gmra.mxu1 %v5596_v17 }
0x19a8   :  { %5536 = vmatpush.msrb.mxu3 %v5503_v33  ;;  %v5713_v28 = vmul.f32 %v6249_v6, %v5712_v5 }
0x19a9   :  { %5652 = vmatpush.msra.mxu2 %v5619_v14  ;;  %5537 = vmatmul.f32.vlgmr.msrb.gmra.mxu3 %v5519_v38 }
0x19aa   :  { %5653 = vmatmul.f32.vlgmr.msra.gmra.mxu2 %v5635_v58  ;;  %5676 = vmatpush.msra.mxu3 %v5673_v32  ;;  %v5714_v17 = vadd.f32 %v6249_v6, %v5713_v28 }
0x19ac   :  { %5677 = vmatpush.msra.mxu3 %v5672_v20  ;;  %v5716_v38 = vsel %vm5715_vm15, %v6249_v6, %v5714_v17 }
0x19ae   :  { %5678 = vmatpush.msra.mxu3 %v5671_v44 }
0x19b0   :  { %5679 = vmatpush.msra.mxu3 %v5670_v54 }
0x19b2   :  { %5680 = vmatpush.msra.mxu3 %v5669_v36 }
0x19b4   :  { %5681 = vmatpush.msra.mxu3 %v5668_v26 }
0x19b6   :  { %5682 = vmatpush.msra.mxu3 %v5667_v49 }
0x19b8   :  { %5683 = vmatpush.msra.mxu3 %v5666_v55 }
0x19ba   :  { %5684 = vmatpush.msra.mxu3 %v5665_v56 }
0x19bc   :  { %5685 = vmatpush.msra.mxu3 %v5664_v23 }
0x19be   :  { %5686 = vmatpush.msra.mxu3 %v5663_v45 }
0x19c0   :  { %5687 = vmatpush.msra.mxu3 %v5662_v18 }
0x19c2   :  { %5688 = vmatpush.msra.mxu3 %v5661_v57 }
0x19c4   :  { %5689 = vmatpush.msra.mxu3 %v5660_v11 }
0x19c6   :  { %5690 = vmatpush.msra.mxu3 %v5659_v4 }
0x19c8   :  { %5691 = vmatpush.msra.mxu3 %v5658_v24 }
0x19c9   :  { %5692 = vmatmul.f32.vlgmr.msra.gmra.mxu3 %v5674_v52 }
0x19e1   :  { %v5151_v16 = vpop.f32.mrf.mxu1 }
0x19e9   :  { %v5131_v1 = vpop.f32.mrf.mxu3  ;;  %v5189_v21 = vpop.f32.mrf.mxu2 }
0x19ea   :  { %v5152_v59 = vadd.f32 %v5151_v16, %v5131_v1  ;;  %v5265_v15 = vpop.f32.mrf.mxu0  ;;  %v5799_v1 = vld [vmem:[#allocation2 + $0x1558] sm:$0xff]  ;;  %v5798_v16 = vld [vmem:[#allocation2 + $0x1550] sm:$0xff] }
0x19eb   :  { %5802 = vmatpush.msra.mxu0 %v5799_v1 }
0x19ec   :  { %v5192_v29 = vadd.f32 %v5189_v21, %v5152_v59  ;;  %v5797_v21 = vld [vmem:[#allocation2 + $0x1548] sm:$0xff] }
0x19ed   :  { %5803 = vmatpush.msra.mxu0 %v5798_v16 }
0x19ef   :  { %v5305_v35 = vpop.f32.mrf.mxu1  ;;  %5804 = vmatpush.msra.mxu0 %v5797_v21 }
0x19f1   :  { %v5228_v22 = vpop.f32.mrf.mxu3 }
0x19f2   :  { %v5231_v9 = vadd.f32 %v5228_v22, %v5192_v29  ;;  %v5959_v22 = vld [vmem:[#allocation5 + $0x25] ss:$0 sm:$0xff] }
0x19f4   :  { %v5268_v3 = vadd.f32 %v5265_v15, %v5231_v9  ;;  %v5796_v9 = vld [vmem:[#allocation2 + $0x1540] sm:$0xff] }
0x19f5   :  { %5805 = vmatpush.msra.mxu0 %v5796_v9 }
0x19f6   :  { %v5308_v63 = vadd.f32 %v5305_v35, %v5268_v3  ;;  %v5960_v3 = vld [vmem:[#allocation5 + $0x26] ss:$0 sm:$0xff]  ;;  %v5795_v35 = vld [vmem:[#allocation2 + $0x1538] sm:$0xff] }
0x19f7   :  { %v5420_v34 = vpop.f32.mrf.mxu0  ;;  %5806 = vmatpush.msra.mxu0 %v5795_v35 }
0x19f9   :  { %v5344_v7 = vpop.f32.mrf.mxu2 }
0x19fa   :  { %v5347_v19 = vadd.f32 %v5344_v7, %v5308_v63  ;;  %v5794_v7 = vld [vmem:[#allocation2 + $0x1530] sm:$0xff] }
0x19fb   :  { %5807 = vmatpush.msra.mxu0 %v5794_v7 }
0x1a02   :  { %v5460_v30 = vpop.f32.mrf.mxu1 }
0x1a0b   :  { %v5383_v47 = vpop.f32.mrf.mxu3 }
0x1a0c   :  { %v5386_v51 = vadd.f32 %v5383_v47, %v5347_v19  ;;  %v5499_v40 = vpop.f32.mrf.mxu2  ;;  %v5793_v19 = vld [vmem:[#allocation2 + $0x1528] sm:$0xff] }
0x1a0d   :  { %5808 = vmatpush.msra.mxu0 %v5793_v19 }
0x1a0e   :  { %v5423_v41 = vadd.f32 %v5420_v34, %v5386_v51  ;;  %v5792_v34 = vld [vmem:[#allocation2 + $0x1520] sm:$0xff] }
0x1a0f   :  { %5809 = vmatpush.msra.mxu0 %v5792_v34 }
0x1a10   :  { %v5463_v0 = vadd.f32 %v5460_v30, %v5423_v41  ;;  %v5575_v46 = vpop.f32.mrf.mxu0  ;;  %v5791_v30 = vld [vmem:[#allocation2 + $0x1518] sm:$0xff] }
0x1a11   :  { %5810 = vmatpush.msra.mxu0 %v5791_v30 }
0x1a12   :  { %v5502_v12 = vadd.f32 %v5499_v40, %v5463_v0  ;;  %v5790_v40 = vld [vmem:[#allocation2 + $0x1510] sm:$0xff] }
0x1a13   :  { %5811 = vmatpush.msra.mxu0 %v5790_v40 }
0x1a24   :  { %v5615_v39 = vpop.f32.mrf.mxu1 }
0x1a2c   :  { %v5538_v61 = vpop.f32.mrf.mxu3 }
0x1a2d   :  { %v5541_v31 = vadd.f32 %v5538_v61, %v5502_v12  ;;  %v5654_v53 = vpop.f32.mrf.mxu2  ;;  %v5789_v12 = vld [vmem:[#allocation2 + $0x1508] sm:$0xff] }
0x1a2e   :  { %5812 = vmatpush.msra.mxu0 %v5789_v12 }
0x1a2f   :  { %v5578_v10 = vadd.f32 %v5575_v46, %v5541_v31  ;;  %v5788_v31 = vld [vmem:[#allocation2 + $0x1500] sm:$0xff]  ;;  %v5787_v46 = vld [vmem:[#allocation2 + $0x14f8] sm:$0xff] }
0x1a30   :  { %5813 = vmatpush.msra.mxu0 %v5788_v31 }
0x1a31   :  { %v5618_v13 = vadd.f32 %v5615_v39, %v5578_v10 }
0x1a32   :  { %5814 = vmatpush.msra.mxu0 %v5787_v46 }
0x1a33   :  { %v5657_v37 = vadd.f32 %v5654_v53, %v5618_v13  ;;  %v5785_v13 = vld [vmem:[#allocation2 + $0x14e8] sm:$0xff]  ;;  %v5784_v53 = vld [vmem:[#allocation2 + $0x14e0] sm:$0xff] }
0x1a34   :  { %5815 = vmatpush.msra.mxu0 %v5786_v43 }
0x1a36   :  { %5816 = vmatpush.msra.mxu0 %v5785_v13 }
0x1a38   :  { %5817 = vmatpush.msra.mxu0 %v5784_v53 }
0x1a4c   :  { %v5693_v25 = vpop.f32.mrf.mxu3 }
0x1a4d   :  { %v5696_v8 = vadd.f32 %v5693_v25, %v5657_v37 }
0x1a4f   :  { %v5699_v27 = vadd.f32 %v5958_v50, %v5696_v8 }
0x1a51   :  { %v5703_v48 = vsel %vm5702_vm9, %v5699_v27, 0.0 }
0x1a52   :  { %v5704_v2 = vrot.slane %v5703_v48, 4 }
0x1a54   :  { %v5705_v42 = vadd.f32 %v5704_v2, %v5703_v48 }
0x1a56   :  { %v5706_v62 = vrot.slane %v5705_v42, 2 }
0x1a58   :  { %v5707_v33 = vadd.f32 %v5706_v62, %v5705_v42 }
0x1a5a   :  { %v5708_v14 = vrot.slane %v5707_v33, 1 }
0x1a5c   :  { %v5709_v32 = vadd.f32 %v5708_v14, %v5707_v33 }
0x1a5e   :  { %v5717_v58 = vmul.f32 %v5716_v38, %v5709_v32 }
0x1a60   :  { %v5718_v20 = vsub.f32 %v5699_v27, %v5717_v58 }
0x1a62   :  { %v5719_v44 = vmul.f32 %v5718_v20, %v5718_v20 }
0x1a64   :  { %v5720_v54 = vsel %vm5702_vm9, %v5719_v44, 0.0 }
0x1a65   :  { %v5721_v36 = vrot.slane %v5720_v54, 4 }
0x1a67   :  { %v5722_v26 = vadd.f32 %v5721_v36, %v5720_v54 }
0x1a69   :  { %v5723_v49 = vrot.slane %v5722_v26, 2 }
0x1a6b   :  { %v5724_v55 = vadd.f32 %v5723_v49, %v5722_v26 }
0x1a6d   :  { %v5725_v56 = vrot.slane %v5724_v55, 1 }
0x1a6f   :  { %v5726_v23 = vadd.f32 %v5725_v56, %v5724_v55 }
0x1a71   :  { %v5727_v45 = vmul.f32 %v5726_v23, %v5716_v38 }
0x1a73   :  { %v5728_v18 = vadd.f32 1e-05, %v5727_v45  ;;  %v5961_v45 = vld [vmem:[#allocation5 + $0x27] ss:$0 sm:$0xff] }
0x1a75   :  { %6250 = vrsqrt.f32 %v5728_v18  ;;  %vm5735_vm13 = vweird.f32 %v5728_v18 }
0x1a7b   :  { %v6251_v57 = vpop.eup %6250 }
0x1a7c   :  { %v5730_v11 = vmul.f32 %v6251_v57, %v5728_v18  ;;  %vm5736_vm4 = vweird.f32 %v6251_v57 }
0x1a7d   :  { %vm5737_vm14 = vmor %vm5735_vm13, %vm5736_vm4 }
0x1a7e   :  { %v5731_v4 = vmul.f32 %v6251_v57, %v5730_v11 }
0x1a80   :  { %v5732_v24 = vmul.f32 0.5, %v5731_v4 }
0x1a82   :  { %v5733_v52 = vsub.f32 1.5, %v5732_v24 }
0x1a84   :  { %v5734_v59 = vmul.f32 %v6251_v57, %v5733_v52 }
0x1a86   :  { %v5738_v29 = vsel %vm5737_vm14, %v6251_v57, %v5734_v59 }
0x1a87   :  { %v5739_v15 = vmul.f32 %v5738_v29, %v5718_v20 }
0x1a89   :  { %v5741_v63 = vmul.f32 %v5959_v22, %v5739_v15 }
0x1a8b   :  { %v5743_v47 = vadd.f32 %v5960_v3, %v5741_v63 }
0x1a8d   :  { %v5744_v51 = vmul.f32 0.70710677, %v5743_v47  ;;  %v5781_v55 = vmul.f32 0.5, %v5743_v47 }
0x1a8f   :  { %v5745_v41 = vand.u32 2147483647, %v5744_v51  ;;  %vm5778_vm3 = vcmp.lt.f32.partialorder %v5744_v51, 0.0 }
0x1a91   :  { %v5746_v0 = vmul.f32 0.3275911, %v5745_v41  ;;  %v5772_v5 = vmul.f32 %v5745_v41, %v5745_v41 }
0x1a93   :  { %v5747_v61 = vadd.f32 1.0, %v5746_v0  ;;  %v5773_v42 = vsub.f32 0.0, %v5772_v5 }
0x1a95   :  { %6252 = vrcp.f32 %v5747_v61  ;;  %v5759_v37 = vand.u32 2147483648, %v5747_v61  ;;  %v5757_v60 = vand.u32 2147483647, %v5747_v61  ;;  %vm5753_vm1 = vweird.f32 %v5747_v61 }
0x1a96   :  { %v5774_v33 = vmul.f32 1.442695, %v5773_v42 }
0x1a97   :  { %v5760_v8 = vor.u32 1.1754944e-38, %v5759_v37  ;;  %vm5758_vm2 = vcmp.eq.f32.partialorder %v5757_v60, 8.507059e+37 }
0x1a98   :  { %6254 = vpow2.f32 %v5774_v33 }
0x1a9b   :  { %v6253_v10 = vpop.eup %6252 }
0x1a9c   :  { %v5749_v39 = vmul.f32 %v6253_v10, %v5747_v61  ;;  %vm5754_vm0 = vweird.f32 %v6253_v10 }
0x1a9d   :  { %vm5755_vm8 = vmor %vm5753_vm1, %vm5754_vm0 }
0x1a9e   :  { %v5750_v6 = vsub.f32 1.0, %v5749_v39  ;;  %v6255_v44 = vpop.eup %6254 }
0x1aa0   :  { %v5751_v50 = vmul.f32 %v6253_v10, %v5750_v6 }
0x1aa2   :  { %v5752_v25 = vadd.f32 %v6253_v10, %v5751_v50 }
0x1aa4   :  { %v5756_v27 = vsel %vm5755_vm8, %v6253_v10, %v5752_v25 }
0x1aa5   :  { %v5761_v48 = vsel %vm5758_vm2, %v5760_v8, %v5756_v27 }
0x1aa6   :  { %v5763_v2 = vmul.f32 1.0614054, %v5761_v48 }
0x1aa8   :  { %v5764_v28 = vadd.f32 -1.4531521, %v5763_v2 }
0x1aaa   :  { %v5765_v62 = vmul.f32 %v5764_v28, %v5761_v48 }
0x1aac   :  { %v5766_v17 = vadd.f32 1.4214138, %v5765_v62 }
0x1aae   :  { %v5767_v14 = vmul.f32 %v5766_v17, %v5761_v48 }
0x1ab0   :  { %v5768_v38 = vadd.f32 -0.28449672, %v5767_v14 }
0x1ab2   :  { %v5769_v32 = vmul.f32 %v5768_v38, %v5761_v48 }
0x1ab4   :  { %v5770_v58 = vadd.f32 0.2548296, %v5769_v32 }
0x1ab6   :  { %v5771_v20 = vmul.f32 %v5770_v58, %v5761_v48 }
0x1ab8   :  { %v5776_v54 = vmul.f32 %v6255_v44, %v5771_v20 }
0x1aba   :  { %v5777_v36 = vsub.f32 1.0, %v5776_v54 }
0x1abc   :  { %v5779_v26 = vsub.f32 0.0, %v5777_v36 }
0x1abe   :  { %v5780_v49 = vsel %vm5778_vm3, %v5779_v26, %v5777_v36 }
0x1abf   :  { %v5782_v56 = vadd.f32 1.0, %v5780_v49 }
0x1ac1   :  { %v5783_v23 = vmul.f32 %v5782_v56, %v5781_v55 }
0x1ac3   :  { %5818 = vmatmul.f32.vlgmr.msra.gmra.mxu0 %v5783_v23 }
0x1b40   :  { %v5819_v18 = vpop.f32.mrf.mxu0 }
0x1b41   :  { %v5820_v57 = vadd.f32 %v5961_v45, %v5819_v18 }
0x1b43   :  { %5823 = vst.msk [vmem:[#allocation7] sm:$0x3] %vm5822_vm5, %v5820_v57 }
0x1b44   :  { %5836 = dma.vmem_to_hbm [thread:$0]  %s5832_s14, 32, %s5834_s17, [#allocation4]  }
0x1b45   :  { %6332 = dma.done.wait [#allocation4], 32  }
0x1b46   :  { %6333 = vsyncadd [#allocation4], 4294967264 }
0x1b47   :  { %5843 = vsyncpa [#allocation3], 1 }
0x1b48   :  { %5844 = vsyncpa [#allocation6], 1 }
0x1b49   :  { %5845 = vsyncpa [#allocation4], 1 }

</bundles_post_ra>
